<compile_context>
chip_gen: v7x
topology: tpu7x:2x2x1
jax: 0.10.0
libtpu: 0.0.40
codegen_flags: <defaults>
</compile_context>

<pallas_src>
import math
import functools

import jax
import jax.numpy as jnp
from jax.experimental import pallas as pl
from jax.experimental.pallas import tpu as pltpu


LANE = 128                            # all channel dims padded to lane width
TILE_K = 512                          # reduction (A column) tile, streamed path
FUSED_VMEM_BUDGET = 24 * 1024 * 1024  # sized against v7x 64 MiB physical VMEM
VMEM_LIMIT_FUSED = 48 * 1024 * 1024
VMEM_LIMIT_STREAM = 32 * 1024 * 1024


def _round_up(v, m):
    return (v + m - 1) // m * m


# ------------------------------------------------------------------ fused kernel
def fused_gcn_kernel(adj_ref, x_ref, w0_ref, b0_ref, convw_ref, w1_ref, b1_ref,
                     out_ref, h_scr, h0_scr, *, alpha, betas, n_real):
    # lins[0] + relu; mask padded rows to exact zeros so padding is inert.
    h0 = jnp.dot(x_ref[...], w0_ref[...], preferred_element_type=jnp.float32)
    h0 = jnp.maximum(h0 + b0_ref[...], 0.0)
    rows = jax.lax.broadcasted_iota(jnp.int32, h0.shape, 0)
    h0 = jnp.where(rows < n_real, h0, 0.0)
    h0_scr[...] = h0.astype(h0_scr.dtype)      # bf16 residual, stays in VMEM
    h_scr[...] = h0.astype(h_scr.dtype)        # bf16 working state, stays in VMEM

    # GCN2Conv stack: A read once from HBM, everything else VMEM-resident.
    # num_layers is small -> static unroll with baked-in beta_l.
    for layer, beta in enumerate(betas):
        ah = jnp.dot(adj_ref[...], h_scr[...], preferred_element_type=jnp.float32)
        z = (1.0 - alpha) * ah + alpha * h0_scr[...].astype(jnp.float32)
        zw = jnp.dot(z.astype(jnp.bfloat16), convw_ref[layer],
                     preferred_element_type=jnp.float32)
        h_scr[...] = jnp.maximum((1.0 - beta) * z + beta * zw,
                                 0.0).astype(h_scr.dtype)

    # lins[1]
    out_ref[...] = (jnp.dot(h_scr[...], w1_ref[...],
                            preferred_element_type=jnp.float32) + b1_ref[...])


# --------------------------------------------------------------- streamed kernels
def lin0_kernel(x_ref, w_ref, b_ref, h_ref, *, n_real, tile_m):
    # h0 = relu(x @ W0 + b0), emitted once in bf16 (used as both h and the residual).
    i = pl.program_id(0)
    h0 = jnp.dot(x_ref[...], w_ref[...], preferred_element_type=jnp.float32)
    h0 = jnp.maximum(h0 + b_ref[...], 0.0)
    rows = i * tile_m + jax.lax.broadcasted_iota(jnp.int32, h0.shape, 0)
    h0 = jnp.where(rows < n_real, h0, 0.0)     # padded rows carry exact zeros
    h_ref[...] = h0.astype(h_ref.dtype)


def gcn2_layer_kernel(a_ref, h_ref, h0_ref, w_ref, hout_ref, acc_ref, *,
                      alpha, beta, tile_k, h_resident):
    # grid = (row_blocks, k_blocks); acc_ref accumulates (A @ h) for one row block.
    k = pl.program_id(1)

    @pl.when(k == 0)
    def _init():
        acc_ref[...] = jnp.zeros_like(acc_ref)

    a = a_ref[...].astype(jnp.bfloat16)        # int8 -> bf16 (VPU, hidden under DMA)
    if h_resident:
        k0 = pl.multiple_of(k * tile_k, tile_k)
        h_panel = h_ref[pl.ds(k0, tile_k), :]  # slice the VMEM-resident h
    else:
        h_panel = h_ref[...]                   # streamed (tile_k, h_p) panel
    acc_ref[...] += jnp.dot(a, h_panel, preferred_element_type=jnp.float32)

    @pl.when(k == pl.num_programs(1) - 1)
    def _finalize():
        # Initial residual + identity mapping + relu, all f32 elementwise.
        z = (1.0 - alpha) * acc_ref[...] + alpha * h0_ref[...].astype(jnp.float32)
        acc_ref[...] = z                       # reuse scratch as z staging
        zw = jnp.dot(acc_ref[...].astype(w_ref.dtype), w_ref[...],
                     preferred_element_type=jnp.float32)
        out = (1.0 - beta) * acc_ref[...] + beta * zw
        hout_ref[...] = jnp.maximum(out, 0.0).astype(hout_ref.dtype)


def lin1_kernel(h_ref, w_ref, b_ref, o_ref):
    o_ref[...] = (jnp.dot(h_ref[...], w_ref[...],
                          preferred_element_type=jnp.float32) + b_ref[...])


# --------------------------------------------------------------------- wrapper
def gcn_encoder_forward(x, edge_index, params, *, alpha, theta, num_layers,
                        force_streamed=False):
    """x: [N, F_in] f32, edge_index: [2, E] int32 (row 0 = src, row 1 = dst)."""
    n, f_in = x.shape
    h_dim = params["w0"].shape[1]
    f_out = params["w1"].shape[1]

    fin_p = _round_up(f_in, LANE)
    h_p = _round_up(h_dim, LANE)
    fout_p = _round_up(f_out, LANE)
    alpha = float(alpha)
    betas = tuple(math.log(theta / (l + 1) + 1.0) for l in range(num_layers))

    # Padded parameters (lane-dense channels; bf16 MXU feeds, f32 biases).
    w0 = jnp.zeros((fin_p, h_p), jnp.float32).at[:f_in, :h_dim].set(params["w0"])
    b0 = jnp.zeros((1, h_p), jnp.float32).at[:, :h_dim].set(params["b0"])
    convw = jnp.zeros((num_layers, h_p, h_p), jnp.bfloat16).at[
        :, :h_dim, :h_dim].set(params["convw"].astype(jnp.bfloat16))
    w1 = jnp.zeros((h_p, fout_p), jnp.bfloat16).at[:h_dim, :f_out].set(
        params["w1"].astype(jnp.bfloat16))
    b1 = jnp.zeros((1, fout_p), jnp.float32).at[:, :f_out].set(params["b1"])

    src, dst = edge_index[0], edge_index[1]

    # Path selection: fully fused kernel when A + h + h0 (double-buffered) fit the
    # VMEM budget (sized for v7x's 64 MiB physical), else per-layer streaming.
    np_fused = _round_up(max(n, 8), LANE)
    fused_bytes = (4 * np_fused * np_fused
                   + 8 * np_fused * (fin_p + fout_p + 2 * h_p))
    use_fused = (not force_streamed) and fused_bytes <= FUSED_VMEM_BUDGET

    # TODO(synk): for very large sparse graphs replace the dense A @ h with a
    # CSR/gather propagate driven by PrefetchScalarGridSpec (E*H work, not N^2*H).

    if use_fused:
        np_ = np_fused
        xp = jnp.zeros((np_, fin_p), jnp.float32).at[:n, :f_in].set(x)
        # Adjacency built once, directly at its storage dtype (bf16 is exact for
        # edge multiplicities <= 256).  TODO(synk): edge_index is static per graph;
        # cache adj outside the jitted forward for steady-state inference.
        adj = jnp.zeros((np_, np_), jnp.bfloat16).at[dst, src].add(1.0)

        flops = (2 * np_ * fin_p * h_p
                 + num_layers * (2 * np_ * np_ * h_p + 2 * np_ * h_p * h_p)
                 + 2 * np_ * h_p * fout_p)
        bytes_acc = (np_ * np_ * 2 + np_ * fin_p * 4 + np_ * fout_p * 4
                     + fin_p * h_p * 4 + num_layers * h_p * h_p * 2
                     + h_p * fout_p * 2)

        out = pl.pallas_call(
            functools.partial(fused_gcn_kernel, alpha=alpha, betas=betas, n_real=n),
            grid=(1,),
            in_specs=[
                pl.BlockSpec((np_, np_), lambda i: (0, 0)),                 # A (bf16)
                pl.BlockSpec((np_, fin_p), lambda i: (0, 0)),               # x
                pl.BlockSpec((fin_p, h_p), lambda i: (0, 0)),               # W0
                pl.BlockSpec((1, h_p), lambda i: (0, 0)),                   # b0
                pl.BlockSpec((num_layers, h_p, h_p), lambda i: (0, 0, 0)),  # conv Ws
                pl.BlockSpec((h_p, fout_p), lambda i: (0, 0)),              # W1
                pl.BlockSpec((1, fout_p), lambda i: (0, 0)),                # b1
            ],
            out_specs=pl.BlockSpec((np_, fout_p), lambda i: (0, 0)),
            out_shape=jax.ShapeDtypeStruct((np_, fout_p), jnp.float32),
            scratch_shapes=[pltpu.VMEM((np_, h_p), jnp.bfloat16),   # h
                            pltpu.VMEM((np_, h_p), jnp.bfloat16)],  # h0 residual
            compiler_params=pltpu.CompilerParams(
                dimension_semantics=("arbitrary",),
                vmem_limit_bytes=VMEM_LIMIT_FUSED),
            cost_estimate=pl.CostEstimate(flops=flops, transcendentals=0,
                                          bytes_accessed=bytes_acc),
        )(adj, xp, w0, b0, convw, w1, b1)
        return out[:n, :f_out]

    # ----------------------- streamed path (large graphs) -----------------------
    np_ = _round_up(max(n, 8), TILE_K)
    tile_m = 512 if np_ >= 1024 else 256     # keep >= 2 row blocks for v7x megacore
    grid_rows = np_ // tile_m
    grid_k = np_ // TILE_K

    xp = jnp.zeros((np_, fin_p), jnp.float32).at[:n, :f_in].set(x)
    # int8 adjacency (exact for multiplicities <= 127): halves the dominant HBM
    # stream; upcast to bf16 in-kernel right before the MXU dot.
    adj = jnp.zeros((np_, np_), jnp.int8).at[dst, src].add(1)

    # lins[0] + relu -> single bf16 array used as both h and the h0 residual.
    h0 = pl.pallas_call(
        functools.partial(lin0_kernel, n_real=n, tile_m=tile_m),
        grid=(grid_rows,),
        in_specs=[
            pl.BlockSpec((tile_m, fin_p), lambda i: (i, 0)),
            pl.BlockSpec((fin_p, h_p), lambda i: (0, 0)),
            pl.BlockSpec((1, h_p), lambda i: (0, 0)),
        ],
        out_specs=pl.BlockSpec((tile_m, h_p), lambda i: (i, 0)),
        out_shape=jax.ShapeDtypeStruct((np_, h_p), jnp.bfloat16),
        compiler_params=pltpu.CompilerParams(
            dimension_semantics=("parallel",),
            vmem_limit_bytes=VMEM_LIMIT_STREAM),
    )(xp, w0, b0)
    h = h0

    # Keep h fully VMEM-resident per layer when it fits (cuts ~33% of layer HBM
    # bytes); otherwise stream (TILE_K, h_p) panels keyed on the reduction index.
    h_resident = 2 * np_ * h_p * 2 <= 12 * 1024 * 1024
    h_spec = (pl.BlockSpec((np_, h_p), lambda i, k: (0, 0)) if h_resident
              else pl.BlockSpec((TILE_K, h_p), lambda i, k: (k, 0)))

    flops_layer = 2 * np_ * np_ * h_p + 2 * np_ * h_p * h_p
    bytes_layer = (np_ * np_ * 1                                     # int8 A panels
                   + (1 if h_resident else grid_rows) * np_ * h_p * 2  # h
                   + np_ * h_p * 2                                   # h0 (bf16)
                   + h_p * h_p * 2 + np_ * h_p * 2)                  # W, h out

    for layer in range(num_layers):
        h = pl.pallas_call(
            functools.partial(gcn2_layer_kernel, alpha=alpha, beta=betas[layer],
                              tile_k=TILE_K, h_resident=h_resident),
            grid=(grid_rows, grid_k),
            in_specs=[
                pl.BlockSpec((tile_m, TILE_K), lambda i, k: (i, k)),   # A panel
                h_spec,                                                # h
                pl.BlockSpec((tile_m, h_p), lambda i, k: (i, 0)),      # h0 rows
                pl.BlockSpec((h_p, h_p), lambda i, k: (0, 0)),         # conv weight
            ],
            out_specs=pl.BlockSpec((tile_m, h_p), lambda i, k: (i, 0)),
            out_shape=jax.ShapeDtypeStruct((np_, h_p), jnp.bfloat16),
            scratch_shapes=[pltpu.VMEM((tile_m, h_p), jnp.float32)],
            compiler_params=pltpu.CompilerParams(
                dimension_semantics=("parallel", "arbitrary"),
                vmem_limit_bytes=VMEM_LIMIT_STREAM),
            cost_estimate=pl.CostEstimate(flops=flops_layer, transcendentals=0,
                                          bytes_accessed=bytes_layer),
        )(adj, h, h0, convw[layer])

    # lins[1]
    out = pl.pallas_call(
        lin1_kernel,
        grid=(grid_rows,),
        in_specs=[
            pl.BlockSpec((tile_m, h_p), lambda i: (i, 0)),
            pl.BlockSpec((h_p, fout_p), lambda i: (0, 0)),
            pl.BlockSpec((1, fout_p), lambda i: (0, 0)),
        ],
        out_specs=pl.BlockSpec((tile_m, fout_p), lambda i: (i, 0)),
        out_shape=jax.ShapeDtypeStruct((np_, fout_p), jnp.float32),
        compiler_params=pltpu.CompilerParams(
            dimension_semantics=("parallel",),
            vmem_limit_bytes=VMEM_LIMIT_STREAM),
    )(h, w1, b1)

    return out[:n, :f_out]


# ---------------------------------------------------------------------- params
def init_params(key, input_channels, hidden_channels, output_channels, num_layers):
    k0, k1, k2, k3, k4 = jax.random.split(key, 5)

    def glorot(k, shape):
        fan_in, fan_out = shape[-2], shape[-1]
        lim = math.sqrt(6.0 / (fan_in + fan_out))
        return jax.random.uniform(k, shape, jnp.float32, -lim, lim)

    return {
        # Linear weights stored pre-transposed: y = x @ W + b
        "w0": glorot(k0, (input_channels, hidden_channels)),
        "b0": jax.random.uniform(k1, (1, hidden_channels), jnp.float32, -0.1, 0.1),
        "convw": glorot(k2, (num_layers, hidden_channels, hidden_channels)),
        "w1": glorot(k3, (hidden_channels, output_channels)),
        "b1": jax.random.uniform(k4, (1, output_channels), jnp.float32, -0.1, 0.1),
    }


if __name__ == "__main__":
    # Small, module-consistent shapes (N not a tile multiple -> exercises padding).
    N = 300                 # number of graph nodes
    E = 1200                # number of edges
    INPUT_CHANNELS = 8
    HIDDEN_CHANNELS = 32
    OUTPUT_CHANNELS = 16
    NUM_LAYERS = 4
    ALPHA = 0.1
    THETA = 0.5
    # dropout = 0.0 -> identity (matches F.dropout with p=0).

    key = jax.random.PRNGKey(0)
    kx, ke, kp = jax.random.split(key, 3)

    x = jax.random.normal(kx, (N, INPUT_CHANNELS), jnp.float32)
    edge_index = jax.random.randint(ke, (2, E), 0, N, dtype=jnp.int32)

    params = init_params(kp, INPUT_CHANNELS, HIDDEN_CHANNELS,
                         OUTPUT_CHANNELS, NUM_LAYERS)

    # Fused single-kernel path (selected automatically at these sizes).
    fwd_fused = jax.jit(functools.partial(gcn_encoder_forward, alpha=ALPHA,
                                          theta=THETA, num_layers=NUM_LAYERS))
    out = jax.block_until_ready(fwd_fused(x, edge_index, params))
    assert out.shape == (N, OUTPUT_CHANNELS) and out.dtype == jnp.float32
    assert bool(jnp.all(jnp.isfinite(out)))

    # Also exercise the large-graph streamed path and check it agrees.
    fwd_streamed = jax.jit(functools.partial(gcn_encoder_forward, alpha=ALPHA,
                                             theta=THETA, num_layers=NUM_LAYERS,
                                             force_streamed=True))
    out_s = jax.block_until_ready(fwd_streamed(x, edge_index, params))
    assert out_s.shape == (N, OUTPUT_CHANNELS)
    max_diff = float(jnp.max(jnp.abs(out_s - out)))
    assert max_diff < 5e-2, f"fused vs streamed mismatch: {max_diff}"

    print("KERNEL_OK")
</pallas_src>

<mosaic_0001>
module attributes {stable_mosaic.version = 11 : i64} {
  func.func @fused_gcn_kernel(%arg0: i32, %arg1: memref<384x384xbf16, #tpu.memory_space<vmem>>, %arg2: memref<384x128xf32, #tpu.memory_space<vmem>>, %arg3: memref<128x128xf32, #tpu.memory_space<vmem>>, %arg4: memref<1x128xf32, #tpu.memory_space<vmem>>, %arg5: memref<4x128x128xbf16, #tpu.memory_space<vmem>>, %arg6: memref<128x128xbf16, #tpu.memory_space<vmem>>, %arg7: memref<1x128xf32, #tpu.memory_space<vmem>>, %arg8: memref<384x128xf32, #tpu.memory_space<vmem>>, %arg9: memref<384x128xbf16, #tpu.memory_space<vmem>>, %arg10: memref<384x128xbf16, #tpu.memory_space<vmem>>) attributes {dimension_semantics = [#tpu.dimension_semantics<arbitrary>], iteration_bounds = array<i64: 1>, scalar_prefetch = 0 : i64, scratch_operands = 2 : i64, tpu.core_type = #tpu.core_type<tc>, window_params = [{pipeline_mode = #tpu.pipeline_mode<synchronous>, transform_indices = @transform_0, window_bounds = array<i64: 384, 384>}, {pipeline_mode = #tpu.pipeline_mode<synchronous>, transform_indices = @transform_1, window_bounds = array<i64: 384, 128>}, {pipeline_mode = #tpu.pipeline_mode<synchronous>, transform_indices = @transform_2, window_bounds = array<i64: 128, 128>}, {pipeline_mode = #tpu.pipeline_mode<synchronous>, transform_indices = @transform_3, window_bounds = array<i64: 1, 128>}, {pipeline_mode = #tpu.pipeline_mode<synchronous>, transform_indices = @transform_4, window_bounds = array<i64: 4, 128, 128>}, {pipeline_mode = #tpu.pipeline_mode<synchronous>, transform_indices = @transform_5, window_bounds = array<i64: 128, 128>}, {pipeline_mode = #tpu.pipeline_mode<synchronous>, transform_indices = @transform_6, window_bounds = array<i64: 1, 128>}, {pipeline_mode = #tpu.pipeline_mode<synchronous>, transform_indices = @transform_7, window_bounds = array<i64: 384, 128>}]} {
    %c0 = arith.constant 0 : index
    %c0_0 = arith.constant 0 : index
    %0 = vector.load %arg2[%c0, %c0_0] : memref<384x128xf32, #tpu.memory_space<vmem>>, vector<384x128xf32>
    %c0_1 = arith.constant 0 : index
    %c0_2 = arith.constant 0 : index
    %1 = vector.load %arg3[%c0_1, %c0_2] : memref<128x128xf32, #tpu.memory_space<vmem>>, vector<128x128xf32>
    %cst = arith.constant dense<0.000000e+00> : vector<384x128xf32>
    %2 = tpu.matmul %0, %1, %cst {dimension_numbers = #tpu.dot_dimension_numbers<[1], [0], [0], [1], [0, 0, 1, 1], [], []>} : vector<384x128xf32>, vector<128x128xf32>, vector<384x128xf32> -> vector<384x128xf32>
    %c0_3 = arith.constant 0 : index
    %c0_4 = arith.constant 0 : index
    %3 = vector.load %arg4[%c0_3, %c0_4] : memref<1x128xf32, #tpu.memory_space<vmem>>, vector<1x128xf32>
    %4 = vector.broadcast %3 : vector<1x128xf32> to vector<384x128xf32>
    %5 = arith.addf %2, %4 : vector<384x128xf32>
    %cst_5 = arith.constant 0.000000e+00 : f32
    %6 = vector.broadcast %cst_5 : f32 to vector<384x128xf32>
    %7 = arith.maximumf %5, %6 : vector<384x128xf32>
    %8 = tpu.iota {dimensions = array<i32: 0>} : vector<384x128xi32>
    %c300_i32 = arith.constant 300 : i32
    %9 = vector.broadcast %c300_i32 : i32 to vector<384x128xi32>
    %10 = arith.cmpi slt, %8, %9 : vector<384x128xi32>
    %cst_6 = arith.constant 0.000000e+00 : f32
    %11 = vector.broadcast %cst_6 : f32 to vector<384x128xf32>
    %12 = arith.select %10, %7, %11 : vector<384x128xi1>, vector<384x128xf32>
    %13 = arith.truncf %12 : vector<384x128xf32> to vector<384x128xbf16>
    %c0_7 = arith.constant 0 : index
    %c0_8 = arith.constant 0 : index
    %14 = vector.load %arg10[%c0_7, %c0_8] : memref<384x128xbf16, #tpu.memory_space<vmem>>, vector<384x128xbf16>
    tpu.vector_store %arg10[%c0_7, %c0_8], %13 {strides = array<i32>} : memref<384x128xbf16, #tpu.memory_space<vmem>>, vector<384x128xbf16>,
    %15 = arith.truncf %12 : vector<384x128xf32> to vector<384x128xbf16>
    %c0_9 = arith.constant 0 : index
    %c0_10 = arith.constant 0 : index
    %16 = vector.load %arg9[%c0_9, %c0_10] : memref<384x128xbf16, #tpu.memory_space<vmem>>, vector<384x128xbf16>
    tpu.vector_store %arg9[%c0_9, %c0_10], %15 {strides = array<i32>} : memref<384x128xbf16, #tpu.memory_space<vmem>>, vector<384x128xbf16>,
    %c0_11 = arith.constant 0 : index
    %c0_12 = arith.constant 0 : index
    %17 = vector.load %arg1[%c0_11, %c0_12] : memref<384x384xbf16, #tpu.memory_space<vmem>>, vector<384x384xbf16>
    %c0_13 = arith.constant 0 : index
    %c0_14 = arith.constant 0 : index
    %18 = vector.load %arg9[%c0_13, %c0_14] : memref<384x128xbf16, #tpu.memory_space<vmem>>, vector<384x128xbf16>
    %cst_15 = arith.constant dense<0.000000e+00> : vector<384x128xf32>
    %19 = tpu.matmul %17, %18, %cst_15 {dimension_numbers = #tpu.dot_dimension_numbers<[1], [0], [0], [1], [0, 0, 1, 1], [], []>} : vector<384x384xbf16>, vector<384x128xbf16>, vector<384x128xf32> -> vector<384x128xf32>
    %cst_16 = arith.constant 0.899999976 : f32
    %20 = vector.broadcast %cst_16 : f32 to vector<384x128xf32>
    %21 = arith.mulf %20, %19 : vector<384x128xf32>
    %c0_17 = arith.constant 0 : index
    %c0_18 = arith.constant 0 : index
    %22 = vector.load %arg10[%c0_17, %c0_18] : memref<384x128xbf16, #tpu.memory_space<vmem>>, vector<384x128xbf16>
    %23 = arith.extf %22 : vector<384x128xbf16> to vector<384x128xf32>
    %cst_19 = arith.constant 1.000000e-01 : f32
    %24 = vector.broadcast %cst_19 : f32 to vector<384x128xf32>
    %25 = arith.mulf %24, %23 : vector<384x128xf32>
    %26 = arith.addf %21, %25 : vector<384x128xf32>
    %27 = arith.truncf %26 : vector<384x128xf32> to vector<384x128xbf16>
    %c0_20 = arith.constant 0 : index
    %c0_21 = arith.constant 0 : index
    %c0_22 = arith.constant 0 : index
    %28 = vector.load %arg5[%c0_20, %c0_21, %c0_22] : memref<4x128x128xbf16, #tpu.memory_space<vmem>>, vector<1x128x128xbf16>
    %29 = vector.shape_cast %28 : vector<1x128x128xbf16> to vector<128x128xbf16>
    %cst_23 = arith.constant dense<0.000000e+00> : vector<384x128xf32>
    %30 = tpu.matmul %27, %29, %cst_23 {dimension_numbers = #tpu.dot_dimension_numbers<[1], [0], [0], [1], [0, 0, 1, 1], [], []>} : vector<384x128xbf16>, vector<128x128xbf16>, vector<384x128xf32> -> vector<384x128xf32>
    %cst_24 = arith.constant 0.594534874 : f32
    %31 = vector.broadcast %cst_24 : f32 to vector<384x128xf32>
    %32 = arith.mulf %31, %26 : vector<384x128xf32>
    %cst_25 = arith.constant 0.405465096 : f32
    %33 = vector.broadcast %cst_25 : f32 to vector<384x128xf32>
    %34 = arith.mulf %33, %30 : vector<384x128xf32>
    %35 = arith.addf %32, %34 : vector<384x128xf32>
    %cst_26 = arith.constant 0.000000e+00 : f32
    %36 = vector.broadcast %cst_26 : f32 to vector<384x128xf32>
    %37 = arith.maximumf %35, %36 : vector<384x128xf32>
    %38 = arith.truncf %37 : vector<384x128xf32> to vector<384x128xbf16>
    %c0_27 = arith.constant 0 : index
    %c0_28 = arith.constant 0 : index
    %39 = vector.load %arg9[%c0_27, %c0_28] : memref<384x128xbf16, #tpu.memory_space<vmem>>, vector<384x128xbf16>
    tpu.vector_store %arg9[%c0_27, %c0_28], %38 {strides = array<i32>} : memref<384x128xbf16, #tpu.memory_space<vmem>>, vector<384x128xbf16>,
    %c0_29 = arith.constant 0 : index
    %c0_30 = arith.constant 0 : index
    %40 = vector.load %arg1[%c0_29, %c0_30] : memref<384x384xbf16, #tpu.memory_space<vmem>>, vector<384x384xbf16>
    %c0_31 = arith.constant 0 : index
    %c0_32 = arith.constant 0 : index
    %41 = vector.load %arg9[%c0_31, %c0_32] : memref<384x128xbf16, #tpu.memory_space<vmem>>, vector<384x128xbf16>
    %cst_33 = arith.constant dense<0.000000e+00> : vector<384x128xf32>
    %42 = tpu.matmul %40, %41, %cst_33 {dimension_numbers = #tpu.dot_dimension_numbers<[1], [0], [0], [1], [0, 0, 1, 1], [], []>} : vector<384x384xbf16>, vector<384x128xbf16>, vector<384x128xf32> -> vector<384x128xf32>
    %cst_34 = arith.constant 0.899999976 : f32
    %43 = vector.broadcast %cst_34 : f32 to vector<384x128xf32>
    %44 = arith.mulf %43, %42 : vector<384x128xf32>
    %c0_35 = arith.constant 0 : index
    %c0_36 = arith.constant 0 : index
    %45 = vector.load %arg10[%c0_35, %c0_36] : memref<384x128xbf16, #tpu.memory_space<vmem>>, vector<384x128xbf16>
    %46 = arith.extf %45 : vector<384x128xbf16> to vector<384x128xf32>
    %cst_37 = arith.constant 1.000000e-01 : f32
    %47 = vector.broadcast %cst_37 : f32 to vector<384x128xf32>
    %48 = arith.mulf %47, %46 : vector<384x128xf32>
    %49 = arith.addf %44, %48 : vector<384x128xf32>
    %50 = arith.truncf %49 : vector<384x128xf32> to vector<384x128xbf16>
    %c1 = arith.constant 1 : index
    %c0_38 = arith.constant 0 : index
    %c0_39 = arith.constant 0 : index
    %51 = vector.load %arg5[%c1, %c0_38, %c0_39] : memref<4x128x128xbf16, #tpu.memory_space<vmem>>, vector<1x128x128xbf16>
    %52 = vector.shape_cast %51 : vector<1x128x128xbf16> to vector<128x128xbf16>
    %cst_40 = arith.constant dense<0.000000e+00> : vector<384x128xf32>
    %53 = tpu.matmul %50, %52, %cst_40 {dimension_numbers = #tpu.dot_dimension_numbers<[1], [0], [0], [1], [0, 0, 1, 1], [], []>} : vector<384x128xbf16>, vector<128x128xbf16>, vector<384x128xf32> -> vector<384x128xf32>
    %cst_41 = arith.constant 0.776856422 : f32
    %54 = vector.broadcast %cst_41 : f32 to vector<384x128xf32>
    %55 = arith.mulf %54, %49 : vector<384x128xf32>
    %cst_42 = arith.constant 0.223143548 : f32
    %56 = vector.broadcast %cst_42 : f32 to vector<384x128xf32>
    %57 = arith.mulf %56, %53 : vector<384x128xf32>
    %58 = arith.addf %55, %57 : vector<384x128xf32>
    %cst_43 = arith.constant 0.000000e+00 : f32
    %59 = vector.broadcast %cst_43 : f32 to vector<384x128xf32>
    %60 = arith.maximumf %58, %59 : vector<384x128xf32>
    %61 = arith.truncf %60 : vector<384x128xf32> to vector<384x128xbf16>
    %c0_44 = arith.constant 0 : index
    %c0_45 = arith.constant 0 : index
    %62 = vector.load %arg9[%c0_44, %c0_45] : memref<384x128xbf16, #tpu.memory_space<vmem>>, vector<384x128xbf16>
    tpu.vector_store %arg9[%c0_44, %c0_45], %61 {strides = array<i32>} : memref<384x128xbf16, #tpu.memory_space<vmem>>, vector<384x128xbf16>,
    %c0_46 = arith.constant 0 : index
    %c0_47 = arith.constant 0 : index
    %63 = vector.load %arg1[%c0_46, %c0_47] : memref<384x384xbf16, #tpu.memory_space<vmem>>, vector<384x384xbf16>
    %c0_48 = arith.constant 0 : index
    %c0_49 = arith.constant 0 : index
    %64 = vector.load %arg9[%c0_48, %c0_49] : memref<384x128xbf16, #tpu.memory_space<vmem>>, vector<384x128xbf16>
    %cst_50 = arith.constant dense<0.000000e+00> : vector<384x128xf32>
    %65 = tpu.matmul %63, %64, %cst_50 {dimension_numbers = #tpu.dot_dimension_numbers<[1], [0], [0], [1], [0, 0, 1, 1], [], []>} : vector<384x384xbf16>, vector<384x128xbf16>, vector<384x128xf32> -> vector<384x128xf32>
    %cst_51 = arith.constant 0.899999976 : f32
    %66 = vector.broadcast %cst_51 : f32 to vector<384x128xf32>
    %67 = arith.mulf %66, %65 : vector<384x128xf32>
    %c0_52 = arith.constant 0 : index
    %c0_53 = arith.constant 0 : index
    %68 = vector.load %arg10[%c0_52, %c0_53] : memref<384x128xbf16, #tpu.memory_space<vmem>>, vector<384x128xbf16>
    %69 = arith.extf %68 : vector<384x128xbf16> to vector<384x128xf32>
    %cst_54 = arith.constant 1.000000e-01 : f32
    %70 = vector.broadcast %cst_54 : f32 to vector<384x128xf32>
    %71 = arith.mulf %70, %69 : vector<384x128xf32>
    %72 = arith.addf %67, %71 : vector<384x128xf32>
    %73 = arith.truncf %72 : vector<384x128xf32> to vector<384x128xbf16>
    %c2 = arith.constant 2 : index
    %c0_55 = arith.constant 0 : index
    %c0_56 = arith.constant 0 : index
    %74 = vector.load %arg5[%c2, %c0_55, %c0_56] : memref<4x128x128xbf16, #tpu.memory_space<vmem>>, vector<1x128x128xbf16>
    %75 = vector.shape_cast %74 : vector<1x128x128xbf16> to vector<128x128xbf16>
    %cst_57 = arith.constant dense<0.000000e+00> : vector<384x128xf32>
    %76 = tpu.matmul %73, %75, %cst_57 {dimension_numbers = #tpu.dot_dimension_numbers<[1], [0], [0], [1], [0, 0, 1, 1], [], []>} : vector<384x128xbf16>, vector<128x128xbf16>, vector<384x128xf32> -> vector<384x128xf32>
    %cst_58 = arith.constant 0.845849335 : f32
    %77 = vector.broadcast %cst_58 : f32 to vector<384x128xf32>
    %78 = arith.mulf %77, %72 : vector<384x128xf32>
    %cst_59 = arith.constant 0.15415068 : f32
    %79 = vector.broadcast %cst_59 : f32 to vector<384x128xf32>
    %80 = arith.mulf %79, %76 : vector<384x128xf32>
    %81 = arith.addf %78, %80 : vector<384x128xf32>
    %cst_60 = arith.constant 0.000000e+00 : f32
    %82 = vector.broadcast %cst_60 : f32 to vector<384x128xf32>
    %83 = arith.maximumf %81, %82 : vector<384x128xf32>
    %84 = arith.truncf %83 : vector<384x128xf32> to vector<384x128xbf16>
    %c0_61 = arith.constant 0 : index
    %c0_62 = arith.constant 0 : index
    %85 = vector.load %arg9[%c0_61, %c0_62] : memref<384x128xbf16, #tpu.memory_space<vmem>>, vector<384x128xbf16>
    tpu.vector_store %arg9[%c0_61, %c0_62], %84 {strides = array<i32>} : memref<384x128xbf16, #tpu.memory_space<vmem>>, vector<384x128xbf16>,
    %c0_63 = arith.constant 0 : index
    %c0_64 = arith.constant 0 : index
    %86 = vector.load %arg1[%c0_63, %c0_64] : memref<384x384xbf16, #tpu.memory_space<vmem>>, vector<384x384xbf16>
    %c0_65 = arith.constant 0 : index
    %c0_66 = arith.constant 0 : index
    %87 = vector.load %arg9[%c0_65, %c0_66] : memref<384x128xbf16, #tpu.memory_space<vmem>>, vector<384x128xbf16>
    %cst_67 = arith.constant dense<0.000000e+00> : vector<384x128xf32>
    %88 = tpu.matmul %86, %87, %cst_67 {dimension_numbers = #tpu.dot_dimension_numbers<[1], [0], [0], [1], [0, 0, 1, 1], [], []>} : vector<384x384xbf16>, vector<384x128xbf16>, vector<384x128xf32> -> vector<384x128xf32>
    %cst_68 = arith.constant 0.899999976 : f32
    %89 = vector.broadcast %cst_68 : f32 to vector<384x128xf32>
    %90 = arith.mulf %89, %88 : vector<384x128xf32>
    %c0_69 = arith.constant 0 : index
    %c0_70 = arith.constant 0 : index
    %91 = vector.load %arg10[%c0_69, %c0_70] : memref<384x128xbf16, #tpu.memory_space<vmem>>, vector<384x128xbf16>
    %92 = arith.extf %91 : vector<384x128xbf16> to vector<384x128xf32>
    %cst_71 = arith.constant 1.000000e-01 : f32
    %93 = vector.broadcast %cst_71 : f32 to vector<384x128xf32>
    %94 = arith.mulf %93, %92 : vector<384x128xf32>
    %95 = arith.addf %90, %94 : vector<384x128xf32>
    %96 = arith.truncf %95 : vector<384x128xf32> to vector<384x128xbf16>
    %c3 = arith.constant 3 : index
    %c0_72 = arith.constant 0 : index
    %c0_73 = arith.constant 0 : index
    %97 = vector.load %arg5[%c3, %c0_72, %c0_73] : memref<4x128x128xbf16, #tpu.memory_space<vmem>>, vector<1x128x128xbf16>
    %98 = vector.shape_cast %97 : vector<1x128x128xbf16> to vector<128x128xbf16>
    %cst_74 = arith.constant dense<0.000000e+00> : vector<384x128xf32>
    %99 = tpu.matmul %96, %98, %cst_74 {dimension_numbers = #tpu.dot_dimension_numbers<[1], [0], [0], [1], [0, 0, 1, 1], [], []>} : vector<384x128xbf16>, vector<128x128xbf16>, vector<384x128xf32> -> vector<384x128xf32>
    %cst_75 = arith.constant 0.882216989 : f32
    %100 = vector.broadcast %cst_75 : f32 to vector<384x128xf32>
    %101 = arith.mulf %100, %95 : vector<384x128xf32>
    %cst_76 = arith.constant 0.117783032 : f32
    %102 = vector.broadcast %cst_76 : f32 to vector<384x128xf32>
    %103 = arith.mulf %102, %99 : vector<384x128xf32>
    %104 = arith.addf %101, %103 : vector<384x128xf32>
    %cst_77 = arith.constant 0.000000e+00 : f32
    %105 = vector.broadcast %cst_77 : f32 to vector<384x128xf32>
    %106 = arith.maximumf %104, %105 : vector<384x128xf32>
    %107 = arith.truncf %106 : vector<384x128xf32> to vector<384x128xbf16>
    %c0_78 = arith.constant 0 : index
    %c0_79 = arith.constant 0 : index
    %108 = vector.load %arg9[%c0_78, %c0_79] : memref<384x128xbf16, #tpu.memory_space<vmem>>, vector<384x128xbf16>
    tpu.vector_store %arg9[%c0_78, %c0_79], %107 {strides = array<i32>} : memref<384x128xbf16, #tpu.memory_space<vmem>>, vector<384x128xbf16>,
    %c0_80 = arith.constant 0 : index
    %c0_81 = arith.constant 0 : index
    %109 = vector.load %arg9[%c0_80, %c0_81] : memref<384x128xbf16, #tpu.memory_space<vmem>>, vector<384x128xbf16>
    %c0_82 = arith.constant 0 : index
    %c0_83 = arith.constant 0 : index
    %110 = vector.load %arg6[%c0_82, %c0_83] : memref<128x128xbf16, #tpu.memory_space<vmem>>, vector<128x128xbf16>
    %cst_84 = arith.constant dense<0.000000e+00> : vector<384x128xf32>
    %111 = tpu.matmul %109, %110, %cst_84 {dimension_numbers = #tpu.dot_dimension_numbers<[1], [0], [0], [1], [0, 0, 1, 1], [], []>} : vector<384x128xbf16>, vector<128x128xbf16>, vector<384x128xf32> -> vector<384x128xf32>
    %c0_85 = arith.constant 0 : index
    %c0_86 = arith.constant 0 : index
    %112 = vector.load %arg7[%c0_85, %c0_86] : memref<1x128xf32, #tpu.memory_space<vmem>>, vector<1x128xf32>
    %113 = vector.broadcast %112 : vector<1x128xf32> to vector<384x128xf32>
    %114 = arith.addf %111, %113 : vector<384x128xf32>
    %c0_87 = arith.constant 0 : index
    %c0_88 = arith.constant 0 : index
    %115 = vector.load %arg8[%c0_87, %c0_88] : memref<384x128xf32, #tpu.memory_space<vmem>>, vector<384x128xf32>
    tpu.vector_store %arg8[%c0_87, %c0_88], %114 {strides = array<i32>} : memref<384x128xf32, #tpu.memory_space<vmem>>, vector<384x128xf32>,
    return
  }
  func.func @transform_0(%arg0: i32) -> (i32, i32) {
    %c0_i32 = arith.constant 0 : i32
    %c0_i32_0 = arith.constant 0 : i32
    %c0_i32_1 = arith.constant 0 : i32
    return %c0_i32, %c0_i32_0 : i32, i32
  }
  func.func @transform_1(%arg0: i32) -> (i32, i32) {
    %c0_i32 = arith.constant 0 : i32
    %c0_i32_0 = arith.constant 0 : i32
    %c0_i32_1 = arith.constant 0 : i32
    return %c0_i32, %c0_i32_0 : i32, i32
  }
  func.func @transform_2(%arg0: i32) -> (i32, i32) {
    %c0_i32 = arith.constant 0 : i32
    %c0_i32_0 = arith.constant 0 : i32
    %c0_i32_1 = arith.constant 0 : i32
    return %c0_i32, %c0_i32_0 : i32, i32
  }
  func.func @transform_3(%arg0: i32) -> (i32, i32) {
    %c0_i32 = arith.constant 0 : i32
    %c0_i32_0 = arith.constant 0 : i32
    %c0_i32_1 = arith.constant 0 : i32
    return %c0_i32, %c0_i32_0 : i32, i32
  }
  func.func @transform_4(%arg0: i32) -> (i32, i32, i32) {
    %c0_i32 = arith.constant 0 : i32
    %c0_i32_0 = arith.constant 0 : i32
    %c0_i32_1 = arith.constant 0 : i32
    %c0_i32_2 = arith.constant 0 : i32
    return %c0_i32, %c0_i32_0, %c0_i32_1 : i32, i32, i32
  }
  func.func @transform_5(%arg0: i32) -> (i32, i32) {
    %c0_i32 = arith.constant 0 : i32
    %c0_i32_0 = arith.constant 0 : i32
    %c0_i32_1 = arith.constant 0 : i32
    return %c0_i32, %c0_i32_0 : i32, i32
  }
  func.func @transform_6(%arg0: i32) -> (i32, i32) {
    %c0_i32 = arith.constant 0 : i32
    %c0_i32_0 = arith.constant 0 : i32
    %c0_i32_1 = arith.constant 0 : i32
    return %c0_i32, %c0_i32_0 : i32, i32
  }
  func.func @transform_7(%arg0: i32) -> (i32, i32) {
    %c0_i32 = arith.constant 0 : i32
    %c0_i32_0 = arith.constant 0 : i32
    %c0_i32_1 = arith.constant 0 : i32
    return %c0_i32, %c0_i32_0 : i32, i32
  }
}

</mosaic_0001>

<bundles_post_ra>
// kernel: gcn_encoder_forward.1
= control target key start
LH: loop header
LB: loop body
LE: loop exit
PB: predicated region body
PF: predicated region fallthrough
CT: control target
= control target key end

     0   :  { %v12719_v62 = vmov 0   ;;  %vm9825_vm1 = vmmov 1   ;;  %s12711_s2 = inlined_call_operand.vmem [shape: f32[128,128], index: 2, kind: input, shape index: {}]   ;;  %s12712_s1 = inlined_call_operand.vmem [shape: f32[384,128], index: 1, kind: input, shape index: {}]   ;;  %s12713_s0 = inlined_call_operand.vmem [shape: bf16[384,384], index: 0, kind: input, shape index: {}]   ;;  %s12714_s3 = inlined_call_operand.vmem [shape: f32[1,128], index: 3, kind: input, shape index: {}]   ;;  %s12715_s4 = inlined_call_operand.vmem [shape: bf16[4,128,128], index: 4, kind: input, shape index: {}]   ;;  %s12716_s5 = inlined_call_operand.vmem [shape: bf16[128,128], index: 5, kind: input, shape index: {}]   ;;  %s12717_s6 = inlined_call_operand.vmem [shape: f32[1,128], index: 6, kind: input, shape index: {}]   ;;  %s12718_s7 = inlined_call_operand.vmem [shape: f32[384,128], index: 7, kind: output, shape index: {}]  }
   0x1   :  { %v75_v0 = vld [vmem:[%s12711_s2] sm:$0xff]  ;;  %v76_v1 = vld [vmem:[%s12711_s2 + $0x8] sm:$0xff]  ;;  %v77_v2 = vld [vmem:[%s12711_s2 + $0x10] sm:$0xff]  ;;  %9365 = vmatprep.subr.bf16.mxu1 %v12719_v62 }
   0x2   :  { %v9333_v3 = vpack.c.bf16 %v76_v1, %v75_v0  ;;  %v78_v4 = vld [vmem:[%s12711_s2 + $0x18] sm:$0xff]  ;;  %v79_v6 = vld [vmem:[%s12711_s2 + $0x20] sm:$0xff]  ;;  %v80_v7 = vld [vmem:[%s12711_s2 + $0x28] sm:$0xff] }
   0x3   :  { %v9337_v5 = vpack.c.bf16 %v78_v4, %v77_v2  ;;  %v9341_v8 = vpack.c.bf16 %v80_v7, %v79_v6  ;;  %v27_v9 = vld [vmem:[%s12712_s1] sm:$0xff]  ;;  %v81_v10 = vld [vmem:[%s12711_s2 + $0x30] sm:$0xff]  ;;  %v82_v11 = vld [vmem:[%s12711_s2 + $0x38] sm:$0xff] }
   0x4   :  { %9334 = vmatprep.subr.bf16.mxu0 %v9333_v3  ;;  %8695 = vmatprep.mubr.f32.mxu0 %v27_v9  ;;  %v9345_v12 = vpack.c.bf16 %v82_v11, %v81_v10  ;;  %v83_v13 = vld [vmem:[%s12711_s2 + $0x40] sm:$0xff]  ;;  %v84_v14 = vld [vmem:[%s12711_s2 + $0x48] sm:$0xff]  ;;  %v85_v16 = vld [vmem:[%s12711_s2 + $0x50] sm:$0xff] }
   0x5   :  { %9336 = vmatpush3.bf16.msra.mxu0 %v9333_v3  ;;  %v9349_v15 = vpack.c.bf16 %v84_v14, %v83_v13  ;;  %v86_v17 = vld [vmem:[%s12711_s2 + $0x58] sm:$0xff]  ;;  %v87_v19 = vld [vmem:[%s12711_s2 + $0x60] sm:$0xff]  ;;  %v88_v20 = vld [vmem:[%s12711_s2 + $0x68] sm:$0xff] }
   0x6   :  { %9338 = vmatprep.subr.bf16.mxu0 %v9337_v5  ;;  %v9353_v18 = vpack.c.bf16 %v86_v17, %v85_v16  ;;  %v9357_v21 = vpack.c.bf16 %v88_v20, %v87_v19  ;;  %v89_v22 = vld [vmem:[%s12711_s2 + $0x70] sm:$0xff]  ;;  %v90_v23 = vld [vmem:[%s12711_s2 + $0x78] sm:$0xff]  ;;  %v28_v25 = vld [vmem:[%s12712_s1 + $0x8] sm:$0xff] }
   0x7   :  { %v9361_v24 = vpack.c.bf16 %v90_v23, %v89_v22  ;;  %v29_v26 = vld [vmem:[%s12712_s1 + $0x10] sm:$0xff]  ;;  %v30_v27 = vld [vmem:[%s12712_s1 + $0x18] sm:$0xff]  ;;  %v31_v28 = vld [vmem:[%s12712_s1 + $0x20] sm:$0xff] }
   0x8   :  { %v32_v29 = vld [vmem:[%s12712_s1 + $0x28] sm:$0xff]  ;;  %v33_v30 = vld [vmem:[%s12712_s1 + $0x30] sm:$0xff]  ;;  %v34_v31 = vld [vmem:[%s12712_s1 + $0x38] sm:$0xff] }
   0x9   :  { %9340 = vmatpush3.bf16.msra.mxu0 %v9337_v5  ;;  %v35_v32 = vld [vmem:[%s12712_s1 + $0x40] sm:$0xff]  ;;  %v36_v33 = vld [vmem:[%s12712_s1 + $0x48] sm:$0xff]  ;;  %v37_v34 = vld [vmem:[%s12712_s1 + $0x50] sm:$0xff] }
   0xa   :  { %9342 = vmatprep.subr.bf16.mxu0 %v9341_v8  ;;  %v38_v35 = vld [vmem:[%s12712_s1 + $0x58] sm:$0xff]  ;;  %v39_v36 = vld [vmem:[%s12712_s1 + $0x60] sm:$0xff]  ;;  %v40_v37 = vld [vmem:[%s12712_s1 + $0x68] sm:$0xff] }
   0xb   :  { %v41_v38 = vld [vmem:[%s12712_s1 + $0x70] sm:$0xff]  ;;  %v42_v39 = vld [vmem:[%s12712_s1 + $0x78] sm:$0xff]  ;;  %v43_v40 = vld [vmem:[%s12712_s1 + $0x80] sm:$0xff] }
   0xc   :  { %v44_v41 = vld [vmem:[%s12712_s1 + $0x88] sm:$0xff]  ;;  %v45_v42 = vld [vmem:[%s12712_s1 + $0x90] sm:$0xff]  ;;  %v46_v43 = vld [vmem:[%s12712_s1 + $0x98] sm:$0xff] }
   0xd   :  { %9344 = vmatpush3.bf16.msra.mxu0 %v9341_v8  ;;  %v47_v44 = vld [vmem:[%s12712_s1 + $0xa0] sm:$0xff]  ;;  %v48_v45 = vld [vmem:[%s12712_s1 + $0xa8] sm:$0xff]  ;;  %v49_v46 = vld [vmem:[%s12712_s1 + $0xb0] sm:$0xff] }
   0xe   :  { %9346 = vmatprep.subr.bf16.mxu0 %v9345_v12  ;;  %v50_v47 = vld [vmem:[%s12712_s1 + $0xb8] sm:$0xff]  ;;  %v51_v48 = vld [vmem:[%s12712_s1 + $0xc0] sm:$0xff]  ;;  %v52_v49 = vld [vmem:[%s12712_s1 + $0xc8] sm:$0xff] }
   0xf   :  { %v53_v50 = vld [vmem:[%s12712_s1 + $0xd0] sm:$0xff]  ;;  %v54_v51 = vld [vmem:[%s12712_s1 + $0xd8] sm:$0xff]  ;;  %v55_v52 = vld [vmem:[%s12712_s1 + $0xe0] sm:$0xff] }
  0x10   :  { %v56_v53 = vld [vmem:[%s12712_s1 + $0xe8] sm:$0xff]  ;;  %v57_v54 = vld [vmem:[%s12712_s1 + $0xf0] sm:$0xff]  ;;  %v58_v55 = vld [vmem:[%s12712_s1 + $0xf8] sm:$0xff] }
  0x11   :  { %9348 = vmatpush3.bf16.msra.mxu0 %v9345_v12  ;;  %v59_v56 = vld [vmem:[%s12712_s1 + $0x100] sm:$0xff]  ;;  %v60_v57 = vld [vmem:[%s12712_s1 + $0x108] sm:$0xff]  ;;  %v61_v58 = vld [vmem:[%s12712_s1 + $0x110] sm:$0xff] }
  0x12   :  { %9350 = vmatprep.subr.bf16.mxu0 %v9349_v15  ;;  %v62_v59 = vld [vmem:[%s12712_s1 + $0x118] sm:$0xff]  ;;  %v63_v60 = vld [vmem:[%s12712_s1 + $0x120] sm:$0xff]  ;;  %v64_v61 = vld [vmem:[%s12712_s1 + $0x128] sm:$0xff] }
  0x13   :  { %v65_v63 = vld [vmem:[%s12712_s1 + $0x130] sm:$0xff]  ;;  %v66_v0 = vld [vmem:[%s12712_s1 + $0x138] sm:$0xff]  ;;  %v67_v1 = vld [vmem:[%s12712_s1 + $0x140] sm:$0xff] }
  0x14   :  { %v68_v2 = vld [vmem:[%s12712_s1 + $0x148] sm:$0xff]  ;;  %v69_v3 = vld [vmem:[%s12712_s1 + $0x150] sm:$0xff]  ;;  %v70_v4 = vld [vmem:[%s12712_s1 + $0x158] sm:$0xff] }
  0x15   :  { %9352 = vmatpush3.bf16.msra.mxu0 %v9349_v15  ;;  %v71_v5 = vld [vmem:[%s12712_s1 + $0x160] sm:$0xff]  ;;  %v72_v6 = vld [vmem:[%s12712_s1 + $0x168] sm:$0xff]  ;;  %v73_v7 = vld [vmem:[%s12712_s1 + $0x170] sm:$0xff] }
  0x16   :  { %9354 = vmatprep.subr.bf16.mxu0 %v9353_v18  ;;  %v74_v8 = vld [vmem:[%s12712_s1 + $0x178] sm:$0xff]  ;;  %v9402_v9 = vld [vmem:[%s12713_s0 + $0x4] ss:$12 sps:$4 sm:$0xff]   ;;  %v9405_v10 = vld [vmem:[%s12713_s0 + $0x34] ss:$12 sps:$4 sm:$0xff]  }
  0x17   :  { %1220 = vmatprep.mubr.bf16.mxu1 %v9405_v10  ;;  %v10070_v11 = vld [vmem:[%s12714_s3] ss:$0 sm:$0xff] }
  0x19   :  { %9356 = vmatpush3.bf16.msra.mxu0 %v9353_v18 }
  0x1a   :  { %9358 = vmatprep.subr.bf16.mxu0 %v9357_v21 }
  0x1d   :  { %9360 = vmatpush3.bf16.msra.mxu0 %v9357_v21 }
  0x1e   :  { %9362 = vmatprep.subr.bf16.mxu0 %v9361_v24 }
  0x21   :  { %9364 = vmatpush3.bf16.msra.mxu0 %v9361_v24 }
  0x22   :  { %1172 = vmatprep.subr.bf16.mxu0 %v12719_v62 }
  0x24   :  { %8696 = vmatmul.mubr.f32.vlgmr.msra.gmra.mrb[0].mxu0 %v28_v25 }
  0x25   :  { %8698 = vmatprep.mubr.f32.mxu0 %v29_v26 }
  0x28   :  { %8699 = vmatmul.mubr.f32.gmra.mrb[2].mxu0 %v30_v27 }
  0x29   :  { %8701 = vmatprep.mubr.f32.mxu0 %v31_v28 }
  0x2c   :  { %8702 = vmatmul.mubr.f32.gmra.mrb[4].mxu0 %v32_v29 }
  0x2d   :  { %8704 = vmatprep.mubr.f32.mxu0 %v33_v30 }
  0x30   :  { %8705 = vmatmul.mubr.f32.gmra.mrb[6].mxu0 %v34_v31 }
  0x31   :  { %8707 = vmatprep.mubr.f32.mxu0 %v35_v32 }
  0x34   :  { %8708 = vmatmul.mubr.f32.gmra.mrb[8].mxu0 %v36_v33 }
  0x35   :  { %8710 = vmatprep.mubr.f32.mxu0 %v37_v34 }
  0x38   :  { %8711 = vmatmul.mubr.f32.gmra.mrb[10].mxu0 %v38_v35 }
  0x39   :  { %8713 = vmatprep.mubr.f32.mxu0 %v39_v36 }
  0x3c   :  { %8714 = vmatmul.mubr.f32.gmra.mrb[12].mxu0 %v40_v37 }
  0x3d   :  { %8716 = vmatprep.mubr.f32.mxu0 %v41_v38 }
  0x40   :  { %8717 = vmatmul.mubr.f32.gmra.mrb[14].mxu0 %v42_v39 }
  0x41   :  { %8719 = vmatprep.mubr.f32.mxu0 %v43_v40 }
  0x44   :  { %8720 = vmatmul.mubr.f32.gmra.mrb[16].mxu0 %v44_v41 }
  0x45   :  { %8722 = vmatprep.mubr.f32.mxu0 %v45_v42 }
  0x48   :  { %8723 = vmatmul.mubr.f32.gmra.mrb[18].mxu0 %v46_v43 }
  0x49   :  { %8725 = vmatprep.mubr.f32.mxu0 %v47_v44 }
  0x4c   :  { %8726 = vmatmul.mubr.f32.gmra.mrb[20].mxu0 %v48_v45 }
  0x4d   :  { %8728 = vmatprep.mubr.f32.mxu0 %v49_v46 }
  0x50   :  { %8729 = vmatmul.mubr.f32.gmra.mrb[22].mxu0 %v50_v47 }
  0x51   :  { %8731 = vmatprep.mubr.f32.mxu0 %v51_v48 }
  0x54   :  { %8732 = vmatmul.mubr.f32.gmra.mrb[24].mxu0 %v52_v49 }
  0x55   :  { %8734 = vmatprep.mubr.f32.mxu0 %v53_v50 }
  0x58   :  { %8735 = vmatmul.mubr.f32.gmra.mrb[26].mxu0 %v54_v51 }
  0x59   :  { %8737 = vmatprep.mubr.f32.mxu0 %v55_v52 }
  0x5c   :  { %8738 = vmatmul.mubr.f32.gmra.mrb[28].mxu0 %v56_v53 }
  0x5d   :  { %8740 = vmatprep.mubr.f32.mxu0 %v57_v54 }
  0x60   :  { %8741 = vmatmul.mubr.f32.gmra.mrb[30].mxu0 %v58_v55 }
  0x61   :  { %8743 = vmatprep.mubr.f32.mxu0 %v59_v56 }
  0x64   :  { %8744 = vmatmul.mubr.f32.gmra.mrb[32].mxu0 %v60_v57 }
  0x65   :  { %8746 = vmatprep.mubr.f32.mxu0 %v61_v58 }
  0x68   :  { %8747 = vmatmul.mubr.f32.gmra.mrb[34].mxu0 %v62_v59 }
  0x69   :  { %8749 = vmatprep.mubr.f32.mxu0 %v63_v60 }
  0x6c   :  { %8750 = vmatmul.mubr.f32.gmra.mrb[36].mxu0 %v64_v61 }
  0x6d   :  { %8752 = vmatprep.mubr.f32.mxu0 %v65_v63 }
  0x70   :  { %8753 = vmatmul.mubr.f32.gmra.mrb[38].mxu0 %v66_v0 }
  0x71   :  { %8755 = vmatprep.mubr.f32.mxu0 %v67_v1 }
  0x74   :  { %8756 = vmatmul.mubr.f32.gmra.mrb[40].mxu0 %v68_v2 }
  0x75   :  { %8758 = vmatprep.mubr.f32.mxu0 %v69_v3 }
  0x78   :  { %8759 = vmatmul.mubr.f32.gmra.mrb[42].mxu0 %v70_v4 }
  0x79   :  { %8761 = vmatprep.mubr.f32.mxu0 %v71_v5 }
  0x7c   :  { %8762 = vmatmul.mubr.f32.gmra.mrb[44].mxu0 %v72_v6 }
  0x7d   :  { %8764 = vmatprep.mubr.f32.mxu0 %v73_v7 }
  0x80   :  { %8765 = vmatmul.mubr.f32.gmra.mrb[46].mxu0 %v74_v8 }
  0x81   :  { %1204 = vmatprep.mubr.bf16.mxu0 %v9402_v9 }
  0xf7   :  { %v8697_v12 = vpop.f32.mrb[0].mxu0 }
  0xf8   :  { %v170_v13 = vadd.f32 %v8697_v12, %v10070_v11  ;;  %v164_v14 = vpop.f32.mrb[1].mxu0 }
  0xf9   :  { %v165_v15 = vadd.f32 %v10070_v11, %v164_v14 }
  0xfa   :  { %v404_v16 = vmax.f32 %v170_v13, 0.0 }
  0xfb   :  { %v403_v17 = vmax.f32 %v165_v15, 0.0  ;;  %v8700_v18 = vpop.f32.mrb[2].mxu0 }
  0xfc   :  { %v180_v19 = vadd.f32 %v8700_v18, %v10070_v11  ;;  %v174_v20 = vpop.f32.mrb[3].mxu0 }
  0xfd   :  { %v10075_v21 = vpack.c.bf16 %v404_v16, %v403_v17  ;;  %v175_v22 = vadd.f32 %v10070_v11, %v174_v20 }
  0xfe   :  { %v406_v23 = vmax.f32 %v180_v19, 0.0 }
  0xff   :  { %v405_v24 = vmax.f32 %v175_v22, 0.0  ;;  %v8703_v25 = vpop.f32.mrb[4].mxu0  ;;  %1173 = vmatpush1.bf16.msra.mxu0 %v10075_v21  ;;  %9381 = vmatpush1.bf16.msra.mxu1 %v10075_v21 }
 0x100   :  { %v190_v26 = vadd.f32 %v8703_v25, %v10070_v11  ;;  %v184_v27 = vpop.f32.mrb[5].mxu0  ;;  %1174 = vmatprep.subr.bf16.mxu0 %v12719_v62  ;;  %9366 = vmatprep.subr.bf16.mxu1 %v12719_v62 }
 0x101   :  { %v10083_v28 = vpack.c.bf16 %v406_v23, %v405_v24  ;;  %v185_v29 = vadd.f32 %v10070_v11, %v184_v27 }
 0x102   :  { %v408_v30 = vmax.f32 %v190_v26, 0.0 }
 0x103   :  { %v407_v31 = vmax.f32 %v185_v29, 0.0  ;;  %v8706_v32 = vpop.f32.mrb[6].mxu0  ;;  %1175 = vmatpush1.bf16.msra.mxu0 %v10083_v28  ;;  %9382 = vmatpush1.bf16.msra.mxu1 %v10083_v28 }
 0x104   :  { %v200_v33 = vadd.f32 %v8706_v32, %v10070_v11  ;;  %v194_v34 = vpop.f32.mrb[7].mxu0  ;;  %1176 = vmatprep.subr.bf16.mxu0 %v12719_v62  ;;  %9367 = vmatprep.subr.bf16.mxu1 %v12719_v62 }
 0x105   :  { %v10091_v35 = vpack.c.bf16 %v408_v30, %v407_v31  ;;  %v195_v36 = vadd.f32 %v10070_v11, %v194_v34 }
 0x106   :  { %v410_v37 = vmax.f32 %v200_v33, 0.0 }
 0x107   :  { %v409_v38 = vmax.f32 %v195_v36, 0.0  ;;  %v8709_v39 = vpop.f32.mrb[8].mxu0  ;;  %1177 = vmatpush1.bf16.msra.mxu0 %v10091_v35  ;;  %9383 = vmatpush1.bf16.msra.mxu1 %v10091_v35 }
 0x108   :  { %v210_v40 = vadd.f32 %v8709_v39, %v10070_v11  ;;  %v204_v41 = vpop.f32.mrb[9].mxu0  ;;  %1178 = vmatprep.subr.bf16.mxu0 %v12719_v62  ;;  %9368 = vmatprep.subr.bf16.mxu1 %v12719_v62 }
 0x109   :  { %v10099_v42 = vpack.c.bf16 %v410_v37, %v409_v38  ;;  %v205_v43 = vadd.f32 %v10070_v11, %v204_v41 }
 0x10a   :  { %v412_v44 = vmax.f32 %v210_v40, 0.0 }
 0x10b   :  { %v411_v45 = vmax.f32 %v205_v43, 0.0  ;;  %v8712_v46 = vpop.f32.mrb[10].mxu0  ;;  %1179 = vmatpush1.bf16.msra.mxu0 %v10099_v42  ;;  %9384 = vmatpush1.bf16.msra.mxu1 %v10099_v42 }
 0x10c   :  { %v220_v47 = vadd.f32 %v8712_v46, %v10070_v11  ;;  %v214_v48 = vpop.f32.mrb[11].mxu0  ;;  %1180 = vmatprep.subr.bf16.mxu0 %v12719_v62  ;;  %9369 = vmatprep.subr.bf16.mxu1 %v12719_v62 }
 0x10d   :  { %v10107_v49 = vpack.c.bf16 %v412_v44, %v411_v45  ;;  %v215_v50 = vadd.f32 %v10070_v11, %v214_v48 }
 0x10e   :  { %v414_v51 = vmax.f32 %v220_v47, 0.0 }
 0x10f   :  { %v413_v52 = vmax.f32 %v215_v50, 0.0  ;;  %v8715_v53 = vpop.f32.mrb[12].mxu0  ;;  %1181 = vmatpush1.bf16.msra.mxu0 %v10107_v49  ;;  %9385 = vmatpush1.bf16.msra.mxu1 %v10107_v49 }
 0x110   :  { %v230_v54 = vadd.f32 %v8715_v53, %v10070_v11  ;;  %v224_v55 = vpop.f32.mrb[13].mxu0  ;;  %1182 = vmatprep.subr.bf16.mxu0 %v12719_v62  ;;  %9370 = vmatprep.subr.bf16.mxu1 %v12719_v62 }
 0x111   :  { %v10115_v56 = vpack.c.bf16 %v414_v51, %v413_v52  ;;  %v225_v57 = vadd.f32 %v10070_v11, %v224_v55  ;;  %v451_v51 = vlaneseq }
 0x112   :  { %v416_v58 = vmax.f32 %v230_v54, 0.0 }
 0x113   :  { %v415_v59 = vmax.f32 %v225_v57, 0.0  ;;  %v8718_v60 = vpop.f32.mrb[14].mxu0  ;;  %1183 = vmatpush1.bf16.msra.mxu0 %v10115_v56  ;;  %9386 = vmatpush1.bf16.msra.mxu1 %v10115_v56 }
 0x114   :  { %v240_v61 = vadd.f32 %v8718_v60, %v10070_v11  ;;  %v234_v63 = vpop.f32.mrb[15].mxu0  ;;  %1184 = vmatprep.subr.bf16.mxu0 %v12719_v62  ;;  %9371 = vmatprep.subr.bf16.mxu1 %v12719_v62  ;;  %v452_v60 = vshrl.u32 %v451_v51, 7 }
 0x115   :  { %v10123_v0 = vpack.c.bf16 %v416_v58, %v415_v59  ;;  %v235_v1 = vadd.f32 %v10070_v11, %v234_v63 }
 0x116   :  { %v418_v2 = vmax.f32 %v240_v61, 0.0 }
 0x117   :  { %v417_v3 = vmax.f32 %v235_v1, 0.0  ;;  %v8721_v4 = vpop.f32.mrb[16].mxu0  ;;  %1185 = vmatpush1.bf16.msra.mxu0 %v10123_v0  ;;  %9387 = vmatpush1.bf16.msra.mxu1 %v10123_v0 }
 0x118   :  { %v250_v5 = vadd.f32 %v8721_v4, %v10070_v11  ;;  %v244_v6 = vpop.f32.mrb[17].mxu0  ;;  %1186 = vmatprep.subr.bf16.mxu0 %v12719_v62  ;;  %9372 = vmatprep.subr.bf16.mxu1 %v12719_v62 }
 0x119   :  { %v10131_v7 = vpack.c.bf16 %v418_v2, %v417_v3  ;;  %v245_v8 = vadd.f32 %v10070_v11, %v244_v6 }
 0x11a   :  { %v420_v9 = vmax.f32 %v250_v5, 0.0 }
 0x11b   :  { %v419_v10 = vmax.f32 %v245_v8, 0.0  ;;  %v8724_v12 = vpop.f32.mrb[18].mxu0  ;;  %1187 = vmatpush1.bf16.msra.mxu0 %v10131_v7  ;;  %9388 = vmatpush1.bf16.msra.mxu1 %v10131_v7 }
 0x11c   :  { %v260_v13 = vadd.f32 %v8724_v12, %v10070_v11  ;;  %v254_v14 = vpop.f32.mrb[19].mxu0  ;;  %1188 = vmatprep.subr.bf16.mxu0 %v12719_v62  ;;  %9373 = vmatprep.subr.bf16.mxu1 %v12719_v62 }
 0x11d   :  { %v10139_v15 = vpack.c.bf16 %v420_v9, %v419_v10  ;;  %v255_v16 = vadd.f32 %v10070_v11, %v254_v14  ;;  %v489_v9 = vadd.s32 296, %v452_v60  ;;  %v9422_v60 = vld [vmem:[%s12713_s0 + $0x94] ss:$12 sps:$4 sm:$0xff]  }
 0x11e   :  { %v422_v17 = vmax.f32 %v260_v13, 0.0  ;;  %v9400_v13 = vld [vmem:[%s12713_s0] ss:$12 sps:$4 sm:$0xff]  }
 0x11f   :  { %v421_v18 = vmax.f32 %v255_v16, 0.0  ;;  %v8727_v19 = vpop.f32.mrb[20].mxu0  ;;  %1189 = vmatpush1.bf16.msra.mxu0 %v10139_v15  ;;  %9389 = vmatpush1.bf16.msra.mxu1 %v10139_v15  ;;  %vm537_vm0 = vcmp.lt.s32.totalorder %v489_v9, 300  ;;  %v9434_v9 = vld [vmem:[%s12713_s0 + $0xc8] ss:$12 sps:$4 sm:$0xff]  }
 0x120   :  { %v270_v20 = vadd.f32 %v8727_v19, %v10070_v11  ;;  %v264_v22 = vpop.f32.mrb[21].mxu0  ;;  %1190 = vmatprep.subr.bf16.mxu0 %v12719_v62  ;;  %9374 = vmatprep.subr.bf16.mxu1 %v12719_v62  ;;  %vm10219_vm2 = vmpackc.low %vm537_vm0, %vm9825_vm1 }
 0x121   :  { %v10147_v23 = vpack.c.bf16 %v422_v17, %v421_v18  ;;  %v265_v24 = vadd.f32 %v10070_v11, %v264_v22  ;;  %v9403_v17 = vld [vmem:[%s12713_s0 + $0x30] ss:$12 sps:$4 sm:$0xff]  }
 0x122   :  { %v424_v25 = vmax.f32 %v270_v20, 0.0  ;;  %v9406_v18 = vld [vmem:[%s12713_s0 + $0x1c] ss:$12 sps:$4 sm:$0xff]   ;;  %v9408_v20 = vld [vmem:[%s12713_s0 + $0x4c] ss:$12 sps:$4 sm:$0xff]  }
 0x123   :  { %v423_v26 = vmax.f32 %v265_v24, 0.0  ;;  %v8730_v27 = vpop.f32.mrb[22].mxu0  ;;  %1191 = vmatpush1.bf16.msra.mxu0 %v10147_v23  ;;  %9390 = vmatpush1.bf16.msra.mxu1 %v10147_v23 }
 0x124   :  { %v280_v29 = vadd.f32 %v8730_v27, %v10070_v11  ;;  %v274_v30 = vpop.f32.mrb[23].mxu0  ;;  %1192 = vmatprep.subr.bf16.mxu0 %v12719_v62  ;;  %9375 = vmatprep.subr.bf16.mxu1 %v12719_v62 }
 0x125   :  { %v10155_v31 = vpack.c.bf16 %v424_v25, %v423_v26  ;;  %v275_v32 = vadd.f32 %v10070_v11, %v274_v30 }
 0x126   :  { %v426_v33 = vmax.f32 %v280_v29, 0.0 }
 0x127   :  { %v425_v34 = vmax.f32 %v275_v32, 0.0  ;;  %v8733_v36 = vpop.f32.mrb[24].mxu0  ;;  %1193 = vmatpush1.bf16.msra.mxu0 %v10155_v31  ;;  %9391 = vmatpush1.bf16.msra.mxu1 %v10155_v31 }
 0x128   :  { %v290_v37 = vadd.f32 %v8733_v36, %v10070_v11  ;;  %v284_v38 = vpop.f32.mrb[25].mxu0  ;;  %1194 = vmatprep.subr.bf16.mxu0 %v12719_v62  ;;  %9376 = vmatprep.subr.bf16.mxu1 %v12719_v62 }
 0x129   :  { %v10163_v39 = vpack.c.bf16 %v426_v33, %v425_v34  ;;  %v285_v40 = vadd.f32 %v10070_v11, %v284_v38  ;;  %v9410_v38 = vld [vmem:[%s12713_s0 + $0x18] ss:$12 sps:$4 sm:$0xff]   ;;  %v9447_v34 = vld [vmem:[%s12713_s0 + $0x108] ss:$12 sps:$4 sm:$0xff]  }
 0x12a   :  { %v428_v41 = vmax.f32 %v290_v37, 0.0 }
 0x12b   :  { %v427_v43 = vmax.f32 %v285_v40, 0.0  ;;  %v8736_v44 = vpop.f32.mrb[26].mxu0  ;;  %1195 = vmatpush1.bf16.msra.mxu0 %v10163_v39  ;;  %9392 = vmatpush1.bf16.msra.mxu1 %v10163_v39  ;;  %v9411_v40 = vld [vmem:[%s12713_s0 + $0x48] ss:$12 sps:$4 sm:$0xff]  }
 0x12c   :  { %v300_v45 = vadd.f32 %v8736_v44, %v10070_v11  ;;  %v294_v46 = vpop.f32.mrb[27].mxu0  ;;  %1196 = vmatprep.subr.bf16.mxu0 %v12719_v62  ;;  %9377 = vmatprep.subr.bf16.mxu1 %v12719_v62  ;;  %v9412_v44 = vld [vmem:[%s12713_s0 + $0x64] ss:$12 sps:$4 sm:$0xff]  }
 0x12d   :  { %v10171_v47 = vpack.c.bf16 %v428_v41, %v427_v43  ;;  %v295_v48 = vadd.f32 %v10070_v11, %v294_v46  ;;  %v9414_v46 = vld [vmem:[%s12713_s0 + $0x8] ss:$12 sps:$4 sm:$0xff]  }
 0x12e   :  { %v430_v50 = vmax.f32 %v300_v45, 0.0 }
 0x12f   :  { %v429_v52 = vmax.f32 %v295_v48, 0.0  ;;  %v8739_v53 = vpop.f32.mrb[28].mxu0  ;;  %1197 = vmatpush1.bf16.msra.mxu0 %v10171_v47  ;;  %9393 = vmatpush1.bf16.msra.mxu1 %v10171_v47 }
 0x130   :  { %v310_v54 = vadd.f32 %v8739_v53, %v10070_v11  ;;  %v304_v55 = vpop.f32.mrb[29].mxu0  ;;  %1198 = vmatprep.subr.bf16.mxu0 %v12719_v62  ;;  %9378 = vmatprep.subr.bf16.mxu1 %v12719_v62  ;;  %v9416_v53 = vld [vmem:[%s12713_s0 + $0x20] ss:$12 sps:$4 sm:$0xff]  }
 0x131   :  { %v10179_v57 = vpack.c.bf16 %v430_v50, %v429_v52  ;;  %v305_v58 = vadd.f32 %v10070_v11, %v304_v55  ;;  %v9419_v55 = vld [vmem:[%s12713_s0 + $0x38] ss:$12 sps:$4 sm:$0xff]  }
 0x132   :  { %v432_v59 = vmax.f32 %v310_v54, 0.0  ;;  %v9417_v54 = vld [vmem:[%s12713_s0 + $0x7c] ss:$12 sps:$4 sm:$0xff]  }
 0x133   :  { %v431_v61 = vmax.f32 %v305_v58, 0.0  ;;  %v8742_v63 = vpop.f32.mrb[30].mxu0  ;;  %1199 = vmatpush1.bf16.msra.mxu0 %v10179_v57  ;;  %9394 = vmatpush1.bf16.msra.mxu1 %v10179_v57  ;;  %v9420_v58 = vld [vmem:[%s12713_s0 + $0x78] ss:$12 sps:$4 sm:$0xff]  }
 0x134   :  { %v320_v1 = vadd.f32 %v8742_v63, %v10070_v11  ;;  %v314_v2 = vpop.f32.mrb[31].mxu0  ;;  %1200 = vmatprep.subr.bf16.mxu0 %v12719_v62  ;;  %9379 = vmatprep.subr.bf16.mxu1 %v12719_v62  ;;  %v9425_v63 = vld [vmem:[%s12713_s0 + $0x90] ss:$12 sps:$4 sm:$0xff]  }
 0x135   :  { %v10187_v3 = vpack.c.bf16 %v432_v59, %v431_v61  ;;  %v315_v4 = vadd.f32 %v10070_v11, %v314_v2  ;;  %v9421_v59 = vld [vmem:[%s12713_s0 + $0x50] ss:$12 sps:$4 sm:$0xff]   ;;  %v9424_v61 = vld [vmem:[%s12713_s0 + $0x68] ss:$12 sps:$4 sm:$0xff]   ;;  %v9427_v2 = vld [vmem:[%s12713_s0 + $0xac] ss:$12 sps:$4 sm:$0xff]  }
 0x136   :  { %v434_v5 = vmax.f32 %v320_v1, 0.0  ;;  %v9426_v1 = vld [vmem:[%s12713_s0 + $0x80] ss:$12 sps:$4 sm:$0xff]  }
 0x137   :  { %v433_v6 = vmax.f32 %v315_v4, 0.0  ;;  %1201 = vmatpush1.bf16.msra.mxu0 %v10187_v3  ;;  %9395 = vmatpush1.bf16.msra.mxu1 %v10187_v3  ;;  %v8745_v8 = vpop.f32.mrb[32].mxu0  ;;  %v9429_v4 = vld [vmem:[%s12713_s0 + $0x98] ss:$12 sps:$4 sm:$0xff]  }
 0x138   :  { %v330_v10 = vadd.f32 %v8745_v8, %v10070_v11  ;;  %1202 = vmatprep.subr.bf16.mxu0 %v12719_v62  ;;  %9380 = vmatprep.subr.bf16.mxu1 %v12719_v62  ;;  %v324_v12 = vpop.f32.mrb[33].mxu0  ;;  %v9432_v8 = vld [vmem:[%s12713_s0 + $0xc4] ss:$12 sps:$4 sm:$0xff]  }
 0x139   :  { %v10198_v14 = vpack.c.bf16 %v434_v5, %v433_v6  ;;  %v325_v16 = vadd.f32 %v10070_v11, %v324_v12  ;;  %v9430_v5 = vld [vmem:[%s12713_s0 + $0xa8] ss:$12 sps:$4 sm:$0xff]   ;;  %v9431_v6 = vld [vmem:[%s12713_s0 + $0xb0] ss:$12 sps:$4 sm:$0xff]   ;;  %v9435_v12 = vld [vmem:[%s12713_s0 + $0xc0] ss:$12 sps:$4 sm:$0xff]  }
 0x13a   :  { %v436_v19 = vmax.f32 %v330_v10, 0.0  ;;  %v9496_v10 = vld [vmem:[%s12715_s4] sm:$0xff]  }
 0x13b   :  { %v435_v22 = vmax.f32 %v325_v16, 0.0  ;;  %1203 = vmatpush1.bf16.msra.mxu0 %v10198_v14  ;;  %9396 = vmatpush1.bf16.msra.mxu1 %v10198_v14  ;;  %v8748_v24 = vpop.f32.mrb[34].mxu0  ;;  %v9437_v16 = vld [vmem:[%s12713_s0 + $0xdc] ss:$12 sps:$4 sm:$0xff]  }
 0x13c   :  { %v340_v25 = vadd.f32 %v8748_v24, %v10070_v11  ;;  %v334_v26 = vpop.f32.mrb[35].mxu0  ;;  %2895 = vmatprep.subr.bf16.mxu1 %v12719_v62  ;;  %v9444_v24 = vld [vmem:[%s12713_s0 + $0xf0] ss:$12 sps:$4 sm:$0xff]  }
 0x13d   :  { %v10214_v27 = vpack.c.bf16 %v436_v19, %v435_v22  ;;  %v335_v29 = vadd.f32 %v10070_v11, %v334_v26  ;;  %v9443_v19 = vld [vmem:[%s12713_s0 + $0x110] ss:$12 sps:$4 sm:$0xff]   ;;  %v9448_v22 = vld [vmem:[%s12713_s0 + $0x128] ss:$12 sps:$4 sm:$0xff]   ;;  %v9445_v26 = vld [vmem:[%s12713_s0 + $0x10c] ss:$12 sps:$4 sm:$0xff]  }
 0x13e   :  { %v438_v30 = vmax.f32 %v340_v25, 0.0  ;;  %1205 = vmatmul.mubr.bf16.vlgmr.msra.gmra.mrb[48].mxu0 %v9400_v13  ;;  %1221 = vmatmul.mubr.bf16.vlgmr.msra.gmra.mrb[0].mxu1 %v9403_v17  ;;  %v9436_v13 = vld [vmem:[%s12713_s0 + $0xe0] ss:$12 sps:$4 sm:$0xff]   ;;  %v9440_v17 = vld [vmem:[%s12713_s0 + $0xf8] ss:$12 sps:$4 sm:$0xff]  }
 0x13f   :  { %v437_v32 = vmax.f32 %v335_v29, 0.0  ;;  %v8751_v33 = vpop.f32.mrb[36].mxu0  ;;  %8767 = vmatprep.subr.bf16.mxu0 %v10214_v27  ;;  %1212 = vmatprep.mubr.bf16.mxu0 %v9406_v18  ;;  %v9439_v18 = vld [vmem:[%s12713_s0 + $0xd8] ss:$12 sps:$4 sm:$0xff]   ;;  %v9451_v25 = vld [vmem:[%s12713_s0 + $0x140] ss:$12 sps:$4 sm:$0xff]  }
 0x140   :  { %v350_v36 = vadd.f32 %v8751_v33, %v10070_v11  ;;  %v344_v37 = vpop.f32.mrb[37].mxu0  ;;  %8768 = vmatpush3.bf16.msra.mxu0 %v10214_v27  ;;  %1228 = vmatprep.mubr.bf16.mxu1 %v9408_v20  ;;  %v9441_v20 = vld [vmem:[%s12713_s0 + $0xf4] ss:$12 sps:$4 sm:$0xff]   ;;  %v9456_v29 = vld [vmem:[%s12713_s0 + $0x158] ss:$12 sps:$4 sm:$0xff]  }
 0x141   :  { %v10231_v41 = vpack.c.bf16 %v438_v30, %v437_v32  ;;  %v345_v43 = vadd.f32 %v10070_v11, %v344_v37  ;;  %v9415_v11 = vld [vmem:[%s12713_s0 + $0x60] ss:$12 sps:$4 sm:$0xff]  }
 0x142   :  { %v440_v45 = vmax.f32 %v350_v36, 0.0  ;;  %v9459_v36 = vld [vmem:[%s12713_s0 + $0x170] ss:$12 sps:$4 sm:$0xff]  }
 0x143   :  { %v439_v48 = vmax.f32 %v345_v43, 0.0  ;;  %8769 = vmatprep.subr.bf16.mxu0 %v10231_v41  ;;  %v8754_v30 = vpop.f32.mrb[38].mxu0 }
 0x144   :  { %8770 = vmatpush3.bf16.msra.mxu0 %v10231_v41  ;;  %v585_v50 = vsel %vm537_vm0, %v440_v45, 0.0  ;;  %v354_v32 = vpop.f32.mrb[39].mxu0  ;;  %v9484_v30 = vld [vmem:[%s12713_s0 + $0x1e0] ss:$12 sps:$4 sm:$0xff]  }
 0x145   :  { %v8314_v51 = vpack.c.bf16 %v440_v45, %v439_v48  ;;  %v10243_v52 = vpack.c.bf16 %v585_v50, %v439_v48  ;;  %v9467_v48 = vld [vmem:[%s12713_s0 + $0x1a0] ss:$12 sps:$4 sm:$0xff]   ;;  %v9485_v32 = vld [vmem:[%s12713_s0 + $0x1fc] ss:$12 sps:$4 sm:$0xff]  }
 0x146   :  { %1213 = vmatmul.mubr.bf16.gmra.mrb[52].mxu0 %v9410_v38  ;;  %1229 = vmatmul.mubr.bf16.gmra.mrb[4].mxu1 %v9411_v40  ;;  %v9449_v38 = vld [vmem:[%s12713_s0 + $0x124] ss:$12 sps:$4 sm:$0xff]   ;;  %v9464_v40 = vld [vmem:[%s12713_s0 + $0x188] ss:$12 sps:$4 sm:$0xff]  }
 0x147   :  { %8771 = vmatprep.subr.msk.bf16.mxu0 %vm10219_vm2, %v8314_v51  ;;  %1236 = vmatprep.mubr.bf16.mxu1 %v9412_v44  ;;  %v8757_v33 = vpop.f32.mrb[40].mxu0 }
 0x148   :  { %8772 = vmatpush3.bf16.msk.msra.mxu0 %vm10219_vm2, %v8314_v51  ;;  %8773 = vmatprep.mubr.bf16.mxu0 %v9414_v46  ;;  %v364_v37 = vpop.f32.mrb[41].mxu0  ;;  %v9452_v46 = vld [vmem:[%s12713_s0 + $0x120] ss:$12 sps:$4 sm:$0xff]   ;;  %v9453_v51 = vld [vmem:[%s12713_s0 + $0x13c] ss:$12 sps:$4 sm:$0xff]  }
 0x149   :  { %8821 = vmatprep.subr.bf16.mxu0 %v9496_v10  ;;  %v9487_v33 = vld [vmem:[%s12713_s0 + $0x1f8] ss:$12 sps:$4 sm:$0xff]  }
 0x14a   :  { %v9493_v37 = vld [vmem:[%s12713_s0 + $0x22c] ss:$12 sps:$4 sm:$0xff]  }
 0x14b   :  { %v8760_v43 = vpop.f32.mrb[42].mxu0 }
 0x14c   :  { %v374_v44 = vpop.f32.mrb[43].mxu0 }
 0x14e   :  { %1237 = vmatmul.mubr.bf16.gmra.mrb[8].mxu1 %v9415_v11  ;;  %8774 = vmatmul.mubr.bf16.vlgmr.msra.gmra.mrb[56].mxu0 %v9416_v53  ;;  %v9472_v11 = vld [vmem:[%s12713_s0 + $0x1b8] ss:$12 sps:$4 sm:$0xff]  }
 0x14f   :  { %1244 = vmatprep.mubr.bf16.mxu1 %v9417_v54  ;;  %8777 = vmatprep.mubr.bf16.mxu0 %v9419_v55  ;;  %v8763_v45 = vpop.f32.mrb[44].mxu0  ;;  %v9497_v55 = vld [vmem:[%s12715_s4 + $0x8] sm:$0xff]  }
 0x150   :  { %8822 = vmatpush3.bf16.msra.mxu0 %v9496_v10  ;;  %v384_v50 = vpop.f32.mrb[45].mxu0  ;;  %v9463_v10 = vld [vmem:[%s12713_s0 + $0x168] ss:$12 sps:$4 sm:$0xff]  }
 0x151   :  { %8823 = vmatprep.subr.bf16.mxu0 %v9497_v55 }
 0x153   :  { %v8766_v53 = vpop.f32.mrb[46].mxu0 }
 0x154   :  { %v394_v54 = vpop.f32.mrb[47].mxu0  ;;  %8824 = vmatpush3.bf16.msra.mxu0 %v9497_v55 }
 0x156   :  { %1245 = vmatmul.mubr.bf16.gmra.mrb[12].mxu1 %v9420_v58  ;;  %8778 = vmatmul.mubr.bf16.gmra.mrb[60].mxu0 %v9421_v59  ;;  %v9455_v58 = vld [vmem:[%s12713_s0 + $0x138] ss:$12 sps:$4 sm:$0xff]   ;;  %v9475_v59 = vld [vmem:[%s12713_s0 + $0x1d0] ss:$12 sps:$4 sm:$0xff]  }
 0x157   :  { %1252 = vmatprep.mubr.bf16.mxu1 %v9422_v60  ;;  %8781 = vmatprep.mubr.bf16.mxu0 %v9424_v61  ;;  %v9457_v60 = vld [vmem:[%s12713_s0 + $0x154] ss:$12 sps:$4 sm:$0xff]  }
 0x158   :  { %v9480_v61 = vld [vmem:[%s12713_s0 + $0x1e8] ss:$12 sps:$4 sm:$0xff]  }
 0x15e   :  { %1253 = vmatmul.mubr.bf16.gmra.mrb[16].mxu1 %v9425_v63  ;;  %8782 = vmatmul.mubr.bf16.gmra.mrb[64].mxu0 %v9426_v1  ;;  %v9498_v63 = vld [vmem:[%s12715_s4 + $0x10] sm:$0xff]   ;;  %v9499_v1 = vld [vmem:[%s12715_s4 + $0x18] sm:$0xff]  }
 0x15f   :  { %1260 = vmatprep.mubr.bf16.mxu1 %v9427_v2  ;;  %8785 = vmatprep.mubr.bf16.mxu0 %v9429_v4  ;;  %v9460_v2 = vld [vmem:[%s12713_s0 + $0x150] ss:$12 sps:$4 sm:$0xff]   ;;  %v9483_v4 = vld [vmem:[%s12713_s0 + $0x200] ss:$12 sps:$4 sm:$0xff]  }
 0x160   :  { %8825 = vmatprep.subr.bf16.mxu0 %v9498_v63 }
 0x161   :  { %8826 = vmatpush3.bf16.msra.mxu0 %v9498_v63 }
 0x162   :  { %8827 = vmatprep.subr.bf16.mxu0 %v9499_v1 }
 0x165   :  { %8828 = vmatpush3.bf16.msra.mxu0 %v9499_v1 }
 0x166   :  { %1261 = vmatmul.mubr.bf16.gmra.mrb[20].mxu1 %v9430_v5  ;;  %8786 = vmatmul.mubr.bf16.gmra.mrb[68].mxu0 %v9431_v6  ;;  %v9461_v5 = vld [vmem:[%s12713_s0 + $0x16c] ss:$12 sps:$4 sm:$0xff]  }
 0x167   :  { %1268 = vmatprep.mubr.bf16.mxu1 %v9432_v8  ;;  %8789 = vmatprep.mubr.bf16.mxu0 %v9434_v9  ;;  %v9488_v6 = vld [vmem:[%s12713_s0 + $0x218] ss:$12 sps:$4 sm:$0xff]   ;;  %v9501_v9 = vld [vmem:[%s12715_s4 + $0x28] sm:$0xff]  }
 0x168   :  { %v9500_v8 = vld [vmem:[%s12715_s4 + $0x20] sm:$0xff]  }
 0x169   :  { %8829 = vmatprep.subr.bf16.mxu0 %v9500_v8 }
 0x16a   :  { %8830 = vmatpush3.bf16.msra.mxu0 %v9500_v8 }
 0x16b   :  { %8831 = vmatprep.subr.bf16.mxu0 %v9501_v9 }
 0x16e   :  { %1269 = vmatmul.mubr.bf16.gmra.mrb[24].mxu1 %v9435_v12  ;;  %8790 = vmatmul.mubr.bf16.gmra.mrb[72].mxu0 %v9436_v13  ;;  %v9491_v12 = vld [vmem:[%s12713_s0 + $0x230] ss:$12 sps:$4 sm:$0xff]  }
 0x16f   :  { %1276 = vmatprep.mubr.bf16.mxu1 %v9437_v16  ;;  %8793 = vmatprep.mubr.bf16.mxu0 %v9440_v17  ;;  %v9465_v13 = vld [vmem:[%s12713_s0 + $0x184] ss:$12 sps:$4 sm:$0xff]   ;;  %v9503_v17 = vld [vmem:[%s12715_s4 + $0x38] sm:$0xff]  }
 0x170   :  { %v9502_v16 = vld [vmem:[%s12715_s4 + $0x30] sm:$0xff]   ;;  %8832 = vmatpush3.bf16.msra.mxu0 %v9501_v9  ;;  %v1694_v9 = vunpack.c.l.bf16 %v10075_v21 }
 0x171   :  { %8833 = vmatprep.subr.bf16.mxu0 %v9502_v16 }
 0x174   :  { %8834 = vmatpush3.bf16.msra.mxu0 %v9502_v16 }
 0x175   :  { %8835 = vmatprep.subr.bf16.mxu0 %v9503_v17 }
 0x176   :  { %1277 = vmatmul.mubr.bf16.gmra.mrb[28].mxu1 %v9439_v18  ;;  %8794 = vmatmul.mubr.bf16.gmra.mrb[76].mxu0 %v9443_v19  ;;  %v9468_v18 = vld [vmem:[%s12713_s0 + $0x180] ss:$12 sps:$4 sm:$0xff]   ;;  %v9469_v19 = vld [vmem:[%s12713_s0 + $0x19c] ss:$12 sps:$4 sm:$0xff]  }
 0x177   :  { %1284 = vmatprep.mubr.bf16.mxu1 %v9441_v20  ;;  %8797 = vmatprep.mubr.bf16.mxu0 %v9448_v22  ;;  %v9471_v20 = vld [vmem:[%s12713_s0 + $0x198] ss:$12 sps:$4 sm:$0xff]   ;;  %v9473_v22 = vld [vmem:[%s12713_s0 + $0x1b4] ss:$12 sps:$4 sm:$0xff]  }
 0x178   :  { %8836 = vmatpush3.bf16.msra.mxu0 %v9503_v17 }
 0x17e   :  { %1285 = vmatmul.mubr.bf16.gmra.mrb[32].mxu1 %v9444_v24  ;;  %8798 = vmatmul.mubr.bf16.gmra.mrb[80].mxu0 %v9451_v25  ;;  %v9476_v24 = vld [vmem:[%s12713_s0 + $0x1b0] ss:$12 sps:$4 sm:$0xff]   ;;  %v9477_v25 = vld [vmem:[%s12713_s0 + $0x1cc] ss:$12 sps:$4 sm:$0xff]  }
 0x17f   :  { %1292 = vmatprep.mubr.bf16.mxu1 %v9445_v26  ;;  %8801 = vmatprep.mubr.bf16.mxu0 %v9456_v29  ;;  %v9479_v26 = vld [vmem:[%s12713_s0 + $0x1c8] ss:$12 sps:$4 sm:$0xff]   ;;  %v9481_v29 = vld [vmem:[%s12713_s0 + $0x1e4] ss:$12 sps:$4 sm:$0xff]  }
 0x186   :  { %1293 = vmatmul.mubr.bf16.gmra.mrb[36].mxu1 %v9447_v34  ;;  %8802 = vmatmul.mubr.bf16.gmra.mrb[84].mxu0 %v9459_v36  ;;  %v9489_v34 = vld [vmem:[%s12713_s0 + $0x214] ss:$12 sps:$4 sm:$0xff]   ;;  %v9492_v36 = vld [vmem:[%s12713_s0 + $0x210] ss:$12 sps:$4 sm:$0xff]  }
 0x187   :  { %1300 = vmatprep.mubr.bf16.mxu1 %v9449_v38  ;;  %8805 = vmatprep.mubr.bf16.mxu0 %v9464_v40  ;;  %v9495_v38 = vld [vmem:[%s12713_s0 + $0x228] ss:$12 sps:$4 sm:$0xff]  }
 0x18e   :  { %1301 = vmatmul.mubr.bf16.gmra.mrb[40].mxu1 %v9452_v46  ;;  %8806 = vmatmul.mubr.bf16.gmra.mrb[88].mxu0 %v9467_v48 }
 0x18f   :  { %1308 = vmatprep.mubr.bf16.mxu1 %v9453_v51  ;;  %8809 = vmatprep.mubr.bf16.mxu0 %v9472_v11 }
 0x196   :  { %1309 = vmatmul.mubr.bf16.gmra.mrb[44].mxu1 %v9455_v58  ;;  %8810 = vmatmul.mubr.bf16.gmra.mrb[92].mxu0 %v9475_v59 }
 0x197   :  { %1316 = vmatprep.mubr.bf16.mxu1 %v9457_v60  ;;  %8813 = vmatprep.mubr.bf16.mxu0 %v9480_v61 }
 0x19e   :  { %1317 = vmatmul.mubr.bf16.gmra.mrb[48].mxu1 %v9460_v2  ;;  %8814 = vmatmul.mubr.bf16.gmra.mrb[96].mxu0 %v9483_v4  ;;  %v1696_v2 = vunpack.c.l.bf16 %v10083_v28  ;;  %v1697_v4 = vunpack.c.h.bf16 %v10083_v28 }
 0x19f   :  { %1324 = vmatprep.mubr.bf16.mxu1 %v9461_v5  ;;  %8817 = vmatprep.mubr.bf16.mxu0 %v9488_v6 }
 0x1a6   :  { %1325 = vmatmul.mubr.bf16.gmra.mrb[52].mxu1 %v9463_v10  ;;  %8818 = vmatmul.mubr.bf16.gmra.mrb[100].mxu0 %v9491_v12  ;;  %v1695_v10 = vunpack.c.h.bf16 %v10075_v21 }
 0x1a7   :  { %1332 = vmatprep.mubr.bf16.mxu1 %v9465_v13 }
 0x1ae   :  { %1333 = vmatmul.mubr.bf16.gmra.mrb[56].mxu1 %v9468_v18 }
 0x1af   :  { %1340 = vmatprep.mubr.bf16.mxu1 %v9469_v19 }
 0x1b6   :  { %1341 = vmatmul.mubr.bf16.gmra.mrb[60].mxu1 %v9471_v20 }
 0x1b7   :  { %1348 = vmatprep.mubr.bf16.mxu1 %v9473_v22 }
 0x1be   :  { %1349 = vmatmul.mubr.bf16.gmra.mrb[64].mxu1 %v9476_v24 }
 0x1bf   :  { %1356 = vmatprep.mubr.bf16.mxu1 %v9477_v25  ;;  %v10467_v25 = vmul.f32 0.1, %v1696_v2 }
 0x1c1   :  { %12823 = vst [vmem:[#allocation4_spill] sm:$0xff] %v10467_v25 }
 0x1c6   :  { %1357 = vmatmul.mubr.bf16.gmra.mrb[68].mxu1 %v9479_v26  ;;  %v10469_v26 = vmul.f32 0.1, %v1697_v4 }
 0x1c7   :  { %1364 = vmatprep.mubr.bf16.mxu1 %v9481_v29 }
 0x1c8   :  { %12824 = vst [vmem:[#allocation5_spill] sm:$0xff] %v10469_v26 }
 0x1ce   :  { %1365 = vmatmul.mubr.bf16.gmra.mrb[72].mxu1 %v9484_v30  ;;  %v10471_v30 = vmul.f32 0.1, %v1694_v9 }
 0x1cf   :  { %1372 = vmatprep.mubr.bf16.mxu1 %v9485_v32  ;;  %v10473_v32 = vmul.f32 0.1, %v1695_v10 }
 0x1d0   :  { %12825 = vst [vmem:[#allocation6_spill] sm:$0xff] %v10471_v30 }
 0x1d1   :  { %12826 = vst [vmem:[#allocation7_spill] sm:$0xff] %v10473_v32 }
 0x1d6   :  { %1373 = vmatmul.mubr.bf16.gmra.mrb[76].mxu1 %v9487_v33 }
 0x1d7   :  { %1380 = vmatprep.mubr.bf16.mxu1 %v9489_v34 }
 0x1de   :  { %1381 = vmatmul.mubr.bf16.gmra.mrb[80].mxu1 %v9492_v36 }
 0x1df   :  { %1388 = vmatprep.mubr.bf16.mxu1 %v9493_v37 }
 0x1e6   :  { %1389 = vmatmul.mubr.bf16.gmra.mrb[84].mxu1 %v9495_v38 }
 0x211   :  { %v1222_v40 = vpop.f32.mrb[0].mxu1  ;;  %v1206_v43 = vpop.f32.mrb[48].mxu0 }
 0x212   :  { %v1224_v44 = vpop.f32.mrb[1].mxu1  ;;  %v1208_v45 = vpop.f32.mrb[49].mxu0 }
 0x213   :  { %v1225_v46 = vpop.f32.mrb[2].mxu1  ;;  %v1209_v48 = vpop.f32.mrb[50].mxu0  ;;  %v1701_v44 = vunpack.c.h.bf16 %v10099_v42 }
 0x214   :  { %v1227_v50 = vpop.f32.mrb[3].mxu1  ;;  %v1211_v51 = vpop.f32.mrb[51].mxu0 }
 0x215   :  { %v10497_v9 = vmul.f32 0.1, %v1701_v44 }
 0x217   :  { %12828 = vst [vmem:[#allocation9_spill] sm:$0xff] %v10497_v9 }
 0x219   :  { %v1230_v11 = vpop.f32.mrb[4].mxu1  ;;  %v1214_v53 = vpop.f32.mrb[52].mxu0 }
 0x21a   :  { %v1232_v54 = vpop.f32.mrb[5].mxu1  ;;  %v1216_v55 = vpop.f32.mrb[53].mxu0 }
 0x21b   :  { %v1233_v58 = vpop.f32.mrb[6].mxu1  ;;  %v1217_v59 = vpop.f32.mrb[54].mxu0  ;;  %v1699_v54 = vunpack.c.h.bf16 %v10091_v35 }
 0x21c   :  { %v1235_v60 = vpop.f32.mrb[7].mxu1  ;;  %v1219_v61 = vpop.f32.mrb[55].mxu0 }
 0x21d   :  { %v10501_v10 = vmul.f32 0.1, %v1699_v54 }
 0x21f   :  { %12830 = vst [vmem:[#allocation11_spill] sm:$0xff] %v10501_v10 }
 0x221   :  { %v10459_v63 = vpop.f32.mrb[8].mxu1  ;;  %v8775_v1 = vpop.f32.mrb[56].mxu0 }
 0x222   :  { %v1440_v5 = vadd.f32 %v8775_v1, %v1214_v53  ;;  %v1240_v6 = vpop.f32.mrb[9].mxu1  ;;  %v1431_v8 = vpop.f32.mrb[57].mxu0  ;;  %v1698_v53 = vunpack.c.l.bf16 %v10091_v35 }
 0x223   :  { %v1432_v12 = vadd.f32 %v1431_v8, %v1206_v43  ;;  %v10465_v13 = vpop.f32.mrb[10].mxu1  ;;  %v8776_v16 = vpop.f32.mrb[58].mxu0  ;;  %v1700_v43 = vunpack.c.l.bf16 %v10099_v42 }
 0x224   :  { %v1624_v17 = vmul.f32 0.9, %v1440_v5  ;;  %v1443_v18 = vadd.f32 %v8776_v16, %v1217_v59  ;;  %v1243_v19 = vpop.f32.mrb[11].mxu1  ;;  %v1434_v20 = vpop.f32.mrb[59].mxu0 }
 0x225   :  { %v1622_v22 = vmul.f32 0.9, %v1432_v12  ;;  %v1435_v24 = vadd.f32 %v1434_v20, %v1209_v48  ;;  %v10495_v8 = vmul.f32 0.1, %v1700_v43  ;;  %v1704_v19 = vunpack.c.l.bf16 %v10115_v56 }
 0x226   :  { %v1625_v28 = vmul.f32 0.9, %v1443_v18  ;;  %v10476_v21 = vadd.f32 %v10467_v25, %v1624_v17  ;;  %v1705_v20 = vunpack.c.h.bf16 %v10115_v56  ;;  %v1703_v43 = vunpack.c.h.bf16 %v10107_v49 }
 0x227   :  { %v1623_v29 = vmul.f32 0.9, %v1435_v24  ;;  %v10482_v37 = vadd.f32 %v10471_v30, %v1622_v22  ;;  %12827 = vst [vmem:[#allocation8_spill] sm:$0xff] %v10495_v8 }
 0x228   :  { %v10479_v33 = vadd.f32 %v10469_v26, %v1625_v28 }
 0x229   :  { %v1246_v34 = vpop.f32.mrb[12].mxu1  ;;  %v8779_v36 = vpop.f32.mrb[60].mxu0  ;;  %v10485_v38 = vadd.f32 %v10473_v32, %v1623_v29 }
 0x22a   :  { %v1839_v45 = vpack.c.bf16 %v10479_v33, %v10476_v21  ;;  %v1456_v48 = vadd.f32 %v8779_v36, %v1230_v11  ;;  %v1248_v50 = vpop.f32.mrb[13].mxu1  ;;  %v1447_v51 = vpop.f32.mrb[61].mxu0  ;;  %v1702_v36 = vunpack.c.l.bf16 %v10107_v49  ;;  %v10527_v49 = vmul.f32 0.1, %v1705_v20 }
 0x22b   :  { %v1448_v55 = vadd.f32 %v1447_v51, %v1222_v40  ;;  %v1249_v59 = vpop.f32.mrb[14].mxu1  ;;  %v8780_v60 = vpop.f32.mrb[62].mxu0  ;;  %v1838_v61 = vpack.c.bf16 %v10485_v38, %v10482_v37  ;;  %v10499_v40 = vmul.f32 0.1, %v1698_v53 }
 0x22c   :  { %v1628_v1 = vmul.f32 0.9, %v1456_v48  ;;  %v1459_v2 = vadd.f32 %v8780_v60, %v1233_v58  ;;  %v1251_v4 = vpop.f32.mrb[15].mxu1  ;;  %v1450_v42 = vpop.f32.mrb[63].mxu0  ;;  %12832 = vst [vmem:[#allocation13_spill] sm:$0xff] %v10527_v49 }
 0x22d   :  { %v1626_v5 = vmul.f32 0.9, %v1448_v55  ;;  %v1451_v6 = vadd.f32 %v1450_v42, %v1225_v46  ;;  %8837 = vmatprep.mubr.bf16.mxu0 %v1838_v61  ;;  %12829 = vst [vmem:[#allocation10_spill] sm:$0xff] %v10499_v40  ;;  %v10525_v61 = vmul.f32 0.1, %v1704_v19 }
 0x22e   :  { %v1629_v11 = vmul.f32 0.9, %v1459_v2  ;;  %8838 = vmatmul.mubr.bf16.vlgmr.msra.gmra.mrb[104].mxu0 %v1839_v45  ;;  %v10504_v12 = vadd.f32 %v10495_v8, %v1628_v1  ;;  %v10529_v1 = vmul.f32 0.1, %v1702_v36  ;;  %v10531_v2 = vmul.f32 0.1, %v1703_v43 }
 0x22f   :  { %v1627_v35 = vmul.f32 0.9, %v1451_v6  ;;  %v10510_v17 = vadd.f32 %v10499_v40, %v1626_v5  ;;  %12831 = vst [vmem:[#allocation12_spill] sm:$0xff] %v10525_v61 }
 0x230   :  { %v10507_v58 = vadd.f32 %v10497_v9, %v1629_v11  ;;  %12833 = vst [vmem:[#allocation14_spill] sm:$0xff] %v10529_v1  ;;  %12834 = vst [vmem:[#allocation15_spill] sm:$0xff] %v10531_v2  ;;  %v1708_v11 = vunpack.c.l.bf16 %v10131_v7 }
 0x231   :  { %v1254_v16 = vpop.f32.mrb[16].mxu1  ;;  %v8783_v46 = vpop.f32.mrb[64].mxu0  ;;  %v10513_v18 = vadd.f32 %v10501_v10, %v1627_v35  ;;  %v1709_v35 = vunpack.c.h.bf16 %v10131_v7 }
 0x232   :  { %v1472_v22 = vadd.f32 %v8783_v46, %v1246_v34  ;;  %v1256_v24 = vpop.f32.mrb[17].mxu1  ;;  %v1463_v28 = vpop.f32.mrb[65].mxu0  ;;  %v1841_v29 = vpack.c.bf16 %v10507_v58, %v10504_v12 }
 0x233   :  { %v1464_v44 = vadd.f32 %v1463_v28, %v10459_v63  ;;  %v1257_v45 = vpop.f32.mrb[18].mxu1  ;;  %v8784_v48 = vpop.f32.mrb[66].mxu0  ;;  %v1840_v50 = vpack.c.bf16 %v10513_v18, %v10510_v17  ;;  %v1706_v24 = vunpack.c.l.bf16 %v10123_v0  ;;  %v1707_v28 = vunpack.c.h.bf16 %v10123_v0 }
 0x234   :  { %v1632_v51 = vmul.f32 0.9, %v1472_v22  ;;  %v1475_v53 = vadd.f32 %v8784_v48, %v1249_v59  ;;  %v1259_v56 = vpop.f32.mrb[19].mxu1  ;;  %v1466_v34 = vpop.f32.mrb[67].mxu0 }
 0x235   :  { %v1630_v54 = vmul.f32 0.9, %v1464_v44  ;;  %v1467_v55 = vadd.f32 %v1466_v34, %v10465_v13  ;;  %8841 = vmatprep.mubr.bf16.mxu0 %v1840_v50 }
 0x236   :  { %v1633_v60 = vmul.f32 0.9, %v1475_v53  ;;  %8842 = vmatmul.mubr.bf16.gmra.mrb[108].mxu0 %v1841_v29  ;;  %v10534_v4 = vadd.f32 %v10525_v61, %v1632_v51 }
 0x237   :  { %v1631_v63 = vmul.f32 0.9, %v1467_v55  ;;  %v10540_v5 = vadd.f32 %v10529_v1, %v1630_v54  ;;  %v10553_v54 = vmul.f32 0.1, %v1708_v11  ;;  %v10555_v55 = vmul.f32 0.1, %v1709_v35 }
 0x238   :  { %v10537_v59 = vadd.f32 %v10527_v49, %v1633_v60  ;;  %v10559_v60 = vmul.f32 0.1, %v1707_v28 }
 0x239   :  { %v1262_v42 = vpop.f32.mrb[20].mxu1  ;;  %v8787_v13 = vpop.f32.mrb[68].mxu0  ;;  %v10543_v6 = vadd.f32 %v10531_v2, %v1631_v63  ;;  %12835 = vst [vmem:[#allocation16_spill] sm:$0xff] %v10553_v54  ;;  %12836 = vst [vmem:[#allocation17_spill] sm:$0xff] %v10555_v55 }
 0x23a   :  { %v1488_v46 = vadd.f32 %v8787_v13, %v1262_v42  ;;  %v1264_v19 = vpop.f32.mrb[21].mxu1  ;;  %v1479_v20 = vpop.f32.mrb[69].mxu0  ;;  %v1843_v22 = vpack.c.bf16 %v10537_v59, %v10534_v4  ;;  %12838 = vst [vmem:[#allocation19_spill] sm:$0xff] %v10559_v60 }
 0x23b   :  { %v1480_v29 = vadd.f32 %v1479_v20, %v1254_v16  ;;  %v1265_v36 = vpop.f32.mrb[22].mxu1  ;;  %v8788_v43 = vpop.f32.mrb[70].mxu0  ;;  %v1842_v44 = vpack.c.bf16 %v10543_v6, %v10540_v5  ;;  %v10557_v16 = vmul.f32 0.1, %v1706_v24  ;;  %v1711_v24 = vunpack.c.h.bf16 %v10139_v15 }
 0x23c   :  { %v1636_v48 = vmul.f32 0.9, %v1488_v46  ;;  %v1491_v50 = vadd.f32 %v8788_v43, %v1265_v36  ;;  %v1267_v51 = vpop.f32.mrb[23].mxu1  ;;  %v1482_v7 = vpop.f32.mrb[71].mxu0 }
 0x23d   :  { %v1634_v53 = vmul.f32 0.9, %v1480_v29  ;;  %v1483_v56 = vadd.f32 %v1482_v7, %v1257_v45  ;;  %8845 = vmatprep.mubr.bf16.mxu0 %v1842_v44  ;;  %12837 = vst [vmem:[#allocation18_spill] sm:$0xff] %v10557_v16 }
 0x23e   :  { %v1637_v34 = vmul.f32 0.9, %v1491_v50  ;;  %8846 = vmatmul.mubr.bf16.gmra.mrb[112].mxu0 %v1843_v22  ;;  %v10562_v63 = vadd.f32 %v10553_v54, %v1636_v48  ;;  %v1710_v22 = vunpack.c.l.bf16 %v10139_v15 }
 0x23f   :  { %v1635_v0 = vmul.f32 0.9, %v1483_v56  ;;  %v10568_v46 = vadd.f32 %v10557_v16, %v1634_v53  ;;  %v10581_v56 = vmul.f32 0.1, %v1711_v24 }
 0x240   :  { %v10565_v42 = vadd.f32 %v10555_v55, %v1637_v34  ;;  %v10579_v53 = vmul.f32 0.1, %v1710_v22 }
 0x241   :  { %v1270_v13 = vpop.f32.mrb[24].mxu1  ;;  %v8791_v45 = vpop.f32.mrb[72].mxu0  ;;  %v10571_v11 = vadd.f32 %v10559_v60, %v1635_v0  ;;  %12840 = vst [vmem:[#allocation21_spill] sm:$0xff] %v10581_v56 }
 0x242   :  { %v1272_v35 = vpop.f32.mrb[25].mxu1  ;;  %v1495_v19 = vpop.f32.mrb[73].mxu0  ;;  %v1845_v20 = vpack.c.bf16 %v10565_v42, %v10562_v63  ;;  %12839 = vst [vmem:[#allocation20_spill] sm:$0xff] %v10579_v53 }
 0x243   :  { %v1496_v28 = vadd.f32 %v1495_v19, %v1270_v13  ;;  %v1273_v29 = vpop.f32.mrb[26].mxu1  ;;  %v8792_v36 = vpop.f32.mrb[74].mxu0  ;;  %v1844_v43 = vpack.c.bf16 %v10571_v11, %v10568_v46  ;;  %v1712_v35 = vunpack.c.l.bf16 %v10147_v23  ;;  %v1713_v19 = vunpack.c.h.bf16 %v10147_v23 }
 0x244   :  { %v1275_v44 = vpop.f32.mrb[27].mxu1  ;;  %v1498_v48 = vpop.f32.mrb[75].mxu0 }
 0x245   :  { %v1638_v50 = vmul.f32 0.9, %v1496_v28  ;;  %v1499_v51 = vadd.f32 %v1498_v48, %v1273_v29  ;;  %8849 = vmatprep.mubr.bf16.mxu0 %v1844_v43  ;;  %v10593_v62 = vmul.f32 0.1, %v1712_v35 }
 0x246   :  { %8850 = vmatmul.mubr.bf16.gmra.mrb[116].mxu0 %v1845_v20 }
 0x247   :  { %v1639_v7 = vmul.f32 0.9, %v1499_v51  ;;  %v10584_v15 = vadd.f32 %v10579_v53, %v1638_v50  ;;  %12841 = vst [vmem:[#allocation22_spill] sm:$0xff] %v10593_v62 }
 0x249   :  { %v1278_v34 = vpop.f32.mrb[28].mxu1  ;;  %v10587_v0 = vadd.f32 %v10581_v56, %v1639_v7  ;;  %v8795_v13 = vpop.f32.mrb[76].mxu0  ;;  %v10595_v56 = vmul.f32 0.1, %v1713_v19 }
 0x24a   :  { %v1504_v28 = vadd.f32 %v8791_v45, %v1278_v34  ;;  %v1280_v29 = vpop.f32.mrb[29].mxu1  ;;  %v1511_v20 = vpop.f32.mrb[77].mxu0 }
 0x24b   :  { %v1281_v43 = vpop.f32.mrb[30].mxu1  ;;  %v1846_v22 = vpack.c.bf16 %v10587_v0, %v10584_v15  ;;  %v8796_v24 = vpop.f32.mrb[78].mxu0  ;;  %12842 = vst [vmem:[#allocation23_spill] sm:$0xff] %v10595_v56 }
 0x24c   :  { %v1640_v44 = vmul.f32 0.9, %v1504_v28  ;;  %v1507_v48 = vadd.f32 %v8792_v36, %v1281_v43  ;;  %v1283_v50 = vpop.f32.mrb[31].mxu1  ;;  %v1514_v51 = vpop.f32.mrb[79].mxu0  ;;  %v1714_v28 = vunpack.c.l.bf16 %v10155_v31  ;;  %v1715_v36 = vunpack.c.h.bf16 %v10155_v31 }
 0x24d   :  { %8853 = vmatprep.mubr.bf16.mxu0 %v1846_v22 }
 0x24e   :  { %v1641_v7 = vmul.f32 0.9, %v1507_v48  ;;  %v10598_v23 = vadd.f32 %v10593_v62, %v1640_v44  ;;  %v10609_v60 = vmul.f32 0.1, %v1714_v28  ;;  %v10611_v16 = vmul.f32 0.1, %v1715_v36 }
 0x250   :  { %v10601_v45 = vadd.f32 %v10595_v56, %v1641_v7  ;;  %12843 = vst [vmem:[#allocation24_spill] sm:$0xff] %v10609_v60  ;;  %12844 = vst [vmem:[#allocation25_spill] sm:$0xff] %v10611_v16 }
 0x251   :  { %v1286_v34 = vpop.f32.mrb[32].mxu1  ;;  %v10603_v29 = vpop.f32.mrb[80].mxu0 }
 0x252   :  { %v1512_v43 = vadd.f32 %v1511_v20, %v1286_v34  ;;  %v1288_v22 = vpop.f32.mrb[33].mxu1  ;;  %v1847_v35 = vpack.c.bf16 %v10601_v45, %v10598_v23  ;;  %v1527_v19 = vpop.f32.mrb[81].mxu0 }
 0x253   :  { %v1289_v48 = vpop.f32.mrb[34].mxu1  ;;  %v8800_v50 = vpop.f32.mrb[82].mxu0 }
 0x254   :  { %v1642_v44 = vmul.f32 0.9, %v1512_v43  ;;  %v1515_v53 = vadd.f32 %v1514_v51, %v1289_v48  ;;  %v1291_v62 = vpop.f32.mrb[35].mxu1  ;;  %8854 = vmatmul.mubr.bf16.gmra.mrb[120].mxu0 %v1847_v35  ;;  %v1530_v7 = vpop.f32.mrb[83].mxu0  ;;  %v1716_v43 = vunpack.c.l.bf16 %v10163_v39 }
 0x255   :  { %v1717_v62 = vunpack.c.h.bf16 %v10163_v39 }
 0x256   :  { %v1643_v56 = vmul.f32 0.9, %v1515_v53  ;;  %v10614_v31 = vadd.f32 %v10609_v60, %v1642_v44  ;;  %v10627_v54 = vmul.f32 0.1, %v1716_v43 }
 0x257   :  { %v10629_v2 = vmul.f32 0.1, %v1717_v62 }
 0x258   :  { %v10617_v20 = vadd.f32 %v10611_v16, %v1643_v56  ;;  %12845 = vst [vmem:[#allocation26_spill] sm:$0xff] %v10627_v54 }
 0x259   :  { %v1294_v34 = vpop.f32.mrb[36].mxu1  ;;  %v10619_v22 = vpop.f32.mrb[84].mxu0  ;;  %12846 = vst [vmem:[#allocation27_spill] sm:$0xff] %v10629_v2 }
 0x25a   :  { %v1520_v51 = vadd.f32 %v8795_v13, %v1294_v34  ;;  %v1296_v35 = vpop.f32.mrb[37].mxu1  ;;  %v1848_v53 = vpack.c.bf16 %v10617_v20, %v10614_v31  ;;  %v1543_v28 = vpop.f32.mrb[85].mxu0 }
 0x25b   :  { %v1297_v36 = vpop.f32.mrb[38].mxu1  ;;  %v10625_v48 = vpop.f32.mrb[86].mxu0 }
 0x25c   :  { %v1644_v44 = vmul.f32 0.9, %v1520_v51  ;;  %v1523_v60 = vadd.f32 %v8796_v24, %v1297_v36  ;;  %v1299_v56 = vpop.f32.mrb[39].mxu1  ;;  %8857 = vmatprep.mubr.bf16.mxu0 %v1848_v53  ;;  %v1546_v16 = vpop.f32.mrb[87].mxu0  ;;  %v1718_v51 = vunpack.c.l.bf16 %v10171_v47  ;;  %v1719_v24 = vunpack.c.h.bf16 %v10171_v47 }
 0x25e   :  { %v1645_v55 = vmul.f32 0.9, %v1523_v60  ;;  %v10632_v39 = vadd.f32 %v10627_v54, %v1644_v44  ;;  %v10649_v49 = vmul.f32 0.1, %v1718_v51  ;;  %v10651_v47 = vmul.f32 0.1, %v1719_v24 }
 0x260   :  { %v10635_v13 = vadd.f32 %v10629_v2, %v1645_v55  ;;  %12847 = vst [vmem:[#allocation28_spill] sm:$0xff] %v10649_v49  ;;  %12848 = vst [vmem:[#allocation29_spill] sm:$0xff] %v10651_v47 }
 0x261   :  { %v1302_v34 = vpop.f32.mrb[40].mxu1  ;;  %v10637_v35 = vpop.f32.mrb[88].mxu0 }
 0x262   :  { %v1528_v53 = vadd.f32 %v1527_v19, %v1302_v34  ;;  %v1304_v36 = vpop.f32.mrb[41].mxu1  ;;  %v1849_v60 = vpack.c.bf16 %v10635_v13, %v10632_v39  ;;  %v10643_v43 = vpop.f32.mrb[89].mxu0 }
 0x263   :  { %v1305_v62 = vpop.f32.mrb[42].mxu1  ;;  %v10645_v44 = vpop.f32.mrb[90].mxu0 }
 0x264   :  { %v1646_v56 = vmul.f32 0.9, %v1528_v53  ;;  %v1531_v55 = vadd.f32 %v1530_v7, %v1305_v62  ;;  %v1307_v2 = vpop.f32.mrb[43].mxu1  ;;  %8858 = vmatmul.mubr.bf16.gmra.mrb[124].mxu0 %v1849_v60  ;;  %v10647_v54 = vpop.f32.mrb[91].mxu0  ;;  %v1720_v7 = vunpack.c.l.bf16 %v10179_v57 }
 0x265   :  { %v1721_v2 = vunpack.c.h.bf16 %v10179_v57 }
 0x266   :  { %v1647_v1 = vmul.f32 0.9, %v1531_v55  ;;  %v10654_v19 = vadd.f32 %v10649_v49, %v1646_v56  ;;  %v10672_v40 = vmul.f32 0.1, %v1720_v7 }
 0x267   :  { %v10674_v57 = vmul.f32 0.1, %v1721_v2 }
 0x268   :  { %v10657_v34 = vadd.f32 %v10651_v47, %v1647_v1  ;;  %12849 = vst [vmem:[#allocation30_spill] sm:$0xff] %v10672_v40 }
 0x269   :  { %v1310_v36 = vpop.f32.mrb[44].mxu1  ;;  %v10659_v61 = vpop.f32.mrb[92].mxu0  ;;  %12850 = vst [vmem:[#allocation31_spill] sm:$0xff] %v10674_v57 }
 0x26a   :  { %v1536_v53 = vadd.f32 %v10603_v29, %v1310_v36  ;;  %v1312_v60 = vpop.f32.mrb[45].mxu1  ;;  %v1850_v51 = vpack.c.bf16 %v10657_v34, %v10654_v19  ;;  %v10666_v24 = vpop.f32.mrb[93].mxu0 }
 0x26b   :  { %v1313_v62 = vpop.f32.mrb[46].mxu1  ;;  %v10668_v56 = vpop.f32.mrb[94].mxu0 }
 0x26c   :  { %v1648_v1 = vmul.f32 0.9, %v1536_v53  ;;  %v1539_v55 = vadd.f32 %v8800_v50, %v1313_v62  ;;  %v1315_v47 = vpop.f32.mrb[47].mxu1  ;;  %8861 = vmatprep.mubr.bf16.mxu0 %v1850_v51  ;;  %v10670_v49 = vpop.f32.mrb[95].mxu0  ;;  %v1722_v50 = vunpack.c.l.bf16 %v10187_v3 }
 0x26d   :  { %v1723_v47 = vunpack.c.h.bf16 %v10187_v3 }
 0x26e   :  { %v1649_v10 = vmul.f32 0.9, %v1539_v55  ;;  %v10677_v29 = vadd.f32 %v10672_v40, %v1648_v1  ;;  %v10694_v32 = vmul.f32 0.1, %v1722_v50 }
 0x26f   :  { %v10696_v3 = vmul.f32 0.1, %v1723_v47 }
 0x270   :  { %v10680_v36 = vadd.f32 %v10674_v57, %v1649_v10  ;;  %12851 = vst [vmem:[#allocation32_spill] sm:$0xff] %v10694_v32 }
 0x271   :  { %v1318_v60 = vpop.f32.mrb[48].mxu1  ;;  %v10682_v9 = vpop.f32.mrb[96].mxu0  ;;  %12852 = vst [vmem:[#allocation33_spill] sm:$0xff] %v10696_v3 }
 0x272   :  { %v1544_v53 = vadd.f32 %v1543_v28, %v1318_v60  ;;  %v1320_v51 = vpop.f32.mrb[49].mxu1  ;;  %v1851_v7 = vpack.c.bf16 %v10680_v36, %v10677_v29  ;;  %v10688_v2 = vpop.f32.mrb[97].mxu0 }
 0x273   :  { %v1321_v62 = vpop.f32.mrb[50].mxu1  ;;  %v10690_v1 = vpop.f32.mrb[98].mxu0 }
 0x274   :  { %v1650_v55 = vmul.f32 0.9, %v1544_v53  ;;  %v1547_v10 = vadd.f32 %v1546_v16, %v1321_v62  ;;  %v1323_v57 = vpop.f32.mrb[51].mxu1  ;;  %8862 = vmatmul.mubr.bf16.gmra.mrb[128].mxu0 %v1851_v7  ;;  %v10692_v40 = vpop.f32.mrb[99].mxu0  ;;  %v1724_v16 = vunpack.c.l.bf16 %v10198_v14 }
 0x275   :  { %v1725_v57 = vunpack.c.h.bf16 %v10198_v14 }
 0x276   :  { %v1651_v8 = vmul.f32 0.9, %v1547_v10  ;;  %v10699_v28 = vadd.f32 %v10694_v32, %v1650_v55  ;;  %v10718_v14 = vmul.f32 0.1, %v1724_v16 }
 0x278   :  { %v10702_v60 = vadd.f32 %v10696_v3, %v1651_v8  ;;  %12854 = vst [vmem:[#allocation35_spill] sm:$0xff] %v10718_v14 }
 0x279   :  { %v1326_v51 = vpop.f32.mrb[52].mxu1  ;;  %v10704_v30 = vpop.f32.mrb[100].mxu0 }
 0x27a   :  { %12853 = vst [vmem:[#allocation34_spill] sm:$0xff] %v10702_v60  ;;  %v1552_v53 = vadd.f32 %v10619_v22, %v1326_v51  ;;  %v1328_v7 = vpop.f32.mrb[53].mxu1  ;;  %v1852_v50 = vpack.c.bf16 %v10702_v60, %v10699_v28  ;;  %v10711_v47 = vpop.f32.mrb[101].mxu0  ;;  %v10720_v22 = vmul.f32 0.1, %v1725_v57 }
 0x27b   :  { %v1329_v62 = vpop.f32.mrb[54].mxu1  ;;  %v10713_v55 = vpop.f32.mrb[102].mxu0 }
 0x27c   :  { %v1652_v8 = vmul.f32 0.9, %v1552_v53  ;;  %v1555_v10 = vadd.f32 %v10625_v48, %v1329_v62  ;;  %v1331_v3 = vpop.f32.mrb[55].mxu1  ;;  %8865 = vmatprep.mubr.bf16.mxu0 %v1852_v50  ;;  %v10716_v32 = vpop.f32.mrb[103].mxu0  ;;  %12855 = vst [vmem:[#allocation36_spill] sm:$0xff] %v10720_v22  ;;  %v1726_v53 = vunpack.c.l.bf16 %v10214_v27  ;;  %v1727_v48 = vunpack.c.h.bf16 %v10214_v27 }
 0x27e   :  { %v1653_v26 = vmul.f32 0.9, %v1555_v10  ;;  %v10723_v51 = vadd.f32 %v10718_v14, %v1652_v8 }
 0x280   :  { %v10726_v7 = vadd.f32 %v10720_v22, %v1653_v26  ;;  %v10734_v26 = vmul.f32 0.1, %v1726_v53  ;;  %v10736_v22 = vmul.f32 0.1, %v1727_v48 }
 0x281   :  { %v1334_v25 = vpop.f32.mrb[56].mxu1 }
 0x282   :  { %v1560_v3 = vadd.f32 %v10643_v43, %v1334_v25  ;;  %v1336_v50 = vpop.f32.mrb[57].mxu1  ;;  %v1853_v16 = vpack.c.bf16 %v10726_v7, %v10723_v51  ;;  %12856 = vst [vmem:[#allocation37_spill] sm:$0xff] %v10734_v26  ;;  %12857 = vst [vmem:[#allocation38_spill] sm:$0xff] %v10736_v22  ;;  %v1728_v43 = vunpack.c.l.bf16 %v10231_v41 }
 0x283   :  { %v1337_v62 = vpop.f32.mrb[58].mxu1 }
 0x284   :  { %v1654_v57 = vmul.f32 0.9, %v1560_v3  ;;  %v1563_v10 = vadd.f32 %v10647_v54, %v1337_v62  ;;  %v1339_v8 = vpop.f32.mrb[59].mxu1  ;;  %8866 = vmatmul.mubr.bf16.gmra.mrb[132].mxu0 %v1853_v16  ;;  %v1729_v3 = vunpack.c.h.bf16 %v10231_v41 }
 0x286   :  { %v1655_v14 = vmul.f32 0.9, %v1563_v10  ;;  %v10739_v60 = vadd.f32 %v10734_v26, %v1654_v57  ;;  %v10752_v8 = vmul.f32 0.1, %v1729_v3 }
 0x288   :  { %v10742_v27 = vadd.f32 %v10736_v22, %v1655_v14  ;;  %v10750_v14 = vmul.f32 0.1, %v1728_v43  ;;  %12859 = vst [vmem:[#allocation40_spill] sm:$0xff] %v10752_v8 }
 0x289   :  { %v1342_v25 = vpop.f32.mrb[60].mxu1 }
 0x28a   :  { %v1568_v54 = vadd.f32 %v10637_v35, %v1342_v25  ;;  %v1344_v50 = vpop.f32.mrb[61].mxu1  ;;  %v1854_v53 = vpack.c.bf16 %v10742_v27, %v10739_v60  ;;  %12858 = vst [vmem:[#allocation39_spill] sm:$0xff] %v10750_v14  ;;  %v1730_v25 = vunpack.c.l.bf16 %v10243_v52 }
 0x28b   :  { %v1345_v16 = vpop.f32.mrb[62].mxu1 }
 0x28c   :  { %v1656_v48 = vmul.f32 0.9, %v1568_v54  ;;  %v1571_v62 = vadd.f32 %v10645_v44, %v1345_v16  ;;  %v1347_v57 = vpop.f32.mrb[63].mxu1  ;;  %8869 = vmatprep.mubr.bf16.mxu0 %v1854_v53  ;;  %v1731_v54 = vunpack.c.h.bf16 %v10243_v52 }
 0x28e   :  { %v1657_v10 = vmul.f32 0.9, %v1571_v62  ;;  %v10755_v22 = vadd.f32 %v10750_v14, %v1656_v48  ;;  %v10766_v62 = vmul.f32 0.1, %v1730_v25  ;;  %v10768_v57 = vmul.f32 0.1, %v1731_v54 }
 0x290   :  { %v10758_v41 = vadd.f32 %v10752_v8, %v1657_v10  ;;  %12860 = vst [vmem:[#allocation41_spill] sm:$0xff] %v10766_v62  ;;  %12861 = vst [vmem:[#allocation42_spill] sm:$0xff] %v10768_v57  ;;  %v9826_v8 = vmov 0.0|0.0  }
 0x291   :  { %v1350_v35 = vpop.f32.mrb[64].mxu1  ;;  %v1732_v14 = vunpack.c.l.bf16 %v9826_v8 }
 0x292   :  { %v1576_v44 = vadd.f32 %v10666_v24, %v1350_v35  ;;  %v1352_v50 = vpop.f32.mrb[65].mxu1  ;;  %v1855_v43 = vpack.c.bf16 %v10758_v41, %v10755_v22  ;;  %v1733_v35 = vunpack.c.h.bf16 %v9826_v8 }
 0x293   :  { %v1353_v53 = vpop.f32.mrb[66].mxu1  ;;  %v10779_v54 = vmul.f32 0.1, %v1732_v14 }
 0x294   :  { %v1658_v3 = vmul.f32 0.9, %v1576_v44  ;;  %v1579_v16 = vadd.f32 %v10670_v49, %v1353_v53  ;;  %v1355_v48 = vpop.f32.mrb[67].mxu1  ;;  %8870 = vmatmul.mubr.bf16.gmra.mrb[136].mxu0 %v1855_v43 }
 0x295   :  { %12862 = vst [vmem:[#allocation43_spill] sm:$0xff] %v10779_v54 }
 0x296   :  { %v1659_v10 = vmul.f32 0.9, %v1579_v16  ;;  %v10771_v52 = vadd.f32 %v10766_v62, %v1658_v3  ;;  %v10782_v3 = vmul.f32 0.1, %v1733_v35 }
 0x298   :  { %v10774_v24 = vadd.f32 %v10768_v57, %v1659_v10  ;;  %12863 = vst [vmem:[#allocation44_spill] sm:$0xff] %v10782_v3 }
 0x299   :  { %v1358_v50 = vpop.f32.mrb[68].mxu1 }
 0x29a   :  { %v1584_v44 = vadd.f32 %v10659_v61, %v1358_v50  ;;  %v1360_v49 = vpop.f32.mrb[69].mxu1  ;;  %v1856_v25 = vpack.c.bf16 %v10774_v24, %v10771_v52 }
 0x29b   :  { %v1361_v43 = vpop.f32.mrb[70].mxu1 }
 0x29c   :  { %v1660_v53 = vmul.f32 0.9, %v1584_v44  ;;  %v1587_v16 = vadd.f32 %v10668_v56, %v1361_v43  ;;  %v1363_v48 = vpop.f32.mrb[71].mxu1  ;;  %8873 = vmatprep.mubr.bf16.mxu0 %v1856_v25 }
 0x29e   :  { %v1661_v10 = vmul.f32 0.9, %v1587_v16  ;;  %v10785_v8 = vadd.f32 %v10779_v54, %v1660_v53 }
 0x2a0   :  { %v10788_v61 = vadd.f32 %v10782_v3, %v1661_v10 }
 0x2a1   :  { %v1366_v50 = vpop.f32.mrb[72].mxu1 }
 0x2a2   :  { %v1592_v49 = vadd.f32 %v10688_v2, %v1366_v50  ;;  %v1368_v57 = vpop.f32.mrb[73].mxu1  ;;  %v1857_v14 = vpack.c.bf16 %v10788_v61, %v10785_v8 }
 0x2a3   :  { %v1369_v44 = vpop.f32.mrb[74].mxu1 }
 0x2a4   :  { %v1662_v56 = vmul.f32 0.9, %v1592_v49  ;;  %v1595_v25 = vadd.f32 %v10692_v40, %v1369_v44  ;;  %v1371_v35 = vpop.f32.mrb[75].mxu1  ;;  %8874 = vmatmul.mubr.bf16.gmra.mrb[140].mxu0 %v1857_v14 }
 0x2a6   :  { %v1663_v43 = vmul.f32 0.9, %v1595_v25  ;;  %v10795_v53 = vadd.f32 %v10779_v54, %v1662_v56 }
 0x2a8   :  { %v10798_v16 = vadd.f32 %v10782_v3, %v1663_v43 }
 0x2a9   :  { %v1374_v48 = vpop.f32.mrb[76].mxu1 }
 0x2aa   :  { %v1600_v2 = vadd.f32 %v10682_v9, %v1374_v48  ;;  %v1376_v57 = vpop.f32.mrb[77].mxu1  ;;  %v1858_v10 = vpack.c.bf16 %v10798_v16, %v10795_v53 }
 0x2ab   :  { %v1377_v50 = vpop.f32.mrb[78].mxu1 }
 0x2ac   :  { %v1664_v49 = vmul.f32 0.9, %v1600_v2  ;;  %v1603_v40 = vadd.f32 %v10690_v1, %v1377_v50  ;;  %v1379_v44 = vpop.f32.mrb[79].mxu1  ;;  %8877 = vmatprep.mubr.bf16.mxu0 %v1858_v10 }
 0x2ae   :  { %v1665_v14 = vmul.f32 0.9, %v1603_v40  ;;  %v10805_v56 = vadd.f32 %v10779_v54, %v1664_v49 }
 0x2b0   :  { %v10808_v25 = vadd.f32 %v10782_v3, %v1665_v14 }
 0x2b1   :  { %v1382_v35 = vpop.f32.mrb[80].mxu1 }
 0x2b2   :  { %v1608_v9 = vadd.f32 %v10711_v47, %v1382_v35  ;;  %v1384_v43 = vpop.f32.mrb[81].mxu1  ;;  %v1859_v48 = vpack.c.bf16 %v10808_v25, %v10805_v56 }
 0x2b3   :  { %v1385_v57 = vpop.f32.mrb[82].mxu1 }
 0x2b4   :  { %v1666_v2 = vmul.f32 0.9, %v1608_v9  ;;  %v1611_v1 = vadd.f32 %v10716_v32, %v1385_v57  ;;  %v1387_v50 = vpop.f32.mrb[83].mxu1  ;;  %8878 = vmatmul.mubr.bf16.gmra.mrb[144].mxu0 %v1859_v48 }
 0x2b5   :  { %v9506_v50 = vld [vmem:[%s12713_s0 + $0x4] ss:$12 sps:$4 sm:$0xff]  }
 0x2b6   :  { %v1667_v10 = vmul.f32 0.9, %v1611_v1  ;;  %v10815_v49 = vadd.f32 %v10779_v54, %v1666_v2  ;;  %2927 = vmatprep.mubr.bf16.mxu1 %v9506_v50 }
 0x2b8   :  { %12864 = vst [vmem:[#allocation45_spill] sm:$0xff] %v10815_v49  ;;  %v10818_v40 = vadd.f32 %v10782_v3, %v1667_v10 }
 0x2b9   :  { %v1390_v44 = vpop.f32.mrb[84].mxu1 }
 0x2ba   :  { %12865 = vst [vmem:[#allocation46_spill] sm:$0xff] %v10818_v40  ;;  %v1616_v47 = vadd.f32 %v10704_v30, %v1390_v44  ;;  %v1392_v14 = vpop.f32.mrb[85].mxu1  ;;  %v1860_v35 = vpack.c.bf16 %v10818_v40, %v10815_v49 }
 0x2bb   :  { %v1393_v43 = vpop.f32.mrb[86].mxu1  ;;  %v2151_v14 = vmul.f32 0.5945349, %v10482_v37  ;;  %v2157_v37 = vmul.f32 0.5945349, %v10504_v12  ;;  %v12867_v12 = vmov 0  }
 0x2bc   :  { %v1668_v9 = vmul.f32 0.9, %v1616_v47  ;;  %v1619_v32 = vadd.f32 %v10713_v55, %v1393_v43  ;;  %v1395_v57 = vpop.f32.mrb[87].mxu1  ;;  %8881 = vmatprep.mubr.bf16.mxu0 %v1860_v35  ;;  %v2153_v55 = vmul.f32 0.5945349, %v10476_v21 }
 0x2be   :  { %v1669_v48 = vmul.f32 0.9, %v1619_v32  ;;  %v10825_v2 = vadd.f32 %v10779_v54, %v1668_v9  ;;  %v2154_v32 = vmul.f32 0.5945349, %v10479_v33  ;;  %v2155_v33 = vmul.f32 0.5945349, %v10510_v17 }
 0x2c0   :  { %v10828_v1 = vadd.f32 %v10782_v3, %v1669_v48  ;;  %v2152_v3 = vmul.f32 0.5945349, %v10485_v38  ;;  %v2158_v38 = vmul.f32 0.5945349, %v10507_v58 }
 0x2c2   :  { %12866 = vst [vmem:[#allocation47_spill] sm:$0xff] %v10828_v1  ;;  %v1861_v30 = vpack.c.bf16 %v10828_v1, %v10825_v2 }
 0x2c4   :  { %8882 = vmatmul.mubr.bf16.gmra.mrb[148].mxu0 %v1861_v30 }
 0x301   :  { %v8839_v10 = vpop.f32.mrb[104].mxu0 }
 0x302   :  { %v2201_v44 = vmul.f32 0.4054651, %v8839_v10  ;;  %v1960_v47 = vpop.f32.mrb[105].mxu0 }
 0x303   :  { %v2199_v35 = vmul.f32 0.4054651, %v1960_v47  ;;  %v8840_v43 = vpop.f32.mrb[106].mxu0 }
 0x304   :  { %v2249_v9 = vadd.f32 %v2201_v44, %v2153_v55  ;;  %v2202_v57 = vmul.f32 0.4054651, %v8840_v43  ;;  %v1963_v48 = vpop.f32.mrb[107].mxu0 }
 0x305   :  { %v2247_v30 = vadd.f32 %v2199_v35, %v2151_v14  ;;  %v2200_v54 = vmul.f32 0.4054651, %v1963_v48 }
 0x306   :  { %v2250_v62 = vadd.f32 %v2202_v57, %v2154_v32  ;;  %v2297_v26 = vmax.f32 %v2249_v9, 0.0 }
 0x307   :  { %v2248_v50 = vadd.f32 %v2200_v54, %v2152_v3  ;;  %v2295_v21 = vmax.f32 %v2247_v30, 0.0  ;;  %v2161_v30 = vmul.f32 0.5945349, %v10534_v4 }
 0x308   :  { %v2298_v40 = vmax.f32 %v2250_v62, 0.0  ;;  %v2156_v62 = vmul.f32 0.5945349, %v10513_v18  ;;  %v2159_v18 = vmul.f32 0.5945349, %v10540_v5 }
 0x309   :  { %v2296_v10 = vmax.f32 %v2248_v50, 0.0  ;;  %v8843_v1 = vpop.f32.mrb[108].mxu0 }
 0x30a   :  { %v2205_v47 = vmul.f32 0.4054651, %v8843_v1  ;;  %v1976_v49 = vpop.f32.mrb[109].mxu0  ;;  %v2344_v55 = vpack.c.bf16 %v2298_v40, %v2297_v26 }
 0x30b   :  { %v2203_v44 = vmul.f32 0.4054651, %v1976_v49  ;;  %v8844_v43 = vpop.f32.mrb[110].mxu0  ;;  %v2343_v14 = vpack.c.bf16 %v2296_v10, %v2295_v21 }
 0x30c   :  { %v2253_v35 = vadd.f32 %v2205_v47, %v2157_v37  ;;  %v2206_v32 = vmul.f32 0.4054651, %v8844_v43  ;;  %v1979_v54 = vpop.f32.mrb[111].mxu0 }
 0x30d   :  { %v2251_v3 = vadd.f32 %v2203_v44, %v2155_v33  ;;  %v2204_v9 = vmul.f32 0.4054651, %v1979_v54  ;;  %2896 = vmatpush1.bf16.msra.mxu1 %v2343_v14  ;;  %v2162_v44 = vmul.f32 0.5945349, %v10537_v59 }
 0x30e   :  { %v2254_v57 = vadd.f32 %v2206_v32, %v2158_v38  ;;  %2897 = vmatprep.subr.bf16.mxu1 %v12867_v12  ;;  %v2301_v26 = vmax.f32 %v2253_v35, 0.0 }
 0x30f   :  { %v2252_v1 = vadd.f32 %v2204_v9, %v2156_v62  ;;  %v2299_v17 = vmax.f32 %v2251_v3, 0.0 }
 0x310   :  { %v2302_v40 = vmax.f32 %v2254_v57, 0.0  ;;  %v2165_v57 = vmul.f32 0.5945349, %v10562_v63 }
 0x311   :  { %v2300_v49 = vmax.f32 %v2252_v1, 0.0  ;;  %v8847_v48 = vpop.f32.mrb[112].mxu0  ;;  %2898 = vmatpush1.bf16.msra.mxu1 %v2344_v55  ;;  %v2160_v55 = vmul.f32 0.5945349, %v10543_v6  ;;  %v2163_v6 = vmul.f32 0.5945349, %v10568_v46 }
 0x312   :  { %v2209_v58 = vmul.f32 0.4054651, %v8847_v48  ;;  %v1992_v50 = vpop.f32.mrb[113].mxu0  ;;  %2899 = vmatprep.subr.bf16.mxu1 %v12867_v12  ;;  %v2346_v21 = vpack.c.bf16 %v2302_v40, %v2301_v26 }
 0x313   :  { %v2207_v10 = vmul.f32 0.4054651, %v1992_v50  ;;  %v8848_v37 = vpop.f32.mrb[114].mxu0  ;;  %v2345_v47 = vpack.c.bf16 %v2300_v49, %v2299_v17 }
 0x314   :  { %v2257_v33 = vadd.f32 %v2209_v58, %v2161_v30  ;;  %v2210_v43 = vmul.f32 0.4054651, %v8848_v37  ;;  %v1995_v14 = vpop.f32.mrb[115].mxu0  ;;  %v2166_v30 = vmul.f32 0.5945349, %v10565_v42 }
 0x315   :  { %v2255_v35 = vadd.f32 %v2207_v10, %v2159_v18  ;;  %v2208_v38 = vmul.f32 0.4054651, %v1995_v14  ;;  %2900 = vmatpush1.bf16.msra.mxu1 %v2345_v47 }
 0x316   :  { %v2258_v4 = vadd.f32 %v2210_v43, %v2162_v44  ;;  %2901 = vmatprep.subr.bf16.mxu1 %v12867_v12  ;;  %v2305_v54 = vmax.f32 %v2257_v33, 0.0 }
 0x317   :  { %v2256_v32 = vadd.f32 %v2208_v38, %v2160_v55  ;;  %v2303_v5 = vmax.f32 %v2255_v35, 0.0  ;;  %v2169_v35 = vmul.f32 0.5945349, %v10598_v23 }
 0x318   :  { %v2306_v3 = vmax.f32 %v2258_v4, 0.0 }
 0x319   :  { %v2304_v62 = vmax.f32 %v2256_v32, 0.0  ;;  %v8851_v9 = vpop.f32.mrb[116].mxu0  ;;  %2902 = vmatpush1.bf16.msra.mxu1 %v2346_v21  ;;  %v2164_v21 = vmul.f32 0.5945349, %v10571_v11  ;;  %v2167_v11 = vmul.f32 0.5945349, %v10584_v15 }
 0x31a   :  { %v2213_v59 = vmul.f32 0.4054651, %v8851_v9  ;;  %v2008_v1 = vpop.f32.mrb[117].mxu0  ;;  %2903 = vmatprep.subr.bf16.mxu1 %v12867_v12  ;;  %v2348_v26 = vpack.c.bf16 %v2306_v3, %v2305_v54  ;;  %v9531_v54 = vld [vmem:[%s12713_s0 + $0x8] ss:$12 sps:$4 sm:$0xff]  }
 0x31b   :  { %v2211_v40 = vmul.f32 0.4054651, %v2008_v1  ;;  %v8852_v17 = vpop.f32.mrb[118].mxu0  ;;  %v2347_v49 = vpack.c.bf16 %v2304_v62, %v2303_v5  ;;  %v2170_v5 = vmul.f32 0.5945349, %v10601_v45  ;;  %8901 = vmatprep.mubr.bf16.mxu0 %v9531_v54 }
 0x31c   :  { %v2261_v48 = vadd.f32 %v2213_v59, %v2165_v57  ;;  %v2214_v58 = vmul.f32 0.4054651, %v8852_v17  ;;  %v2011_v50 = vpop.f32.mrb[119].mxu0  ;;  %v2168_v15 = vmul.f32 0.5945349, %v10587_v0 }
 0x31d   :  { %v2259_v18 = vadd.f32 %v2211_v40, %v2163_v6  ;;  %v2212_v10 = vmul.f32 0.4054651, %v2011_v50  ;;  %2904 = vmatpush1.bf16.msra.mxu1 %v2347_v49  ;;  %v2171_v0 = vmul.f32 0.5945349, %v10614_v31 }
 0x31e   :  { %v2262_v63 = vadd.f32 %v2214_v58, %v2166_v30  ;;  %2905 = vmatprep.subr.bf16.mxu1 %v12867_v12  ;;  %v2309_v47 = vmax.f32 %v2261_v48, 0.0  ;;  %v2173_v30 = vmul.f32 0.5945349, %v10632_v39 }
 0x31f   :  { %v2260_v37 = vadd.f32 %v2212_v10, %v2164_v21  ;;  %v2307_v46 = vmax.f32 %v2259_v18, 0.0 }
 0x320   :  { %v2310_v33 = vmax.f32 %v2262_v63, 0.0  ;;  %v2174_v63 = vmul.f32 0.5945349, %v10635_v13  ;;  %v2177_v13 = vmul.f32 0.5945349, %v10677_v29 }
 0x321   :  { %v2308_v44 = vmax.f32 %v2260_v37, 0.0  ;;  %2906 = vmatpush1.bf16.msra.mxu1 %v2348_v26 }
 0x322   :  { %2907 = vmatprep.subr.bf16.mxu1 %v12867_v12  ;;  %v2350_v43 = vpack.c.bf16 %v2310_v33, %v2309_v47 }
 0x323   :  { %v2349_v42 = vpack.c.bf16 %v2308_v44, %v2307_v46  ;;  %v2172_v46 = vmul.f32 0.5945349, %v10617_v20  ;;  %v2175_v20 = vmul.f32 0.5945349, %v10654_v19 }
 0x325   :  { %2908 = vmatpush1.bf16.msra.mxu1 %v2349_v42 }
 0x326   :  { %2909 = vmatprep.subr.bf16.mxu1 %v12867_v12 }
 0x327   :  { %v8855_v14 = vpop.f32.mrb[120].mxu0 }
 0x328   :  { %v2217_v55 = vmul.f32 0.4054651, %v8855_v14  ;;  %v2024_v38 = vpop.f32.mrb[121].mxu0 }
 0x329   :  { %v2215_v4 = vmul.f32 0.4054651, %v2024_v38  ;;  %v8856_v32 = vpop.f32.mrb[122].mxu0  ;;  %2910 = vmatpush1.bf16.msra.mxu1 %v2350_v43 }
 0x32a   :  { %v2265_v3 = vadd.f32 %v2217_v55, %v2169_v35  ;;  %v2218_v62 = vmul.f32 0.4054651, %v8856_v32  ;;  %v2027_v9 = vpop.f32.mrb[123].mxu0  ;;  %2911 = vmatprep.subr.bf16.mxu1 %v12867_v12 }
 0x32b   :  { %v2263_v57 = vadd.f32 %v2215_v4, %v2167_v11  ;;  %v2216_v23 = vmul.f32 0.4054651, %v2027_v9 }
 0x32c   :  { %v2266_v59 = vadd.f32 %v2218_v62, %v2170_v5  ;;  %v2313_v26 = vmax.f32 %v2265_v3, 0.0  ;;  %v2178_v62 = vmul.f32 0.5945349, %v10680_v36  ;;  %v2181_v36 = vmul.f32 0.5945349, %v10723_v51 }
 0x32d   :  { %v2264_v1 = vadd.f32 %v2216_v23, %v2168_v15  ;;  %v2311_v40 = vmax.f32 %v2263_v57, 0.0  ;;  %v2176_v23 = vmul.f32 0.5945349, %v10657_v34  ;;  %v2179_v34 = vmul.f32 0.5945349, %v10699_v28 }
 0x32e   :  { %v2314_v6 = vmax.f32 %v2266_v59, 0.0  ;;  %v9504_v28 = vld [vmem:[%s12713_s0] ss:$12 sps:$4 sm:$0xff]  }
 0x32f   :  { %v2312_v17 = vmax.f32 %v2264_v1, 0.0 }
 0x330   :  { %v2352_v49 = vpack.c.bf16 %v2314_v6, %v2313_v26 }
 0x331   :  { %v2351_v48 = vpack.c.bf16 %v2312_v17, %v2311_v40 }
 0x333   :  { %2912 = vmatpush1.bf16.msra.mxu1 %v2351_v48 }
 0x334   :  { %2913 = vmatprep.subr.bf16.mxu1 %v12867_v12 }
 0x337   :  { %v8859_v45 = vpop.f32.mrb[124].mxu0  ;;  %2914 = vmatpush1.bf16.msra.mxu1 %v2352_v49 }
 0x338   :  { %v2221_v58 = vmul.f32 0.4054651, %v8859_v45  ;;  %v2040_v50 = vpop.f32.mrb[125].mxu0  ;;  %2915 = vmatprep.subr.bf16.mxu1 %v12867_v12 }
 0x339   :  { %v2219_v18 = vmul.f32 0.4054651, %v2040_v50  ;;  %v8860_v21 = vpop.f32.mrb[126].mxu0 }
 0x33a   :  { %v2269_v10 = vadd.f32 %v2221_v58, %v2173_v30  ;;  %v2222_v37 = vmul.f32 0.4054651, %v8860_v21  ;;  %v2043_v47 = vpop.f32.mrb[127].mxu0 }
 0x33b   :  { %v2267_v33 = vadd.f32 %v2219_v18, %v2171_v0  ;;  %v2220_v44 = vmul.f32 0.4054651, %v2043_v47  ;;  %v2182_v18 = vmul.f32 0.5945349, %v10726_v7 }
 0x33c   :  { %v2270_v43 = vadd.f32 %v2222_v37, %v2174_v63  ;;  %v2317_v39 = vmax.f32 %v2269_v10, 0.0  ;;  %v12868_v37 = vld [vmem:[#allocation34_spill] sm:$0xff] }
 0x33d   :  { %v2268_v42 = vadd.f32 %v2220_v44, %v2172_v46  ;;  %v2315_v11 = vmax.f32 %v2267_v33, 0.0  ;;  %v2180_v47 = vmul.f32 0.5945349, %v12868_v37  ;;  %v9515_v37 = vld [vmem:[%s12713_s0 + $0x48] ss:$12 sps:$4 sm:$0xff]  }
 0x33e   :  { %v2318_v14 = vmax.f32 %v2270_v43, 0.0 }
 0x33f   :  { %v2316_v35 = vmax.f32 %v2268_v42, 0.0 }
 0x340   :  { %v2354_v55 = vpack.c.bf16 %v2318_v14, %v2317_v39 }
 0x341   :  { %v2353_v38 = vpack.c.bf16 %v2316_v35, %v2315_v11  ;;  %v9507_v35 = vld [vmem:[%s12713_s0 + $0x1c] ss:$12 sps:$4 sm:$0xff]  }
 0x343   :  { %2916 = vmatpush1.bf16.msra.mxu1 %v2353_v38 }
 0x344   :  { %2917 = vmatprep.subr.bf16.mxu1 %v12867_v12 }
 0x347   :  { %v8863_v31 = vpop.f32.mrb[128].mxu0  ;;  %2918 = vmatpush1.bf16.msra.mxu1 %v2354_v55  ;;  %v2185_v55 = vmul.f32 0.5945349, %v10755_v22 }
 0x348   :  { %v2225_v4 = vmul.f32 0.4054651, %v8863_v31  ;;  %v2056_v32 = vpop.f32.mrb[129].mxu0  ;;  %2919 = vmatprep.subr.bf16.mxu1 %v12867_v12 }
 0x349   :  { %v2223_v54 = vmul.f32 0.4054651, %v2056_v32  ;;  %v8864_v3 = vpop.f32.mrb[130].mxu0 }
 0x34a   :  { %v2273_v5 = vadd.f32 %v2225_v4, %v2177_v13  ;;  %v2226_v9 = vmul.f32 0.4054651, %v8864_v3  ;;  %v2059_v57 = vpop.f32.mrb[131].mxu0  ;;  %v2183_v13 = vmul.f32 0.5945349, %v10739_v60 }
 0x34b   :  { %v2271_v15 = vadd.f32 %v2223_v54, %v2175_v20  ;;  %v2224_v59 = vmul.f32 0.4054651, %v2059_v57  ;;  %v2186_v54 = vmul.f32 0.5945349, %v10758_v41  ;;  %v9510_v41 = vld [vmem:[%s12713_s0 + $0x34] ss:$12 sps:$4 sm:$0xff]  }
 0x34c   :  { %v2274_v1 = vadd.f32 %v2226_v9, %v2178_v62  ;;  %v2321_v29 = vmax.f32 %v2273_v5, 0.0  ;;  %v2184_v9 = vmul.f32 0.5945349, %v10742_v27  ;;  %v9512_v27 = vld [vmem:[%s12713_s0 + $0x30] ss:$12 sps:$4 sm:$0xff]  }
 0x34d   :  { %v2272_v26 = vadd.f32 %v2224_v59, %v2176_v23  ;;  %v2319_v40 = vmax.f32 %v2271_v15, 0.0  ;;  %v9509_v23 = vld [vmem:[%s12713_s0 + $0x18] ss:$12 sps:$4 sm:$0xff]  }
 0x34e   :  { %v2322_v6 = vmax.f32 %v2274_v1, 0.0 }
 0x34f   :  { %v2320_v17 = vmax.f32 %v2272_v26, 0.0 }
 0x350   :  { %v2356_v49 = vpack.c.bf16 %v2322_v6, %v2321_v29 }
 0x351   :  { %v2355_v48 = vpack.c.bf16 %v2320_v17, %v2319_v40  ;;  %v9513_v17 = vld [vmem:[%s12713_s0 + $0x4c] ss:$12 sps:$4 sm:$0xff]  }
 0x353   :  { %2920 = vmatpush1.bf16.msra.mxu1 %v2355_v48 }
 0x354   :  { %2921 = vmatprep.subr.bf16.mxu1 %v12867_v12 }
 0x357   :  { %v8867_v19 = vpop.f32.mrb[132].mxu0  ;;  %2922 = vmatpush1.bf16.msra.mxu1 %v2356_v49  ;;  %v2189_v49 = vmul.f32 0.5945349, %v10785_v8 }
 0x358   :  { %v2229_v45 = vmul.f32 0.4054651, %v8867_v19  ;;  %v2072_v30 = vpop.f32.mrb[133].mxu0  ;;  %2923 = vmatprep.subr.bf16.mxu1 %v12867_v12 }
 0x359   :  { %v2227_v58 = vmul.f32 0.4054651, %v2072_v30  ;;  %v8868_v50 = vpop.f32.mrb[134].mxu0 }
 0x35a   :  { %v2277_v0 = vadd.f32 %v2229_v45, %v2181_v36  ;;  %v2230_v21 = vmul.f32 0.4054651, %v8868_v50  ;;  %v2075_v10 = vpop.f32.mrb[135].mxu0  ;;  %v2187_v36 = vmul.f32 0.5945349, %v10771_v52 }
 0x35b   :  { %v2275_v63 = vadd.f32 %v2227_v58, %v2179_v34  ;;  %v2228_v33 = vmul.f32 0.4054651, %v2075_v10  ;;  %v2190_v58 = vmul.f32 0.5945349, %v10788_v61  ;;  %v9516_v61 = vld [vmem:[%s12713_s0 + $0x64] ss:$12 sps:$4 sm:$0xff]  }
 0x35c   :  { %v2278_v46 = vadd.f32 %v2230_v21, %v2182_v18  ;;  %v2325_v51 = vmax.f32 %v2277_v0, 0.0  ;;  %v2188_v21 = vmul.f32 0.5945349, %v10774_v24  ;;  %v9518_v24 = vld [vmem:[%s12713_s0 + $0x60] ss:$12 sps:$4 sm:$0xff]  }
 0x35d   :  { %v2276_v44 = vadd.f32 %v2228_v33, %v2180_v47  ;;  %v2323_v42 = vmax.f32 %v2275_v63, 0.0 }
 0x35e   :  { %v2326_v43 = vmax.f32 %v2278_v46, 0.0 }
 0x35f   :  { %v2324_v39 = vmax.f32 %v2276_v44, 0.0 }
 0x360   :  { %v2358_v14 = vpack.c.bf16 %v2326_v43, %v2325_v51 }
 0x361   :  { %v2357_v11 = vpack.c.bf16 %v2324_v39, %v2323_v42  ;;  %v9519_v42 = vld [vmem:[%s12713_s0 + $0x7c] ss:$12 sps:$4 sm:$0xff]   ;;  %v2193_v39 = vmul.f32 0.5945349, %v10805_v56 }
 0x363   :  { %2924 = vmatpush1.bf16.msra.mxu1 %v2357_v11 }
 0x364   :  { %2925 = vmatprep.subr.bf16.mxu1 %v12867_v12 }
 0x367   :  { %v8871_v7 = vpop.f32.mrb[136].mxu0  ;;  %2926 = vmatpush1.bf16.msra.mxu1 %v2358_v14 }
 0x368   :  { %v2233_v38 = vmul.f32 0.4054651, %v8871_v7  ;;  %v2088_v31 = vpop.f32.mrb[137].mxu0  ;;  %4619 = vmatprep.subr.bf16.mxu1 %v12867_v12 }
 0x369   :  { %v2231_v4 = vmul.f32 0.4054651, %v2088_v31  ;;  %v8872_v32 = vpop.f32.mrb[138].mxu0 }
 0x36a   :  { %v2281_v20 = vadd.f32 %v2233_v38, %v2185_v55  ;;  %v2234_v3 = vmul.f32 0.4054651, %v8872_v32  ;;  %v2091_v5 = vpop.f32.mrb[139].mxu0  ;;  %2928 = vmatmul.mubr.bf16.vlgmr.msra.gmra.mrb[88].mxu1 %v9504_v28  ;;  %v2191_v28 = vmul.f32 0.5945349, %v10795_v53 }
 0x36b   :  { %v2279_v62 = vadd.f32 %v2231_v4, %v2183_v13  ;;  %v2232_v57 = vmul.f32 0.4054651, %v2091_v5  ;;  %2935 = vmatprep.mubr.bf16.mxu1 %v9507_v35  ;;  %v2194_v38 = vmul.f32 0.5945349, %v10808_v25  ;;  %v2192_v32 = vmul.f32 0.5945349, %v10798_v16 }
 0x36c   :  { %v2282_v22 = vadd.f32 %v2234_v3, %v2186_v54  ;;  %v2329_v60 = vmax.f32 %v2281_v20, 0.0  ;;  %v9521_v3 = vld [vmem:[%s12713_s0 + $0x78] ss:$12 sps:$4 sm:$0xff]   ;;  %v9522_v25 = vld [vmem:[%s12713_s0 + $0x94] ss:$12 sps:$4 sm:$0xff]  }
 0x36d   :  { %v2280_v15 = vadd.f32 %v2232_v57, %v2184_v9  ;;  %v2327_v1 = vmax.f32 %v2279_v62, 0.0  ;;  %v9524_v16 = vld [vmem:[%s12713_s0 + $0x90] ss:$12 sps:$4 sm:$0xff]  }
 0x36e   :  { %v2330_v59 = vmax.f32 %v2282_v22, 0.0 }
 0x36f   :  { %v2328_v26 = vmax.f32 %v2280_v15, 0.0 }
 0x370   :  { %v2360_v29 = vpack.c.bf16 %v2330_v59, %v2329_v60  ;;  %v2197_v60 = vmul.f32 0.5945349, %v10825_v2 }
 0x371   :  { %v2359_v6 = vpack.c.bf16 %v2328_v26, %v2327_v1  ;;  %v12869_v26 = vld [vmem:[#allocation45_spill] sm:$0xff] }
 0x372   :  { %2936 = vmatmul.mubr.bf16.gmra.mrb[92].mxu1 %v9509_v23  ;;  %v9525_v23 = vld [vmem:[%s12713_s0 + $0xac] ss:$12 sps:$4 sm:$0xff]  }
 0x373   :  { %8885 = vmatprep.subr.bf16.mxu0 %v2359_v6  ;;  %2943 = vmatprep.mubr.bf16.mxu1 %v9510_v41  ;;  %v2195_v41 = vmul.f32 0.5945349, %v12869_v26  ;;  %v9579_v26 = vld [vmem:[%s12713_s0 + $0x1d0] ss:$12 sps:$4 sm:$0xff]  }
 0x374   :  { %8886 = vmatpush3.bf16.msra.mxu0 %v2359_v6 }
 0x375   :  { %8887 = vmatprep.subr.bf16.mxu0 %v2360_v29 }
 0x377   :  { %v8875_v40 = vpop.f32.mrb[140].mxu0 }
 0x378   :  { %v2237_v48 = vmul.f32 0.4054651, %v8875_v40  ;;  %v2104_v19 = vpop.f32.mrb[141].mxu0  ;;  %8888 = vmatpush3.bf16.msra.mxu0 %v2360_v29  ;;  %v12870_v40 = vld [vmem:[#allocation47_spill] sm:$0xff] }
 0x379   :  { %v2235_v45 = vmul.f32 0.4054651, %v2104_v19  ;;  %v8876_v30 = vpop.f32.mrb[142].mxu0 }
 0x37a   :  { %v2285_v34 = vadd.f32 %v2237_v48, %v2189_v49  ;;  %v2238_v50 = vmul.f32 0.4054651, %v8876_v30  ;;  %v2107_v0 = vpop.f32.mrb[143].mxu0  ;;  %2944 = vmatmul.mubr.bf16.gmra.mrb[96].mxu1 %v9512_v27 }
 0x37b   :  { %v2283_v18 = vadd.f32 %v2235_v45, %v2187_v36  ;;  %v2236_v10 = vmul.f32 0.4054651, %v2107_v0  ;;  %2951 = vmatprep.mubr.bf16.mxu1 %v9513_v17  ;;  %v2198_v17 = vmul.f32 0.5945349, %v12870_v40  ;;  %v12871_v36 = vld [vmem:[#allocation46_spill] sm:$0xff] }
 0x37c   :  { %v2286_v63 = vadd.f32 %v2238_v50, %v2190_v58  ;;  %v2333_v52 = vmax.f32 %v2285_v34, 0.0  ;;  %v2196_v45 = vmul.f32 0.5945349, %v12871_v36  ;;  %v9527_v58 = vld [vmem:[%s12713_s0 + $0xa8] ss:$12 sps:$4 sm:$0xff]  }
 0x37d   :  { %v2284_v8 = vadd.f32 %v2236_v10, %v2188_v21  ;;  %v2331_v33 = vmax.f32 %v2283_v18, 0.0  ;;  %v9528_v10 = vld [vmem:[%s12713_s0 + $0xc4] ss:$12 sps:$4 sm:$0xff]   ;;  %v9581_v40 = vld [vmem:[%s12713_s0 + $0x1cc] ss:$12 sps:$4 sm:$0xff]  }
 0x37e   :  { %v2334_v47 = vmax.f32 %v2286_v63, 0.0  ;;  %v9583_v36 = vld [vmem:[%s12713_s0 + $0x1c8] ss:$12 sps:$4 sm:$0xff]  }
 0x37f   :  { %v2332_v46 = vmax.f32 %v2284_v8, 0.0 }
 0x380   :  { %v2362_v44 = vpack.c.bf16 %v2334_v47, %v2333_v52  ;;  %v9532_v52 = vld [vmem:[%s12713_s0 + $0x20] ss:$12 sps:$4 sm:$0xff]   ;;  %v9533_v47 = vld [vmem:[%s12713_s0 + $0xdc] ss:$12 sps:$4 sm:$0xff]  }
 0x381   :  { %v2361_v51 = vpack.c.bf16 %v2332_v46, %v2331_v33  ;;  %v9536_v33 = vld [vmem:[%s12713_s0 + $0x38] ss:$12 sps:$4 sm:$0xff]  }
 0x382   :  { %2952 = vmatmul.mubr.bf16.gmra.mrb[100].mxu1 %v9515_v37  ;;  %v9530_v37 = vld [vmem:[%s12713_s0 + $0xc0] ss:$12 sps:$4 sm:$0xff]   ;;  %v9535_v46 = vld [vmem:[%s12713_s0 + $0xd8] ss:$12 sps:$4 sm:$0xff]  }
 0x383   :  { %8889 = vmatprep.subr.bf16.mxu0 %v2361_v51  ;;  %2959 = vmatprep.mubr.bf16.mxu1 %v9516_v61  ;;  %v9537_v61 = vld [vmem:[%s12713_s0 + $0x50] ss:$12 sps:$4 sm:$0xff]  }
 0x384   :  { %8890 = vmatpush3.bf16.msra.mxu0 %v2361_v51  ;;  %v9541_v51 = vld [vmem:[%s12713_s0 + $0x68] ss:$12 sps:$4 sm:$0xff]  }
 0x385   :  { %8891 = vmatprep.subr.bf16.mxu0 %v2362_v44 }
 0x387   :  { %v8879_v43 = vpop.f32.mrb[144].mxu0 }
 0x388   :  { %v2241_v14 = vmul.f32 0.4054651, %v8879_v43  ;;  %v2120_v11 = vpop.f32.mrb[145].mxu0  ;;  %8892 = vmatpush3.bf16.msra.mxu0 %v2362_v44  ;;  %v9538_v44 = vld [vmem:[%s12713_s0 + $0xf4] ss:$12 sps:$4 sm:$0xff]  }
 0x389   :  { %v2239_v7 = vmul.f32 0.4054651, %v2120_v11  ;;  %v8880_v35 = vpop.f32.mrb[146].mxu0  ;;  %v9542_v43 = vld [vmem:[%s12713_s0 + $0x80] ss:$12 sps:$4 sm:$0xff]  }
 0x38a   :  { %v2289_v55 = vadd.f32 %v2241_v14, %v2193_v39  ;;  %v2242_v31 = vmul.f32 0.4054651, %v8880_v35  ;;  %v2123_v13 = vpop.f32.mrb[147].mxu0  ;;  %2960 = vmatmul.mubr.bf16.gmra.mrb[104].mxu1 %v9518_v24  ;;  %v9540_v24 = vld [vmem:[%s12713_s0 + $0xf0] ss:$12 sps:$4 sm:$0xff]  }
 0x38b   :  { %v2287_v4 = vadd.f32 %v2239_v7, %v2191_v28  ;;  %v2240_v20 = vmul.f32 0.4054651, %v2123_v13  ;;  %2967 = vmatprep.mubr.bf16.mxu1 %v9519_v42  ;;  %v9543_v42 = vld [vmem:[%s12713_s0 + $0x10c] ss:$12 sps:$4 sm:$0xff]   ;;  %v9545_v14 = vld [vmem:[%s12713_s0 + $0x108] ss:$12 sps:$4 sm:$0xff]  }
 0x38c   :  { %v2290_v54 = vadd.f32 %v2242_v31, %v2194_v38  ;;  %v2337_v53 = vmax.f32 %v2289_v55, 0.0  ;;  %v9546_v39 = vld [vmem:[%s12713_s0 + $0x98] ss:$12 sps:$4 sm:$0xff]   ;;  %v9547_v11 = vld [vmem:[%s12713_s0 + $0xb0] ss:$12 sps:$4 sm:$0xff]  }
 0x38d   :  { %v2288_v56 = vadd.f32 %v2240_v20, %v2192_v32  ;;  %v2335_v62 = vmax.f32 %v2287_v4, 0.0  ;;  %v9548_v28 = vld [vmem:[%s12713_s0 + $0x124] ss:$12 sps:$4 sm:$0xff]   ;;  %v9551_v7 = vld [vmem:[%s12713_s0 + $0xc8] ss:$12 sps:$4 sm:$0xff]  }
 0x38e   :  { %v2338_v5 = vmax.f32 %v2290_v54, 0.0  ;;  %v9550_v35 = vld [vmem:[%s12713_s0 + $0x120] ss:$12 sps:$4 sm:$0xff]   ;;  %v9553_v38 = vld [vmem:[%s12713_s0 + $0x13c] ss:$12 sps:$4 sm:$0xff]  }
 0x38f   :  { %v2336_v9 = vmax.f32 %v2288_v56, 0.0  ;;  %v9552_v55 = vld [vmem:[%s12713_s0 + $0xe0] ss:$12 sps:$4 sm:$0xff]   ;;  %v9556_v31 = vld [vmem:[%s12713_s0 + $0xf8] ss:$12 sps:$4 sm:$0xff]  }
 0x390   :  { %v2364_v57 = vpack.c.bf16 %v2338_v5, %v2337_v53  ;;  %v9555_v13 = vld [vmem:[%s12713_s0 + $0x138] ss:$12 sps:$4 sm:$0xff]   ;;  %v9557_v4 = vld [vmem:[%s12713_s0 + $0x110] ss:$12 sps:$4 sm:$0xff]   ;;  %v9558_v32 = vld [vmem:[%s12713_s0 + $0x154] ss:$12 sps:$4 sm:$0xff]  }
 0x391   :  { %v2363_v22 = vpack.c.bf16 %v2336_v9, %v2335_v62  ;;  %v9561_v20 = vld [vmem:[%s12713_s0 + $0x128] ss:$12 sps:$4 sm:$0xff]   ;;  %v9560_v54 = vld [vmem:[%s12713_s0 + $0x150] ss:$12 sps:$4 sm:$0xff]   ;;  %v9562_v56 = vld [vmem:[%s12713_s0 + $0x140] ss:$12 sps:$4 sm:$0xff]  }
 0x392   :  { %2968 = vmatmul.mubr.bf16.gmra.mrb[108].mxu1 %v9521_v3  ;;  %v9563_v3 = vld [vmem:[%s12713_s0 + $0x16c] ss:$12 sps:$4 sm:$0xff]   ;;  %v9565_v5 = vld [vmem:[%s12713_s0 + $0x168] ss:$12 sps:$4 sm:$0xff]   ;;  %v9567_v62 = vld [vmem:[%s12713_s0 + $0x170] ss:$12 sps:$4 sm:$0xff]  }
 0x393   :  { %8893 = vmatprep.subr.bf16.mxu0 %v2363_v22  ;;  %2975 = vmatprep.mubr.bf16.mxu1 %v9522_v25  ;;  %v9566_v53 = vld [vmem:[%s12713_s0 + $0x158] ss:$12 sps:$4 sm:$0xff]   ;;  %v9571_v25 = vld [vmem:[%s12713_s0 + $0x188] ss:$12 sps:$4 sm:$0xff]  }
 0x394   :  { %8894 = vmatpush3.bf16.msra.mxu0 %v2363_v22  ;;  %v9568_v9 = vld [vmem:[%s12713_s0 + $0x184] ss:$12 sps:$4 sm:$0xff]   ;;  %v9572_v22 = vld [vmem:[%s12713_s0 + $0x1a0] ss:$12 sps:$4 sm:$0xff]  }
 0x395   :  { %8895 = vmatprep.subr.bf16.mxu0 %v2364_v57 }
 0x397   :  { %v8883_v15 = vpop.f32.mrb[148].mxu0 }
 0x398   :  { %v2245_v59 = vmul.f32 0.4054651, %v8883_v15  ;;  %v2136_v1 = vpop.f32.mrb[149].mxu0  ;;  %8896 = vmatpush3.bf16.msra.mxu0 %v2364_v57  ;;  %v9570_v57 = vld [vmem:[%s12713_s0 + $0x180] ss:$12 sps:$4 sm:$0xff]  }
 0x399   :  { %v2243_v29 = vmul.f32 0.4054651, %v2136_v1  ;;  %v8884_v6 = vpop.f32.mrb[150].mxu0  ;;  %v9576_v15 = vld [vmem:[%s12713_s0 + $0x1b8] ss:$12 sps:$4 sm:$0xff]  }
 0x39a   :  { %v2293_v27 = vadd.f32 %v2245_v59, %v2197_v60  ;;  %v2246_v49 = vmul.f32 0.4054651, %v8884_v6  ;;  %v2139_v48 = vpop.f32.mrb[151].mxu0  ;;  %2976 = vmatmul.mubr.bf16.gmra.mrb[112].mxu1 %v9524_v16  ;;  %v9573_v16 = vld [vmem:[%s12713_s0 + $0x19c] ss:$12 sps:$4 sm:$0xff]  }
 0x39b   :  { %v2291_v19 = vadd.f32 %v2243_v29, %v2195_v41  ;;  %v2244_v30 = vmul.f32 0.4054651, %v2139_v48  ;;  %2983 = vmatprep.mubr.bf16.mxu1 %v9525_v23  ;;  %v9600_v23 = vld [vmem:[%s12715_s4 + $0x40] sm:$0xff]   ;;  %v9601_v60 = vld [vmem:[%s12715_s4 + $0x48] sm:$0xff]   ;;  %v9602_v29 = vld [vmem:[%s12715_s4 + $0x50] sm:$0xff]  }
 0x39c   :  { %v2294_v34 = vadd.f32 %v2246_v49, %v2198_v17  ;;  %v2341_v50 = vmax.f32 %v2293_v27, 0.0  ;;  %v9575_v59 = vld [vmem:[%s12713_s0 + $0x198] ss:$12 sps:$4 sm:$0xff]   ;;  %v9577_v1 = vld [vmem:[%s12713_s0 + $0x1b4] ss:$12 sps:$4 sm:$0xff]  }
 0x39d   :  { %v2292_v2 = vadd.f32 %v2244_v30, %v2196_v45  ;;  %v2339_v18 = vmax.f32 %v2291_v19, 0.0  ;;  %v9584_v41 = vld [vmem:[%s12713_s0 + $0x1e8] ss:$12 sps:$4 sm:$0xff]   ;;  %v9603_v6 = vld [vmem:[%s12715_s4 + $0x58] sm:$0xff]   ;;  %v9587_v17 = vld [vmem:[%s12713_s0 + $0x200] ss:$12 sps:$4 sm:$0xff]  }
 0x39e   :  { %v2342_v0 = vmax.f32 %v2294_v34, 0.0  ;;  %v9580_v27 = vld [vmem:[%s12713_s0 + $0x1b0] ss:$12 sps:$4 sm:$0xff]   ;;  %v9592_v49 = vld [vmem:[%s12713_s0 + $0x218] ss:$12 sps:$4 sm:$0xff]   ;;  %v9605_v19 = vld [vmem:[%s12715_s4 + $0x68] sm:$0xff]  }
 0x39f   :  { %v2340_v21 = vmax.f32 %v2292_v2, 0.0  ;;  %v9604_v48 = vld [vmem:[%s12715_s4 + $0x60] sm:$0xff]   ;;  %v9595_v30 = vld [vmem:[%s12713_s0 + $0x230] ss:$12 sps:$4 sm:$0xff]  }
 0x3a0   :  { %v2366_v63 = vpack.c.bf16 %v2342_v0, %v2341_v50  ;;  %v9585_v45 = vld [vmem:[%s12713_s0 + $0x1e4] ss:$12 sps:$4 sm:$0xff]   ;;  %v9607_v2 = vld [vmem:[%s12715_s4 + $0x78] sm:$0xff]  }
 0x3a1   :  { %v2365_v8 = vpack.c.bf16 %v2340_v21, %v2339_v18  ;;  %v9606_v34 = vld [vmem:[%s12715_s4 + $0x70] sm:$0xff]   ;;  %v9589_v50 = vld [vmem:[%s12713_s0 + $0x1fc] ss:$12 sps:$4 sm:$0xff]   ;;  %v9591_v0 = vld [vmem:[%s12713_s0 + $0x1f8] ss:$12 sps:$4 sm:$0xff]  }
 0x3a2   :  { %2984 = vmatmul.mubr.bf16.gmra.mrb[116].mxu1 %v9527_v58  ;;  %v9588_v58 = vld [vmem:[%s12713_s0 + $0x1e0] ss:$12 sps:$4 sm:$0xff]   ;;  %v9596_v21 = vld [vmem:[%s12713_s0 + $0x210] ss:$12 sps:$4 sm:$0xff]  }
 0x3a3   :  { %8897 = vmatprep.subr.bf16.mxu0 %v2365_v8  ;;  %2991 = vmatprep.mubr.bf16.mxu1 %v9528_v10  ;;  %v9593_v18 = vld [vmem:[%s12713_s0 + $0x214] ss:$12 sps:$4 sm:$0xff]   ;;  %v9597_v10 = vld [vmem:[%s12713_s0 + $0x22c] ss:$12 sps:$4 sm:$0xff]  }
 0x3a4   :  { %8898 = vmatpush3.bf16.msra.mxu0 %v2365_v8 }
 0x3a5   :  { %8899 = vmatprep.subr.bf16.mxu0 %v2366_v63 }
 0x3a8   :  { %8900 = vmatpush3.bf16.msra.mxu0 %v2366_v63  ;;  %v9599_v63 = vld [vmem:[%s12713_s0 + $0x228] ss:$12 sps:$4 sm:$0xff]  }
 0x3a9   :  { %8949 = vmatprep.subr.bf16.mxu0 %v9600_v23 }
 0x3aa   :  { %2992 = vmatmul.mubr.bf16.gmra.mrb[120].mxu1 %v9530_v37 }
 0x3ab   :  { %8902 = vmatmul.mubr.bf16.vlgmr.msra.gmra.mrb[152].mxu0 %v9532_v52  ;;  %2999 = vmatprep.mubr.bf16.mxu1 %v9533_v47 }
 0x3ac   :  { %8905 = vmatprep.mubr.bf16.mxu0 %v9536_v33  ;;  %8950 = vmatpush3.bf16.msra.mxu0 %v9600_v23 }
 0x3ad   :  { %8951 = vmatprep.subr.bf16.mxu0 %v9601_v60 }
 0x3b0   :  { %8952 = vmatpush3.bf16.msra.mxu0 %v9601_v60 }
 0x3b1   :  { %8953 = vmatprep.subr.bf16.mxu0 %v9602_v29 }
 0x3b2   :  { %3000 = vmatmul.mubr.bf16.gmra.mrb[124].mxu1 %v9535_v46 }
 0x3b3   :  { %8906 = vmatmul.mubr.bf16.gmra.mrb[156].mxu0 %v9537_v61  ;;  %3007 = vmatprep.mubr.bf16.mxu1 %v9538_v44 }
 0x3b4   :  { %8909 = vmatprep.mubr.bf16.mxu0 %v9541_v51  ;;  %8954 = vmatpush3.bf16.msra.mxu0 %v9602_v29 }
 0x3b5   :  { %8955 = vmatprep.subr.bf16.mxu0 %v9603_v6 }
 0x3b8   :  { %8956 = vmatpush3.bf16.msra.mxu0 %v9603_v6 }
 0x3b9   :  { %8957 = vmatprep.subr.bf16.mxu0 %v9604_v48 }
 0x3ba   :  { %3008 = vmatmul.mubr.bf16.gmra.mrb[128].mxu1 %v9540_v24 }
 0x3bb   :  { %8910 = vmatmul.mubr.bf16.gmra.mrb[160].mxu0 %v9542_v43  ;;  %3015 = vmatprep.mubr.bf16.mxu1 %v9543_v42 }
 0x3bc   :  { %8913 = vmatprep.mubr.bf16.mxu0 %v9546_v39  ;;  %8958 = vmatpush3.bf16.msra.mxu0 %v9604_v48 }
 0x3bd   :  { %8959 = vmatprep.subr.bf16.mxu0 %v9605_v19 }
 0x3c0   :  { %8960 = vmatpush3.bf16.msra.mxu0 %v9605_v19  ;;  %v12873_v19 = vld [vmem:[#allocation5_spill] sm:$0xff] }
 0x3c1   :  { %8961 = vmatprep.subr.bf16.mxu0 %v9606_v34 }
 0x3c2   :  { %3016 = vmatmul.mubr.bf16.gmra.mrb[132].mxu1 %v9545_v14 }
 0x3c3   :  { %8914 = vmatmul.mubr.bf16.gmra.mrb[164].mxu0 %v9547_v11  ;;  %3023 = vmatprep.mubr.bf16.mxu1 %v9548_v28 }
 0x3c4   :  { %8917 = vmatprep.mubr.bf16.mxu0 %v9551_v7  ;;  %8962 = vmatpush3.bf16.msra.mxu0 %v9606_v34 }
 0x3c5   :  { %8963 = vmatprep.subr.bf16.mxu0 %v9607_v2 }
 0x3c8   :  { %8964 = vmatpush3.bf16.msra.mxu0 %v9607_v2  ;;  %v12874_v2 = vld [vmem:[#allocation6_spill] sm:$0xff] }
 0x3ca   :  { %3024 = vmatmul.mubr.bf16.gmra.mrb[136].mxu1 %v9550_v35 }
 0x3cb   :  { %8918 = vmatmul.mubr.bf16.gmra.mrb[168].mxu0 %v9552_v55  ;;  %3031 = vmatprep.mubr.bf16.mxu1 %v9553_v38 }
 0x3cc   :  { %8921 = vmatprep.mubr.bf16.mxu0 %v9556_v31 }
 0x3d2   :  { %3032 = vmatmul.mubr.bf16.gmra.mrb[140].mxu1 %v9555_v13 }
 0x3d3   :  { %8922 = vmatmul.mubr.bf16.gmra.mrb[172].mxu0 %v9557_v4  ;;  %3039 = vmatprep.mubr.bf16.mxu1 %v9558_v32 }
 0x3d4   :  { %8925 = vmatprep.mubr.bf16.mxu0 %v9561_v20 }
 0x3da   :  { %3040 = vmatmul.mubr.bf16.gmra.mrb[144].mxu1 %v9560_v54 }
 0x3db   :  { %8926 = vmatmul.mubr.bf16.gmra.mrb[176].mxu0 %v9562_v56  ;;  %3047 = vmatprep.mubr.bf16.mxu1 %v9563_v3 }
 0x3dc   :  { %8929 = vmatprep.mubr.bf16.mxu0 %v9566_v53 }
 0x3e2   :  { %3048 = vmatmul.mubr.bf16.gmra.mrb[148].mxu1 %v9565_v5 }
 0x3e3   :  { %8930 = vmatmul.mubr.bf16.gmra.mrb[180].mxu0 %v9567_v62  ;;  %3055 = vmatprep.mubr.bf16.mxu1 %v9568_v9 }
 0x3e4   :  { %8933 = vmatprep.mubr.bf16.mxu0 %v9571_v25 }
 0x3ea   :  { %3056 = vmatmul.mubr.bf16.gmra.mrb[152].mxu1 %v9570_v57 }
 0x3eb   :  { %8934 = vmatmul.mubr.bf16.gmra.mrb[184].mxu0 %v9572_v22  ;;  %3063 = vmatprep.mubr.bf16.mxu1 %v9573_v16 }
 0x3ec   :  { %8937 = vmatprep.mubr.bf16.mxu0 %v9576_v15 }
 0x3f2   :  { %3064 = vmatmul.mubr.bf16.gmra.mrb[156].mxu1 %v9575_v59 }
 0x3f3   :  { %3071 = vmatprep.mubr.bf16.mxu1 %v9577_v1  ;;  %8938 = vmatmul.mubr.bf16.gmra.mrb[188].mxu0 %v9579_v26 }
 0x3f4   :  { %8941 = vmatprep.mubr.bf16.mxu0 %v9584_v41 }
 0x3fa   :  { %3072 = vmatmul.mubr.bf16.gmra.mrb[160].mxu1 %v9580_v27 }
 0x3fb   :  { %3079 = vmatprep.mubr.bf16.mxu1 %v9581_v40  ;;  %8942 = vmatmul.mubr.bf16.gmra.mrb[192].mxu0 %v9587_v17 }
 0x3fc   :  { %8945 = vmatprep.mubr.bf16.mxu0 %v9592_v49  ;;  %v12872_v49 = vld [vmem:[#allocation4_spill] sm:$0xff] }
 0x402   :  { %3080 = vmatmul.mubr.bf16.gmra.mrb[164].mxu1 %v9583_v36 }
 0x403   :  { %3087 = vmatprep.mubr.bf16.mxu1 %v9585_v45  ;;  %8946 = vmatmul.mubr.bf16.gmra.mrb[196].mxu0 %v9595_v30 }
 0x40a   :  { %3088 = vmatmul.mubr.bf16.gmra.mrb[168].mxu1 %v9588_v58 }
 0x40b   :  { %3095 = vmatprep.mubr.bf16.mxu1 %v9589_v50  ;;  %v12875_v50 = vld [vmem:[#allocation7_spill] sm:$0xff] }
 0x412   :  { %3096 = vmatmul.mubr.bf16.gmra.mrb[172].mxu1 %v9591_v0 }
 0x413   :  { %3103 = vmatprep.mubr.bf16.mxu1 %v9593_v18 }
 0x41a   :  { %3104 = vmatmul.mubr.bf16.gmra.mrb[176].mxu1 %v9596_v21 }
 0x41b   :  { %3111 = vmatprep.mubr.bf16.mxu1 %v9597_v10 }
 0x422   :  { %3112 = vmatmul.mubr.bf16.gmra.mrb[180].mxu1 %v9599_v63 }
 0x43d   :  { %v2929_v8 = vpop.f32.mrb[88].mxu1 }
 0x43e   :  { %v2931_v37 = vpop.f32.mrb[89].mxu1 }
 0x43f   :  { %v2932_v52 = vpop.f32.mrb[90].mxu1 }
 0x440   :  { %v2934_v47 = vpop.f32.mrb[91].mxu1 }
 0x445   :  { %v2937_v33 = vpop.f32.mrb[92].mxu1 }
 0x446   :  { %v2939_v46 = vpop.f32.mrb[93].mxu1 }
 0x447   :  { %v2940_v61 = vpop.f32.mrb[94].mxu1 }
 0x448   :  { %v2942_v44 = vpop.f32.mrb[95].mxu1 }
 0x44d   :  { %v2945_v51 = vpop.f32.mrb[96].mxu1 }
 0x44e   :  { %v2947_v24 = vpop.f32.mrb[97].mxu1 }
 0x44f   :  { %v2948_v43 = vpop.f32.mrb[98].mxu1 }
 0x450   :  { %v2950_v42 = vpop.f32.mrb[99].mxu1 }
 0x455   :  { %v2953_v39 = vpop.f32.mrb[100].mxu1 }
 0x456   :  { %v2955_v14 = vpop.f32.mrb[101].mxu1 }
 0x457   :  { %v2956_v11 = vpop.f32.mrb[102].mxu1 }
 0x458   :  { %v2958_v28 = vpop.f32.mrb[103].mxu1 }
 0x45d   :  { %v11136_v7 = vpop.f32.mrb[104].mxu1 }
 0x45e   :  { %v2963_v35 = vpop.f32.mrb[105].mxu1 }
 0x45f   :  { %v11138_v55 = vpop.f32.mrb[106].mxu1 }
 0x460   :  { %v2966_v38 = vpop.f32.mrb[107].mxu1 }
 0x465   :  { %v2969_v31 = vpop.f32.mrb[108].mxu1 }
 0x466   :  { %v2971_v13 = vpop.f32.mrb[109].mxu1 }
 0x467   :  { %v11140_v4 = vpop.f32.mrb[110].mxu1 }
 0x468   :  { %v2974_v32 = vpop.f32.mrb[111].mxu1 }
 0x46d   :  { %v11142_v20 = vpop.f32.mrb[112].mxu1 }
 0x46e   :  { %v2979_v54 = vpop.f32.mrb[113].mxu1 }
 0x46f   :  { %v11144_v56 = vpop.f32.mrb[114].mxu1  ;;  %v12878_v54 = vld [vmem:[#allocation10_spill] sm:$0xff] }
 0x470   :  { %v2982_v3 = vpop.f32.mrb[115].mxu1 }
 0x475   :  { %v11146_v53 = vpop.f32.mrb[116].mxu1 }
 0x476   :  { %v2987_v5 = vpop.f32.mrb[117].mxu1 }
 0x477   :  { %v11148_v62 = vpop.f32.mrb[118].mxu1 }
 0x478   :  { %v2990_v9 = vpop.f32.mrb[119].mxu1 }
 0x47d   :  { %v11150_v25 = vpop.f32.mrb[120].mxu1 }
 0x47e   :  { %v2995_v57 = vpop.f32.mrb[121].mxu1  ;;  %v8903_v22 = vpop.f32.mrb[152].mxu0 }
 0x47f   :  { %v3163_v16 = vadd.f32 %v8903_v22, %v2937_v33  ;;  %v11152_v15 = vpop.f32.mrb[122].mxu1  ;;  %v3154_v23 = vpop.f32.mrb[153].mxu0 }
 0x480   :  { %v3155_v60 = vadd.f32 %v3154_v23, %v2929_v8  ;;  %v2998_v59 = vpop.f32.mrb[123].mxu1  ;;  %v8904_v1 = vpop.f32.mrb[154].mxu0 }
 0x481   :  { %v3347_v26 = vmul.f32 0.9, %v3163_v16  ;;  %v3166_v41 = vadd.f32 %v8904_v1, %v2940_v61  ;;  %v3157_v29 = vpop.f32.mrb[155].mxu0 }
 0x482   :  { %v3345_v6 = vmul.f32 0.9, %v3155_v60  ;;  %v3158_v27 = vadd.f32 %v3157_v29, %v2932_v52 }
 0x483   :  { %v3348_v40 = vmul.f32 0.9, %v3166_v41  ;;  %v11155_v48 = vadd.f32 %v3347_v26, %v12872_v49 }
 0x484   :  { %v3346_v17 = vmul.f32 0.9, %v3158_v27  ;;  %v11163_v58 = vadd.f32 %v3345_v6, %v12874_v2 }
 0x485   :  { %v11158_v36 = vadd.f32 %v3348_v40, %v12873_v19  ;;  %v11160_v45 = vpop.f32.mrb[124].mxu1 }
 0x486   :  { %v3003_v30 = vpop.f32.mrb[125].mxu1  ;;  %v8907_v34 = vpop.f32.mrb[156].mxu0  ;;  %v11166_v0 = vadd.f32 %v3346_v17, %v12875_v50  ;;  %v12880_v17 = vld [vmem:[#allocation12_spill] sm:$0xff] }
 0x487   :  { %v3562_v18 = vpack.c.bf16 %v11158_v36, %v11155_v48  ;;  %v3179_v21 = vadd.f32 %v8907_v34, %v2953_v39  ;;  %v11170_v10 = vpop.f32.mrb[126].mxu1  ;;  %v3170_v63 = vpop.f32.mrb[157].mxu0  ;;  %v12876_v39 = vld [vmem:[#allocation8_spill] sm:$0xff] }
 0x488   :  { %v3171_v8 = vadd.f32 %v3170_v63, %v2945_v51  ;;  %v3006_v37 = vpop.f32.mrb[127].mxu1  ;;  %v8908_v52 = vpop.f32.mrb[158].mxu0  ;;  %v3561_v47 = vpack.c.bf16 %v11166_v0, %v11163_v58  ;;  %v12877_v51 = vld [vmem:[#allocation9_spill] sm:$0xff]  ;;  %v12882_v63 = vld [vmem:[#allocation14_spill] sm:$0xff] }
 0x489   :  { %v3351_v33 = vmul.f32 0.9, %v3179_v21  ;;  %v3182_v46 = vadd.f32 %v8908_v52, %v2956_v11  ;;  %v3173_v61 = vpop.f32.mrb[159].mxu0  ;;  %v12879_v11 = vld [vmem:[#allocation11_spill] sm:$0xff] }
 0x48a   :  { %v3349_v44 = vmul.f32 0.9, %v3171_v8  ;;  %v3174_v24 = vadd.f32 %v3173_v61, %v2948_v43  ;;  %8965 = vmatprep.mubr.bf16.mxu0 %v3561_v47 }
 0x48b   :  { %v3352_v42 = vmul.f32 0.9, %v3182_v46  ;;  %8966 = vmatmul.mubr.bf16.vlgmr.msra.gmra.mrb[200].mxu0 %v3562_v18  ;;  %v11177_v35 = vadd.f32 %v3351_v33, %v12876_v39 }
 0x48c   :  { %v3350_v14 = vmul.f32 0.9, %v3174_v24  ;;  %v11183_v3 = vadd.f32 %v3349_v44, %v12878_v54 }
 0x48d   :  { %v11174_v28 = vpop.f32.mrb[128].mxu1  ;;  %v11180_v38 = vadd.f32 %v3352_v42, %v12877_v51 }
 0x48e   :  { %v3011_v13 = vpop.f32.mrb[129].mxu1  ;;  %v8911_v32 = vpop.f32.mrb[160].mxu0  ;;  %v11186_v5 = vadd.f32 %v3350_v14, %v12879_v11 }
 0x48f   :  { %v3195_v43 = vadd.f32 %v8911_v32, %v2969_v31  ;;  %v11188_v9 = vpop.f32.mrb[130].mxu1  ;;  %v3186_v57 = vpop.f32.mrb[161].mxu0  ;;  %v3564_v22 = vpack.c.bf16 %v11180_v38, %v11177_v35 }
 0x490   :  { %v3187_v16 = vadd.f32 %v3186_v57, %v11136_v7  ;;  %v3014_v23 = vpop.f32.mrb[131].mxu1  ;;  %v8912_v60 = vpop.f32.mrb[162].mxu0  ;;  %v3563_v59 = vpack.c.bf16 %v11186_v5, %v11183_v3  ;;  %v12881_v7 = vld [vmem:[#allocation13_spill] sm:$0xff] }
 0x491   :  { %v3355_v1 = vmul.f32 0.9, %v3195_v43  ;;  %v3198_v26 = vadd.f32 %v8912_v60, %v11140_v4  ;;  %v3189_v41 = vpop.f32.mrb[163].mxu0  ;;  %v12883_v4 = vld [vmem:[#allocation15_spill] sm:$0xff] }
 0x492   :  { %v3353_v29 = vmul.f32 0.9, %v3187_v16  ;;  %v3190_v31 = vadd.f32 %v3189_v41, %v11138_v55  ;;  %8969 = vmatprep.mubr.bf16.mxu0 %v3563_v59  ;;  %v12884_v16 = vld [vmem:[#allocation16_spill] sm:$0xff] }
 0x493   :  { %v3356_v6 = vmul.f32 0.9, %v3198_v26  ;;  %8970 = vmatmul.mubr.bf16.gmra.mrb[204].mxu0 %v3564_v22  ;;  %v11198_v30 = vadd.f32 %v3355_v1, %v12880_v17  ;;  %v12886_v26 = vld [vmem:[#allocation18_spill] sm:$0xff] }
 0x494   :  { %v3354_v27 = vmul.f32 0.9, %v3190_v31  ;;  %v11204_v8 = vadd.f32 %v3353_v29, %v12882_v63 }
 0x495   :  { %v3017_v40 = vpop.f32.mrb[132].mxu1  ;;  %v11201_v34 = vadd.f32 %v3356_v6, %v12881_v7 }
 0x496   :  { %v3019_v18 = vpop.f32.mrb[133].mxu1  ;;  %v8915_v21 = vpop.f32.mrb[164].mxu0  ;;  %v11207_v37 = vadd.f32 %v3354_v27, %v12883_v4 }
 0x497   :  { %v3211_v55 = vadd.f32 %v8915_v21, %v11146_v53  ;;  %v3020_v52 = vpop.f32.mrb[134].mxu1  ;;  %v3202_v47 = vpop.f32.mrb[165].mxu0  ;;  %v3566_v33 = vpack.c.bf16 %v11201_v34, %v11198_v30 }
 0x498   :  { %v3203_v46 = vadd.f32 %v3202_v47, %v11142_v20  ;;  %v3022_v61 = vpop.f32.mrb[135].mxu1  ;;  %v8916_v44 = vpop.f32.mrb[166].mxu0  ;;  %v3565_v24 = vpack.c.bf16 %v11207_v37, %v11204_v8  ;;  %v12885_v20 = vld [vmem:[#allocation17_spill] sm:$0xff] }
 0x499   :  { %v3359_v42 = vmul.f32 0.9, %v3211_v55  ;;  %v3214_v14 = vadd.f32 %v8916_v44, %v11148_v62  ;;  %v3205_v13 = vpop.f32.mrb[167].mxu0  ;;  %v12887_v62 = vld [vmem:[#allocation19_spill] sm:$0xff] }
 0x49a   :  { %v3357_v32 = vmul.f32 0.9, %v3203_v46  ;;  %v3206_v43 = vadd.f32 %v3205_v13, %v11144_v56  ;;  %8973 = vmatprep.mubr.bf16.mxu0 %v3565_v24  ;;  %v12888_v13 = vld [vmem:[#allocation22_spill] sm:$0xff] }
 0x49b   :  { %v3360_v53 = vmul.f32 0.9, %v3214_v14  ;;  %8974 = vmatmul.mubr.bf16.gmra.mrb[208].mxu0 %v3566_v33  ;;  %v11218_v23 = vadd.f32 %v3359_v42, %v12884_v16 }
 0x49c   :  { %v3358_v57 = vmul.f32 0.9, %v3206_v43  ;;  %v11224_v41 = vadd.f32 %v3357_v32, %v12886_v26 }
 0x49d   :  { %v3025_v22 = vpop.f32.mrb[136].mxu1  ;;  %v11221_v60 = vadd.f32 %v3360_v53, %v12885_v20  ;;  %v12902_v20 = vld [vmem:[#allocation32_spill] sm:$0xff] }
 0x49e   :  { %v3027_v59 = vpop.f32.mrb[137].mxu1  ;;  %v8919_v1 = vpop.f32.mrb[168].mxu0  ;;  %v11227_v29 = vadd.f32 %v3358_v57, %v12887_v62  ;;  %v12898_v62 = vld [vmem:[#allocation28_spill] sm:$0xff] }
 0x49f   :  { %v3227_v56 = vadd.f32 %v8919_v1, %v11160_v45  ;;  %v3028_v31 = vpop.f32.mrb[138].mxu1  ;;  %v3218_v6 = vpop.f32.mrb[169].mxu0  ;;  %v3568_v27 = vpack.c.bf16 %v11221_v60, %v11218_v23  ;;  %v12890_v59 = vld [vmem:[#allocation20_spill] sm:$0xff] }
 0x4a0   :  { %v3219_v18 = vadd.f32 %v3218_v6, %v11150_v25  ;;  %v3030_v21 = vpop.f32.mrb[139].mxu1  ;;  %v8920_v55 = vpop.f32.mrb[170].mxu0  ;;  %v3567_v47 = vpack.c.bf16 %v11227_v29, %v11224_v41  ;;  %v12889_v25 = vld [vmem:[#allocation23_spill] sm:$0xff] }
 0x4a1   :  { %v3363_v33 = vmul.f32 0.9, %v3227_v56  ;;  %v3230_v46 = vadd.f32 %v8920_v55, %v11170_v10  ;;  %v3221_v61 = vpop.f32.mrb[171].mxu0  ;;  %v12891_v10 = vld [vmem:[#allocation21_spill] sm:$0xff] }
 0x4a2   :  { %v3361_v44 = vmul.f32 0.9, %v3219_v18  ;;  %v3222_v24 = vadd.f32 %v3221_v61, %v11152_v15  ;;  %8977 = vmatprep.mubr.bf16.mxu0 %v3567_v47 }
 0x4a3   :  { %v3364_v45 = vmul.f32 0.9, %v3230_v46  ;;  %8978 = vmatmul.mubr.bf16.gmra.mrb[212].mxu0 %v3568_v27  ;;  %v11238_v32 = vadd.f32 %v3363_v33, %v12888_v13  ;;  %v12897_v13 = vld [vmem:[#allocation31_spill] sm:$0xff] }
 0x4a4   :  { %v3362_v42 = vmul.f32 0.9, %v3222_v24  ;;  %v11244_v1 = vadd.f32 %v3361_v44, %v12890_v59 }
 0x4a5   :  { %v3033_v14 = vpop.f32.mrb[140].mxu1  ;;  %v11241_v43 = vadd.f32 %v3364_v45, %v12889_v25  ;;  %v12894_v25 = vld [vmem:[#allocation24_spill] sm:$0xff] }
 0x4a6   :  { %v3035_v53 = vpop.f32.mrb[141].mxu1  ;;  %v8923_v57 = vpop.f32.mrb[172].mxu0  ;;  %v11247_v56 = vadd.f32 %v3362_v42, %v12891_v10 }
 0x4a7   :  { %v3243_v15 = vadd.f32 %v8923_v57, %v3017_v40  ;;  %v3036_v6 = vpop.f32.mrb[142].mxu1  ;;  %v3234_v18 = vpop.f32.mrb[173].mxu0  ;;  %v3570_v27 = vpack.c.bf16 %v11241_v43, %v11238_v32  ;;  %v12892_v57 = vld [vmem:[#allocation26_spill] sm:$0xff] }
 0x4a8   :  { %v3235_v21 = vadd.f32 %v3234_v18, %v11174_v28  ;;  %v3038_v55 = vpop.f32.mrb[143].mxu1  ;;  %v8924_v47 = vpop.f32.mrb[174].mxu0  ;;  %v3569_v33 = vpack.c.bf16 %v11247_v56, %v11244_v1  ;;  %v12893_v28 = vld [vmem:[#allocation27_spill] sm:$0xff] }
 0x4a9   :  { %v3367_v46 = vmul.f32 0.9, %v3243_v15  ;;  %v3246_v61 = vadd.f32 %v8924_v47, %v3020_v52  ;;  %v3237_v44 = vpop.f32.mrb[175].mxu0  ;;  %v12895_v52 = vld [vmem:[#allocation25_spill] sm:$0xff] }
 0x4aa   :  { %v3365_v24 = vmul.f32 0.9, %v3235_v21  ;;  %v3238_v45 = vadd.f32 %v3237_v44, %v11188_v9  ;;  %8981 = vmatprep.mubr.bf16.mxu0 %v3569_v33 }
 0x4ab   :  { %v3368_v40 = vmul.f32 0.9, %v3246_v61  ;;  %8982 = vmatmul.mubr.bf16.gmra.mrb[216].mxu0 %v3570_v27  ;;  %v11256_v10 = vadd.f32 %v3367_v46, %v12892_v57 }
 0x4ac   :  { %v3366_v42 = vmul.f32 0.9, %v3238_v45  ;;  %v11262_v15 = vadd.f32 %v3365_v24, %v12894_v25 }
 0x4ad   :  { %v3041_v53 = vpop.f32.mrb[144].mxu1  ;;  %v11259_v18 = vadd.f32 %v3368_v40, %v12893_v28 }
 0x4ae   :  { %v3043_v55 = vpop.f32.mrb[145].mxu1  ;;  %v8927_v59 = vpop.f32.mrb[176].mxu0  ;;  %v11265_v21 = vadd.f32 %v3366_v42, %v12895_v52  ;;  %v12896_v52 = vld [vmem:[#allocation30_spill] sm:$0xff] }
 0x4af   :  { %v3259_v9 = vadd.f32 %v8927_v59, %v3033_v14  ;;  %v3044_v47 = vpop.f32.mrb[146].mxu1  ;;  %v3250_v33 = vpop.f32.mrb[177].mxu0  ;;  %v3572_v27 = vpack.c.bf16 %v11259_v18, %v11256_v10 }
 0x4b0   :  { %v3251_v61 = vadd.f32 %v3250_v33, %v3025_v22  ;;  %v3046_v46 = vpop.f32.mrb[147].mxu1  ;;  %v8928_v44 = vpop.f32.mrb[178].mxu0  ;;  %v3571_v45 = vpack.c.bf16 %v11265_v21, %v11262_v15 }
 0x4b1   :  { %v3371_v40 = vmul.f32 0.9, %v3259_v9  ;;  %v3262_v55 = vadd.f32 %v8928_v44, %v3036_v6  ;;  %v3253_v28 = vpop.f32.mrb[179].mxu0  ;;  %v12899_v6 = vld [vmem:[#allocation29_spill] sm:$0xff] }
 0x4b2   :  { %v3369_v24 = vmul.f32 0.9, %v3251_v61  ;;  %v3254_v25 = vadd.f32 %v3253_v28, %v3028_v31  ;;  %8985 = vmatprep.mubr.bf16.mxu0 %v3571_v45 }
 0x4b3   :  { %v3372_v42 = vmul.f32 0.9, %v3262_v55  ;;  %8986 = vmatmul.mubr.bf16.gmra.mrb[220].mxu0 %v3572_v27  ;;  %v11272_v57 = vadd.f32 %v3371_v40, %v12896_v52  ;;  %v12901_v52 = vld [vmem:[#allocation36_spill] sm:$0xff] }
 0x4b4   :  { %v3370_v14 = vmul.f32 0.9, %v3254_v25  ;;  %v11278_v26 = vadd.f32 %v3369_v24, %v12898_v62 }
 0x4b5   :  { %v3049_v59 = vpop.f32.mrb[148].mxu1  ;;  %v11275_v22 = vadd.f32 %v3372_v42, %v12897_v13 }
 0x4b6   :  { %v3051_v33 = vpop.f32.mrb[149].mxu1  ;;  %v8931_v46 = vpop.f32.mrb[180].mxu0  ;;  %v11281_v9 = vadd.f32 %v3370_v14, %v12899_v6  ;;  %v12900_v6 = vld [vmem:[#allocation35_spill] sm:$0xff] }
 0x4b7   :  { %v3275_v31 = vadd.f32 %v8931_v46, %v3049_v59  ;;  %v3052_v28 = vpop.f32.mrb[150].mxu1  ;;  %v3266_v61 = vpop.f32.mrb[181].mxu0  ;;  %v3574_v25 = vpack.c.bf16 %v11275_v22, %v11272_v57 }
 0x4b8   :  { %v3267_v27 = vadd.f32 %v3266_v61, %v3041_v53  ;;  %v3054_v44 = vpop.f32.mrb[151].mxu1  ;;  %v8932_v45 = vpop.f32.mrb[182].mxu0  ;;  %v3573_v40 = vpack.c.bf16 %v11281_v9, %v11278_v26 }
 0x4b9   :  { %v3375_v55 = vmul.f32 0.9, %v3275_v31  ;;  %v3278_v42 = vadd.f32 %v8932_v45, %v3052_v28  ;;  %v3269_v33 = vpop.f32.mrb[183].mxu0  ;;  %v12903_v31 = vld [vmem:[#allocation33_spill] sm:$0xff] }
 0x4ba   :  { %v3373_v24 = vmul.f32 0.9, %v3267_v27  ;;  %v3270_v62 = vadd.f32 %v3269_v33, %v3044_v47  ;;  %8989 = vmatprep.mubr.bf16.mxu0 %v3573_v40 }
 0x4bb   :  { %v3376_v14 = vmul.f32 0.9, %v3278_v42  ;;  %8990 = vmatmul.mubr.bf16.gmra.mrb[224].mxu0 %v3574_v25  ;;  %v11288_v13 = vadd.f32 %v3375_v55, %v12900_v6  ;;  %v12905_v6 = vld [vmem:[#allocation38_spill] sm:$0xff] }
 0x4bc   :  { %v3374_v59 = vmul.f32 0.9, %v3270_v62  ;;  %v11294_v16 = vadd.f32 %v3373_v24, %v12902_v20 }
 0x4bd   :  { %v3057_v46 = vpop.f32.mrb[152].mxu1  ;;  %v11291_v53 = vadd.f32 %v3376_v14, %v12901_v52 }
 0x4be   :  { %v3059_v61 = vpop.f32.mrb[153].mxu1  ;;  %v8935_v44 = vpop.f32.mrb[184].mxu0  ;;  %v11297_v28 = vadd.f32 %v3374_v59, %v12903_v31  ;;  %v12904_v59 = vld [vmem:[#allocation37_spill] sm:$0xff] }
 0x4bf   :  { %v3060_v47 = vpop.f32.mrb[154].mxu1  ;;  %v3282_v27 = vpop.f32.mrb[185].mxu0  ;;  %v3576_v62 = vpack.c.bf16 %v11291_v53, %v11288_v13 }
 0x4c0   :  { %v3283_v25 = vadd.f32 %v3282_v27, %v3057_v46  ;;  %v3062_v45 = vpop.f32.mrb[155].mxu1  ;;  %v8936_v40 = vpop.f32.mrb[186].mxu0  ;;  %v3575_v55 = vpack.c.bf16 %v11297_v28, %v11294_v16 }
 0x4c1   :  { %v3285_v42 = vpop.f32.mrb[187].mxu0 }
 0x4c2   :  { %v3377_v33 = vmul.f32 0.9, %v3283_v25  ;;  %v3286_v14 = vadd.f32 %v3285_v42, %v3060_v47  ;;  %8993 = vmatprep.mubr.bf16.mxu0 %v3575_v55  ;;  %v12906_v42 = vld [vmem:[#allocation39_spill] sm:$0xff] }
 0x4c3   :  { %8994 = vmatmul.mubr.bf16.gmra.mrb[228].mxu0 %v3576_v62 }
 0x4c4   :  { %v3378_v24 = vmul.f32 0.9, %v3286_v14  ;;  %v11304_v52 = vadd.f32 %v3377_v33, %v12904_v59  ;;  %v12907_v14 = vld [vmem:[#allocation40_spill] sm:$0xff] }
 0x4c5   :  { %v3065_v61 = vpop.f32.mrb[156].mxu1 }
 0x4c6   :  { %v11307_v31 = vadd.f32 %v3378_v24, %v12905_v6  ;;  %v3291_v20 = vadd.f32 %v8935_v44, %v3065_v61  ;;  %v3067_v46 = vpop.f32.mrb[157].mxu1  ;;  %v8939_v27 = vpop.f32.mrb[188].mxu0 }
 0x4c7   :  { %v3068_v45 = vpop.f32.mrb[158].mxu1  ;;  %v3298_v4 = vpop.f32.mrb[189].mxu0 }
 0x4c8   :  { %v3379_v63 = vmul.f32 0.9, %v3291_v20  ;;  %v3294_v7 = vadd.f32 %v8936_v40, %v3068_v45  ;;  %v3070_v17 = vpop.f32.mrb[159].mxu1  ;;  %v3577_v47 = vpack.c.bf16 %v11307_v31, %v11304_v52  ;;  %v8940_v62 = vpop.f32.mrb[190].mxu0 }
 0x4c9   :  { %v3301_v25 = vpop.f32.mrb[191].mxu0 }
 0x4ca   :  { %v3380_v55 = vmul.f32 0.9, %v3294_v7  ;;  %8997 = vmatprep.mubr.bf16.mxu0 %v3577_v47  ;;  %v11312_v33 = vadd.f32 %v3379_v63, %v12906_v42  ;;  %v12908_v42 = vld [vmem:[#allocation41_spill] sm:$0xff] }
 0x4cc   :  { %v11315_v24 = vadd.f32 %v3380_v55, %v12907_v14  ;;  %v12909_v55 = vld [vmem:[#allocation42_spill] sm:$0xff] }
 0x4cd   :  { %v3073_v44 = vpop.f32.mrb[160].mxu1 }
 0x4ce   :  { %v3299_v61 = vadd.f32 %v3298_v4, %v3073_v44  ;;  %v3075_v46 = vpop.f32.mrb[161].mxu1  ;;  %v3578_v20 = vpack.c.bf16 %v11315_v24, %v11312_v33  ;;  %v8943_v17 = vpop.f32.mrb[192].mxu0 }
 0x4cf   :  { %v3076_v40 = vpop.f32.mrb[162].mxu1  ;;  %v3314_v45 = vpop.f32.mrb[193].mxu0 }
 0x4d0   :  { %v3381_v6 = vmul.f32 0.9, %v3299_v61  ;;  %v3302_v59 = vadd.f32 %v3301_v25, %v3076_v40  ;;  %v3078_v11 = vpop.f32.mrb[163].mxu1  ;;  %8998 = vmatmul.mubr.bf16.gmra.mrb[232].mxu0 %v3578_v20  ;;  %v8944_v7 = vpop.f32.mrb[194].mxu0 }
 0x4d1   :  { %v3317_v47 = vpop.f32.mrb[195].mxu0 }
 0x4d2   :  { %v3382_v63 = vmul.f32 0.9, %v3302_v59  ;;  %v11320_v54 = vadd.f32 %v3381_v6, %v12908_v42  ;;  %v12911_v42 = vld [vmem:[#allocation43_spill] sm:$0xff] }
 0x4d4   :  { %v11323_v14 = vadd.f32 %v3382_v63, %v12909_v55  ;;  %v12912_v63 = vld [vmem:[#allocation44_spill] sm:$0xff] }
 0x4d5   :  { %v3081_v4 = vpop.f32.mrb[164].mxu1 }
 0x4d6   :  { %12910 = vst [vmem:[#allocation34_spill] sm:$0xff] %v11323_v14  ;;  %v3307_v44 = vadd.f32 %v8939_v27, %v3081_v4  ;;  %v3083_v46 = vpop.f32.mrb[165].mxu1  ;;  %v3579_v51 = vpack.c.bf16 %v11323_v14, %v11320_v54  ;;  %v8947_v39 = vpop.f32.mrb[196].mxu0 }
 0x4d7   :  { %v3084_v61 = vpop.f32.mrb[166].mxu1  ;;  %v3330_v25 = vpop.f32.mrb[197].mxu0 }
 0x4d8   :  { %v3383_v11 = vmul.f32 0.9, %v3307_v44  ;;  %v3310_v20 = vadd.f32 %v8940_v62, %v3084_v61  ;;  %v3086_v40 = vpop.f32.mrb[167].mxu1  ;;  %9001 = vmatprep.mubr.bf16.mxu0 %v3579_v51  ;;  %v8948_v59 = vpop.f32.mrb[198].mxu0 }
 0x4d9   :  { %v3333_v50 = vpop.f32.mrb[199].mxu0 }
 0x4da   :  { %v3384_v6 = vmul.f32 0.9, %v3310_v20  ;;  %v11328_v2 = vadd.f32 %v3383_v11, %v12911_v42 }
 0x4dc   :  { %v11331_v55 = vadd.f32 %v3384_v6, %v12912_v63 }
 0x4dd   :  { %v3089_v27 = vpop.f32.mrb[168].mxu1 }
 0x4de   :  { %12913 = vst [vmem:[#allocation45_spill] sm:$0xff] %v11331_v55  ;;  %v3315_v4 = vadd.f32 %v3314_v45, %v3089_v27  ;;  %v3091_v46 = vpop.f32.mrb[169].mxu1  ;;  %v3580_v19 = vpack.c.bf16 %v11331_v55, %v11328_v2 }
 0x4df   :  { %v3092_v49 = vpop.f32.mrb[170].mxu1 }
 0x4e0   :  { %v3385_v44 = vmul.f32 0.9, %v3315_v4  ;;  %v3318_v62 = vadd.f32 %v3317_v47, %v3092_v49  ;;  %v3094_v61 = vpop.f32.mrb[171].mxu1  ;;  %9002 = vmatmul.mubr.bf16.gmra.mrb[236].mxu0 %v3580_v19 }
 0x4e2   :  { %v3386_v51 = vmul.f32 0.9, %v3318_v62  ;;  %v11336_v20 = vadd.f32 %v3385_v44, %v12911_v42 }
 0x4e4   :  { %v11339_v11 = vadd.f32 %v3386_v51, %v12912_v63 }
 0x4e5   :  { %v3097_v40 = vpop.f32.mrb[172].mxu1 }
 0x4e6   :  { %v3323_v6 = vadd.f32 %v8943_v17, %v3097_v40  ;;  %v3099_v14 = vpop.f32.mrb[173].mxu1  ;;  %v3581_v45 = vpack.c.bf16 %v11339_v11, %v11336_v20 }
 0x4e7   :  { %v3100_v27 = vpop.f32.mrb[174].mxu1 }
 0x4e8   :  { %v3387_v46 = vmul.f32 0.9, %v3323_v6  ;;  %v3326_v55 = vadd.f32 %v8944_v7, %v3100_v27  ;;  %v3102_v4 = vpop.f32.mrb[175].mxu1  ;;  %9005 = vmatprep.mubr.bf16.mxu0 %v3581_v45 }
 0x4ea   :  { %v3388_v49 = vmul.f32 0.9, %v3326_v55  ;;  %v11344_v19 = vadd.f32 %v3387_v46, %v12911_v42 }
 0x4ec   :  { %v11347_v47 = vadd.f32 %v3388_v49, %v12912_v63 }
 0x4ed   :  { %v3105_v44 = vpop.f32.mrb[176].mxu1 }
 0x4ee   :  { %v3331_v62 = vadd.f32 %v3330_v25, %v3105_v44  ;;  %v3107_v61 = vpop.f32.mrb[177].mxu1  ;;  %v3582_v14 = vpack.c.bf16 %v11347_v47, %v11344_v19 }
 0x4ef   :  { %v3108_v17 = vpop.f32.mrb[178].mxu1 }
 0x4f0   :  { %v3389_v51 = vmul.f32 0.9, %v3331_v62  ;;  %v3334_v40 = vadd.f32 %v3333_v50, %v3108_v17  ;;  %v3110_v6 = vpop.f32.mrb[179].mxu1  ;;  %9006 = vmatmul.mubr.bf16.gmra.mrb[240].mxu0 %v3582_v14 }
 0x4f2   :  { %v3390_v7 = vmul.f32 0.9, %v3334_v40  ;;  %v11352_v55 = vadd.f32 %v3389_v51, %v12911_v42 }
 0x4f4   :  { %v11355_v45 = vadd.f32 %v3390_v7, %v12912_v63 }
 0x4f5   :  { %v3113_v27 = vpop.f32.mrb[180].mxu1 }
 0x4f6   :  { %12914 = vst [vmem:[#allocation47_spill] sm:$0xff] %v11355_v45  ;;  %v3339_v46 = vadd.f32 %v8947_v39, %v3113_v27  ;;  %v3115_v4 = vpop.f32.mrb[181].mxu1  ;;  %v3583_v25 = vpack.c.bf16 %v11355_v45, %v11352_v55  ;;  %v9610_v39 = vld [vmem:[%s12713_s0 + $0x4] ss:$12 sps:$4 sm:$0xff]   ;;  %v3875_v27 = vmul.f32 0.7768564, %v11163_v58 }
 0x4f7   :  { %v3116_v49 = vpop.f32.mrb[182].mxu1  ;;  %4651 = vmatprep.mubr.bf16.mxu1 %v9610_v39 }
 0x4f8   :  { %v3391_v44 = vmul.f32 0.9, %v3339_v46  ;;  %v3342_v61 = vadd.f32 %v8948_v59, %v3116_v49  ;;  %v3118_v62 = vpop.f32.mrb[183].mxu1  ;;  %9009 = vmatprep.mubr.bf16.mxu0 %v3583_v25  ;;  %v3877_v59 = vmul.f32 0.7768564, %v11155_v48 }
 0x4f9   :  { %v3878_v49 = vmul.f32 0.7768564, %v11158_v36  ;;  %v9632_v48 = vld [vmem:[%s12713_s0 + $0x8] ss:$12 sps:$4 sm:$0xff]   ;;  %v3881_v36 = vmul.f32 0.7768564, %v11177_v35 }
 0x4fa   :  { %v3392_v50 = vmul.f32 0.9, %v3342_v61  ;;  %v11360_v14 = vadd.f32 %v3391_v44, %v12911_v42 }
 0x4fc   :  { %v11363_v17 = vadd.f32 %v3392_v50, %v12912_v63  ;;  %v3876_v50 = vmul.f32 0.7768564, %v11166_v0  ;;  %v3879_v0 = vmul.f32 0.7768564, %v11183_v3 }
 0x4fe   :  { %v3584_v51 = vpack.c.bf16 %v11363_v17, %v11360_v14 }
 0x500   :  { %9010 = vmatmul.mubr.bf16.gmra.mrb[244].mxu0 %v3584_v51 }
 0x501   :  { %9029 = vmatprep.mubr.bf16.mxu0 %v9632_v48 }
 0x55e   :  { %v8967_v40 = vpop.f32.mrb[200].mxu0 }
 0x55f   :  { %v3925_v6 = vmul.f32 0.22314355, %v8967_v40  ;;  %v3684_v7 = vpop.f32.mrb[201].mxu0 }
 0x560   :  { %v3923_v46 = vmul.f32 0.22314355, %v3684_v7  ;;  %v8968_v4 = vpop.f32.mrb[202].mxu0 }
 0x561   :  { %v3973_v25 = vadd.f32 %v3925_v6, %v3877_v59  ;;  %v3926_v44 = vmul.f32 0.22314355, %v8968_v4  ;;  %v3687_v61 = vpop.f32.mrb[203].mxu0 }
 0x562   :  { %v3971_v62 = vadd.f32 %v3923_v46, %v3875_v27  ;;  %v3924_v51 = vmul.f32 0.22314355, %v3687_v61  ;;  %v3882_v61 = vmul.f32 0.7768564, %v11180_v38  ;;  %v3885_v38 = vmul.f32 0.7768564, %v11198_v30 }
 0x563   :  { %v3974_v63 = vadd.f32 %v3926_v44, %v3878_v49  ;;  %v4021_v40 = vmax.f32 %v3973_v25, 0.0 }
 0x564   :  { %v3972_v39 = vadd.f32 %v3924_v51, %v3876_v50  ;;  %v4019_v58 = vmax.f32 %v3971_v62, 0.0  ;;  %v3880_v62 = vmul.f32 0.7768564, %v11186_v5 }
 0x565   :  { %v4022_v42 = vmax.f32 %v3974_v63, 0.0 }
 0x566   :  { %v4020_v7 = vmax.f32 %v3972_v39, 0.0  ;;  %v8971_v45 = vpop.f32.mrb[204].mxu0 }
 0x567   :  { %v4068_v59 = vpack.c.bf16 %v4022_v42, %v4021_v40  ;;  %v3929_v6 = vmul.f32 0.22314355, %v8971_v45  ;;  %v3700_v27 = vpop.f32.mrb[205].mxu0 }
 0x568   :  { %v4067_v46 = vpack.c.bf16 %v4020_v7, %v4019_v58  ;;  %v3927_v4 = vmul.f32 0.22314355, %v3700_v27  ;;  %v8972_v49 = vpop.f32.mrb[206].mxu0 }
 0x569   :  { %v3977_v44 = vadd.f32 %v3929_v6, %v3881_v36  ;;  %v3930_v50 = vmul.f32 0.22314355, %v8972_v49  ;;  %v3703_v25 = vpop.f32.mrb[207].mxu0  ;;  %v3883_v6 = vmul.f32 0.7768564, %v11204_v8 }
 0x56a   :  { %v3975_v63 = vadd.f32 %v3927_v4, %v3879_v0  ;;  %v3928_v51 = vmul.f32 0.22314355, %v3703_v25  ;;  %4620 = vmatpush1.bf16.msra.mxu1 %v4067_v46  ;;  %v3886_v4 = vmul.f32 0.7768564, %v11201_v34  ;;  %v3889_v34 = vmul.f32 0.7768564, %v11218_v23 }
 0x56b   :  { %v3978_v42 = vadd.f32 %v3930_v50, %v3882_v61  ;;  %4621 = vmatprep.subr.bf16.mxu1 %v12867_v12  ;;  %v4025_v45 = vmax.f32 %v3977_v44, 0.0 }
 0x56c   :  { %v3976_v35 = vadd.f32 %v3928_v51, %v3880_v62  ;;  %v4023_v48 = vmax.f32 %v3975_v63, 0.0 }
 0x56d   :  { %v4026_v39 = vmax.f32 %v3978_v42, 0.0 }
 0x56e   :  { %v4024_v3 = vmax.f32 %v3976_v35, 0.0  ;;  %v8975_v40 = vpop.f32.mrb[208].mxu0  ;;  %4622 = vmatpush1.bf16.msra.mxu1 %v4068_v59  ;;  %v3884_v59 = vmul.f32 0.7768564, %v11207_v37 }
 0x56f   :  { %v4070_v58 = vpack.c.bf16 %v4026_v39, %v4025_v45  ;;  %v3933_v7 = vmul.f32 0.22314355, %v8975_v40  ;;  %v3716_v36 = vpop.f32.mrb[209].mxu0  ;;  %4623 = vmatprep.subr.bf16.mxu1 %v12867_v12 }
 0x570   :  { %v4069_v5 = vpack.c.bf16 %v4024_v3, %v4023_v48  ;;  %v3931_v27 = vmul.f32 0.22314355, %v3716_v36  ;;  %v8976_v46 = vpop.f32.mrb[210].mxu0  ;;  %v3887_v48 = vmul.f32 0.7768564, %v11224_v41 }
 0x571   :  { %v3981_v0 = vadd.f32 %v3933_v7, %v3885_v38  ;;  %v3934_v49 = vmul.f32 0.22314355, %v8976_v46  ;;  %v3719_v44 = vpop.f32.mrb[211].mxu0  ;;  %v3890_v7 = vmul.f32 0.7768564, %v11221_v60 }
 0x572   :  { %v3979_v61 = vadd.f32 %v3931_v27, %v3883_v6  ;;  %v3932_v50 = vmul.f32 0.22314355, %v3719_v44  ;;  %4624 = vmatpush1.bf16.msra.mxu1 %v4069_v5  ;;  %v3893_v60 = vmul.f32 0.7768564, %v11238_v32 }
 0x573   :  { %v3982_v30 = vadd.f32 %v3934_v49, %v3886_v4  ;;  %4625 = vmatprep.subr.bf16.mxu1 %v12867_v12  ;;  %v4029_v63 = vmax.f32 %v3981_v0, 0.0 }
 0x574   :  { %v3980_v25 = vadd.f32 %v3932_v50, %v3884_v59  ;;  %v4027_v51 = vmax.f32 %v3979_v61, 0.0 }
 0x575   :  { %v4030_v62 = vmax.f32 %v3982_v30, 0.0  ;;  %v3891_v30 = vmul.f32 0.7768564, %v11244_v1 }
 0x576   :  { %v4028_v8 = vmax.f32 %v3980_v25, 0.0  ;;  %v8979_v42 = vpop.f32.mrb[212].mxu0  ;;  %4626 = vmatpush1.bf16.msra.mxu1 %v4070_v58  ;;  %v3888_v58 = vmul.f32 0.7768564, %v11227_v29 }
 0x577   :  { %v4072_v35 = vpack.c.bf16 %v4030_v62, %v4029_v63  ;;  %v3937_v45 = vmul.f32 0.22314355, %v8979_v42  ;;  %v3732_v39 = vpop.f32.mrb[213].mxu0  ;;  %4627 = vmatprep.subr.bf16.mxu1 %v12867_v12 }
 0x578   :  { %v4071_v37 = vpack.c.bf16 %v4028_v8, %v4027_v51  ;;  %v3935_v3 = vmul.f32 0.22314355, %v3732_v39  ;;  %v8980_v40 = vpop.f32.mrb[214].mxu0  ;;  %v3894_v51 = vmul.f32 0.7768564, %v11241_v43 }
 0x579   :  { %v3985_v38 = vadd.f32 %v3937_v45, %v3889_v34  ;;  %v3938_v36 = vmul.f32 0.22314355, %v8980_v40  ;;  %v3735_v5 = vpop.f32.mrb[215].mxu0  ;;  %v3897_v43 = vmul.f32 0.7768564, %v11256_v10 }
 0x57a   :  { %v3983_v6 = vadd.f32 %v3935_v3, %v3887_v48  ;;  %v3936_v27 = vmul.f32 0.22314355, %v3735_v5  ;;  %4628 = vmatpush1.bf16.msra.mxu1 %v4071_v37  ;;  %v3895_v5 = vmul.f32 0.7768564, %v11262_v15 }
 0x57b   :  { %v3986_v23 = vadd.f32 %v3938_v36, %v3890_v7  ;;  %4629 = vmatprep.subr.bf16.mxu1 %v12867_v12  ;;  %v4033_v0 = vmax.f32 %v3985_v38, 0.0 }
 0x57c   :  { %v3984_v46 = vadd.f32 %v3936_v27, %v3888_v58  ;;  %v4031_v49 = vmax.f32 %v3983_v6, 0.0 }
 0x57d   :  { %v4034_v4 = vmax.f32 %v3986_v23, 0.0  ;;  %v3898_v23 = vmul.f32 0.7768564, %v11259_v18  ;;  %v3901_v18 = vmul.f32 0.7768564, %v11272_v57 }
 0x57e   :  { %v4032_v41 = vmax.f32 %v3984_v46, 0.0  ;;  %v8983_v44 = vpop.f32.mrb[216].mxu0  ;;  %4630 = vmatpush1.bf16.msra.mxu1 %v4072_v35  ;;  %v3892_v35 = vmul.f32 0.7768564, %v11247_v56 }
 0x57f   :  { %v4074_v61 = vpack.c.bf16 %v4034_v4, %v4033_v0  ;;  %v3941_v59 = vmul.f32 0.22314355, %v8983_v44  ;;  %v3748_v50 = vpop.f32.mrb[217].mxu0  ;;  %4631 = vmatprep.subr.bf16.mxu1 %v12867_v12 }
 0x580   :  { %v4073_v29 = vpack.c.bf16 %v4032_v41, %v4031_v49  ;;  %v3939_v25 = vmul.f32 0.22314355, %v3748_v50  ;;  %v8984_v63 = vpop.f32.mrb[218].mxu0  ;;  %v3896_v49 = vmul.f32 0.7768564, %v11265_v21 }
 0x581   :  { %v3989_v62 = vadd.f32 %v3941_v59, %v3893_v60  ;;  %v3942_v8 = vmul.f32 0.22314355, %v8984_v63  ;;  %v3751_v42 = vpop.f32.mrb[219].mxu0  ;;  %v3899_v63 = vmul.f32 0.7768564, %v11278_v26 }
 0x582   :  { %v3987_v34 = vadd.f32 %v3939_v25, %v3891_v30  ;;  %v3940_v45 = vmul.f32 0.22314355, %v3751_v42  ;;  %4632 = vmatpush1.bf16.msra.mxu1 %v4073_v29  ;;  %v3902_v42 = vmul.f32 0.7768564, %v11275_v22  ;;  %v3905_v22 = vmul.f32 0.7768564, %v11288_v13 }
 0x583   :  { %v3990_v32 = vadd.f32 %v3942_v8, %v3894_v51  ;;  %4633 = vmatprep.subr.bf16.mxu1 %v12867_v12  ;;  %v4037_v37 = vmax.f32 %v3989_v62, 0.0 }
 0x584   :  { %v3988_v39 = vadd.f32 %v3940_v45, %v3892_v35  ;;  %v4035_v3 = vmax.f32 %v3987_v34, 0.0 }
 0x585   :  { %v4038_v48 = vmax.f32 %v3990_v32, 0.0  ;;  %v3900_v32 = vmul.f32 0.7768564, %v11281_v9 }
 0x586   :  { %v4036_v1 = vmax.f32 %v3988_v39, 0.0  ;;  %v8987_v40 = vpop.f32.mrb[220].mxu0  ;;  %4634 = vmatpush1.bf16.msra.mxu1 %v4074_v61 }
 0x587   :  { %v4076_v38 = vpack.c.bf16 %v4038_v48, %v4037_v37  ;;  %v3945_v7 = vmul.f32 0.22314355, %v8987_v40  ;;  %v3764_v36 = vpop.f32.mrb[221].mxu0  ;;  %4635 = vmatprep.subr.bf16.mxu1 %v12867_v12 }
 0x588   :  { %v4075_v56 = vpack.c.bf16 %v4036_v1, %v4035_v3  ;;  %v3943_v6 = vmul.f32 0.22314355, %v3764_v36  ;;  %v8988_v58 = vpop.f32.mrb[222].mxu0  ;;  %v3903_v36 = vmul.f32 0.7768564, %v11294_v16 }
 0x589   :  { %v3993_v27 = vadd.f32 %v3945_v7, %v3897_v43  ;;  %v3946_v46 = vmul.f32 0.22314355, %v8988_v58  ;;  %v3767_v0 = vpop.f32.mrb[223].mxu0  ;;  %v3906_v58 = vmul.f32 0.7768564, %v11291_v53 }
 0x58a   :  { %v3991_v4 = vadd.f32 %v3943_v6, %v3895_v5  ;;  %v3944_v41 = vmul.f32 0.22314355, %v3767_v0  ;;  %4636 = vmatpush1.bf16.msra.mxu1 %v4075_v56  ;;  %v3904_v0 = vmul.f32 0.7768564, %v11297_v28  ;;  %v3907_v28 = vmul.f32 0.7768564, %v11304_v52 }
 0x58b   :  { %v3994_v10 = vadd.f32 %v3946_v46, %v3898_v23  ;;  %4637 = vmatprep.subr.bf16.mxu1 %v12867_v12  ;;  %v4041_v61 = vmax.f32 %v3993_v27, 0.0  ;;  %v9611_v52 = vld [vmem:[%s12713_s0 + $0x1c] ss:$12 sps:$4 sm:$0xff]  }
 0x58c   :  { %v3992_v44 = vadd.f32 %v3944_v41, %v3896_v49  ;;  %v4039_v59 = vmax.f32 %v3991_v4, 0.0 }
 0x58d   :  { %v4042_v60 = vmax.f32 %v3994_v10, 0.0 }
 0x58e   :  { %v4040_v15 = vmax.f32 %v3992_v44, 0.0  ;;  %v8991_v50 = vpop.f32.mrb[224].mxu0  ;;  %4638 = vmatpush1.bf16.msra.mxu1 %v4076_v38 }
 0x58f   :  { %v4078_v29 = vpack.c.bf16 %v4042_v60, %v4041_v61  ;;  %v3949_v30 = vmul.f32 0.22314355, %v8991_v50  ;;  %v3780_v25 = vpop.f32.mrb[225].mxu0  ;;  %4639 = vmatprep.subr.bf16.mxu1 %v12867_v12 }
 0x590   :  { %v4077_v21 = vpack.c.bf16 %v4040_v15, %v4039_v59  ;;  %v3947_v62 = vmul.f32 0.22314355, %v3780_v25  ;;  %v8992_v51 = vpop.f32.mrb[226].mxu0  ;;  %v3909_v59 = vmul.f32 0.7768564, %v11312_v33 }
 0x591   :  { %v3997_v8 = vadd.f32 %v3949_v30, %v3901_v18  ;;  %v3950_v34 = vmul.f32 0.22314355, %v8992_v51  ;;  %v3783_v35 = vpop.f32.mrb[227].mxu0  ;;  %v9608_v25 = vld [vmem:[%s12713_s0] ss:$12 sps:$4 sm:$0xff]  }
 0x592   :  { %v3995_v45 = vadd.f32 %v3947_v62, %v3899_v63  ;;  %v3948_v39 = vmul.f32 0.22314355, %v3783_v35  ;;  %4640 = vmatpush1.bf16.msra.mxu1 %v4077_v21  ;;  %v3908_v51 = vmul.f32 0.7768564, %v11307_v31  ;;  %v9614_v31 = vld [vmem:[%s12713_s0 + $0x34] ss:$12 sps:$4 sm:$0xff]  }
 0x593   :  { %v3998_v57 = vadd.f32 %v3950_v34, %v3902_v42  ;;  %4641 = vmatprep.subr.bf16.mxu1 %v12867_v12  ;;  %v4045_v48 = vmax.f32 %v3997_v8, 0.0 }
 0x594   :  { %v3996_v37 = vadd.f32 %v3948_v39, %v3900_v32  ;;  %v4043_v1 = vmax.f32 %v3995_v45, 0.0 }
 0x595   :  { %v4046_v3 = vmax.f32 %v3998_v57, 0.0 }
 0x596   :  { %v4044_v26 = vmax.f32 %v3996_v37, 0.0  ;;  %v8995_v40 = vpop.f32.mrb[228].mxu0  ;;  %4642 = vmatpush1.bf16.msra.mxu1 %v4078_v29  ;;  %v3910_v29 = vmul.f32 0.7768564, %v11315_v24  ;;  %v9613_v37 = vld [vmem:[%s12713_s0 + $0x18] ss:$12 sps:$4 sm:$0xff]  }
 0x597   :  { %v4080_v38 = vpack.c.bf16 %v4046_v3, %v4045_v48  ;;  %v3953_v43 = vmul.f32 0.22314355, %v8995_v40  ;;  %v3796_v7 = vpop.f32.mrb[229].mxu0  ;;  %4643 = vmatprep.subr.bf16.mxu1 %v12867_v12  ;;  %v3913_v3 = vmul.f32 0.7768564, %v11328_v2 }
 0x598   :  { %v4079_v9 = vpack.c.bf16 %v4044_v26, %v4043_v1  ;;  %v3951_v56 = vmul.f32 0.22314355, %v3796_v7  ;;  %v8996_v5 = vpop.f32.mrb[230].mxu0  ;;  %v3911_v1 = vmul.f32 0.7768564, %v11320_v54  ;;  %v12916_v54 = vld [vmem:[#allocation34_spill] sm:$0xff] }
 0x599   :  { %v4001_v6 = vadd.f32 %v3953_v43, %v3905_v22  ;;  %v3954_v27 = vmul.f32 0.22314355, %v8996_v5  ;;  %v3799_v23 = vpop.f32.mrb[231].mxu0  ;;  %v9617_v2 = vld [vmem:[%s12713_s0 + $0x4c] ss:$12 sps:$4 sm:$0xff]  }
 0x59a   :  { %v3999_v46 = vadd.f32 %v3951_v56, %v3903_v36  ;;  %v3952_v4 = vmul.f32 0.22314355, %v3799_v23  ;;  %4644 = vmatpush1.bf16.msra.mxu1 %v4079_v9  ;;  %v9616_v9 = vld [vmem:[%s12713_s0 + $0x30] ss:$12 sps:$4 sm:$0xff]  }
 0x59b   :  { %v4002_v13 = vadd.f32 %v3954_v27, %v3906_v58  ;;  %4645 = vmatprep.subr.bf16.mxu1 %v12867_v12  ;;  %v4049_v41 = vmax.f32 %v4001_v6, 0.0  ;;  %v3912_v58 = vmul.f32 0.7768564, %v12916_v54 }
 0x59c   :  { %v4000_v49 = vadd.f32 %v3952_v4, %v3904_v0  ;;  %v4047_v44 = vmax.f32 %v3999_v46, 0.0 }
 0x59d   :  { %v4050_v10 = vmax.f32 %v4002_v13, 0.0 }
 0x59e   :  { %v4048_v16 = vmax.f32 %v4000_v49, 0.0  ;;  %4646 = vmatpush1.bf16.msra.mxu1 %v4080_v38  ;;  %v12915_v38 = vld [vmem:[#allocation45_spill] sm:$0xff] }
 0x59f   :  { %v4082_v61 = vpack.c.bf16 %v4050_v10, %v4049_v41  ;;  %4647 = vmatprep.subr.bf16.mxu1 %v12867_v12  ;;  %v3914_v22 = vmul.f32 0.7768564, %v12915_v38 }
 0x5a0   :  { %v4081_v53 = vpack.c.bf16 %v4048_v16, %v4047_v44  ;;  %v9619_v44 = vld [vmem:[%s12713_s0 + $0x48] ss:$12 sps:$4 sm:$0xff]   ;;  %v9620_v16 = vld [vmem:[%s12713_s0 + $0x64] ss:$12 sps:$4 sm:$0xff]  }
 0x5a2   :  { %4648 = vmatpush1.bf16.msra.mxu1 %v4081_v53  ;;  %v3917_v53 = vmul.f32 0.7768564, %v11344_v19  ;;  %v9623_v19 = vld [vmem:[%s12713_s0 + $0x7c] ss:$12 sps:$4 sm:$0xff]  }
 0x5a3   :  { %v8999_v60 = vpop.f32.mrb[232].mxu0  ;;  %4649 = vmatprep.subr.bf16.mxu1 %v12867_v12 }
 0x5a4   :  { %v3957_v15 = vmul.f32 0.22314355, %v8999_v60  ;;  %v3812_v50 = vpop.f32.mrb[233].mxu0  ;;  %v3915_v60 = vmul.f32 0.7768564, %v11336_v20 }
 0x5a5   :  { %v3955_v18 = vmul.f32 0.22314355, %v3812_v50  ;;  %v9000_v30 = vpop.f32.mrb[234].mxu0  ;;  %v3916_v20 = vmul.f32 0.7768564, %v11339_v11 }
 0x5a6   :  { %v4005_v21 = vadd.f32 %v3957_v15, %v3909_v59  ;;  %v3958_v63 = vmul.f32 0.22314355, %v9000_v30  ;;  %v3815_v62 = vpop.f32.mrb[235].mxu0  ;;  %4650 = vmatpush1.bf16.msra.mxu1 %v4082_v61  ;;  %v3918_v15 = vmul.f32 0.7768564, %v11347_v47 }
 0x5a7   :  { %v4003_v33 = vadd.f32 %v3955_v18, %v3907_v28  ;;  %v3956_v8 = vmul.f32 0.22314355, %v3815_v62  ;;  %6343 = vmatprep.subr.bf16.mxu1 %v12867_v12  ;;  %v9622_v18 = vld [vmem:[%s12713_s0 + $0x60] ss:$12 sps:$4 sm:$0xff]  }
 0x5a8   :  { %v4006_v24 = vadd.f32 %v3958_v63, %v3910_v29  ;;  %v4053_v34 = vmax.f32 %v4005_v21, 0.0 }
 0x5a9   :  { %v4004_v42 = vadd.f32 %v3956_v8, %v3908_v51  ;;  %4652 = vmatmul.mubr.bf16.vlgmr.msra.gmra.mrb[184].mxu1 %v9608_v25  ;;  %v4051_v45 = vmax.f32 %v4003_v33, 0.0 }
 0x5aa   :  { %v4054_v35 = vmax.f32 %v4006_v24, 0.0  ;;  %4659 = vmatprep.mubr.bf16.mxu1 %v9611_v52 }
 0x5ab   :  { %v4052_v32 = vmax.f32 %v4004_v42, 0.0 }
 0x5ac   :  { %v4084_v39 = vpack.c.bf16 %v4054_v35, %v4053_v34  ;;  %v9625_v35 = vld [vmem:[%s12713_s0 + $0x78] ss:$12 sps:$4 sm:$0xff]  }
 0x5ad   :  { %v4083_v57 = vpack.c.bf16 %v4052_v32, %v4051_v45  ;;  %v9626_v45 = vld [vmem:[%s12713_s0 + $0x94] ss:$12 sps:$4 sm:$0xff]   ;;  %v3921_v32 = vmul.f32 0.7768564, %v11360_v14  ;;  %v9629_v14 = vld [vmem:[%s12713_s0 + $0xac] ss:$12 sps:$4 sm:$0xff]  }
 0x5af   :  { %9013 = vmatprep.subr.bf16.mxu0 %v4083_v57 }
 0x5b0   :  { %9014 = vmatpush3.bf16.msra.mxu0 %v4083_v57 }
 0x5b1   :  { %4660 = vmatmul.mubr.bf16.gmra.mrb[188].mxu1 %v9613_v37  ;;  %9015 = vmatprep.subr.bf16.mxu0 %v4084_v39 }
 0x5b2   :  { %4667 = vmatprep.mubr.bf16.mxu1 %v9614_v31  ;;  %v3922_v31 = vmul.f32 0.7768564, %v11363_v17 }
 0x5b3   :  { %v9003_v48 = vpop.f32.mrb[236].mxu0 }
 0x5b4   :  { %v3961_v26 = vmul.f32 0.22314355, %v9003_v48  ;;  %v3828_v40 = vpop.f32.mrb[237].mxu0  ;;  %9016 = vmatpush3.bf16.msra.mxu0 %v4084_v39  ;;  %v3919_v39 = vmul.f32 0.7768564, %v11352_v55  ;;  %v12917_v55 = vld [vmem:[#allocation47_spill] sm:$0xff] }
 0x5b5   :  { %v3959_v43 = vmul.f32 0.22314355, %v3828_v40  ;;  %v9004_v7 = vpop.f32.mrb[238].mxu0 }
 0x5b6   :  { %v4009_v36 = vadd.f32 %v3961_v26, %v3913_v3  ;;  %v3962_v56 = vmul.f32 0.22314355, %v9004_v7  ;;  %v3831_v5 = vpop.f32.mrb[239].mxu0 }
 0x5b7   :  { %v4007_v6 = vadd.f32 %v3959_v43, %v3911_v1  ;;  %v3960_v27 = vmul.f32 0.22314355, %v3831_v5  ;;  %v9628_v1 = vld [vmem:[%s12713_s0 + $0x90] ss:$12 sps:$4 sm:$0xff]   ;;  %v3920_v43 = vmul.f32 0.7768564, %v12917_v55 }
 0x5b8   :  { %v4010_v23 = vadd.f32 %v3962_v56, %v3914_v22  ;;  %v4057_v0 = vmax.f32 %v4009_v36, 0.0  ;;  %v9700_v55 = vld [vmem:[%s12713_s0 + $0x230] ss:$12 sps:$4 sm:$0xff]  }
 0x5b9   :  { %v4008_v46 = vadd.f32 %v3960_v27, %v3912_v58  ;;  %4668 = vmatmul.mubr.bf16.gmra.mrb[192].mxu1 %v9616_v9  ;;  %v4055_v13 = vmax.f32 %v4007_v6, 0.0  ;;  %v9631_v58 = vld [vmem:[%s12713_s0 + $0xa8] ss:$12 sps:$4 sm:$0xff]   ;;  %v9634_v27 = vld [vmem:[%s12713_s0 + $0xc4] ss:$12 sps:$4 sm:$0xff]  }
 0x5ba   :  { %v4058_v4 = vmax.f32 %v4010_v23, 0.0  ;;  %4675 = vmatprep.mubr.bf16.mxu1 %v9617_v2  ;;  %v9704_v23 = vld [vmem:[%s12715_s4 + $0x80] sm:$0xff]  }
 0x5bb   :  { %v4056_v49 = vmax.f32 %v4008_v46, 0.0  ;;  %v9633_v46 = vld [vmem:[%s12713_s0 + $0x20] ss:$12 sps:$4 sm:$0xff]  }
 0x5bc   :  { %v4086_v41 = vpack.c.bf16 %v4058_v4, %v4057_v0  ;;  %v9637_v0 = vld [vmem:[%s12713_s0 + $0x38] ss:$12 sps:$4 sm:$0xff]   ;;  %v9636_v4 = vld [vmem:[%s12713_s0 + $0xc0] ss:$12 sps:$4 sm:$0xff]  }
 0x5bd   :  { %v4085_v10 = vpack.c.bf16 %v4056_v49, %v4055_v13  ;;  %v9705_v13 = vld [vmem:[%s12715_s4 + $0x88] sm:$0xff]  }
 0x5be   :  { %v9639_v49 = vld [vmem:[%s12713_s0 + $0xdc] ss:$12 sps:$4 sm:$0xff]  }
 0x5bf   :  { %9017 = vmatprep.subr.bf16.mxu0 %v4085_v10 }
 0x5c0   :  { %9018 = vmatpush3.bf16.msra.mxu0 %v4085_v10  ;;  %v9638_v10 = vld [vmem:[%s12713_s0 + $0x50] ss:$12 sps:$4 sm:$0xff]  }
 0x5c1   :  { %4676 = vmatmul.mubr.bf16.gmra.mrb[196].mxu1 %v9619_v44  ;;  %9019 = vmatprep.subr.bf16.mxu0 %v4086_v41  ;;  %v9642_v44 = vld [vmem:[%s12713_s0 + $0x68] ss:$12 sps:$4 sm:$0xff]  }
 0x5c2   :  { %4683 = vmatprep.mubr.bf16.mxu1 %v9620_v16  ;;  %v9641_v16 = vld [vmem:[%s12713_s0 + $0xd8] ss:$12 sps:$4 sm:$0xff]  }
 0x5c3   :  { %v9007_v61 = vpop.f32.mrb[240].mxu0 }
 0x5c4   :  { %v3965_v59 = vmul.f32 0.22314355, %v9007_v61  ;;  %v3844_v28 = vpop.f32.mrb[241].mxu0  ;;  %9020 = vmatpush3.bf16.msra.mxu0 %v4086_v41  ;;  %v9706_v41 = vld [vmem:[%s12715_s4 + $0x90] sm:$0xff]  }
 0x5c5   :  { %v3963_v50 = vmul.f32 0.22314355, %v3844_v28  ;;  %v9008_v29 = vpop.f32.mrb[242].mxu0  ;;  %v9644_v61 = vld [vmem:[%s12713_s0 + $0xf4] ss:$12 sps:$4 sm:$0xff]  }
 0x5c6   :  { %v4013_v30 = vadd.f32 %v3965_v59, %v3917_v53  ;;  %v3966_v25 = vmul.f32 0.22314355, %v9008_v29  ;;  %v3847_v21 = vpop.f32.mrb[243].mxu0  ;;  %v9643_v53 = vld [vmem:[%s12713_s0 + $0x80] ss:$12 sps:$4 sm:$0xff]  }
 0x5c7   :  { %v4011_v63 = vadd.f32 %v3963_v50, %v3915_v60  ;;  %v3964_v62 = vmul.f32 0.22314355, %v3847_v21  ;;  %v9647_v60 = vld [vmem:[%s12713_s0 + $0x98] ss:$12 sps:$4 sm:$0xff]   ;;  %v9646_v59 = vld [vmem:[%s12713_s0 + $0xf0] ss:$12 sps:$4 sm:$0xff]  }
 0x5c8   :  { %v4014_v52 = vadd.f32 %v3966_v25, %v3918_v15  ;;  %v4061_v47 = vmax.f32 %v4013_v30, 0.0  ;;  %v9649_v28 = vld [vmem:[%s12713_s0 + $0x10c] ss:$12 sps:$4 sm:$0xff]   ;;  %v9648_v15 = vld [vmem:[%s12713_s0 + $0xb0] ss:$12 sps:$4 sm:$0xff]   ;;  %v9708_v25 = vld [vmem:[%s12715_s4 + $0xa0] sm:$0xff]  }
 0x5c9   :  { %v4012_v33 = vadd.f32 %v3964_v62, %v3916_v20  ;;  %4684 = vmatmul.mubr.bf16.gmra.mrb[200].mxu1 %v9622_v18  ;;  %v4059_v8 = vmax.f32 %v4011_v63, 0.0  ;;  %v9652_v50 = vld [vmem:[%s12713_s0 + $0xc8] ss:$12 sps:$4 sm:$0xff]   ;;  %v9654_v18 = vld [vmem:[%s12713_s0 + $0x124] ss:$12 sps:$4 sm:$0xff]   ;;  %v9707_v30 = vld [vmem:[%s12715_s4 + $0x98] sm:$0xff]  }
 0x5ca   :  { %v4062_v51 = vmax.f32 %v4014_v52, 0.0  ;;  %4691 = vmatprep.mubr.bf16.mxu1 %v9623_v19  ;;  %v9651_v29 = vld [vmem:[%s12713_s0 + $0x108] ss:$12 sps:$4 sm:$0xff]   ;;  %v9653_v21 = vld [vmem:[%s12713_s0 + $0xe0] ss:$12 sps:$4 sm:$0xff]  }
 0x5cb   :  { %v4060_v24 = vmax.f32 %v4012_v33, 0.0  ;;  %v9657_v19 = vld [vmem:[%s12713_s0 + $0xf8] ss:$12 sps:$4 sm:$0xff]   ;;  %v9656_v63 = vld [vmem:[%s12713_s0 + $0x120] ss:$12 sps:$4 sm:$0xff]  }
 0x5cc   :  { %v4088_v42 = vpack.c.bf16 %v4062_v51, %v4061_v47  ;;  %v9659_v20 = vld [vmem:[%s12713_s0 + $0x13c] ss:$12 sps:$4 sm:$0xff]   ;;  %v9661_v33 = vld [vmem:[%s12713_s0 + $0x138] ss:$12 sps:$4 sm:$0xff]   ;;  %v9664_v47 = vld [vmem:[%s12713_s0 + $0x154] ss:$12 sps:$4 sm:$0xff]  }
 0x5cd   :  { %v4087_v34 = vpack.c.bf16 %v4060_v24, %v4059_v8  ;;  %v9658_v62 = vld [vmem:[%s12713_s0 + $0x110] ss:$12 sps:$4 sm:$0xff]   ;;  %v9662_v52 = vld [vmem:[%s12713_s0 + $0x128] ss:$12 sps:$4 sm:$0xff]   ;;  %v9663_v51 = vld [vmem:[%s12713_s0 + $0x140] ss:$12 sps:$4 sm:$0xff]  }
 0x5ce   :  { %v9667_v8 = vld [vmem:[%s12713_s0 + $0x158] ss:$12 sps:$4 sm:$0xff]   ;;  %v9666_v24 = vld [vmem:[%s12713_s0 + $0x150] ss:$12 sps:$4 sm:$0xff]  }
 0x5cf   :  { %9021 = vmatprep.subr.bf16.mxu0 %v4087_v34 }
 0x5d0   :  { %9022 = vmatpush3.bf16.msra.mxu0 %v4087_v34  ;;  %v9668_v34 = vld [vmem:[%s12713_s0 + $0x170] ss:$12 sps:$4 sm:$0xff]  }
 0x5d1   :  { %4692 = vmatmul.mubr.bf16.gmra.mrb[204].mxu1 %v9625_v35  ;;  %9023 = vmatprep.subr.bf16.mxu0 %v4088_v42  ;;  %v9672_v35 = vld [vmem:[%s12713_s0 + $0x188] ss:$12 sps:$4 sm:$0xff]  }
 0x5d2   :  { %4699 = vmatprep.mubr.bf16.mxu1 %v9626_v45  ;;  %v9671_v45 = vld [vmem:[%s12713_s0 + $0x168] ss:$12 sps:$4 sm:$0xff]  }
 0x5d3   :  { %v9011_v11 = vpop.f32.mrb[244].mxu0 }
 0x5d4   :  { %v3969_v57 = vmul.f32 0.22314355, %v9011_v11  ;;  %v3860_v37 = vpop.f32.mrb[245].mxu0  ;;  %9024 = vmatpush3.bf16.msra.mxu0 %v4088_v42  ;;  %v9669_v42 = vld [vmem:[%s12713_s0 + $0x16c] ss:$12 sps:$4 sm:$0xff]  }
 0x5d5   :  { %v3967_v48 = vmul.f32 0.22314355, %v3860_v37  ;;  %v9012_v3 = vpop.f32.mrb[246].mxu0  ;;  %v9673_v11 = vld [vmem:[%s12713_s0 + $0x184] ss:$12 sps:$4 sm:$0xff]  }
 0x5d6   :  { %v4017_v26 = vadd.f32 %v3969_v57, %v3921_v32  ;;  %v3970_v40 = vmul.f32 0.22314355, %v9012_v3  ;;  %v3863_v38 = vpop.f32.mrb[247].mxu0  ;;  %v9675_v32 = vld [vmem:[%s12713_s0 + $0x1a0] ss:$12 sps:$4 sm:$0xff]  }
 0x5d7   :  { %v4015_v22 = vadd.f32 %v3967_v48, %v3919_v39  ;;  %v3968_v7 = vmul.f32 0.22314355, %v3863_v38  ;;  %v9680_v39 = vld [vmem:[%s12713_s0 + $0x1b8] ss:$12 sps:$4 sm:$0xff]   ;;  %v9676_v57 = vld [vmem:[%s12713_s0 + $0x180] ss:$12 sps:$4 sm:$0xff]  }
 0x5d8   :  { %v4018_v9 = vadd.f32 %v3970_v40, %v3922_v31  ;;  %v4065_v17 = vmax.f32 %v4017_v26, 0.0  ;;  %v9677_v37 = vld [vmem:[%s12713_s0 + $0x19c] ss:$12 sps:$4 sm:$0xff]   ;;  %v9679_v3 = vld [vmem:[%s12713_s0 + $0x198] ss:$12 sps:$4 sm:$0xff]  }
 0x5d9   :  { %v4016_v36 = vadd.f32 %v3968_v7, %v3920_v43  ;;  %4700 = vmatmul.mubr.bf16.gmra.mrb[208].mxu1 %v9628_v1  ;;  %v4063_v5 = vmax.f32 %v4015_v22, 0.0  ;;  %v9684_v31 = vld [vmem:[%s12713_s0 + $0x1d0] ss:$12 sps:$4 sm:$0xff]   ;;  %v9691_v48 = vld [vmem:[%s12713_s0 + $0x1e8] ss:$12 sps:$4 sm:$0xff]  }
 0x5da   :  { %v4066_v56 = vmax.f32 %v4018_v9, 0.0  ;;  %4707 = vmatprep.mubr.bf16.mxu1 %v9629_v14  ;;  %v9683_v1 = vld [vmem:[%s12713_s0 + $0x1b4] ss:$12 sps:$4 sm:$0xff]   ;;  %v9699_v40 = vld [vmem:[%s12713_s0 + $0x218] ss:$12 sps:$4 sm:$0xff]   ;;  %v9709_v22 = vld [vmem:[%s12715_s4 + $0xa8] sm:$0xff]  }
 0x5db   :  { %v4064_v2 = vmax.f32 %v4016_v36, 0.0  ;;  %v9692_v26 = vld [vmem:[%s12713_s0 + $0x200] ss:$12 sps:$4 sm:$0xff]   ;;  %v9681_v38 = vld [vmem:[%s12713_s0 + $0x1b0] ss:$12 sps:$4 sm:$0xff]  }
 0x5dc   :  { %v4090_v6 = vpack.c.bf16 %v4066_v56, %v4065_v17  ;;  %v9687_v14 = vld [vmem:[%s12713_s0 + $0x1cc] ss:$12 sps:$4 sm:$0xff]   ;;  %v9685_v43 = vld [vmem:[%s12713_s0 + $0x1c8] ss:$12 sps:$4 sm:$0xff]   ;;  %v9690_v9 = vld [vmem:[%s12713_s0 + $0x1e4] ss:$12 sps:$4 sm:$0xff]  }
 0x5dd   :  { %v4089_v54 = vpack.c.bf16 %v4064_v2, %v4063_v5  ;;  %v9710_v7 = vld [vmem:[%s12715_s4 + $0xb0] sm:$0xff]   ;;  %v9711_v36 = vld [vmem:[%s12715_s4 + $0xb8] sm:$0xff]   ;;  %v9688_v17 = vld [vmem:[%s12713_s0 + $0x1e0] ss:$12 sps:$4 sm:$0xff]  }
 0x5de   :  { %v9695_v56 = vld [vmem:[%s12713_s0 + $0x1fc] ss:$12 sps:$4 sm:$0xff]   ;;  %v9693_v5 = vld [vmem:[%s12713_s0 + $0x1f8] ss:$12 sps:$4 sm:$0xff]   ;;  %v9698_v2 = vld [vmem:[%s12713_s0 + $0x214] ss:$12 sps:$4 sm:$0xff]  }
 0x5df   :  { %9025 = vmatprep.subr.bf16.mxu0 %v4089_v54 }
 0x5e0   :  { %9026 = vmatpush3.bf16.msra.mxu0 %v4089_v54  ;;  %v9703_v54 = vld [vmem:[%s12713_s0 + $0x22c] ss:$12 sps:$4 sm:$0xff]  }
 0x5e1   :  { %4708 = vmatmul.mubr.bf16.gmra.mrb[212].mxu1 %v9631_v58  ;;  %9027 = vmatprep.subr.bf16.mxu0 %v4090_v6  ;;  %v9701_v58 = vld [vmem:[%s12713_s0 + $0x228] ss:$12 sps:$4 sm:$0xff]  }
 0x5e2   :  { %4715 = vmatprep.mubr.bf16.mxu1 %v9634_v27 }
 0x5e4   :  { %9028 = vmatpush3.bf16.msra.mxu0 %v4090_v6  ;;  %v9696_v6 = vld [vmem:[%s12713_s0 + $0x210] ss:$12 sps:$4 sm:$0xff]  }
 0x5e5   :  { %9077 = vmatprep.subr.bf16.mxu0 %v9704_v23 }
 0x5e7   :  { %9030 = vmatmul.mubr.bf16.vlgmr.msra.gmra.mrb[248].mxu0 %v9633_v46 }
 0x5e8   :  { %9033 = vmatprep.mubr.bf16.mxu0 %v9637_v0  ;;  %9078 = vmatpush3.bf16.msra.mxu0 %v9704_v23 }
 0x5e9   :  { %4716 = vmatmul.mubr.bf16.gmra.mrb[216].mxu1 %v9636_v4  ;;  %9079 = vmatprep.subr.bf16.mxu0 %v9705_v13 }
 0x5ea   :  { %4723 = vmatprep.mubr.bf16.mxu1 %v9639_v49 }
 0x5ec   :  { %9080 = vmatpush3.bf16.msra.mxu0 %v9705_v13 }
 0x5ed   :  { %9081 = vmatprep.subr.bf16.mxu0 %v9706_v41 }
 0x5ef   :  { %9034 = vmatmul.mubr.bf16.gmra.mrb[252].mxu0 %v9638_v10 }
 0x5f0   :  { %9037 = vmatprep.mubr.bf16.mxu0 %v9642_v44  ;;  %9082 = vmatpush3.bf16.msra.mxu0 %v9706_v41 }
 0x5f1   :  { %4724 = vmatmul.mubr.bf16.gmra.mrb[220].mxu1 %v9641_v16  ;;  %9083 = vmatprep.subr.bf16.mxu0 %v9707_v30 }
 0x5f2   :  { %4731 = vmatprep.mubr.bf16.mxu1 %v9644_v61 }
 0x5f4   :  { %9084 = vmatpush3.bf16.msra.mxu0 %v9707_v30 }
 0x5f5   :  { %9085 = vmatprep.subr.bf16.mxu0 %v9708_v25 }
 0x5f7   :  { %9038 = vmatmul.mubr.bf16.gmra.mrb[0].mxu0 %v9643_v53 }
 0x5f8   :  { %9041 = vmatprep.mubr.bf16.mxu0 %v9647_v60  ;;  %9086 = vmatpush3.bf16.msra.mxu0 %v9708_v25 }
 0x5f9   :  { %4732 = vmatmul.mubr.bf16.gmra.mrb[224].mxu1 %v9646_v59  ;;  %9087 = vmatprep.subr.bf16.mxu0 %v9709_v22 }
 0x5fa   :  { %4739 = vmatprep.mubr.bf16.mxu1 %v9649_v28 }
 0x5fc   :  { %9088 = vmatpush3.bf16.msra.mxu0 %v9709_v22  ;;  %v12919_v22 = vld [vmem:[#allocation5_spill] sm:$0xff] }
 0x5fd   :  { %9089 = vmatprep.subr.bf16.mxu0 %v9710_v7 }
 0x5ff   :  { %9042 = vmatmul.mubr.bf16.gmra.mrb[4].mxu0 %v9648_v15 }
 0x600   :  { %9045 = vmatprep.mubr.bf16.mxu0 %v9652_v50  ;;  %9090 = vmatpush3.bf16.msra.mxu0 %v9710_v7 }
 0x601   :  { %4740 = vmatmul.mubr.bf16.gmra.mrb[228].mxu1 %v9651_v29  ;;  %9091 = vmatprep.subr.bf16.mxu0 %v9711_v36 }
 0x602   :  { %4747 = vmatprep.mubr.bf16.mxu1 %v9654_v18 }
 0x604   :  { %9092 = vmatpush3.bf16.msra.mxu0 %v9711_v36 }
 0x607   :  { %9046 = vmatmul.mubr.bf16.gmra.mrb[8].mxu0 %v9653_v21 }
 0x608   :  { %9049 = vmatprep.mubr.bf16.mxu0 %v9657_v19 }
 0x609   :  { %4748 = vmatmul.mubr.bf16.gmra.mrb[232].mxu1 %v9656_v63 }
 0x60a   :  { %4755 = vmatprep.mubr.bf16.mxu1 %v9659_v20 }
 0x60f   :  { %9050 = vmatmul.mubr.bf16.gmra.mrb[12].mxu0 %v9658_v62 }
 0x610   :  { %9053 = vmatprep.mubr.bf16.mxu0 %v9662_v52 }
 0x611   :  { %4756 = vmatmul.mubr.bf16.gmra.mrb[236].mxu1 %v9661_v33 }
 0x612   :  { %4763 = vmatprep.mubr.bf16.mxu1 %v9664_v47 }
 0x617   :  { %9054 = vmatmul.mubr.bf16.gmra.mrb[16].mxu0 %v9663_v51 }
 0x618   :  { %9057 = vmatprep.mubr.bf16.mxu0 %v9667_v8 }
 0x619   :  { %4764 = vmatmul.mubr.bf16.gmra.mrb[240].mxu1 %v9666_v24 }
 0x61a   :  { %4771 = vmatprep.mubr.bf16.mxu1 %v9669_v42 }
 0x61f   :  { %9058 = vmatmul.mubr.bf16.gmra.mrb[20].mxu0 %v9668_v34 }
 0x620   :  { %9061 = vmatprep.mubr.bf16.mxu0 %v9672_v35 }
 0x621   :  { %4772 = vmatmul.mubr.bf16.gmra.mrb[244].mxu1 %v9671_v45 }
 0x622   :  { %4779 = vmatprep.mubr.bf16.mxu1 %v9673_v11 }
 0x627   :  { %9062 = vmatmul.mubr.bf16.gmra.mrb[24].mxu0 %v9675_v32 }
 0x628   :  { %9065 = vmatprep.mubr.bf16.mxu0 %v9680_v39 }
 0x629   :  { %4780 = vmatmul.mubr.bf16.gmra.mrb[248].mxu1 %v9676_v57 }
 0x62a   :  { %4787 = vmatprep.mubr.bf16.mxu1 %v9677_v37 }
 0x62f   :  { %9066 = vmatmul.mubr.bf16.gmra.mrb[28].mxu0 %v9684_v31 }
 0x630   :  { %9069 = vmatprep.mubr.bf16.mxu0 %v9691_v48 }
 0x631   :  { %4788 = vmatmul.mubr.bf16.gmra.mrb[252].mxu1 %v9679_v3 }
 0x632   :  { %4795 = vmatprep.mubr.bf16.mxu1 %v9683_v1 }
 0x637   :  { %9070 = vmatmul.mubr.bf16.gmra.mrb[32].mxu0 %v9692_v26 }
 0x638   :  { %9073 = vmatprep.mubr.bf16.mxu0 %v9699_v40 }
 0x639   :  { %4796 = vmatmul.mubr.bf16.gmra.mrb[0].mxu1 %v9681_v38  ;;  %v12918_v38 = vld [vmem:[#allocation4_spill] sm:$0xff] }
 0x63a   :  { %4803 = vmatprep.mubr.bf16.mxu1 %v9687_v14 }
 0x63f   :  { %9074 = vmatmul.mubr.bf16.gmra.mrb[36].mxu0 %v9700_v55 }
 0x641   :  { %4804 = vmatmul.mubr.bf16.gmra.mrb[4].mxu1 %v9685_v43  ;;  %v12920_v43 = vld [vmem:[#allocation6_spill] sm:$0xff] }
 0x642   :  { %4811 = vmatprep.mubr.bf16.mxu1 %v9690_v9  ;;  %v12921_v9 = vld [vmem:[#allocation7_spill] sm:$0xff] }
 0x649   :  { %4812 = vmatmul.mubr.bf16.gmra.mrb[8].mxu1 %v9688_v17 }
 0x64a   :  { %4819 = vmatprep.mubr.bf16.mxu1 %v9695_v56 }
 0x651   :  { %4820 = vmatmul.mubr.bf16.gmra.mrb[12].mxu1 %v9693_v5 }
 0x652   :  { %4827 = vmatprep.mubr.bf16.mxu1 %v9698_v2 }
 0x659   :  { %4828 = vmatmul.mubr.bf16.gmra.mrb[16].mxu1 %v9696_v6 }
 0x65a   :  { %4835 = vmatprep.mubr.bf16.mxu1 %v9703_v54 }
 0x661   :  { %4836 = vmatmul.mubr.bf16.gmra.mrb[20].mxu1 %v9701_v58 }
 0x67c   :  { %v4653_v27 = vpop.f32.mrb[184].mxu1 }
 0x67d   :  { %v4655_v23 = vpop.f32.mrb[185].mxu1 }
 0x67e   :  { %v4656_v46 = vpop.f32.mrb[186].mxu1 }
 0x67f   :  { %v4658_v0 = vpop.f32.mrb[187].mxu1 }
 0x684   :  { %v4661_v4 = vpop.f32.mrb[188].mxu1 }
 0x685   :  { %v4663_v13 = vpop.f32.mrb[189].mxu1 }
 0x686   :  { %v4664_v49 = vpop.f32.mrb[190].mxu1 }
 0x687   :  { %v4666_v41 = vpop.f32.mrb[191].mxu1 }
 0x68c   :  { %v4669_v10 = vpop.f32.mrb[192].mxu1 }
 0x68d   :  { %v4671_v44 = vpop.f32.mrb[193].mxu1 }
 0x68e   :  { %v4672_v16 = vpop.f32.mrb[194].mxu1 }
 0x68f   :  { %v4674_v61 = vpop.f32.mrb[195].mxu1 }
 0x694   :  { %v4677_v53 = vpop.f32.mrb[196].mxu1 }
 0x695   :  { %v4679_v60 = vpop.f32.mrb[197].mxu1 }
 0x696   :  { %v4680_v59 = vpop.f32.mrb[198].mxu1 }
 0x697   :  { %v4682_v28 = vpop.f32.mrb[199].mxu1 }
 0x698   :  { %v12923_v28 = vld [vmem:[#allocation9_spill] sm:$0xff] }
 0x69c   :  { %v11671_v15 = vpop.f32.mrb[200].mxu1 }
 0x69d   :  { %v4687_v50 = vpop.f32.mrb[201].mxu1 }
 0x69e   :  { %v11673_v29 = vpop.f32.mrb[202].mxu1 }
 0x69f   :  { %v4690_v18 = vpop.f32.mrb[203].mxu1 }
 0x6a0   :  { %v12924_v18 = vld [vmem:[#allocation10_spill] sm:$0xff] }
 0x6a4   :  { %v4693_v30 = vpop.f32.mrb[204].mxu1 }
 0x6a5   :  { %v4695_v25 = vpop.f32.mrb[205].mxu1 }
 0x6a6   :  { %v11675_v21 = vpop.f32.mrb[206].mxu1 }
 0x6a7   :  { %v4698_v19 = vpop.f32.mrb[207].mxu1 }
 0x6ac   :  { %v11677_v63 = vpop.f32.mrb[208].mxu1 }
 0x6ad   :  { %v4703_v20 = vpop.f32.mrb[209].mxu1 }
 0x6ae   :  { %v11679_v62 = vpop.f32.mrb[210].mxu1 }
 0x6af   :  { %v4706_v52 = vpop.f32.mrb[211].mxu1 }
 0x6b4   :  { %v11681_v33 = vpop.f32.mrb[212].mxu1 }
 0x6b5   :  { %v4711_v47 = vpop.f32.mrb[213].mxu1 }
 0x6b6   :  { %v11683_v51 = vpop.f32.mrb[214].mxu1 }
 0x6b7   :  { %v4714_v8 = vpop.f32.mrb[215].mxu1 }
 0x6ba   :  { %v9031_v24 = vpop.f32.mrb[248].mxu0 }
 0x6bb   :  { %v4887_v42 = vadd.f32 %v9031_v24, %v4661_v4  ;;  %v4878_v34 = vpop.f32.mrb[249].mxu0 }
 0x6bc   :  { %v4879_v35 = vadd.f32 %v4878_v34, %v4653_v27  ;;  %v9032_v45 = vpop.f32.mrb[250].mxu0  ;;  %v11685_v11 = vpop.f32.mrb[216].mxu1 }
 0x6bd   :  { %v5071_v32 = vmul.f32 0.9, %v4887_v42  ;;  %v4890_v39 = vadd.f32 %v9032_v45, %v4664_v49  ;;  %v4881_v57 = vpop.f32.mrb[251].mxu0  ;;  %v4719_v37 = vpop.f32.mrb[217].mxu1 }
 0x6be   :  { %v5069_v31 = vmul.f32 0.9, %v4879_v35  ;;  %v4882_v48 = vadd.f32 %v4881_v57, %v4656_v46  ;;  %v11687_v3 = vpop.f32.mrb[218].mxu1 }
 0x6bf   :  { %v5072_v1 = vmul.f32 0.9, %v4890_v39  ;;  %v4722_v26 = vpop.f32.mrb[219].mxu1  ;;  %v11690_v14 = vadd.f32 %v5071_v32, %v12918_v38 }
 0x6c0   :  { %v5070_v40 = vmul.f32 0.9, %v4882_v48  ;;  %v11696_v7 = vadd.f32 %v5069_v31, %v12920_v43 }
 0x6c1   :  { %v11693_v55 = vadd.f32 %v5072_v1, %v12919_v22  ;;  %v12926_v1 = vld [vmem:[#allocation12_spill] sm:$0xff] }
 0x6c2   :  { %v11699_v36 = vadd.f32 %v5070_v40, %v12921_v9  ;;  %v9035_v17 = vpop.f32.mrb[252].mxu0  ;;  %v12927_v40 = vld [vmem:[#allocation13_spill] sm:$0xff] }
 0x6c3   :  { %v5286_v56 = vpack.c.bf16 %v11693_v55, %v11690_v14  ;;  %v4903_v5 = vadd.f32 %v9035_v17, %v4677_v53  ;;  %v4894_v2 = vpop.f32.mrb[253].mxu0 }
 0x6c4   :  { %v4895_v6 = vadd.f32 %v4894_v2, %v4669_v10  ;;  %v9036_v54 = vpop.f32.mrb[254].mxu0  ;;  %v5285_v58 = vpack.c.bf16 %v11699_v36, %v11696_v7  ;;  %v11705_v27 = vpop.f32.mrb[220].mxu1  ;;  %v12922_v10 = vld [vmem:[#allocation8_spill] sm:$0xff] }
 0x6c5   :  { %v5075_v23 = vmul.f32 0.9, %v4903_v5  ;;  %v4906_v46 = vadd.f32 %v9036_v54, %v4680_v59  ;;  %v4897_v0 = vpop.f32.mrb[255].mxu0  ;;  %v4727_v4 = vpop.f32.mrb[221].mxu1  ;;  %v12925_v59 = vld [vmem:[#allocation11_spill] sm:$0xff] }
 0x6c6   :  { %v5073_v13 = vmul.f32 0.9, %v4895_v6  ;;  %v4898_v49 = vadd.f32 %v4897_v0, %v4672_v16  ;;  %9093 = vmatprep.mubr.bf16.mxu0 %v5285_v58  ;;  %v11707_v41 = vpop.f32.mrb[222].mxu1  ;;  %v12929_v5 = vld [vmem:[#allocation15_spill] sm:$0xff] }
 0x6c7   :  { %v5076_v44 = vmul.f32 0.9, %v4906_v46  ;;  %9094 = vmatmul.mubr.bf16.vlgmr.msra.gmra.mrb[40].mxu0 %v5286_v56  ;;  %v4730_v61 = vpop.f32.mrb[223].mxu1  ;;  %v11710_v60 = vadd.f32 %v5075_v23, %v12922_v10  ;;  %v12928_v56 = vld [vmem:[#allocation14_spill] sm:$0xff] }
 0x6c8   :  { %v5074_v53 = vmul.f32 0.9, %v4898_v49  ;;  %v11716_v25 = vadd.f32 %v5073_v13, %v12924_v18 }
 0x6c9   :  { %v11713_v50 = vadd.f32 %v5076_v44, %v12923_v28 }
 0x6ca   :  { %v11719_v19 = vadd.f32 %v5074_v53, %v12925_v59  ;;  %v9039_v16 = vpop.f32.mrb[0].mxu0 }
 0x6cb   :  { %v5288_v20 = vpack.c.bf16 %v11713_v50, %v11710_v60  ;;  %v4919_v52 = vadd.f32 %v9039_v16, %v4693_v30  ;;  %v4910_v47 = vpop.f32.mrb[1].mxu0 }
 0x6cc   :  { %v4911_v8 = vadd.f32 %v4910_v47, %v11671_v15  ;;  %v9040_v24 = vpop.f32.mrb[2].mxu0  ;;  %v5287_v42 = vpack.c.bf16 %v11719_v19, %v11716_v25  ;;  %v11726_v34 = vpop.f32.mrb[224].mxu1 }
 0x6cd   :  { %v5079_v35 = vmul.f32 0.9, %v4919_v52  ;;  %v4922_v45 = vadd.f32 %v9040_v24, %v11675_v21  ;;  %v4913_v32 = vpop.f32.mrb[3].mxu0  ;;  %v4735_v39 = vpop.f32.mrb[225].mxu1  ;;  %v12931_v24 = vld [vmem:[#allocation17_spill] sm:$0xff] }
 0x6ce   :  { %v5077_v57 = vmul.f32 0.9, %v4911_v8  ;;  %v4914_v37 = vadd.f32 %v4913_v32, %v11673_v29  ;;  %9097 = vmatprep.mubr.bf16.mxu0 %v5287_v42  ;;  %v11730_v31 = vpop.f32.mrb[226].mxu1 }
 0x6cf   :  { %v5080_v30 = vmul.f32 0.9, %v4922_v45  ;;  %9098 = vmatmul.mubr.bf16.gmra.mrb[44].mxu0 %v5288_v20  ;;  %v4738_v15 = vpop.f32.mrb[227].mxu1  ;;  %v11733_v26 = vadd.f32 %v5079_v35, %v12926_v1  ;;  %v12932_v35 = vld [vmem:[#allocation18_spill] sm:$0xff] }
 0x6d0   :  { %v5078_v48 = vmul.f32 0.9, %v4914_v37  ;;  %v11739_v21 = vadd.f32 %v5077_v57, %v12928_v56 }
 0x6d1   :  { %v11736_v17 = vadd.f32 %v5080_v30, %v12927_v40 }
 0x6d2   :  { %v11742_v2 = vadd.f32 %v5078_v48, %v12929_v5  ;;  %v9043_v29 = vpop.f32.mrb[4].mxu0 }
 0x6d3   :  { %v5290_v6 = vpack.c.bf16 %v11736_v17, %v11733_v26  ;;  %v4935_v54 = vadd.f32 %v9043_v29, %v11681_v33  ;;  %v4926_v58 = vpop.f32.mrb[5].mxu0 }
 0x6d4   :  { %v4927_v23 = vadd.f32 %v4926_v58, %v11677_v63  ;;  %v9044_v46 = vpop.f32.mrb[6].mxu0  ;;  %v5289_v0 = vpack.c.bf16 %v11742_v2, %v11739_v21  ;;  %v4741_v4 = vpop.f32.mrb[228].mxu1  ;;  %v12930_v63 = vld [vmem:[#allocation16_spill] sm:$0xff] }
 0x6d5   :  { %v5083_v13 = vmul.f32 0.9, %v4935_v54  ;;  %v4938_v49 = vadd.f32 %v9044_v46, %v11683_v51  ;;  %v4929_v44 = vpop.f32.mrb[7].mxu0  ;;  %v4743_v61 = vpop.f32.mrb[229].mxu1  ;;  %v12933_v51 = vld [vmem:[#allocation19_spill] sm:$0xff] }
 0x6d6   :  { %v5081_v53 = vmul.f32 0.9, %v4927_v23  ;;  %v4930_v16 = vadd.f32 %v4929_v44, %v11679_v62  ;;  %9101 = vmatprep.mubr.bf16.mxu0 %v5289_v0  ;;  %v4744_v20 = vpop.f32.mrb[230].mxu1 }
 0x6d7   :  { %v5084_v52 = vmul.f32 0.9, %v4938_v49  ;;  %9102 = vmatmul.mubr.bf16.gmra.mrb[48].mxu0 %v5290_v6  ;;  %v4746_v33 = vpop.f32.mrb[231].mxu1  ;;  %v11753_v8 = vadd.f32 %v5083_v13, %v12930_v63 }
 0x6d8   :  { %v5082_v47 = vmul.f32 0.9, %v4930_v16  ;;  %v11759_v45 = vadd.f32 %v5081_v53, %v12932_v35  ;;  %v12935_v53 = vld [vmem:[#allocation23_spill] sm:$0xff]  ;;  %v12946_v35 = vld [vmem:[#allocation32_spill] sm:$0xff] }
 0x6d9   :  { %v11756_v42 = vadd.f32 %v5084_v52, %v12931_v24  ;;  %v12936_v52 = vld [vmem:[#allocation20_spill] sm:$0xff] }
 0x6da   :  { %v11762_v32 = vadd.f32 %v5082_v47, %v12933_v51  ;;  %v9047_v39 = vpop.f32.mrb[8].mxu0 }
 0x6db   :  { %v5292_v62 = vpack.c.bf16 %v11756_v42, %v11753_v8  ;;  %v4951_v57 = vadd.f32 %v9047_v39, %v11705_v27  ;;  %v4942_v37 = vpop.f32.mrb[9].mxu0 }
 0x6dc   :  { %v4943_v30 = vadd.f32 %v4942_v37, %v11685_v11  ;;  %v9048_v15 = vpop.f32.mrb[10].mxu0  ;;  %v5291_v48 = vpack.c.bf16 %v11762_v32, %v11759_v45  ;;  %v4749_v29 = vpop.f32.mrb[232].mxu1  ;;  %v12934_v11 = vld [vmem:[#allocation22_spill] sm:$0xff] }
 0x6dd   :  { %v5087_v6 = vmul.f32 0.9, %v4951_v57  ;;  %v4954_v54 = vadd.f32 %v9048_v15, %v11707_v41  ;;  %v4945_v58 = vpop.f32.mrb[11].mxu0  ;;  %v4751_v23 = vpop.f32.mrb[233].mxu1  ;;  %v12937_v41 = vld [vmem:[#allocation21_spill] sm:$0xff] }
 0x6de   :  { %v5085_v46 = vmul.f32 0.9, %v4943_v30  ;;  %v4946_v0 = vadd.f32 %v4945_v58, %v11687_v3  ;;  %9105 = vmatprep.mubr.bf16.mxu0 %v5291_v48  ;;  %v4752_v13 = vpop.f32.mrb[234].mxu1 }
 0x6df   :  { %v5088_v49 = vmul.f32 0.9, %v4954_v54  ;;  %9106 = vmatmul.mubr.bf16.gmra.mrb[52].mxu0 %v5292_v62  ;;  %v4754_v27 = vpop.f32.mrb[235].mxu1  ;;  %v11773_v61 = vadd.f32 %v5087_v6, %v12934_v11  ;;  %v12944_v11 = vld [vmem:[#allocation28_spill] sm:$0xff] }
 0x6e0   :  { %v5086_v44 = vmul.f32 0.9, %v4946_v0  ;;  %v11779_v33 = vadd.f32 %v5085_v46, %v12936_v52  ;;  %v12940_v52 = vld [vmem:[#allocation24_spill] sm:$0xff] }
 0x6e1   :  { %v11776_v16 = vadd.f32 %v5088_v49, %v12935_v53 }
 0x6e2   :  { %v11782_v47 = vadd.f32 %v5086_v44, %v12937_v41  ;;  %v9051_v39 = vpop.f32.mrb[12].mxu0 }
 0x6e3   :  { %v5294_v3 = vpack.c.bf16 %v11776_v16, %v11773_v61  ;;  %v4967_v57 = vadd.f32 %v9051_v39, %v4741_v4  ;;  %v4958_v62 = vpop.f32.mrb[13].mxu0  ;;  %v12938_v39 = vld [vmem:[#allocation26_spill] sm:$0xff] }
 0x6e4   :  { %v4959_v37 = vadd.f32 %v4958_v62, %v11726_v34  ;;  %v9052_v30 = vpop.f32.mrb[14].mxu0  ;;  %v5293_v15 = vpack.c.bf16 %v11782_v47, %v11779_v33  ;;  %v4757_v48 = vpop.f32.mrb[236].mxu1  ;;  %v12939_v62 = vld [vmem:[#allocation27_spill] sm:$0xff] }
 0x6e5   :  { %v5091_v6 = vmul.f32 0.9, %v4967_v57  ;;  %v4970_v54 = vadd.f32 %v9052_v30, %v4744_v20  ;;  %v4961_v58 = vpop.f32.mrb[15].mxu0  ;;  %v4759_v23 = vpop.f32.mrb[237].mxu1  ;;  %v12941_v20 = vld [vmem:[#allocation25_spill] sm:$0xff] }
 0x6e6   :  { %v5089_v46 = vmul.f32 0.9, %v4959_v37  ;;  %v4962_v0 = vadd.f32 %v4961_v58, %v11730_v31  ;;  %9109 = vmatprep.mubr.bf16.mxu0 %v5293_v15  ;;  %v4760_v49 = vpop.f32.mrb[238].mxu1 }
 0x6e7   :  { %v5092_v27 = vmul.f32 0.9, %v4970_v54  ;;  %9110 = vmatmul.mubr.bf16.gmra.mrb[56].mxu0 %v5294_v3  ;;  %v4762_v4 = vpop.f32.mrb[239].mxu1  ;;  %v11791_v34 = vadd.f32 %v5091_v6, %v12938_v39 }
 0x6e8   :  { %v5090_v44 = vmul.f32 0.9, %v4962_v0  ;;  %v11797_v57 = vadd.f32 %v5089_v46, %v12940_v52 }
 0x6e9   :  { %v11794_v41 = vadd.f32 %v5092_v27, %v12939_v62 }
 0x6ea   :  { %v11800_v30 = vadd.f32 %v5090_v44, %v12941_v20  ;;  %v9055_v37 = vpop.f32.mrb[16].mxu0 }
 0x6eb   :  { %v5296_v31 = vpack.c.bf16 %v11794_v41, %v11791_v34  ;;  %v4983_v15 = vadd.f32 %v9055_v37, %v4757_v48  ;;  %v4974_v3 = vpop.f32.mrb[17].mxu0  ;;  %v12942_v48 = vld [vmem:[#allocation30_spill] sm:$0xff] }
 0x6ec   :  { %v4975_v54 = vadd.f32 %v4974_v3, %v4749_v29  ;;  %v9056_v58 = vpop.f32.mrb[18].mxu0  ;;  %v5295_v6 = vpack.c.bf16 %v11800_v30, %v11797_v57  ;;  %v4765_v23 = vpop.f32.mrb[240].mxu1  ;;  %v12943_v29 = vld [vmem:[#allocation31_spill] sm:$0xff] }
 0x6ed   :  { %v5095_v0 = vmul.f32 0.9, %v4983_v15  ;;  %v4986_v27 = vadd.f32 %v9056_v58, %v4760_v49  ;;  %v4977_v4 = vpop.f32.mrb[19].mxu0  ;;  %v4767_v46 = vpop.f32.mrb[241].mxu1  ;;  %v12945_v49 = vld [vmem:[#allocation29_spill] sm:$0xff] }
 0x6ee   :  { %v5093_v52 = vmul.f32 0.9, %v4975_v54  ;;  %v4978_v62 = vadd.f32 %v4977_v4, %v4752_v13  ;;  %9113 = vmatprep.mubr.bf16.mxu0 %v5295_v6  ;;  %v4768_v44 = vpop.f32.mrb[242].mxu1 }
 0x6ef   :  { %v5096_v20 = vmul.f32 0.9, %v4986_v27  ;;  %9114 = vmatmul.mubr.bf16.gmra.mrb[60].mxu0 %v5296_v31  ;;  %v4770_v39 = vpop.f32.mrb[243].mxu1  ;;  %v11807_v37 = vadd.f32 %v5095_v0, %v12942_v48 }
 0x6f0   :  { %v5094_v53 = vmul.f32 0.9, %v4978_v62  ;;  %v11813_v51 = vadd.f32 %v5093_v52, %v12944_v11 }
 0x6f1   :  { %v11810_v3 = vadd.f32 %v5096_v20, %v12943_v29 }
 0x6f2   :  { %v11816_v15 = vadd.f32 %v5094_v53, %v12945_v49  ;;  %v9059_v54 = vpop.f32.mrb[20].mxu0 }
 0x6f3   :  { %v5298_v13 = vpack.c.bf16 %v11810_v3, %v11807_v37  ;;  %v4990_v58 = vpop.f32.mrb[21].mxu0 }
 0x6f4   :  { %v4991_v31 = vadd.f32 %v4990_v58, %v4765_v23  ;;  %v4773_v39 = vpop.f32.mrb[244].mxu1  ;;  %v9060_v62 = vpop.f32.mrb[22].mxu0  ;;  %v5297_v6 = vpack.c.bf16 %v11816_v15, %v11813_v51  ;;  %v12947_v58 = vld [vmem:[#allocation33_spill] sm:$0xff] }
 0x6f5   :  { %v4999_v0 = vadd.f32 %v9059_v54, %v4773_v39  ;;  %v4775_v20 = vpop.f32.mrb[245].mxu1  ;;  %v4993_v27 = vpop.f32.mrb[23].mxu0  ;;  %v12948_v54 = vld [vmem:[#allocation35_spill] sm:$0xff] }
 0x6f6   :  { %v5097_v4 = vmul.f32 0.9, %v4991_v31  ;;  %v4994_v52 = vadd.f32 %v4993_v27, %v4768_v44  ;;  %v4776_v46 = vpop.f32.mrb[246].mxu1  ;;  %9117 = vmatprep.mubr.bf16.mxu0 %v5297_v6  ;;  %v12949_v31 = vld [vmem:[#allocation36_spill] sm:$0xff] }
 0x6f7   :  { %v5099_v53 = vmul.f32 0.9, %v4999_v0  ;;  %v5002_v49 = vadd.f32 %v9060_v62, %v4776_v46  ;;  %9118 = vmatmul.mubr.bf16.gmra.mrb[64].mxu0 %v5298_v13  ;;  %v4778_v11 = vpop.f32.mrb[247].mxu1 }
 0x6f8   :  { %v5098_v29 = vmul.f32 0.9, %v4994_v52  ;;  %v11823_v23 = vadd.f32 %v5097_v4, %v12946_v35 }
 0x6f9   :  { %v5100_v48 = vmul.f32 0.9, %v5002_v49  ;;  %v11829_v39 = vadd.f32 %v5099_v53, %v12948_v54 }
 0x6fa   :  { %v11826_v24 = vadd.f32 %v5098_v29, %v12947_v58  ;;  %v9063_v63 = vpop.f32.mrb[24].mxu0  ;;  %v12950_v58 = vld [vmem:[#allocation37_spill] sm:$0xff] }
 0x6fb   :  { %v11832_v44 = vadd.f32 %v5100_v48, %v12949_v31  ;;  %v5006_v6 = vpop.f32.mrb[25].mxu0  ;;  %v12951_v31 = vld [vmem:[#allocation38_spill] sm:$0xff] }
 0x6fc   :  { %v4781_v0 = vpop.f32.mrb[248].mxu1  ;;  %v9064_v62 = vpop.f32.mrb[26].mxu0  ;;  %v5299_v11 = vpack.c.bf16 %v11826_v24, %v11823_v23 }
 0x6fd   :  { %v5300_v49 = vpack.c.bf16 %v11832_v44, %v11829_v39  ;;  %v5007_v13 = vadd.f32 %v5006_v6, %v4781_v0  ;;  %v4783_v20 = vpop.f32.mrb[249].mxu1  ;;  %v5009_v29 = vpop.f32.mrb[27].mxu0 }
 0x6fe   :  { %v4784_v27 = vpop.f32.mrb[250].mxu1  ;;  %9121 = vmatprep.mubr.bf16.mxu0 %v5299_v11 }
 0x6ff   :  { %v5101_v4 = vmul.f32 0.9, %v5007_v13  ;;  %v5010_v52 = vadd.f32 %v5009_v29, %v4784_v27  ;;  %9122 = vmatmul.mubr.bf16.gmra.mrb[68].mxu0 %v5300_v49  ;;  %v4786_v46 = vpop.f32.mrb[251].mxu1 }
 0x700   :  { %v12952_v46 = vld [vmem:[#allocation39_spill] sm:$0xff] }
 0x701   :  { %v5102_v48 = vmul.f32 0.9, %v5010_v52  ;;  %v11839_v35 = vadd.f32 %v5101_v4, %v12950_v58 }
 0x702   :  { %v9067_v53 = vpop.f32.mrb[28].mxu0 }
 0x703   :  { %v11842_v54 = vadd.f32 %v5102_v48, %v12951_v31  ;;  %v5022_v5 = vpop.f32.mrb[29].mxu0  ;;  %v12953_v48 = vld [vmem:[#allocation40_spill] sm:$0xff] }
 0x704   :  { %v4789_v56 = vpop.f32.mrb[252].mxu1  ;;  %v9068_v40 = vpop.f32.mrb[30].mxu0 }
 0x705   :  { %v5015_v6 = vadd.f32 %v9063_v63, %v4789_v56  ;;  %v4791_v0 = vpop.f32.mrb[253].mxu1  ;;  %v5301_v11 = vpack.c.bf16 %v11842_v54, %v11839_v35  ;;  %v5025_v13 = vpop.f32.mrb[31].mxu0 }
 0x706   :  { %v4792_v20 = vpop.f32.mrb[254].mxu1 }
 0x707   :  { %v5103_v49 = vmul.f32 0.9, %v5015_v6  ;;  %v5018_v29 = vadd.f32 %v9064_v62, %v4792_v20  ;;  %9125 = vmatprep.mubr.bf16.mxu0 %v5301_v11  ;;  %v4794_v27 = vpop.f32.mrb[255].mxu1 }
 0x709   :  { %v5104_v52 = vmul.f32 0.9, %v5018_v29  ;;  %v11847_v58 = vadd.f32 %v5103_v49, %v12952_v46  ;;  %v12954_v46 = vld [vmem:[#allocation41_spill] sm:$0xff] }
 0x70a   :  { %v9071_v4 = vpop.f32.mrb[32].mxu0 }
 0x70b   :  { %v11850_v31 = vadd.f32 %v5104_v52, %v12953_v48  ;;  %v5038_v1 = vpop.f32.mrb[33].mxu0  ;;  %v12955_v52 = vld [vmem:[#allocation42_spill] sm:$0xff] }
 0x70c   :  { %v4797_v56 = vpop.f32.mrb[0].mxu1  ;;  %v9072_v63 = vpop.f32.mrb[34].mxu0 }
 0x70d   :  { %v5302_v0 = vpack.c.bf16 %v11850_v31, %v11847_v58  ;;  %v5023_v59 = vadd.f32 %v5022_v5, %v4797_v56  ;;  %v4799_v18 = vpop.f32.mrb[1].mxu1  ;;  %v5041_v6 = vpop.f32.mrb[35].mxu0 }
 0x70e   :  { %v4800_v62 = vpop.f32.mrb[2].mxu1 }
 0x70f   :  { %v5105_v11 = vmul.f32 0.9, %v5023_v59  ;;  %v5026_v20 = vadd.f32 %v5025_v13, %v4800_v62  ;;  %9126 = vmatmul.mubr.bf16.gmra.mrb[72].mxu0 %v5302_v0  ;;  %v4802_v29 = vpop.f32.mrb[3].mxu1 }
 0x711   :  { %v5106_v27 = vmul.f32 0.9, %v5026_v20  ;;  %v11855_v28 = vadd.f32 %v5105_v11, %v12954_v46  ;;  %v12957_v20 = vld [vmem:[#allocation43_spill] sm:$0xff] }
 0x712   :  { %v9075_v49 = vpop.f32.mrb[36].mxu0 }
 0x713   :  { %v11858_v48 = vadd.f32 %v5106_v27, %v12955_v52  ;;  %v5054_v10 = vpop.f32.mrb[37].mxu0  ;;  %v12958_v27 = vld [vmem:[#allocation44_spill] sm:$0xff] }
 0x714   :  { %v4805_v9 = vpop.f32.mrb[4].mxu1  ;;  %v9076_v43 = vpop.f32.mrb[38].mxu0 }
 0x715   :  { %12956 = vst [vmem:[#allocation46_spill] sm:$0xff] %v11858_v48  ;;  %v5031_v22 = vadd.f32 %v9067_v53, %v4805_v9  ;;  %v4807_v5 = vpop.f32.mrb[5].mxu1  ;;  %v5303_v18 = vpack.c.bf16 %v11858_v48, %v11855_v28  ;;  %v5057_v59 = vpop.f32.mrb[39].mxu0 }
 0x716   :  { %v4808_v13 = vpop.f32.mrb[6].mxu1 }
 0x717   :  { %v5107_v56 = vmul.f32 0.9, %v5031_v22  ;;  %v5034_v0 = vadd.f32 %v9068_v40, %v4808_v13  ;;  %9129 = vmatprep.mubr.bf16.mxu0 %v5303_v18  ;;  %v4810_v62 = vpop.f32.mrb[7].mxu1 }
 0x719   :  { %v11863_v11 = vadd.f32 %v5107_v56, %v12957_v20  ;;  %v5108_v29 = vmul.f32 0.9, %v5034_v0 }
 0x71b   :  { %v11866_v52 = vadd.f32 %v5108_v29, %v12958_v27 }
 0x71c   :  { %v4813_v46 = vpop.f32.mrb[8].mxu1 }
 0x71d   :  { %12959 = vst [vmem:[#allocation45_spill] sm:$0xff] %v11866_v52  ;;  %v5304_v9 = vpack.c.bf16 %v11866_v52, %v11863_v11  ;;  %v4815_v53 = vpop.f32.mrb[9].mxu1  ;;  %v5039_v5 = vadd.f32 %v5038_v1, %v4813_v46 }
 0x71e   :  { %v4816_v38 = vpop.f32.mrb[10].mxu1 }
 0x71f   :  { %9130 = vmatmul.mubr.bf16.gmra.mrb[76].mxu0 %v5304_v9  ;;  %v4818_v48 = vpop.f32.mrb[11].mxu1  ;;  %v5109_v22 = vmul.f32 0.9, %v5039_v5  ;;  %v5042_v40 = vadd.f32 %v5041_v6, %v4816_v38 }
 0x721   :  { %v11871_v18 = vadd.f32 %v5109_v22, %v12957_v20  ;;  %v5110_v13 = vmul.f32 0.9, %v5042_v40 }
 0x723   :  { %v11874_v56 = vadd.f32 %v5110_v13, %v12958_v27 }
 0x724   :  { %v4821_v0 = vpop.f32.mrb[12].mxu1 }
 0x725   :  { %v5047_v62 = vadd.f32 %v9071_v4, %v4821_v0  ;;  %v4823_v29 = vpop.f32.mrb[13].mxu1  ;;  %v5305_v52 = vpack.c.bf16 %v11874_v56, %v11871_v18 }
 0x726   :  { %v4824_v53 = vpop.f32.mrb[14].mxu1 }
 0x727   :  { %v5111_v1 = vmul.f32 0.9, %v5047_v62  ;;  %v5050_v46 = vadd.f32 %v9072_v63, %v4824_v53  ;;  %9133 = vmatprep.mubr.bf16.mxu0 %v5305_v52  ;;  %v4826_v48 = vpop.f32.mrb[15].mxu1 }
 0x729   :  { %v11879_v38 = vadd.f32 %v5111_v1, %v12957_v20  ;;  %v5112_v6 = vmul.f32 0.9, %v5050_v46 }
 0x72b   :  { %v11882_v9 = vadd.f32 %v5112_v6, %v12958_v27 }
 0x72c   :  { %v4829_v5 = vpop.f32.mrb[16].mxu1 }
 0x72d   :  { %v5306_v4 = vpack.c.bf16 %v11882_v9, %v11879_v38  ;;  %v4831_v22 = vpop.f32.mrb[17].mxu1  ;;  %v5055_v40 = vadd.f32 %v5054_v10, %v4829_v5 }
 0x72e   :  { %v4832_v13 = vpop.f32.mrb[18].mxu1 }
 0x72f   :  { %9134 = vmatmul.mubr.bf16.gmra.mrb[80].mxu0 %v5306_v4  ;;  %v4834_v0 = vpop.f32.mrb[19].mxu1  ;;  %v5113_v62 = vmul.f32 0.9, %v5055_v40  ;;  %v5058_v63 = vadd.f32 %v5057_v59, %v4832_v13 }
 0x731   :  { %v11887_v52 = vadd.f32 %v5113_v62, %v12957_v20  ;;  %v5114_v29 = vmul.f32 0.9, %v5058_v63 }
 0x733   :  { %12960 = vst [vmem:[#allocation34_spill] sm:$0xff] %v11887_v52  ;;  %v11890_v53 = vadd.f32 %v5114_v29, %v12958_v27 }
 0x734   :  { %v4837_v1 = vpop.f32.mrb[20].mxu1 }
 0x735   :  { %12961 = vst [vmem:[#allocation47_spill] sm:$0xff] %v11890_v53  ;;  %v5063_v46 = vadd.f32 %v9075_v49, %v4837_v1  ;;  %v4839_v48 = vpop.f32.mrb[21].mxu1  ;;  %v5307_v6 = vpack.c.bf16 %v11890_v53, %v11887_v52  ;;  %v9714_v49 = vld [vmem:[%s12713_s0 + $0x4] ss:$12 sps:$4 sm:$0xff]   ;;  %v5599_v1 = vmul.f32 0.84584934, %v11696_v7 }
 0x736   :  { %v4840_v22 = vpop.f32.mrb[22].mxu1  ;;  %6375 = vmatprep.mubr.bf16.mxu1 %v9714_v49  ;;  %v5605_v7 = vmul.f32 0.84584934, %v11710_v60  ;;  %v5604_v60 = vmul.f32 0.84584934, %v11719_v19 }
 0x737   :  { %v5115_v10 = vmul.f32 0.9, %v5063_v46  ;;  %v5066_v5 = vadd.f32 %v9076_v43, %v4840_v22  ;;  %9137 = vmatprep.mubr.bf16.mxu0 %v5307_v6  ;;  %v4842_v4 = vpop.f32.mrb[23].mxu1  ;;  %v5601_v43 = vmul.f32 0.84584934, %v11690_v14 }
 0x738   :  { %v5602_v22 = vmul.f32 0.84584934, %v11693_v55  ;;  %v5603_v55 = vmul.f32 0.84584934, %v11716_v25 }
 0x739   :  { %v11895_v59 = vadd.f32 %v5115_v10, %v12957_v20  ;;  %v5116_v40 = vmul.f32 0.9, %v5066_v5 }
 0x73b   :  { %v11898_v13 = vadd.f32 %v5116_v40, %v12958_v27  ;;  %v5600_v40 = vmul.f32 0.84584934, %v11699_v36  ;;  %v9739_v36 = vld [vmem:[%s12713_s0 + $0x8] ss:$12 sps:$4 sm:$0xff]  }
 0x73d   :  { %12962 = vst [vmem:[#allocation48_spill] sm:$0xff] %v11898_v13  ;;  %v5308_v0 = vpack.c.bf16 %v11898_v13, %v11895_v59 }
 0x73f   :  { %9138 = vmatmul.mubr.bf16.gmra.mrb[84].mxu0 %v5308_v0 }
 0x740   :  { %9157 = vmatprep.mubr.bf16.mxu0 %v9739_v36 }
 0x79a   :  { %v9095_v62 = vpop.f32.mrb[40].mxu0 }
 0x79b   :  { %v5649_v63 = vmul.f32 0.15415068, %v9095_v62  ;;  %v5408_v29 = vpop.f32.mrb[41].mxu0 }
 0x79c   :  { %v5647_v46 = vmul.f32 0.15415068, %v5408_v29  ;;  %v9096_v48 = vpop.f32.mrb[42].mxu0 }
 0x79d   :  { %v5697_v6 = vadd.f32 %v5649_v63, %v5601_v43  ;;  %v5650_v10 = vmul.f32 0.15415068, %v9096_v48  ;;  %v5411_v5 = vpop.f32.mrb[43].mxu0 }
 0x79e   :  { %v5695_v4 = vadd.f32 %v5647_v46, %v5599_v1  ;;  %v5648_v0 = vmul.f32 0.15415068, %v5411_v5 }
 0x79f   :  { %v5698_v27 = vadd.f32 %v5650_v10, %v5602_v22  ;;  %v5745_v20 = vmax.f32 %v5697_v6, 0.0 }
 0x7a0   :  { %v5696_v49 = vadd.f32 %v5648_v0, %v5600_v40  ;;  %v5743_v14 = vmax.f32 %v5695_v4, 0.0 }
 0x7a1   :  { %v5746_v53 = vmax.f32 %v5698_v27, 0.0  ;;  %v5606_v27 = vmul.f32 0.84584934, %v11713_v50  ;;  %v5609_v50 = vmul.f32 0.84584934, %v11733_v26 }
 0x7a2   :  { %v5744_v62 = vmax.f32 %v5696_v49, 0.0  ;;  %v9099_v13 = vpop.f32.mrb[44].mxu0 }
 0x7a3   :  { %v5792_v29 = vpack.c.bf16 %v5746_v53, %v5745_v20  ;;  %v5653_v52 = vmul.f32 0.15415068, %v9099_v13  ;;  %v5424_v43 = vpop.f32.mrb[45].mxu0 }
 0x7a4   :  { %v5791_v63 = vpack.c.bf16 %v5744_v62, %v5743_v14  ;;  %v5651_v48 = vmul.f32 0.15415068, %v5424_v43  ;;  %v9100_v1 = vpop.f32.mrb[46].mxu0  ;;  %v5607_v62 = vmul.f32 0.84584934, %v11739_v21 }
 0x7a5   :  { %v5701_v46 = vadd.f32 %v5653_v52, %v5605_v7  ;;  %v5654_v6 = vmul.f32 0.15415068, %v9100_v1  ;;  %v5427_v22 = vpop.f32.mrb[47].mxu0 }
 0x7a6   :  { %v5699_v10 = vadd.f32 %v5651_v48, %v5603_v55  ;;  %v5652_v20 = vmul.f32 0.15415068, %v5427_v22  ;;  %6344 = vmatpush1.bf16.msra.mxu1 %v5791_v63  ;;  %v5610_v63 = vmul.f32 0.84584934, %v11736_v17  ;;  %v5613_v17 = vmul.f32 0.84584934, %v11753_v8 }
 0x7a7   :  { %v5702_v53 = vadd.f32 %v5654_v6, %v5606_v27  ;;  %6345 = vmatprep.subr.bf16.mxu1 %v12867_v12  ;;  %v5749_v13 = vmax.f32 %v5701_v46, 0.0 }
 0x7a8   :  { %v5700_v25 = vadd.f32 %v5652_v20, %v5604_v60  ;;  %v5747_v4 = vmax.f32 %v5699_v10, 0.0 }
 0x7a9   :  { %v5750_v5 = vmax.f32 %v5702_v53, 0.0 }
 0x7aa   :  { %v5748_v40 = vmax.f32 %v5700_v25, 0.0  ;;  %v9103_v0 = vpop.f32.mrb[48].mxu0  ;;  %6346 = vmatpush1.bf16.msra.mxu1 %v5792_v29  ;;  %v5608_v29 = vmul.f32 0.84584934, %v11742_v2 }
 0x7ab   :  { %v5794_v52 = vpack.c.bf16 %v5750_v5, %v5749_v13  ;;  %v5657_v49 = vmul.f32 0.15415068, %v9103_v0  ;;  %v5440_v14 = vpop.f32.mrb[49].mxu0  ;;  %6347 = vmatprep.subr.bf16.mxu1 %v12867_v12  ;;  %v5611_v13 = vmul.f32 0.84584934, %v11759_v45 }
 0x7ac   :  { %v5793_v19 = vpack.c.bf16 %v5748_v40, %v5747_v4  ;;  %v5655_v7 = vmul.f32 0.15415068, %v5440_v14  ;;  %v9104_v43 = vpop.f32.mrb[50].mxu0  ;;  %v5614_v0 = vmul.f32 0.84584934, %v11756_v42 }
 0x7ad   :  { %v5705_v55 = vadd.f32 %v5657_v49, %v5609_v50  ;;  %v5658_v48 = vmul.f32 0.15415068, %v9104_v43  ;;  %v5443_v1 = vpop.f32.mrb[51].mxu0  ;;  %v5617_v42 = vmul.f32 0.84584934, %v11773_v61 }
 0x7ae   :  { %v5703_v36 = vadd.f32 %v5655_v7, %v5607_v62  ;;  %v5656_v46 = vmul.f32 0.15415068, %v5443_v1  ;;  %6348 = vmatpush1.bf16.msra.mxu1 %v5793_v19 }
 0x7af   :  { %v5706_v26 = vadd.f32 %v5658_v48, %v5610_v63  ;;  %6349 = vmatprep.subr.bf16.mxu1 %v12867_v12  ;;  %v5753_v6 = vmax.f32 %v5705_v55, 0.0 }
 0x7b0   :  { %v5704_v27 = vadd.f32 %v5656_v46, %v5608_v29  ;;  %v5751_v10 = vmax.f32 %v5703_v36, 0.0  ;;  %v5615_v29 = vmul.f32 0.84584934, %v11779_v33 }
 0x7b1   :  { %v5754_v22 = vmax.f32 %v5706_v26, 0.0 }
 0x7b2   :  { %v5752_v21 = vmax.f32 %v5704_v27, 0.0  ;;  %v9107_v60 = vpop.f32.mrb[52].mxu0  ;;  %6350 = vmatpush1.bf16.msra.mxu1 %v5794_v52  ;;  %v5612_v52 = vmul.f32 0.84584934, %v11762_v32 }
 0x7b3   :  { %v5796_v20 = vpack.c.bf16 %v5754_v22, %v5753_v6  ;;  %v5661_v53 = vmul.f32 0.15415068, %v9107_v60  ;;  %v5456_v25 = vpop.f32.mrb[53].mxu0  ;;  %6351 = vmatprep.subr.bf16.mxu1 %v12867_v12  ;;  %v5618_v6 = vmul.f32 0.84584934, %v11776_v16 }
 0x7b4   :  { %v5795_v2 = vpack.c.bf16 %v5752_v21, %v5751_v10  ;;  %v5659_v5 = vmul.f32 0.15415068, %v5456_v25  ;;  %v9108_v4 = vpop.f32.mrb[54].mxu0  ;;  %v5616_v60 = vmul.f32 0.84584934, %v11782_v47 }
 0x7b5   :  { %v5709_v40 = vadd.f32 %v5661_v53, %v5613_v17  ;;  %v5662_v50 = vmul.f32 0.15415068, %v9108_v4  ;;  %v5459_v49 = vpop.f32.mrb[55].mxu0  ;;  %v5621_v16 = vmul.f32 0.84584934, %v11791_v34 }
 0x7b6   :  { %v5707_v14 = vadd.f32 %v5659_v5, %v5611_v13  ;;  %v5660_v19 = vmul.f32 0.15415068, %v5459_v49  ;;  %6352 = vmatpush1.bf16.msra.mxu1 %v5795_v2 }
 0x7b7   :  { %v5710_v8 = vadd.f32 %v5662_v50, %v5614_v0  ;;  %6353 = vmatprep.subr.bf16.mxu1 %v12867_v12  ;;  %v5757_v7 = vmax.f32 %v5709_v40, 0.0  ;;  %v5619_v0 = vmul.f32 0.84584934, %v11797_v57 }
 0x7b8   :  { %v5708_v62 = vadd.f32 %v5660_v19, %v5612_v52  ;;  %v5755_v55 = vmax.f32 %v5707_v14, 0.0  ;;  %v5622_v52 = vmul.f32 0.84584934, %v11794_v41  ;;  %v5625_v41 = vmul.f32 0.84584934, %v11807_v37 }
 0x7b9   :  { %v5758_v43 = vmax.f32 %v5710_v8, 0.0 }
 0x7ba   :  { %v5756_v45 = vmax.f32 %v5708_v62, 0.0  ;;  %v9111_v63 = vpop.f32.mrb[56].mxu0  ;;  %6354 = vmatpush1.bf16.msra.mxu1 %v5796_v20 }
 0x7bb   :  { %v5798_v48 = vpack.c.bf16 %v5758_v43, %v5757_v7  ;;  %v5665_v1 = vmul.f32 0.15415068, %v9111_v63  ;;  %v5472_v36 = vpop.f32.mrb[57].mxu0  ;;  %6355 = vmatprep.subr.bf16.mxu1 %v12867_v12  ;;  %v5620_v7 = vmul.f32 0.84584934, %v11800_v30 }
 0x7bc   :  { %v5797_v32 = vpack.c.bf16 %v5756_v45, %v5755_v55  ;;  %v5663_v46 = vmul.f32 0.15415068, %v5472_v36  ;;  %v9112_v26 = vpop.f32.mrb[58].mxu0 }
 0x7bd   :  { %v5713_v27 = vadd.f32 %v5665_v1, %v5617_v42  ;;  %v5666_v22 = vmul.f32 0.15415068, %v9112_v26  ;;  %v5475_v10 = vpop.f32.mrb[59].mxu0 }
 0x7be   :  { %v5711_v21 = vadd.f32 %v5663_v46, %v5615_v29  ;;  %v5664_v20 = vmul.f32 0.15415068, %v5475_v10  ;;  %6356 = vmatpush1.bf16.msra.mxu1 %v5797_v32  ;;  %v5623_v29 = vmul.f32 0.84584934, %v11813_v51 }
 0x7bf   :  { %v5714_v61 = vadd.f32 %v5666_v22, %v5618_v6  ;;  %6357 = vmatprep.subr.bf16.mxu1 %v12867_v12  ;;  %v5761_v53 = vmax.f32 %v5713_v27, 0.0  ;;  %v5626_v6 = vmul.f32 0.84584934, %v11810_v3  ;;  %v5629_v3 = vmul.f32 0.84584934, %v11829_v39 }
 0x7c0   :  { %v5712_v17 = vadd.f32 %v5664_v20, %v5616_v60  ;;  %v5759_v2 = vmax.f32 %v5711_v21, 0.0  ;;  %v5624_v60 = vmul.f32 0.84584934, %v11816_v15 }
 0x7c1   :  { %v5762_v25 = vmax.f32 %v5714_v61, 0.0 }
 0x7c2   :  { %v5760_v33 = vmax.f32 %v5712_v17, 0.0  ;;  %v9115_v13 = vpop.f32.mrb[60].mxu0  ;;  %6358 = vmatpush1.bf16.msra.mxu1 %v5798_v48 }
 0x7c3   :  { %v5800_v5 = vpack.c.bf16 %v5762_v25, %v5761_v53  ;;  %v5669_v4 = vmul.f32 0.15415068, %v9115_v13  ;;  %v5488_v40 = vpop.f32.mrb[61].mxu0  ;;  %6359 = vmatprep.subr.bf16.mxu1 %v12867_v12 }
 0x7c4   :  { %v5799_v47 = vpack.c.bf16 %v5760_v33, %v5759_v2  ;;  %v5667_v50 = vmul.f32 0.15415068, %v5488_v40  ;;  %v9116_v49 = vpop.f32.mrb[62].mxu0 }
 0x7c5   :  { %v5717_v14 = vadd.f32 %v5669_v4, %v5621_v16  ;;  %v5670_v19 = vmul.f32 0.15415068, %v9116_v49  ;;  %v5491_v8 = vpop.f32.mrb[63].mxu0  ;;  %v5627_v16 = vmul.f32 0.84584934, %v11823_v23 }
 0x7c6   :  { %v5715_v62 = vadd.f32 %v5667_v50, %v5619_v0  ;;  %v5668_v43 = vmul.f32 0.15415068, %v5491_v8  ;;  %6360 = vmatpush1.bf16.msra.mxu1 %v5799_v47  ;;  %v5630_v0 = vmul.f32 0.84584934, %v11832_v44 }
 0x7c7   :  { %v5718_v34 = vadd.f32 %v5670_v19, %v5622_v52  ;;  %6361 = vmatprep.subr.bf16.mxu1 %v12867_v12  ;;  %v5765_v45 = vmax.f32 %v5717_v14, 0.0  ;;  %v5628_v52 = vmul.f32 0.84584934, %v11826_v24  ;;  %v9712_v24 = vld [vmem:[%s12713_s0] ss:$12 sps:$4 sm:$0xff]  }
 0x7c8   :  { %v5716_v55 = vadd.f32 %v5668_v43, %v5620_v7  ;;  %v5763_v48 = vmax.f32 %v5715_v62, 0.0 }
 0x7c9   :  { %v5766_v63 = vmax.f32 %v5718_v34, 0.0 }
 0x7ca   :  { %v5764_v57 = vmax.f32 %v5716_v55, 0.0  ;;  %v9119_v42 = vpop.f32.mrb[64].mxu0  ;;  %6362 = vmatpush1.bf16.msra.mxu1 %v5800_v5 }
 0x7cb   :  { %v5802_v1 = vpack.c.bf16 %v5766_v63, %v5765_v45  ;;  %v5673_v36 = vmul.f32 0.15415068, %v9119_v42  ;;  %v5504_v32 = vpop.f32.mrb[65].mxu0  ;;  %6363 = vmatprep.subr.bf16.mxu1 %v12867_v12  ;;  %v9717_v45 = vld [vmem:[%s12713_s0 + $0x1c] ss:$12 sps:$4 sm:$0xff]  }
 0x7cc   :  { %v5801_v30 = vpack.c.bf16 %v5764_v57, %v5763_v48  ;;  %v5671_v46 = vmul.f32 0.15415068, %v5504_v32  ;;  %v9120_v26 = vpop.f32.mrb[66].mxu0  ;;  %v5633_v63 = vmul.f32 0.84584934, %v11847_v58 }
 0x7cd   :  { %v5721_v27 = vadd.f32 %v5673_v36, %v5625_v41  ;;  %v5674_v22 = vmul.f32 0.15415068, %v9120_v26  ;;  %v5507_v10 = vpop.f32.mrb[67].mxu0  ;;  %v5631_v42 = vmul.f32 0.84584934, %v11839_v35 }
 0x7ce   :  { %v5719_v21 = vadd.f32 %v5671_v46, %v5623_v29  ;;  %v5672_v20 = vmul.f32 0.15415068, %v5507_v10  ;;  %6364 = vmatpush1.bf16.msra.mxu1 %v5801_v30  ;;  %v5632_v46 = vmul.f32 0.84584934, %v11842_v54  ;;  %v9715_v35 = vld [vmem:[%s12713_s0 + $0x18] ss:$12 sps:$4 sm:$0xff]  }
 0x7cf   :  { %v5722_v37 = vadd.f32 %v5674_v22, %v5626_v6  ;;  %6365 = vmatprep.subr.bf16.mxu1 %v12867_v12  ;;  %v5769_v17 = vmax.f32 %v5721_v27, 0.0  ;;  %v9718_v54 = vld [vmem:[%s12713_s0 + $0x30] ss:$12 sps:$4 sm:$0xff]  }
 0x7d0   :  { %v5720_v61 = vadd.f32 %v5672_v20, %v5624_v60  ;;  %v5767_v25 = vmax.f32 %v5719_v21, 0.0 }
 0x7d1   :  { %v5770_v53 = vmax.f32 %v5722_v37, 0.0 }
 0x7d2   :  { %v5768_v51 = vmax.f32 %v5720_v61, 0.0  ;;  %v9123_v2 = vpop.f32.mrb[68].mxu0  ;;  %6366 = vmatpush1.bf16.msra.mxu1 %v5802_v1  ;;  %v9723_v61 = vld [vmem:[%s12713_s0 + $0x4c] ss:$12 sps:$4 sm:$0xff]  }
 0x7d3   :  { %v5804_v33 = vpack.c.bf16 %v5770_v53, %v5769_v17  ;;  %v5677_v13 = vmul.f32 0.15415068, %v9123_v2  ;;  %v5520_v5 = vpop.f32.mrb[69].mxu0  ;;  %6367 = vmatprep.subr.bf16.mxu1 %v12867_v12  ;;  %v5637_v17 = vmul.f32 0.84584934, %v11863_v11 }
 0x7d4   :  { %v5803_v15 = vpack.c.bf16 %v5768_v51, %v5767_v25  ;;  %v5675_v4 = vmul.f32 0.15415068, %v5520_v5  ;;  %v9124_v40 = vpop.f32.mrb[70].mxu0  ;;  %v5635_v51 = vmul.f32 0.84584934, %v11855_v28 }
 0x7d5   :  { %v5725_v47 = vadd.f32 %v5677_v13, %v5629_v3  ;;  %v5678_v50 = vmul.f32 0.15415068, %v9124_v40  ;;  %v5523_v49 = vpop.f32.mrb[71].mxu0  ;;  %v12963_v13 = vld [vmem:[#allocation45_spill] sm:$0xff]  ;;  %v12964_v40 = vld [vmem:[#allocation46_spill] sm:$0xff] }
 0x7d6   :  { %v5723_v14 = vadd.f32 %v5675_v4, %v5627_v16  ;;  %v5676_v19 = vmul.f32 0.15415068, %v5523_v49  ;;  %6368 = vmatpush1.bf16.msra.mxu1 %v5803_v15  ;;  %v5638_v5 = vmul.f32 0.84584934, %v12963_v13  ;;  %v9721_v28 = vld [vmem:[%s12713_s0 + $0x48] ss:$12 sps:$4 sm:$0xff]  }
 0x7d7   :  { %v5726_v39 = vadd.f32 %v5678_v50, %v5630_v0  ;;  %6369 = vmatprep.subr.bf16.mxu1 %v12867_v12  ;;  %v5773_v62 = vmax.f32 %v5725_v47, 0.0  ;;  %v5636_v47 = vmul.f32 0.84584934, %v12964_v40 }
 0x7d8   :  { %v5724_v8 = vadd.f32 %v5676_v19, %v5628_v52  ;;  %v5771_v43 = vmax.f32 %v5723_v14, 0.0 }
 0x7d9   :  { %v5774_v7 = vmax.f32 %v5726_v39, 0.0  ;;  %v9726_v39 = vld [vmem:[%s12713_s0 + $0x64] ss:$12 sps:$4 sm:$0xff]  }
 0x7da   :  { %v5772_v23 = vmax.f32 %v5724_v8, 0.0  ;;  %6370 = vmatpush1.bf16.msra.mxu1 %v5804_v33 }
 0x7db   :  { %v5806_v34 = vpack.c.bf16 %v5774_v7, %v5773_v62  ;;  %6371 = vmatprep.subr.bf16.mxu1 %v12867_v12  ;;  %v9724_v7 = vld [vmem:[%s12713_s0 + $0x60] ss:$12 sps:$4 sm:$0xff]  }
 0x7dc   :  { %v5805_v44 = vpack.c.bf16 %v5772_v23, %v5771_v43  ;;  %v9729_v23 = vld [vmem:[%s12713_s0 + $0x7c] ss:$12 sps:$4 sm:$0xff]  }
 0x7de   :  { %6372 = vmatpush1.bf16.msra.mxu1 %v5805_v44 }
 0x7df   :  { %6373 = vmatprep.subr.bf16.mxu1 %v12867_v12  ;;  %v5634_v12 = vmul.f32 0.84584934, %v11850_v31  ;;  %v9720_v31 = vld [vmem:[%s12713_s0 + $0x34] ss:$12 sps:$4 sm:$0xff]  }
 0x7e2   :  { %v9127_v55 = vpop.f32.mrb[72].mxu0  ;;  %6374 = vmatpush1.bf16.msra.mxu1 %v5806_v34  ;;  %v5641_v34 = vmul.f32 0.84584934, %v11879_v38 }
 0x7e3   :  { %v5681_v48 = vmul.f32 0.15415068, %v9127_v55  ;;  %v5536_v57 = vpop.f32.mrb[73].mxu0  ;;  %v5639_v55 = vmul.f32 0.84584934, %v11871_v18 }
 0x7e4   :  { %v5679_v1 = vmul.f32 0.15415068, %v5536_v57  ;;  %v9128_v41 = vpop.f32.mrb[74].mxu0  ;;  %v5642_v57 = vmul.f32 0.84584934, %v11882_v9 }
 0x7e5   :  { %v5729_v36 = vadd.f32 %v5681_v48, %v5633_v63  ;;  %v5682_v32 = vmul.f32 0.15415068, %v9128_v41  ;;  %v5539_v30 = vpop.f32.mrb[75].mxu0  ;;  %6376 = vmatmul.mubr.bf16.vlgmr.msra.gmra.mrb[24].mxu1 %v9712_v24  ;;  %v9727_v18 = vld [vmem:[%s12713_s0 + $0x78] ss:$12 sps:$4 sm:$0xff]  }
 0x7e6   :  { %v5727_v29 = vadd.f32 %v5679_v1, %v5631_v42  ;;  %v5680_v26 = vmul.f32 0.15415068, %v5539_v30  ;;  %6383 = vmatprep.mubr.bf16.mxu1 %v9717_v45  ;;  %v9732_v9 = vld [vmem:[%s12713_s0 + $0x94] ss:$12 sps:$4 sm:$0xff]  }
 0x7e7   :  { %v5730_v27 = vadd.f32 %v5682_v32, %v5634_v12  ;;  %v5777_v58 = vmax.f32 %v5729_v36, 0.0  ;;  %v5640_v36 = vmul.f32 0.84584934, %v11874_v56  ;;  %v9730_v56 = vld [vmem:[%s12713_s0 + $0x90] ss:$12 sps:$4 sm:$0xff]  }
 0x7e8   :  { %v5728_v6 = vadd.f32 %v5680_v26, %v5632_v46  ;;  %v5775_v10 = vmax.f32 %v5727_v29, 0.0 }
 0x7e9   :  { %v5778_v22 = vmax.f32 %v5730_v27, 0.0 }
 0x7ea   :  { %v5776_v21 = vmax.f32 %v5728_v6, 0.0 }
 0x7eb   :  { %v5808_v60 = vpack.c.bf16 %v5778_v22, %v5777_v58  ;;  %v9735_v22 = vld [vmem:[%s12713_s0 + $0xac] ss:$12 sps:$4 sm:$0xff]  }
 0x7ec   :  { %v5807_v20 = vpack.c.bf16 %v5776_v21, %v5775_v10 }
 0x7ed   :  { %6384 = vmatmul.mubr.bf16.gmra.mrb[28].mxu1 %v9715_v35  ;;  %v5645_v35 = vmul.f32 0.84584934, %v11895_v59 }
 0x7ee   :  { %9141 = vmatprep.subr.bf16.mxu0 %v5807_v20  ;;  %6391 = vmatprep.mubr.bf16.mxu1 %v9720_v31  ;;  %v12965_v31 = vld [vmem:[#allocation34_spill] sm:$0xff] }
 0x7ef   :  { %9142 = vmatpush3.bf16.msra.mxu0 %v5807_v20 }
 0x7f0   :  { %9143 = vmatprep.subr.bf16.mxu0 %v5808_v60 }
 0x7f2   :  { %v9131_v37 = vpop.f32.mrb[76].mxu0 }
 0x7f3   :  { %v5685_v53 = vmul.f32 0.15415068, %v9131_v37  ;;  %v5552_v25 = vpop.f32.mrb[77].mxu0  ;;  %9144 = vmatpush3.bf16.msra.mxu0 %v5808_v60  ;;  %v5643_v60 = vmul.f32 0.84584934, %v12965_v31 }
 0x7f4   :  { %v5683_v2 = vmul.f32 0.15415068, %v5552_v25  ;;  %v9132_v33 = vpop.f32.mrb[78].mxu0  ;;  %v9781_v31 = vld [vmem:[%s12713_s0 + $0x198] ss:$12 sps:$4 sm:$0xff]  }
 0x7f5   :  { %v5733_v3 = vadd.f32 %v5685_v53, %v5637_v17  ;;  %v5686_v15 = vmul.f32 0.15415068, %v9132_v33  ;;  %v5555_v16 = vpop.f32.mrb[79].mxu0  ;;  %6392 = vmatmul.mubr.bf16.gmra.mrb[32].mxu1 %v9718_v54 }
 0x7f6   :  { %v5731_v4 = vadd.f32 %v5683_v2, %v5635_v51  ;;  %v5684_v0 = vmul.f32 0.15415068, %v5555_v16  ;;  %6399 = vmatprep.mubr.bf16.mxu1 %v9723_v61  ;;  %v12966_v61 = vld [vmem:[#allocation48_spill] sm:$0xff]  ;;  %v12967_v2 = vld [vmem:[#allocation47_spill] sm:$0xff]  ;;  %v9733_v16 = vld [vmem:[%s12713_s0 + $0xa8] ss:$12 sps:$4 sm:$0xff]  }
 0x7f7   :  { %v5734_v50 = vadd.f32 %v5686_v15, %v5638_v5  ;;  %v5781_v49 = vmax.f32 %v5733_v3, 0.0  ;;  %v5646_v17 = vmul.f32 0.84584934, %v12966_v61  ;;  %v5644_v33 = vmul.f32 0.84584934, %v12967_v2 }
 0x7f8   :  { %v5732_v11 = vadd.f32 %v5684_v0, %v5636_v47  ;;  %v5779_v52 = vmax.f32 %v5731_v4, 0.0  ;;  %v9738_v47 = vld [vmem:[%s12713_s0 + $0xc4] ss:$12 sps:$4 sm:$0xff]   ;;  %v9791_v61 = vld [vmem:[%s12713_s0 + $0x1cc] ss:$12 sps:$4 sm:$0xff]  }
 0x7f9   :  { %v5782_v14 = vmax.f32 %v5734_v50, 0.0  ;;  %v9794_v2 = vld [vmem:[%s12713_s0 + $0x1e4] ss:$12 sps:$4 sm:$0xff]  }
 0x7fa   :  { %v5780_v19 = vmax.f32 %v5732_v11, 0.0  ;;  %v9808_v11 = vld [vmem:[%s12715_s4 + $0xc0] sm:$0xff]  }
 0x7fb   :  { %v5810_v8 = vpack.c.bf16 %v5782_v14, %v5781_v49  ;;  %v9736_v49 = vld [vmem:[%s12713_s0 + $0xc0] ss:$12 sps:$4 sm:$0xff]  }
 0x7fc   :  { %v5809_v62 = vpack.c.bf16 %v5780_v19, %v5779_v52  ;;  %v9740_v14 = vld [vmem:[%s12713_s0 + $0x20] ss:$12 sps:$4 sm:$0xff]   ;;  %v9744_v52 = vld [vmem:[%s12713_s0 + $0x38] ss:$12 sps:$4 sm:$0xff]  }
 0x7fd   :  { %6400 = vmatmul.mubr.bf16.gmra.mrb[36].mxu1 %v9721_v28  ;;  %v9743_v28 = vld [vmem:[%s12713_s0 + $0xdc] ss:$12 sps:$4 sm:$0xff]  }
 0x7fe   :  { %9145 = vmatprep.subr.bf16.mxu0 %v5809_v62  ;;  %6407 = vmatprep.mubr.bf16.mxu1 %v9726_v39  ;;  %v9809_v19 = vld [vmem:[%s12715_s4 + $0xc8] sm:$0xff]   ;;  %v9810_v39 = vld [vmem:[%s12715_s4 + $0xd0] sm:$0xff]  }
 0x7ff   :  { %9146 = vmatpush3.bf16.msra.mxu0 %v5809_v62  ;;  %v9745_v62 = vld [vmem:[%s12713_s0 + $0x50] ss:$12 sps:$4 sm:$0xff]  }
 0x800   :  { %9147 = vmatprep.subr.bf16.mxu0 %v5810_v8 }
 0x802   :  { %v9135_v43 = vpop.f32.mrb[80].mxu0 }
 0x803   :  { %v5689_v44 = vmul.f32 0.15415068, %v9135_v43  ;;  %v5568_v24 = vpop.f32.mrb[81].mxu0  ;;  %9148 = vmatpush3.bf16.msra.mxu0 %v5810_v8  ;;  %v9741_v8 = vld [vmem:[%s12713_s0 + $0xd8] ss:$12 sps:$4 sm:$0xff]  }
 0x804   :  { %v5687_v45 = vmul.f32 0.15415068, %v5568_v24  ;;  %v9136_v63 = vpop.f32.mrb[82].mxu0  ;;  %v9749_v43 = vld [vmem:[%s12713_s0 + $0x68] ss:$12 sps:$4 sm:$0xff]  }
 0x805   :  { %v5737_v48 = vadd.f32 %v5689_v44, %v5641_v34  ;;  %v5690_v42 = vmul.f32 0.15415068, %v9136_v63  ;;  %v5571_v1 = vpop.f32.mrb[83].mxu0  ;;  %6408 = vmatmul.mubr.bf16.gmra.mrb[40].mxu1 %v9724_v7  ;;  %v9748_v7 = vld [vmem:[%s12713_s0 + $0xf4] ss:$12 sps:$4 sm:$0xff]  }
 0x806   :  { %v5735_v41 = vadd.f32 %v5687_v45, %v5639_v55  ;;  %v5688_v12 = vmul.f32 0.15415068, %v5571_v1  ;;  %6415 = vmatprep.mubr.bf16.mxu1 %v9729_v23  ;;  %v9811_v23 = vld [vmem:[%s12715_s4 + $0xd8] sm:$0xff]   ;;  %v9750_v44 = vld [vmem:[%s12713_s0 + $0x80] ss:$12 sps:$4 sm:$0xff]  }
 0x807   :  { %v5738_v32 = vadd.f32 %v5690_v42, %v5642_v57  ;;  %v5785_v30 = vmax.f32 %v5737_v48, 0.0  ;;  %v9746_v34 = vld [vmem:[%s12713_s0 + $0xf0] ss:$12 sps:$4 sm:$0xff]   ;;  %v9753_v24 = vld [vmem:[%s12713_s0 + $0x10c] ss:$12 sps:$4 sm:$0xff]   ;;  %v9812_v63 = vld [vmem:[%s12715_s4 + $0xe0] sm:$0xff]  }
 0x808   :  { %v5736_v38 = vadd.f32 %v5688_v12, %v5640_v36  ;;  %v5783_v46 = vmax.f32 %v5735_v41, 0.0  ;;  %v9754_v55 = vld [vmem:[%s12713_s0 + $0x98] ss:$12 sps:$4 sm:$0xff]   ;;  %v9751_v45 = vld [vmem:[%s12713_s0 + $0x108] ss:$12 sps:$4 sm:$0xff]  }
 0x809   :  { %v5786_v29 = vmax.f32 %v5738_v32, 0.0  ;;  %v9755_v48 = vld [vmem:[%s12713_s0 + $0xb0] ss:$12 sps:$4 sm:$0xff]   ;;  %v9759_v42 = vld [vmem:[%s12713_s0 + $0xc8] ss:$12 sps:$4 sm:$0xff]  }
 0x80a   :  { %v5784_v26 = vmax.f32 %v5736_v38, 0.0  ;;  %v9758_v57 = vld [vmem:[%s12713_s0 + $0x124] ss:$12 sps:$4 sm:$0xff]   ;;  %v9756_v1 = vld [vmem:[%s12713_s0 + $0x120] ss:$12 sps:$4 sm:$0xff]  }
 0x80b   :  { %v5812_v27 = vpack.c.bf16 %v5786_v29, %v5785_v30  ;;  %v9760_v41 = vld [vmem:[%s12713_s0 + $0xe0] ss:$12 sps:$4 sm:$0xff]   ;;  %v9763_v36 = vld [vmem:[%s12713_s0 + $0x13c] ss:$12 sps:$4 sm:$0xff]   ;;  %v9764_v12 = vld [vmem:[%s12713_s0 + $0xf8] ss:$12 sps:$4 sm:$0xff]  }
 0x80c   :  { %v5811_v6 = vpack.c.bf16 %v5784_v26, %v5783_v46  ;;  %v9761_v32 = vld [vmem:[%s12713_s0 + $0x138] ss:$12 sps:$4 sm:$0xff]   ;;  %v9765_v38 = vld [vmem:[%s12713_s0 + $0x110] ss:$12 sps:$4 sm:$0xff]   ;;  %v9768_v30 = vld [vmem:[%s12713_s0 + $0x154] ss:$12 sps:$4 sm:$0xff]  }
 0x80d   :  { %6416 = vmatmul.mubr.bf16.gmra.mrb[44].mxu1 %v9727_v18  ;;  %v9769_v29 = vld [vmem:[%s12713_s0 + $0x128] ss:$12 sps:$4 sm:$0xff]   ;;  %v9766_v18 = vld [vmem:[%s12713_s0 + $0x150] ss:$12 sps:$4 sm:$0xff]   ;;  %v9770_v46 = vld [vmem:[%s12713_s0 + $0x140] ss:$12 sps:$4 sm:$0xff]  }
 0x80e   :  { %9149 = vmatprep.subr.bf16.mxu0 %v5811_v6  ;;  %6423 = vmatprep.mubr.bf16.mxu1 %v9732_v9  ;;  %v9773_v26 = vld [vmem:[%s12713_s0 + $0x16c] ss:$12 sps:$4 sm:$0xff]  }
 0x80f   :  { %9150 = vmatpush3.bf16.msra.mxu0 %v5811_v6  ;;  %v9774_v9 = vld [vmem:[%s12713_s0 + $0x158] ss:$12 sps:$4 sm:$0xff]   ;;  %v9775_v6 = vld [vmem:[%s12713_s0 + $0x170] ss:$12 sps:$4 sm:$0xff]  }
 0x810   :  { %9151 = vmatprep.subr.bf16.mxu0 %v5812_v27 }
 0x812   :  { %v9139_v58 = vpop.f32.mrb[84].mxu0 }
 0x813   :  { %v5693_v10 = vmul.f32 0.15415068, %v9139_v58  ;;  %v5584_v21 = vpop.f32.mrb[85].mxu0  ;;  %9152 = vmatpush3.bf16.msra.mxu0 %v5812_v27  ;;  %v9771_v27 = vld [vmem:[%s12713_s0 + $0x168] ss:$12 sps:$4 sm:$0xff]  }
 0x814   :  { %v5691_v20 = vmul.f32 0.15415068, %v5584_v21  ;;  %v9140_v54 = vpop.f32.mrb[86].mxu0  ;;  %v9779_v58 = vld [vmem:[%s12713_s0 + $0x188] ss:$12 sps:$4 sm:$0xff]  }
 0x815   :  { %v5741_v37 = vadd.f32 %v5693_v10, %v5645_v35  ;;  %v5694_v53 = vmul.f32 0.15415068, %v9140_v54  ;;  %v5587_v25 = vpop.f32.mrb[87].mxu0  ;;  %6424 = vmatmul.mubr.bf16.gmra.mrb[48].mxu1 %v9730_v56  ;;  %v9778_v56 = vld [vmem:[%s12713_s0 + $0x184] ss:$12 sps:$4 sm:$0xff]  }
 0x816   :  { %v5739_v51 = vadd.f32 %v5691_v20, %v5643_v60  ;;  %v5692_v3 = vmul.f32 0.15415068, %v5587_v25  ;;  %6431 = vmatprep.mubr.bf16.mxu1 %v9735_v22  ;;  %v9776_v22 = vld [vmem:[%s12713_s0 + $0x180] ss:$12 sps:$4 sm:$0xff]   ;;  %v9783_v10 = vld [vmem:[%s12713_s0 + $0x19c] ss:$12 sps:$4 sm:$0xff]  }
 0x817   :  { %v5742_v13 = vadd.f32 %v5694_v53, %v5646_v17  ;;  %v5789_v5 = vmax.f32 %v5741_v37, 0.0  ;;  %v9780_v35 = vld [vmem:[%s12713_s0 + $0x1a0] ss:$12 sps:$4 sm:$0xff]   ;;  %v9784_v21 = vld [vmem:[%s12713_s0 + $0x1b8] ss:$12 sps:$4 sm:$0xff]  }
 0x818   :  { %v5740_v59 = vadd.f32 %v5692_v3, %v5644_v33  ;;  %v5787_v4 = vmax.f32 %v5739_v51, 0.0  ;;  %v9787_v60 = vld [vmem:[%s12713_s0 + $0x1b4] ss:$12 sps:$4 sm:$0xff]   ;;  %v9788_v20 = vld [vmem:[%s12713_s0 + $0x1d0] ss:$12 sps:$4 sm:$0xff]   ;;  %v9813_v25 = vld [vmem:[%s12715_s4 + $0xe8] sm:$0xff]  }
 0x819   :  { %v5790_v15 = vmax.f32 %v5742_v13, 0.0  ;;  %v9795_v54 = vld [vmem:[%s12713_s0 + $0x1e8] ss:$12 sps:$4 sm:$0xff]   ;;  %v9785_v37 = vld [vmem:[%s12713_s0 + $0x1b0] ss:$12 sps:$4 sm:$0xff]  }
 0x81a   :  { %v5788_v40 = vmax.f32 %v5740_v59, 0.0  ;;  %v9796_v17 = vld [vmem:[%s12713_s0 + $0x200] ss:$12 sps:$4 sm:$0xff]   ;;  %v9803_v53 = vld [vmem:[%s12713_s0 + $0x218] ss:$12 sps:$4 sm:$0xff]   ;;  %v9814_v3 = vld [vmem:[%s12715_s4 + $0xf0] sm:$0xff]  }
 0x81b   :  { %v5814_v0 = vpack.c.bf16 %v5790_v15, %v5789_v5  ;;  %v9789_v51 = vld [vmem:[%s12713_s0 + $0x1c8] ss:$12 sps:$4 sm:$0xff]   ;;  %v9804_v33 = vld [vmem:[%s12713_s0 + $0x230] ss:$12 sps:$4 sm:$0xff]   ;;  %v9792_v59 = vld [vmem:[%s12713_s0 + $0x1e0] ss:$12 sps:$4 sm:$0xff]  }
 0x81c   :  { %v5813_v50 = vpack.c.bf16 %v5788_v40, %v5787_v4  ;;  %v9815_v13 = vld [vmem:[%s12715_s4 + $0xf8] sm:$0xff]  }
 0x81d   :  { %6432 = vmatmul.mubr.bf16.gmra.mrb[52].mxu1 %v9733_v16  ;;  %v9799_v5 = vld [vmem:[%s12713_s0 + $0x1fc] ss:$12 sps:$4 sm:$0xff]   ;;  %v9797_v15 = vld [vmem:[%s12713_s0 + $0x1f8] ss:$12 sps:$4 sm:$0xff]   ;;  %v9802_v16 = vld [vmem:[%s12713_s0 + $0x214] ss:$12 sps:$4 sm:$0xff]  }
 0x81e   :  { %9153 = vmatprep.subr.bf16.mxu0 %v5813_v50  ;;  %6439 = vmatprep.mubr.bf16.mxu1 %v9738_v47  ;;  %v9800_v4 = vld [vmem:[%s12713_s0 + $0x210] ss:$12 sps:$4 sm:$0xff]   ;;  %v9807_v40 = vld [vmem:[%s12713_s0 + $0x22c] ss:$12 sps:$4 sm:$0xff]   ;;  %v9805_v47 = vld [vmem:[%s12713_s0 + $0x228] ss:$12 sps:$4 sm:$0xff]  }
 0x81f   :  { %9154 = vmatpush3.bf16.msra.mxu0 %v5813_v50 }
 0x820   :  { %9155 = vmatprep.subr.bf16.mxu0 %v5814_v0 }
 0x823   :  { %9156 = vmatpush3.bf16.msra.mxu0 %v5814_v0 }
 0x824   :  { %9205 = vmatprep.subr.bf16.mxu0 %v9808_v11 }
 0x825   :  { %6440 = vmatmul.mubr.bf16.gmra.mrb[56].mxu1 %v9736_v49 }
 0x826   :  { %9158 = vmatmul.mubr.bf16.vlgmr.msra.gmra.mrb[88].mxu0 %v9740_v14  ;;  %6447 = vmatprep.mubr.bf16.mxu1 %v9743_v28 }
 0x827   :  { %9161 = vmatprep.mubr.bf16.mxu0 %v9744_v52  ;;  %9206 = vmatpush3.bf16.msra.mxu0 %v9808_v11 }
 0x828   :  { %9207 = vmatprep.subr.bf16.mxu0 %v9809_v19 }
 0x82b   :  { %9208 = vmatpush3.bf16.msra.mxu0 %v9809_v19 }
 0x82c   :  { %9209 = vmatprep.subr.bf16.mxu0 %v9810_v39 }
 0x82d   :  { %6448 = vmatmul.mubr.bf16.gmra.mrb[60].mxu1 %v9741_v8 }
 0x82e   :  { %9162 = vmatmul.mubr.bf16.gmra.mrb[92].mxu0 %v9745_v62  ;;  %6455 = vmatprep.mubr.bf16.mxu1 %v9748_v7 }
 0x82f   :  { %9165 = vmatprep.mubr.bf16.mxu0 %v9749_v43  ;;  %9210 = vmatpush3.bf16.msra.mxu0 %v9810_v39 }
 0x830   :  { %9211 = vmatprep.subr.bf16.mxu0 %v9811_v23 }
 0x833   :  { %9212 = vmatpush3.bf16.msra.mxu0 %v9811_v23 }
 0x834   :  { %9213 = vmatprep.subr.bf16.mxu0 %v9812_v63 }
 0x835   :  { %6456 = vmatmul.mubr.bf16.gmra.mrb[64].mxu1 %v9746_v34 }
 0x836   :  { %9166 = vmatmul.mubr.bf16.gmra.mrb[96].mxu0 %v9750_v44  ;;  %6463 = vmatprep.mubr.bf16.mxu1 %v9753_v24 }
 0x837   :  { %9169 = vmatprep.mubr.bf16.mxu0 %v9754_v55  ;;  %9214 = vmatpush3.bf16.msra.mxu0 %v9812_v63 }
 0x838   :  { %9215 = vmatprep.subr.bf16.mxu0 %v9813_v25 }
 0x83b   :  { %9216 = vmatpush3.bf16.msra.mxu0 %v9813_v25 }
 0x83c   :  { %9217 = vmatprep.subr.bf16.mxu0 %v9814_v3 }
 0x83d   :  { %6464 = vmatmul.mubr.bf16.gmra.mrb[68].mxu1 %v9751_v45 }
 0x83e   :  { %9170 = vmatmul.mubr.bf16.gmra.mrb[100].mxu0 %v9755_v48  ;;  %6471 = vmatprep.mubr.bf16.mxu1 %v9758_v57 }
 0x83f   :  { %9173 = vmatprep.mubr.bf16.mxu0 %v9759_v42  ;;  %9218 = vmatpush3.bf16.msra.mxu0 %v9814_v3  ;;  %v9818_v3 = vld [vmem:[%s12716_s5 + $0x10] sm:$0xff]  }
 0x840   :  { %9219 = vmatprep.subr.bf16.mxu0 %v9815_v13 }
 0x843   :  { %9220 = vmatpush3.bf16.msra.mxu0 %v9815_v13  ;;  %v12970_v13 = vld [vmem:[#allocation6_spill] sm:$0xff] }
 0x845   :  { %6472 = vmatmul.mubr.bf16.gmra.mrb[72].mxu1 %v9756_v1 }
 0x846   :  { %9174 = vmatmul.mubr.bf16.gmra.mrb[104].mxu0 %v9760_v41  ;;  %6479 = vmatprep.mubr.bf16.mxu1 %v9763_v36 }
 0x847   :  { %9177 = vmatprep.mubr.bf16.mxu0 %v9764_v12 }
 0x84d   :  { %6480 = vmatmul.mubr.bf16.gmra.mrb[76].mxu1 %v9761_v32 }
 0x84e   :  { %9178 = vmatmul.mubr.bf16.gmra.mrb[108].mxu0 %v9765_v38  ;;  %6487 = vmatprep.mubr.bf16.mxu1 %v9768_v30 }
 0x84f   :  { %9181 = vmatprep.mubr.bf16.mxu0 %v9769_v29 }
 0x855   :  { %6488 = vmatmul.mubr.bf16.gmra.mrb[80].mxu1 %v9766_v18 }
 0x856   :  { %9182 = vmatmul.mubr.bf16.gmra.mrb[112].mxu0 %v9770_v46  ;;  %6495 = vmatprep.mubr.bf16.mxu1 %v9773_v26 }
 0x857   :  { %9185 = vmatprep.mubr.bf16.mxu0 %v9774_v9 }
 0x85d   :  { %6496 = vmatmul.mubr.bf16.gmra.mrb[84].mxu1 %v9771_v27 }
 0x85e   :  { %9186 = vmatmul.mubr.bf16.gmra.mrb[116].mxu0 %v9775_v6  ;;  %6503 = vmatprep.mubr.bf16.mxu1 %v9778_v56 }
 0x85f   :  { %9189 = vmatprep.mubr.bf16.mxu0 %v9779_v58 }
 0x865   :  { %6504 = vmatmul.mubr.bf16.gmra.mrb[88].mxu1 %v9776_v22 }
 0x866   :  { %9190 = vmatmul.mubr.bf16.gmra.mrb[120].mxu0 %v9780_v35  ;;  %6511 = vmatprep.mubr.bf16.mxu1 %v9783_v10 }
 0x867   :  { %9193 = vmatprep.mubr.bf16.mxu0 %v9784_v21 }
 0x86d   :  { %6512 = vmatmul.mubr.bf16.gmra.mrb[92].mxu1 %v9781_v31 }
 0x86e   :  { %6519 = vmatprep.mubr.bf16.mxu1 %v9787_v60  ;;  %9194 = vmatmul.mubr.bf16.gmra.mrb[124].mxu0 %v9788_v20  ;;  %v9816_v60 = vld [vmem:[%s12716_s5] sm:$0xff]  }
 0x86f   :  { %9197 = vmatprep.mubr.bf16.mxu0 %v9795_v54  ;;  %9269 = vmatprep.subr.bf16.mxu1 %v9816_v60 }
 0x870   :  { %9270 = vmatpush3.bf16.msra.mxu1 %v9816_v60 }
 0x875   :  { %6520 = vmatmul.mubr.bf16.gmra.mrb[96].mxu1 %v9785_v37 }
 0x876   :  { %6527 = vmatprep.mubr.bf16.mxu1 %v9791_v61  ;;  %9198 = vmatmul.mubr.bf16.gmra.mrb[128].mxu0 %v9796_v17  ;;  %v9817_v61 = vld [vmem:[%s12716_s5 + $0x8] sm:$0xff]  }
 0x877   :  { %9201 = vmatprep.mubr.bf16.mxu0 %v9803_v53  ;;  %v12968_v53 = vld [vmem:[#allocation4_spill] sm:$0xff]  ;;  %9271 = vmatprep.subr.bf16.mxu1 %v9817_v61 }
 0x878   :  { %9272 = vmatpush3.bf16.msra.mxu1 %v9817_v61 }
 0x879   :  { %9273 = vmatprep.subr.bf16.mxu1 %v9818_v3 }
 0x87c   :  { %9274 = vmatpush3.bf16.msra.mxu1 %v9818_v3 }
 0x87d   :  { %6528 = vmatmul.mubr.bf16.gmra.mrb[100].mxu1 %v9789_v51  ;;  %v12969_v51 = vld [vmem:[#allocation5_spill] sm:$0xff] }
 0x87e   :  { %6535 = vmatprep.mubr.bf16.mxu1 %v9794_v2  ;;  %9202 = vmatmul.mubr.bf16.gmra.mrb[132].mxu0 %v9804_v33 }
 0x885   :  { %6536 = vmatmul.mubr.bf16.gmra.mrb[104].mxu1 %v9792_v59 }
 0x886   :  { %6543 = vmatprep.mubr.bf16.mxu1 %v9799_v5  ;;  %v12971_v5 = vld [vmem:[#allocation7_spill] sm:$0xff] }
 0x88d   :  { %6544 = vmatmul.mubr.bf16.gmra.mrb[108].mxu1 %v9797_v15 }
 0x88e   :  { %6551 = vmatprep.mubr.bf16.mxu1 %v9802_v16 }
 0x895   :  { %6552 = vmatmul.mubr.bf16.gmra.mrb[112].mxu1 %v9800_v4 }
 0x896   :  { %6559 = vmatprep.mubr.bf16.mxu1 %v9807_v40 }
 0x89d   :  { %6560 = vmatmul.mubr.bf16.gmra.mrb[116].mxu1 %v9805_v47 }
 0x8b8   :  { %v6377_v0 = vpop.f32.mrb[24].mxu1 }
 0x8b9   :  { %v6379_v50 = vpop.f32.mrb[25].mxu1 }
 0x8ba   :  { %v6380_v11 = vpop.f32.mrb[26].mxu1 }
 0x8bb   :  { %v6382_v49 = vpop.f32.mrb[27].mxu1 }
 0x8c0   :  { %v6385_v14 = vpop.f32.mrb[28].mxu1 }
 0x8c1   :  { %v6387_v28 = vpop.f32.mrb[29].mxu1 }
 0x8c2   :  { %v6388_v52 = vpop.f32.mrb[30].mxu1 }
 0x8c3   :  { %v6390_v19 = vpop.f32.mrb[31].mxu1 }
 0x8c8   :  { %v6393_v39 = vpop.f32.mrb[32].mxu1 }
 0x8c9   :  { %v6395_v8 = vpop.f32.mrb[33].mxu1 }
 0x8ca   :  { %v12205_v62 = vpop.f32.mrb[34].mxu1 }
 0x8cb   :  { %v6398_v7 = vpop.f32.mrb[35].mxu1 }
 0x8cc   :  { %v9819_v7 = vld [vmem:[%s12716_s5 + $0x18] sm:$0xff]  }
 0x8cd   :  { %9275 = vmatprep.subr.bf16.mxu1 %v9819_v7 }
 0x8ce   :  { %9276 = vmatpush3.bf16.msra.mxu1 %v9819_v7 }
 0x8d0   :  { %v6401_v43 = vpop.f32.mrb[36].mxu1 }
 0x8d1   :  { %v6403_v23 = vpop.f32.mrb[37].mxu1 }
 0x8d2   :  { %v6404_v34 = vpop.f32.mrb[38].mxu1 }
 0x8d3   :  { %v6406_v44 = vpop.f32.mrb[39].mxu1 }
 0x8d8   :  { %v12207_v24 = vpop.f32.mrb[40].mxu1 }
 0x8d9   :  { %v6411_v55 = vpop.f32.mrb[41].mxu1 }
 0x8da   :  { %v12209_v45 = vpop.f32.mrb[42].mxu1  ;;  %v12972_v55 = vld [vmem:[#allocation8_spill] sm:$0xff] }
 0x8db   :  { %v6414_v63 = vpop.f32.mrb[43].mxu1 }
 0x8e0   :  { %v12211_v48 = vpop.f32.mrb[44].mxu1 }
 0x8e1   :  { %v6419_v57 = vpop.f32.mrb[45].mxu1 }
 0x8e2   :  { %v12213_v42 = vpop.f32.mrb[46].mxu1  ;;  %v12973_v57 = vld [vmem:[#allocation9_spill] sm:$0xff] }
 0x8e3   :  { %v6422_v1 = vpop.f32.mrb[47].mxu1 }
 0x8e8   :  { %v12215_v41 = vpop.f32.mrb[48].mxu1 }
 0x8e9   :  { %v6427_v36 = vpop.f32.mrb[49].mxu1 }
 0x8ea   :  { %v12217_v12 = vpop.f32.mrb[50].mxu1  ;;  %v9820_v36 = vld [vmem:[%s12716_s5 + $0x20] sm:$0xff]  }
 0x8eb   :  { %v6430_v32 = vpop.f32.mrb[51].mxu1  ;;  %9277 = vmatprep.subr.bf16.mxu1 %v9820_v36 }
 0x8ec   :  { %v12974_v32 = vld [vmem:[#allocation10_spill] sm:$0xff]  ;;  %9278 = vmatpush3.bf16.msra.mxu1 %v9820_v36 }
 0x8f0   :  { %v12219_v38 = vpop.f32.mrb[52].mxu1 }
 0x8f1   :  { %v6435_v30 = vpop.f32.mrb[53].mxu1 }
 0x8f2   :  { %v12221_v29 = vpop.f32.mrb[54].mxu1  ;;  %v12975_v30 = vld [vmem:[#allocation11_spill] sm:$0xff] }
 0x8f3   :  { %v6438_v18 = vpop.f32.mrb[55].mxu1 }
 0x8f8   :  { %v12223_v46 = vpop.f32.mrb[56].mxu1 }
 0x8f9   :  { %v9159_v26 = vpop.f32.mrb[88].mxu0  ;;  %v6443_v9 = vpop.f32.mrb[57].mxu1 }
 0x8fa   :  { %v6611_v27 = vadd.f32 %v9159_v26, %v6385_v14  ;;  %v6602_v6 = vpop.f32.mrb[89].mxu0  ;;  %v12225_v56 = vpop.f32.mrb[58].mxu1 }
 0x8fb   :  { %v6603_v58 = vadd.f32 %v6602_v6, %v6377_v0  ;;  %v9160_v22 = vpop.f32.mrb[90].mxu0  ;;  %v6446_v35 = vpop.f32.mrb[59].mxu1 }
 0x8fc   :  { %v6795_v10 = vmul.f32 0.9, %v6611_v27  ;;  %v6614_v21 = vadd.f32 %v9160_v22, %v6388_v52  ;;  %v6605_v31 = vpop.f32.mrb[91].mxu0 }
 0x8fd   :  { %v6793_v20 = vmul.f32 0.9, %v6603_v58  ;;  %v6606_v54 = vadd.f32 %v6605_v31, %v6380_v11 }
 0x8fe   :  { %v6796_v37 = vmul.f32 0.9, %v6614_v21  ;;  %v12234_v25 = vadd.f32 %v6795_v10, %v12968_v53 }
 0x8ff   :  { %v6794_v17 = vmul.f32 0.9, %v6606_v54  ;;  %v12245_v59 = vadd.f32 %v6793_v20, %v12970_v13 }
 0x900   :  { %v12237_v2 = vadd.f32 %v6796_v37, %v12969_v51  ;;  %v12239_v33 = vpop.f32.mrb[60].mxu1  ;;  %v12977_v51 = vld [vmem:[#allocation13_spill] sm:$0xff] }
 0x901   :  { %v12248_v15 = vadd.f32 %v6794_v17, %v12971_v5  ;;  %v9163_v16 = vpop.f32.mrb[92].mxu0  ;;  %v6451_v4 = vpop.f32.mrb[61].mxu1  ;;  %v12978_v5 = vld [vmem:[#allocation14_spill] sm:$0xff] }
 0x902   :  { %v7010_v40 = vpack.c.bf16 %v12237_v2, %v12234_v25  ;;  %v6627_v47 = vadd.f32 %v9163_v16, %v6401_v43  ;;  %v6618_v0 = vpop.f32.mrb[93].mxu0  ;;  %v12252_v50 = vpop.f32.mrb[62].mxu1 }
 0x903   :  { %v6619_v11 = vadd.f32 %v6618_v0, %v6393_v39  ;;  %v9164_v49 = vpop.f32.mrb[94].mxu0  ;;  %v7009_v14 = vpack.c.bf16 %v12248_v15, %v12245_v59  ;;  %v6454_v28 = vpop.f32.mrb[63].mxu1 }
 0x904   :  { %v6799_v52 = vmul.f32 0.9, %v6627_v47  ;;  %v6630_v19 = vadd.f32 %v9164_v49, %v6404_v34  ;;  %v6621_v8 = vpop.f32.mrb[95].mxu0 }
 0x905   :  { %v6797_v23 = vmul.f32 0.9, %v6619_v11  ;;  %v6622_v43 = vadd.f32 %v6621_v8, %v12205_v62  ;;  %9221 = vmatprep.mubr.bf16.mxu0 %v7009_v14 }
 0x906   :  { %v6800_v44 = vmul.f32 0.9, %v6630_v19  ;;  %9222 = vmatmul.mubr.bf16.vlgmr.msra.gmra.mrb[136].mxu0 %v7010_v40  ;;  %v12261_v63 = vadd.f32 %v6799_v52, %v12972_v55  ;;  %v12980_v55 = vld [vmem:[#allocation16_spill] sm:$0xff] }
 0x907   :  { %v6798_v39 = vmul.f32 0.9, %v6622_v43  ;;  %v12272_v62 = vadd.f32 %v6797_v23, %v12974_v32 }
 0x908   :  { %v12264_v1 = vadd.f32 %v6800_v44, %v12973_v57  ;;  %v12266_v34 = vpop.f32.mrb[64].mxu1 }
 0x909   :  { %v12275_v18 = vadd.f32 %v6798_v39, %v12975_v30  ;;  %v9167_v26 = vpop.f32.mrb[96].mxu0  ;;  %v6459_v9 = vpop.f32.mrb[65].mxu1  ;;  %v12982_v30 = vld [vmem:[#allocation18_spill] sm:$0xff] }
 0x90a   :  { %v7012_v27 = vpack.c.bf16 %v12264_v1, %v12261_v63  ;;  %v6643_v6 = vadd.f32 %v9167_v26, %v12211_v48  ;;  %v6634_v58 = vpop.f32.mrb[97].mxu0  ;;  %v12280_v22 = vpop.f32.mrb[66].mxu1  ;;  %v12983_v9 = vld [vmem:[#allocation19_spill] sm:$0xff] }
 0x90b   :  { %v6635_v35 = vadd.f32 %v6634_v58, %v12207_v24  ;;  %v9168_v10 = vpop.f32.mrb[98].mxu0  ;;  %v7011_v21 = vpack.c.bf16 %v12275_v18, %v12272_v62  ;;  %v6462_v31 = vpop.f32.mrb[67].mxu1  ;;  %v12976_v24 = vld [vmem:[#allocation12_spill] sm:$0xff] }
 0x90c   :  { %v6803_v60 = vmul.f32 0.9, %v6643_v6  ;;  %v6646_v20 = vadd.f32 %v9168_v10, %v12213_v42  ;;  %v6637_v54 = vpop.f32.mrb[99].mxu0  ;;  %v12979_v42 = vld [vmem:[#allocation15_spill] sm:$0xff] }
 0x90d   :  { %v6801_v37 = vmul.f32 0.9, %v6635_v35  ;;  %v6638_v61 = vadd.f32 %v6637_v54, %v12209_v45  ;;  %9225 = vmatprep.mubr.bf16.mxu0 %v7011_v21 }
 0x90e   :  { %v6804_v48 = vmul.f32 0.9, %v6646_v20  ;;  %9226 = vmatmul.mubr.bf16.gmra.mrb[140].mxu0 %v7012_v27  ;;  %v12288_v53 = vadd.f32 %v6803_v60, %v12976_v24 }
 0x90f   :  { %v6802_v17 = vmul.f32 0.9, %v6638_v61  ;;  %v12294_v16 = vadd.f32 %v6801_v37, %v12978_v5 }
 0x910   :  { %v12291_v3 = vadd.f32 %v6804_v48, %v12977_v51  ;;  %v6465_v13 = vpop.f32.mrb[68].mxu1  ;;  %v12984_v51 = vld [vmem:[#allocation22_spill] sm:$0xff] }
 0x911   :  { %v12297_v4 = vadd.f32 %v6802_v17, %v12979_v42  ;;  %v9171_v40 = vpop.f32.mrb[100].mxu0  ;;  %v6467_v45 = vpop.f32.mrb[69].mxu1 }
 0x912   :  { %v7014_v47 = vpack.c.bf16 %v12291_v3, %v12288_v53  ;;  %v6659_v0 = vadd.f32 %v9171_v40, %v12219_v38  ;;  %v6650_v11 = vpop.f32.mrb[101].mxu0  ;;  %v6468_v49 = vpop.f32.mrb[70].mxu1  ;;  %v12986_v45 = vld [vmem:[#allocation20_spill] sm:$0xff] }
 0x913   :  { %v6651_v14 = vadd.f32 %v6650_v11, %v12215_v41  ;;  %v9172_v28 = vpop.f32.mrb[102].mxu0  ;;  %v7013_v52 = vpack.c.bf16 %v12297_v4, %v12294_v16  ;;  %v6470_v19 = vpop.f32.mrb[71].mxu1  ;;  %v12981_v41 = vld [vmem:[#allocation17_spill] sm:$0xff] }
 0x914   :  { %v6807_v8 = vmul.f32 0.9, %v6659_v0  ;;  %v6662_v7 = vadd.f32 %v9172_v28, %v12221_v29  ;;  %v6653_v23 = vpop.f32.mrb[103].mxu0  ;;  %v12987_v0 = vld [vmem:[#allocation21_spill] sm:$0xff] }
 0x915   :  { %v6805_v43 = vmul.f32 0.9, %v6651_v14  ;;  %v6654_v44 = vadd.f32 %v6653_v23, %v12217_v12  ;;  %9229 = vmatprep.mubr.bf16.mxu0 %v7013_v52 }
 0x916   :  { %v6808_v39 = vmul.f32 0.9, %v6662_v7  ;;  %9230 = vmatmul.mubr.bf16.gmra.mrb[144].mxu0 %v7014_v47  ;;  %v12308_v57 = vadd.f32 %v6807_v8, %v12980_v55 }
 0x917   :  { %v6806_v38 = vmul.f32 0.9, %v6654_v44  ;;  %v12314_v26 = vadd.f32 %v6805_v43, %v12982_v30 }
 0x918   :  { %v12311_v36 = vadd.f32 %v6808_v39, %v12981_v41  ;;  %v6473_v32 = vpop.f32.mrb[72].mxu1 }
 0x919   :  { %v12317_v29 = vadd.f32 %v6806_v38, %v12983_v9  ;;  %v9175_v27 = vpop.f32.mrb[104].mxu0  ;;  %v6475_v6 = vpop.f32.mrb[73].mxu1 }
 0x91a   :  { %v7016_v12 = vpack.c.bf16 %v12311_v36, %v12308_v57  ;;  %v6675_v58 = vadd.f32 %v9175_v27, %v12239_v33  ;;  %v6666_v35 = vpop.f32.mrb[105].mxu0  ;;  %v6476_v10 = vpop.f32.mrb[74].mxu1  ;;  %v12989_v6 = vld [vmem:[#allocation27_spill] sm:$0xff] }
 0x91b   :  { %v6667_v21 = vadd.f32 %v6666_v35, %v12223_v46  ;;  %v9176_v31 = vpop.f32.mrb[106].mxu0  ;;  %v7015_v60 = vpack.c.bf16 %v12317_v29, %v12314_v26  ;;  %v6478_v20 = vpop.f32.mrb[75].mxu1  ;;  %v12985_v46 = vld [vmem:[#allocation23_spill] sm:$0xff] }
 0x91c   :  { %v6811_v54 = vmul.f32 0.9, %v6675_v58  ;;  %v6678_v37 = vadd.f32 %v9176_v31, %v12252_v50  ;;  %v6669_v61 = vpop.f32.mrb[107].mxu0  ;;  %v12990_v58 = vld [vmem:[#allocation24_spill] sm:$0xff] }
 0x91d   :  { %v6809_v48 = vmul.f32 0.9, %v6667_v21  ;;  %v6670_v17 = vadd.f32 %v6669_v61, %v12225_v56  ;;  %9233 = vmatprep.mubr.bf16.mxu0 %v7015_v60  ;;  %v12991_v21 = vld [vmem:[#allocation25_spill] sm:$0xff] }
 0x91e   :  { %v6812_v24 = vmul.f32 0.9, %v6678_v37  ;;  %9234 = vmatmul.mubr.bf16.gmra.mrb[148].mxu0 %v7016_v12  ;;  %v12328_v5 = vadd.f32 %v6811_v54, %v12984_v51 }
 0x91f   :  { %v6810_v33 = vmul.f32 0.9, %v6670_v17  ;;  %v12334_v47 = vadd.f32 %v6809_v48, %v12986_v45 }
 0x920   :  { %v12331_v42 = vadd.f32 %v6812_v24, %v12985_v46  ;;  %v6481_v40 = vpop.f32.mrb[76].mxu1 }
 0x921   :  { %v12337_v50 = vadd.f32 %v6810_v33, %v12987_v0  ;;  %v9179_v11 = vpop.f32.mrb[108].mxu0  ;;  %v6483_v14 = vpop.f32.mrb[77].mxu1 }
 0x922   :  { %v7018_v56 = vpack.c.bf16 %v12331_v42, %v12328_v5  ;;  %v6691_v28 = vadd.f32 %v9179_v11, %v6465_v13  ;;  %v6682_v52 = vpop.f32.mrb[109].mxu0  ;;  %v6484_v19 = vpop.f32.mrb[78].mxu1  ;;  %v12988_v13 = vld [vmem:[#allocation26_spill] sm:$0xff] }
 0x923   :  { %v6683_v8 = vadd.f32 %v6682_v52, %v12266_v34  ;;  %v9180_v7 = vpop.f32.mrb[110].mxu0  ;;  %v7017_v23 = vpack.c.bf16 %v12337_v50, %v12334_v47  ;;  %v6486_v43 = vpop.f32.mrb[79].mxu1 }
 0x924   :  { %v6815_v44 = vmul.f32 0.9, %v6691_v28  ;;  %v6694_v39 = vadd.f32 %v9180_v7, %v6468_v49  ;;  %v6685_v38 = vpop.f32.mrb[111].mxu0 }
 0x925   :  { %v6813_v55 = vmul.f32 0.9, %v6683_v8  ;;  %v6686_v41 = vadd.f32 %v6685_v38, %v12280_v22  ;;  %9237 = vmatprep.mubr.bf16.mxu0 %v7017_v23  ;;  %v12994_v8 = vld [vmem:[#allocation28_spill] sm:$0xff]  ;;  %v12995_v23 = vld [vmem:[#allocation29_spill] sm:$0xff] }
 0x926   :  { %v6816_v30 = vmul.f32 0.9, %v6694_v39  ;;  %9238 = vmatmul.mubr.bf16.gmra.mrb[152].mxu0 %v7018_v56  ;;  %v12346_v27 = vadd.f32 %v6815_v44, %v12988_v13  ;;  %v12992_v56 = vld [vmem:[#allocation30_spill] sm:$0xff] }
 0x927   :  { %v6814_v9 = vmul.f32 0.9, %v6686_v41  ;;  %v12352_v35 = vadd.f32 %v6813_v55, %v12990_v58 }
 0x928   :  { %v12349_v34 = vadd.f32 %v6816_v30, %v12989_v6  ;;  %v6489_v12 = vpop.f32.mrb[80].mxu1 }
 0x929   :  { %v12355_v49 = vadd.f32 %v6814_v9, %v12991_v21  ;;  %v9183_v31 = vpop.f32.mrb[112].mxu0  ;;  %v6491_v60 = vpop.f32.mrb[81].mxu1 }
 0x92a   :  { %v7020_v22 = vpack.c.bf16 %v12349_v34, %v12346_v27  ;;  %v6707_v20 = vadd.f32 %v9183_v31, %v6481_v40  ;;  %v6698_v54 = vpop.f32.mrb[113].mxu0  ;;  %v6492_v37 = vpop.f32.mrb[82].mxu1  ;;  %v12993_v40 = vld [vmem:[#allocation31_spill] sm:$0xff] }
 0x92b   :  { %v6699_v61 = vadd.f32 %v6698_v54, %v6473_v32  ;;  %v9184_v48 = vpop.f32.mrb[114].mxu0  ;;  %v7019_v17 = vpack.c.bf16 %v12355_v49, %v12352_v35  ;;  %v6494_v24 = vpop.f32.mrb[83].mxu1  ;;  %v12996_v54 = vld [vmem:[#allocation35_spill] sm:$0xff] }
 0x92c   :  { %v6819_v33 = vmul.f32 0.9, %v6707_v20  ;;  %v6710_v51 = vadd.f32 %v9184_v48, %v6484_v19  ;;  %v6701_v46 = vpop.f32.mrb[115].mxu0  ;;  %v12997_v48 = vld [vmem:[#allocation36_spill] sm:$0xff] }
 0x92d   :  { %v6817_v45 = vmul.f32 0.9, %v6699_v61  ;;  %v6702_v0 = vadd.f32 %v6701_v46, %v6476_v10  ;;  %9241 = vmatprep.mubr.bf16.mxu0 %v7019_v17  ;;  %v12998_v24 = vld [vmem:[#allocation32_spill] sm:$0xff] }
 0x92e   :  { %v6820_v11 = vmul.f32 0.9, %v6710_v51  ;;  %9242 = vmatmul.mubr.bf16.gmra.mrb[156].mxu0 %v7020_v22  ;;  %v12362_v28 = vadd.f32 %v6819_v33, %v12992_v56  ;;  %v12999_v51 = vld [vmem:[#allocation33_spill] sm:$0xff] }
 0x92f   :  { %v6818_v14 = vmul.f32 0.9, %v6702_v0  ;;  %v12368_v7 = vadd.f32 %v6817_v45, %v12994_v8 }
 0x930   :  { %v12365_v52 = vadd.f32 %v6820_v11, %v12993_v40  ;;  %v6497_v32 = vpop.f32.mrb[84].mxu1 }
 0x931   :  { %v12371_v43 = vadd.f32 %v6818_v14, %v12995_v23  ;;  %v9187_v19 = vpop.f32.mrb[116].mxu0  ;;  %v6499_v44 = vpop.f32.mrb[85].mxu1 }
 0x932   :  { %v7022_v10 = vpack.c.bf16 %v12365_v52, %v12362_v28  ;;  %v6723_v39 = vadd.f32 %v9187_v19, %v6497_v32  ;;  %v6714_v38 = vpop.f32.mrb[117].mxu0  ;;  %v6500_v55 = vpop.f32.mrb[86].mxu1 }
 0x933   :  { %v6715_v41 = vadd.f32 %v6714_v38, %v6489_v12  ;;  %v9188_v30 = vpop.f32.mrb[118].mxu0  ;;  %v7021_v9 = vpack.c.bf16 %v12371_v43, %v12368_v7  ;;  %v6502_v13 = vpop.f32.mrb[87].mxu1  ;;  %v13000_v38 = vld [vmem:[#allocation37_spill] sm:$0xff] }
 0x934   :  { %v6823_v6 = vmul.f32 0.9, %v6723_v39  ;;  %v6726_v58 = vadd.f32 %v9188_v30, %v6500_v55  ;;  %v6717_v21 = vpop.f32.mrb[119].mxu0 }
 0x935   :  { %v6821_v31 = vmul.f32 0.9, %v6715_v41  ;;  %v6718_v60 = vadd.f32 %v6717_v21, %v6492_v37  ;;  %9245 = vmatprep.mubr.bf16.mxu0 %v7021_v9  ;;  %v13001_v41 = vld [vmem:[#allocation38_spill] sm:$0xff] }
 0x936   :  { %v6824_v22 = vmul.f32 0.9, %v6726_v58  ;;  %9246 = vmatmul.mubr.bf16.gmra.mrb[160].mxu0 %v7022_v10  ;;  %v12378_v61 = vadd.f32 %v6823_v6, %v12996_v54 }
 0x937   :  { %v6822_v20 = vmul.f32 0.9, %v6718_v60  ;;  %v12384_v33 = vadd.f32 %v6821_v31, %v12998_v24  ;;  %v13002_v24 = vld [vmem:[#allocation39_spill] sm:$0xff] }
 0x938   :  { %v12381_v17 = vadd.f32 %v6824_v22, %v12997_v48  ;;  %v6505_v12 = vpop.f32.mrb[88].mxu1 }
 0x939   :  { %v12387_v46 = vadd.f32 %v6822_v20, %v12999_v51  ;;  %v9191_v45 = vpop.f32.mrb[120].mxu0  ;;  %v6507_v0 = vpop.f32.mrb[89].mxu1 }
 0x93a   :  { %v7024_v37 = vpack.c.bf16 %v12381_v17, %v12378_v61  ;;  %v6730_v11 = vpop.f32.mrb[121].mxu0  ;;  %v6508_v14 = vpop.f32.mrb[90].mxu1  ;;  %v13003_v0 = vld [vmem:[#allocation40_spill] sm:$0xff] }
 0x93b   :  { %v6731_v56 = vadd.f32 %v6730_v11, %v6505_v12  ;;  %v9192_v40 = vpop.f32.mrb[122].mxu0  ;;  %v7023_v32 = vpack.c.bf16 %v12387_v46, %v12384_v33  ;;  %v6510_v8 = vpop.f32.mrb[91].mxu1 }
 0x93c   :  { %v6733_v23 = vpop.f32.mrb[123].mxu0 }
 0x93d   :  { %v6825_v19 = vmul.f32 0.9, %v6731_v56  ;;  %v6734_v44 = vadd.f32 %v6733_v23, %v6508_v14  ;;  %9249 = vmatprep.mubr.bf16.mxu0 %v7023_v32 }
 0x93e   :  { %9250 = vmatmul.mubr.bf16.gmra.mrb[164].mxu0 %v7024_v37 }
 0x93f   :  { %v6826_v10 = vmul.f32 0.9, %v6734_v44  ;;  %v12394_v55 = vadd.f32 %v6825_v19, %v13000_v38 }
 0x940   :  { %v6513_v39 = vpop.f32.mrb[92].mxu1 }
 0x941   :  { %v12397_v30 = vadd.f32 %v6826_v10, %v13001_v41  ;;  %v6739_v9 = vadd.f32 %v9191_v45, %v6513_v39  ;;  %v6515_v13 = vpop.f32.mrb[93].mxu1  ;;  %v9195_v6 = vpop.f32.mrb[124].mxu0  ;;  %v13004_v41 = vld [vmem:[#allocation41_spill] sm:$0xff] }
 0x942   :  { %v6516_v58 = vpop.f32.mrb[94].mxu1  ;;  %v6746_v21 = vpop.f32.mrb[125].mxu0  ;;  %v13005_v13 = vld [vmem:[#allocation42_spill] sm:$0xff] }
 0x943   :  { %v6827_v31 = vmul.f32 0.9, %v6739_v9  ;;  %v6742_v60 = vadd.f32 %v9192_v40, %v6516_v58  ;;  %v7025_v22 = vpack.c.bf16 %v12397_v30, %v12394_v55  ;;  %v6518_v20 = vpop.f32.mrb[95].mxu1  ;;  %v9196_v54 = vpop.f32.mrb[126].mxu0 }
 0x944   :  { %v6749_v48 = vpop.f32.mrb[127].mxu0 }
 0x945   :  { %v6828_v12 = vmul.f32 0.9, %v6742_v60  ;;  %9253 = vmatprep.mubr.bf16.mxu0 %v7025_v22  ;;  %v12402_v51 = vadd.f32 %v6827_v31, %v13002_v24 }
 0x947   :  { %v12405_v37 = vadd.f32 %v6828_v12, %v13003_v0 }
 0x948   :  { %v6521_v45 = vpop.f32.mrb[96].mxu1 }
 0x949   :  { %v7026_v11 = vpack.c.bf16 %v12405_v37, %v12402_v51  ;;  %v6747_v14 = vadd.f32 %v6746_v21, %v6521_v45  ;;  %v6523_v56 = vpop.f32.mrb[97].mxu1  ;;  %v9199_v40 = vpop.f32.mrb[128].mxu0 }
 0x94a   :  { %v6524_v32 = vpop.f32.mrb[98].mxu1  ;;  %v6762_v8 = vpop.f32.mrb[129].mxu0 }
 0x94b   :  { %v6829_v23 = vmul.f32 0.9, %v6747_v14  ;;  %v6750_v19 = vadd.f32 %v6749_v48, %v6524_v32  ;;  %9254 = vmatmul.mubr.bf16.gmra.mrb[168].mxu0 %v7026_v11  ;;  %v6526_v44 = vpop.f32.mrb[99].mxu1  ;;  %v9200_v10 = vpop.f32.mrb[130].mxu0  ;;  %v13006_v32 = vld [vmem:[#allocation43_spill] sm:$0xff] }
 0x94c   :  { %v6765_v39 = vpop.f32.mrb[131].mxu0 }
 0x94d   :  { %v6830_v38 = vmul.f32 0.9, %v6750_v19  ;;  %v12410_v9 = vadd.f32 %v6829_v23, %v13004_v41  ;;  %v13007_v19 = vld [vmem:[#allocation44_spill] sm:$0xff] }
 0x94f   :  { %v12413_v58 = vadd.f32 %v6830_v38, %v13005_v13 }
 0x950   :  { %v6529_v31 = vpop.f32.mrb[100].mxu1 }
 0x951   :  { %v6755_v60 = vadd.f32 %v9195_v6, %v6529_v31  ;;  %v6531_v21 = vpop.f32.mrb[101].mxu1  ;;  %v7027_v22 = vpack.c.bf16 %v12413_v58, %v12410_v9  ;;  %v9203_v20 = vpop.f32.mrb[132].mxu0 }
 0x952   :  { %v6532_v12 = vpop.f32.mrb[102].mxu1  ;;  %v6778_v48 = vpop.f32.mrb[133].mxu0 }
 0x953   :  { %v6831_v24 = vmul.f32 0.9, %v6755_v60  ;;  %v6758_v0 = vadd.f32 %v9196_v54, %v6532_v12  ;;  %9257 = vmatprep.mubr.bf16.mxu0 %v7027_v22  ;;  %v6534_v45 = vpop.f32.mrb[103].mxu1  ;;  %v9204_v11 = vpop.f32.mrb[134].mxu0  ;;  %v9821_v54 = vld [vmem:[%s12716_s5 + $0x28] sm:$0xff]  }
 0x954   :  { %v6781_v14 = vpop.f32.mrb[135].mxu0  ;;  %9279 = vmatprep.subr.bf16.mxu1 %v9821_v54 }
 0x955   :  { %v6832_v56 = vmul.f32 0.9, %v6758_v0  ;;  %v12418_v23 = vadd.f32 %v6831_v24, %v13006_v32  ;;  %9280 = vmatpush3.bf16.msra.mxu1 %v9821_v54  ;;  %v9823_v54 = vld [vmem:[%s12716_s5 + $0x38] sm:$0xff]  }
 0x957   :  { %v12421_v44 = vadd.f32 %v6832_v56, %v13007_v19 }
 0x958   :  { %v6537_v6 = vpop.f32.mrb[104].mxu1 }
 0x959   :  { %v7028_v38 = vpack.c.bf16 %v12421_v44, %v12418_v23  ;;  %v6539_v41 = vpop.f32.mrb[105].mxu1  ;;  %v6763_v13 = vadd.f32 %v6762_v8, %v6537_v6  ;;  %v9822_v8 = vld [vmem:[%s12716_s5 + $0x30] sm:$0xff]  }
 0x95a   :  { %v6540_v31 = vpop.f32.mrb[106].mxu1  ;;  %9281 = vmatprep.subr.bf16.mxu1 %v9822_v8 }
 0x95b   :  { %9258 = vmatmul.mubr.bf16.gmra.mrb[172].mxu0 %v7028_v38  ;;  %v6542_v60 = vpop.f32.mrb[107].mxu1  ;;  %v6833_v21 = vmul.f32 0.9, %v6763_v13  ;;  %v6766_v22 = vadd.f32 %v6765_v39, %v6540_v31  ;;  %9282 = vmatpush3.bf16.msra.mxu1 %v9822_v8 }
 0x95c   :  { %9283 = vmatprep.subr.bf16.mxu1 %v9823_v54 }
 0x95d   :  { %v6834_v12 = vmul.f32 0.9, %v6766_v22  ;;  %v12429_v24 = vadd.f32 %v6833_v21, %v13006_v32 }
 0x95f   :  { %v12432_v0 = vadd.f32 %v6834_v12, %v13007_v19  ;;  %9284 = vmatpush3.bf16.msra.mxu1 %v9823_v54 }
 0x960   :  { %v6545_v45 = vpop.f32.mrb[108].mxu1 }
 0x961   :  { %13008 = vst [vmem:[#allocation45_spill] sm:$0xff] %v12432_v0  ;;  %v6771_v56 = vadd.f32 %v9199_v40, %v6545_v45  ;;  %v6547_v6 = vpop.f32.mrb[109].mxu1  ;;  %v7029_v38 = vpack.c.bf16 %v12432_v0, %v12429_v24 }
 0x962   :  { %v6548_v39 = vpop.f32.mrb[110].mxu1 }
 0x963   :  { %v6835_v41 = vmul.f32 0.9, %v6771_v56  ;;  %v6774_v13 = vadd.f32 %v9200_v10, %v6548_v39  ;;  %9261 = vmatprep.mubr.bf16.mxu0 %v7029_v38  ;;  %v6550_v31 = vpop.f32.mrb[111].mxu1 }
 0x965   :  { %v6836_v60 = vmul.f32 0.9, %v6774_v13  ;;  %v12443_v40 = vadd.f32 %v6835_v41, %v13006_v32 }
 0x967   :  { %v12446_v21 = vadd.f32 %v6836_v60, %v13007_v19 }
 0x968   :  { %v6553_v22 = vpop.f32.mrb[112].mxu1 }
 0x969   :  { %v7030_v12 = vpack.c.bf16 %v12446_v21, %v12443_v40  ;;  %v6555_v10 = vpop.f32.mrb[113].mxu1  ;;  %v6779_v8 = vadd.f32 %v6778_v48, %v6553_v22 }
 0x96a   :  { %v6556_v45 = vpop.f32.mrb[114].mxu1 }
 0x96b   :  { %9262 = vmatmul.mubr.bf16.gmra.mrb[176].mxu0 %v7030_v12  ;;  %v6558_v56 = vpop.f32.mrb[115].mxu1  ;;  %v6837_v6 = vmul.f32 0.9, %v6779_v8  ;;  %v6782_v38 = vadd.f32 %v6781_v14, %v6556_v45 }
 0x96d   :  { %v6838_v39 = vmul.f32 0.9, %v6782_v38  ;;  %v12451_v13 = vadd.f32 %v6837_v6, %v13006_v32  ;;  %v7325_v6 = vmul.f32 0.882217, %v12234_v25 }
 0x96f   :  { %13009 = vst [vmem:[#allocation46_spill] sm:$0xff] %v12451_v13  ;;  %v12454_v41 = vadd.f32 %v6838_v39, %v13007_v19 }
 0x970   :  { %v6561_v31 = vpop.f32.mrb[116].mxu1 }
 0x971   :  { %13010 = vst [vmem:[#allocation34_spill] sm:$0xff] %v12454_v41  ;;  %v6787_v54 = vadd.f32 %v9203_v20, %v6561_v31  ;;  %v6563_v60 = vpop.f32.mrb[117].mxu1  ;;  %v7031_v0 = vpack.c.bf16 %v12454_v41, %v12451_v13 }
 0x972   :  { %v6564_v10 = vpop.f32.mrb[118].mxu1 }
 0x973   :  { %v6839_v48 = vmul.f32 0.9, %v6787_v54  ;;  %v6790_v22 = vadd.f32 %v9204_v11, %v6564_v10  ;;  %9265 = vmatprep.mubr.bf16.mxu0 %v7031_v0  ;;  %v6566_v12 = vpop.f32.mrb[119].mxu1  ;;  %v7323_v11 = vmul.f32 0.882217, %v12245_v59 }
 0x974   :  { %v7329_v59 = vmul.f32 0.882217, %v12261_v63 }
 0x975   :  { %v6840_v8 = vmul.f32 0.9, %v6790_v22  ;;  %v12459_v14 = vadd.f32 %v6839_v48, %v13006_v32  ;;  %v7326_v32 = vmul.f32 0.882217, %v12237_v2  ;;  %v7324_v48 = vmul.f32 0.882217, %v12248_v15 }
 0x976   :  { %v7327_v2 = vmul.f32 0.882217, %v12272_v62  ;;  %v7330_v15 = vmul.f32 0.882217, %v12264_v1 }
 0x977   :  { %v12462_v45 = vadd.f32 %v6840_v8, %v13007_v19 }
 0x979   :  { %13011 = vst [vmem:[#allocation48_spill] sm:$0xff] %v12462_v45  ;;  %v7032_v56 = vpack.c.bf16 %v12462_v45, %v12459_v14 }
 0x97b   :  { %9266 = vmatmul.mubr.bf16.gmra.mrb[180].mxu0 %v7032_v56 }
 0x9d9   :  { %v9223_v20 = vpop.f32.mrb[136].mxu0 }
 0x9da   :  { %v7373_v38 = vmul.f32 0.11778303, %v9223_v20  ;;  %v7132_v39 = vpop.f32.mrb[137].mxu0 }
 0x9db   :  { %v7371_v0 = vmul.f32 0.11778303, %v7132_v39  ;;  %v9224_v31 = vpop.f32.mrb[138].mxu0 }
 0x9dc   :  { %v7421_v54 = vadd.f32 %v7373_v38, %v7325_v6  ;;  %v7374_v60 = vmul.f32 0.11778303, %v9224_v31  ;;  %v7135_v10 = vpop.f32.mrb[139].mxu0 }
 0x9dd   :  { %v7419_v19 = vadd.f32 %v7371_v0, %v7323_v11  ;;  %v7372_v22 = vmul.f32 0.11778303, %v7135_v10  ;;  %v7328_v10 = vmul.f32 0.882217, %v12275_v18 }
 0x9de   :  { %v7422_v12 = vadd.f32 %v7374_v60, %v7326_v32  ;;  %v7469_v56 = vmax.f32 %v7421_v54, 0.0 }
 0x9df   :  { %v7420_v8 = vadd.f32 %v7372_v22, %v7324_v48  ;;  %v7467_v25 = vmax.f32 %v7419_v19, 0.0 }
 0x9e0   :  { %v7470_v41 = vmax.f32 %v7422_v12, 0.0 }
 0x9e1   :  { %v7468_v20 = vmax.f32 %v7420_v8, 0.0  ;;  %v9227_v45 = vpop.f32.mrb[140].mxu0 }
 0x9e2   :  { %v7516_v13 = vpack.c.bf16 %v7470_v41, %v7469_v56  ;;  %v7377_v39 = vmul.f32 0.11778303, %v9227_v45  ;;  %v7148_v6 = vpop.f32.mrb[141].mxu0  ;;  %v7333_v56 = vmul.f32 0.882217, %v12288_v53 }
 0x9e3   :  { %v7375_v38 = vmul.f32 0.11778303, %v7148_v6  ;;  %v9228_v31 = vpop.f32.mrb[142].mxu0  ;;  %v7515_v11 = vpack.c.bf16 %v7468_v20, %v7467_v25  ;;  %v7331_v20 = vmul.f32 0.882217, %v12294_v16 }
 0x9e4   :  { %v7425_v0 = vadd.f32 %v7377_v39, %v7329_v59  ;;  %v7378_v32 = vmul.f32 0.11778303, %v9228_v31  ;;  %v7151_v60 = vpop.f32.mrb[143].mxu0 }
 0x9e5   :  { %v7423_v54 = vadd.f32 %v7375_v38, %v7327_v2  ;;  %v7376_v19 = vmul.f32 0.11778303, %v7151_v60  ;;  %9285 = vmatprep.mubr.bf16.mxu1 %v7515_v11  ;;  %v7334_v2 = vmul.f32 0.882217, %v12291_v3  ;;  %v7332_v11 = vmul.f32 0.882217, %v12297_v4 }
 0x9e6   :  { %v7426_v41 = vadd.f32 %v7378_v32, %v7330_v15  ;;  %9286 = vmatmul.mubr.bf16.vlgmr.msra.gmra.mrb[120].mxu1 %v7516_v13  ;;  %v7473_v45 = vmax.f32 %v7425_v0, 0.0 }
 0x9e7   :  { %v7424_v63 = vadd.f32 %v7376_v19, %v7328_v10  ;;  %v7471_v22 = vmax.f32 %v7423_v54, 0.0 }
 0x9e8   :  { %v7474_v48 = vmax.f32 %v7426_v41, 0.0  ;;  %v7337_v41 = vmul.f32 0.882217, %v12308_v57 }
 0x9e9   :  { %v7472_v62 = vmax.f32 %v7424_v63, 0.0  ;;  %v9231_v12 = vpop.f32.mrb[144].mxu0 }
 0x9ea   :  { %v7518_v8 = vpack.c.bf16 %v7474_v48, %v7473_v45  ;;  %v7381_v25 = vmul.f32 0.11778303, %v9231_v12  ;;  %v7164_v1 = vpop.f32.mrb[145].mxu0  ;;  %v7335_v45 = vmul.f32 0.882217, %v12314_v26 }
 0x9eb   :  { %v7379_v59 = vmul.f32 0.11778303, %v7164_v1  ;;  %v9232_v39 = vpop.f32.mrb[146].mxu0  ;;  %v7517_v18 = vpack.c.bf16 %v7472_v62, %v7471_v22  ;;  %v7338_v12 = vmul.f32 0.882217, %v12311_v36 }
 0x9ec   :  { %v7429_v6 = vadd.f32 %v7381_v25, %v7333_v56  ;;  %v7382_v13 = vmul.f32 0.11778303, %v9232_v39  ;;  %v7167_v38 = vpop.f32.mrb[147].mxu0  ;;  %v7336_v1 = vmul.f32 0.882217, %v12317_v29 }
 0x9ed   :  { %v7427_v31 = vadd.f32 %v7379_v59, %v7331_v20  ;;  %v7380_v0 = vmul.f32 0.11778303, %v7167_v38  ;;  %9289 = vmatprep.mubr.bf16.mxu1 %v7517_v18  ;;  %v7341_v38 = vmul.f32 0.882217, %v12328_v5 }
 0x9ee   :  { %v7430_v15 = vadd.f32 %v7382_v13, %v7334_v2  ;;  %9290 = vmatmul.mubr.bf16.gmra.mrb[124].mxu1 %v7518_v8  ;;  %v7477_v32 = vmax.f32 %v7429_v6, 0.0 }
 0x9ef   :  { %v7428_v53 = vadd.f32 %v7380_v0, %v7332_v11  ;;  %v7475_v54 = vmax.f32 %v7427_v31, 0.0  ;;  %v7339_v11 = vmul.f32 0.882217, %v12334_v47 }
 0x9f0   :  { %v7478_v60 = vmax.f32 %v7430_v15, 0.0 }
 0x9f1   :  { %v7476_v16 = vmax.f32 %v7428_v53, 0.0  ;;  %v9235_v10 = vpop.f32.mrb[148].mxu0 }
 0x9f2   :  { %v7520_v19 = vpack.c.bf16 %v7478_v60, %v7477_v32  ;;  %v7385_v63 = vmul.f32 0.11778303, %v9235_v10  ;;  %v7180_v3 = vpop.f32.mrb[149].mxu0  ;;  %v7342_v32 = vmul.f32 0.882217, %v12331_v42 }
 0x9f3   :  { %v7383_v48 = vmul.f32 0.11778303, %v7180_v3  ;;  %v9236_v22 = vpop.f32.mrb[150].mxu0  ;;  %v7519_v4 = vpack.c.bf16 %v7476_v16, %v7475_v54  ;;  %v7340_v10 = vmul.f32 0.882217, %v12337_v50 }
 0x9f4   :  { %v7433_v62 = vadd.f32 %v7385_v63, %v7337_v41  ;;  %v7386_v8 = vmul.f32 0.11778303, %v9236_v22  ;;  %v7183_v56 = vpop.f32.mrb[151].mxu0 }
 0x9f5   :  { %v7431_v25 = vadd.f32 %v7383_v48, %v7335_v45  ;;  %v7384_v20 = vmul.f32 0.11778303, %v7183_v56  ;;  %9293 = vmatprep.mubr.bf16.mxu1 %v7519_v4  ;;  %v7345_v4 = vmul.f32 0.882217, %v12346_v27 }
 0x9f6   :  { %v7434_v59 = vadd.f32 %v7386_v8, %v7338_v12  ;;  %9294 = vmatmul.mubr.bf16.gmra.mrb[128].mxu1 %v7520_v19  ;;  %v7481_v39 = vmax.f32 %v7433_v62, 0.0  ;;  %v7343_v12 = vmul.f32 0.882217, %v12352_v35 }
 0x9f7   :  { %v7432_v57 = vadd.f32 %v7384_v20, %v7336_v1  ;;  %v7479_v6 = vmax.f32 %v7431_v25, 0.0  ;;  %v7346_v1 = vmul.f32 0.882217, %v12349_v34 }
 0x9f8   :  { %v7482_v18 = vmax.f32 %v7434_v59, 0.0 }
 0x9f9   :  { %v7480_v26 = vmax.f32 %v7432_v57, 0.0  ;;  %v9239_v2 = vpop.f32.mrb[152].mxu0 }
 0x9fa   :  { %v7522_v13 = vpack.c.bf16 %v7482_v18, %v7481_v39  ;;  %v7389_v31 = vmul.f32 0.11778303, %v9239_v2  ;;  %v7196_v36 = vpop.f32.mrb[153].mxu0  ;;  %v7344_v39 = vmul.f32 0.882217, %v12355_v49 }
 0x9fb   :  { %v7387_v0 = vmul.f32 0.11778303, %v7196_v36  ;;  %v9240_v15 = vpop.f32.mrb[154].mxu0  ;;  %v7521_v29 = vpack.c.bf16 %v7480_v26, %v7479_v6  ;;  %v7349_v36 = vmul.f32 0.882217, %v12362_v28 }
 0x9fc   :  { %v7437_v53 = vadd.f32 %v7389_v31, %v7341_v38  ;;  %v7390_v60 = vmul.f32 0.11778303, %v9240_v15  ;;  %v7199_v54 = vpop.f32.mrb[155].mxu0 }
 0x9fd   :  { %v7435_v16 = vadd.f32 %v7387_v0, %v7339_v11  ;;  %v7388_v19 = vmul.f32 0.11778303, %v7199_v54  ;;  %9297 = vmatprep.mubr.bf16.mxu1 %v7521_v29  ;;  %v7347_v0 = vmul.f32 0.882217, %v12368_v7 }
 0x9fe   :  { %v7438_v41 = vadd.f32 %v7390_v60, %v7342_v32  ;;  %9298 = vmatmul.mubr.bf16.gmra.mrb[132].mxu1 %v7522_v13  ;;  %v7485_v63 = vmax.f32 %v7437_v53, 0.0  ;;  %v7350_v32 = vmul.f32 0.882217, %v12365_v52 }
 0x9ff   :  { %v7436_v5 = vadd.f32 %v7388_v19, %v7340_v10  ;;  %v7483_v45 = vmax.f32 %v7435_v16, 0.0  ;;  %v7348_v10 = vmul.f32 0.882217, %v12371_v43 }
 0xa00   :  { %v7486_v3 = vmax.f32 %v7438_v41, 0.0 }
 0xa01   :  { %v7484_v47 = vmax.f32 %v7436_v5, 0.0  ;;  %v9243_v48 = vpop.f32.mrb[156].mxu0 }
 0xa02   :  { %v7524_v22 = vpack.c.bf16 %v7486_v3, %v7485_v63  ;;  %v7393_v62 = vmul.f32 0.11778303, %v9243_v48  ;;  %v7212_v42 = vpop.f32.mrb[157].mxu0  ;;  %v7353_v48 = vmul.f32 0.882217, %v12378_v61 }
 0xa03   :  { %v7391_v8 = vmul.f32 0.11778303, %v7212_v42  ;;  %v9244_v56 = vpop.f32.mrb[158].mxu0  ;;  %v7523_v50 = vpack.c.bf16 %v7484_v47, %v7483_v45 }
 0xa04   :  { %v7441_v25 = vadd.f32 %v7393_v62, %v7345_v4  ;;  %v7394_v20 = vmul.f32 0.11778303, %v9244_v56  ;;  %v7215_v59 = vpop.f32.mrb[159].mxu0  ;;  %v7351_v4 = vmul.f32 0.882217, %v12384_v33 }
 0xa05   :  { %v7439_v57 = vadd.f32 %v7391_v8, %v7343_v12  ;;  %v7392_v18 = vmul.f32 0.11778303, %v7215_v59  ;;  %9301 = vmatprep.mubr.bf16.mxu1 %v7523_v50  ;;  %v7354_v8 = vmul.f32 0.882217, %v12381_v17  ;;  %v7357_v17 = vmul.f32 0.882217, %v12402_v51 }
 0xa06   :  { %v7442_v6 = vadd.f32 %v7394_v20, %v7346_v1  ;;  %9302 = vmatmul.mubr.bf16.gmra.mrb[136].mxu1 %v7524_v22  ;;  %v7489_v26 = vmax.f32 %v7441_v25, 0.0  ;;  %v7352_v1 = vmul.f32 0.882217, %v12387_v46  ;;  %v7355_v46 = vmul.f32 0.882217, %v12394_v55 }
 0xa07   :  { %v7440_v27 = vadd.f32 %v7392_v18, %v7344_v39  ;;  %v7487_v13 = vmax.f32 %v7439_v57, 0.0 }
 0xa08   :  { %v7490_v2 = vmax.f32 %v7442_v6, 0.0 }
 0xa09   :  { %v7488_v35 = vmax.f32 %v7440_v27, 0.0  ;;  %v9247_v38 = vpop.f32.mrb[160].mxu0 }
 0xa0a   :  { %v7526_v31 = vpack.c.bf16 %v7490_v2, %v7489_v26  ;;  %v7397_v11 = vmul.f32 0.11778303, %v9247_v38  ;;  %v7228_v34 = vpop.f32.mrb[161].mxu0 }
 0xa0b   :  { %v7395_v15 = vmul.f32 0.11778303, %v7228_v34  ;;  %v9248_v29 = vpop.f32.mrb[162].mxu0  ;;  %v7525_v49 = vpack.c.bf16 %v7488_v35, %v7487_v13 }
 0xa0c   :  { %v7445_v53 = vadd.f32 %v7397_v11, %v7349_v36  ;;  %v7398_v60 = vmul.f32 0.11778303, %v9248_v29  ;;  %v7231_v54 = vpop.f32.mrb[163].mxu0  ;;  %v7358_v36 = vmul.f32 0.882217, %v12405_v37 }
 0xa0d   :  { %v7443_v16 = vadd.f32 %v7395_v15, %v7347_v0  ;;  %v7396_v19 = vmul.f32 0.11778303, %v7231_v54  ;;  %9305 = vmatprep.mubr.bf16.mxu1 %v7525_v49  ;;  %v7356_v15 = vmul.f32 0.882217, %v12397_v30 }
 0xa0e   :  { %v7446_v41 = vadd.f32 %v7398_v60, %v7350_v32  ;;  %9306 = vmatmul.mubr.bf16.gmra.mrb[140].mxu1 %v7526_v31  ;;  %v7493_v5 = vmax.f32 %v7445_v53, 0.0 }
 0xa0f   :  { %v7444_v28 = vadd.f32 %v7396_v19, %v7348_v10  ;;  %v7491_v3 = vmax.f32 %v7443_v16, 0.0  ;;  %v7361_v19 = vmul.f32 0.882217, %v12418_v23 }
 0xa10   :  { %v7494_v63 = vmax.f32 %v7446_v41, 0.0 }
 0xa11   :  { %v7492_v7 = vmax.f32 %v7444_v28, 0.0  ;;  %v9251_v45 = vpop.f32.mrb[164].mxu0  ;;  %v7359_v28 = vmul.f32 0.882217, %v12410_v9 }
 0xa12   :  { %v7528_v47 = vpack.c.bf16 %v7494_v63, %v7493_v5  ;;  %v7401_v22 = vmul.f32 0.11778303, %v9251_v45  ;;  %v7244_v52 = vpop.f32.mrb[165].mxu0 }
 0xa13   :  { %v7399_v62 = vmul.f32 0.11778303, %v7244_v52  ;;  %v9252_v42 = vpop.f32.mrb[166].mxu0  ;;  %v7527_v43 = vpack.c.bf16 %v7492_v7, %v7491_v3  ;;  %v7362_v3 = vmul.f32 0.882217, %v12421_v44 }
 0xa14   :  { %v7449_v12 = vadd.f32 %v7401_v22, %v7353_v48  ;;  %v7402_v56 = vmul.f32 0.11778303, %v9252_v42  ;;  %v7247_v50 = vpop.f32.mrb[167].mxu0  ;;  %v7360_v48 = vmul.f32 0.882217, %v12413_v58 }
 0xa15   :  { %v7447_v25 = vadd.f32 %v7399_v62, %v7351_v4  ;;  %v7400_v20 = vmul.f32 0.11778303, %v7247_v50  ;;  %9309 = vmatprep.mubr.bf16.mxu1 %v7527_v43 }
 0xa16   :  { %v7450_v59 = vadd.f32 %v7402_v56, %v7354_v8  ;;  %9310 = vmatmul.mubr.bf16.gmra.mrb[144].mxu1 %v7528_v47  ;;  %v7497_v57 = vmax.f32 %v7449_v12, 0.0  ;;  %v7365_v56 = vmul.f32 0.882217, %v12443_v40 }
 0xa17   :  { %v7448_v61 = vadd.f32 %v7400_v20, %v7352_v1  ;;  %v7495_v18 = vmax.f32 %v7447_v25, 0.0  ;;  %v7363_v25 = vmul.f32 0.882217, %v12429_v24 }
 0xa18   :  { %v7498_v39 = vmax.f32 %v7450_v59, 0.0  ;;  %v7366_v59 = vmul.f32 0.882217, %v12446_v21 }
 0xa19   :  { %v7496_v33 = vmax.f32 %v7448_v61, 0.0 }
 0xa1a   :  { %v7530_v6 = vpack.c.bf16 %v7498_v39, %v7497_v57 }
 0xa1b   :  { %v7529_v27 = vpack.c.bf16 %v7496_v33, %v7495_v18  ;;  %v13012_v18 = vld [vmem:[#allocation45_spill] sm:$0xff] }
 0xa1c   :  { %v7364_v33 = vmul.f32 0.882217, %v13012_v18 }
 0xa1d   :  { %9313 = vmatprep.mubr.bf16.mxu1 %v7529_v27 }
 0xa1e   :  { %v9255_v26 = vpop.f32.mrb[168].mxu0  ;;  %9314 = vmatmul.mubr.bf16.gmra.mrb[148].mxu1 %v7530_v6 }
 0xa1f   :  { %v7405_v2 = vmul.f32 0.11778303, %v9255_v26  ;;  %v7260_v13 = vpop.f32.mrb[169].mxu0 }
 0xa20   :  { %v7403_v35 = vmul.f32 0.11778303, %v7260_v13  ;;  %v9256_v38 = vpop.f32.mrb[170].mxu0 }
 0xa21   :  { %v7453_v31 = vadd.f32 %v7405_v2, %v7357_v17  ;;  %v7406_v11 = vmul.f32 0.11778303, %v9256_v38  ;;  %v7263_v34 = vpop.f32.mrb[171].mxu0  ;;  %v7369_v38 = vmul.f32 0.882217, %v12459_v14 }
 0xa22   :  { %v7451_v0 = vadd.f32 %v7403_v35, %v7355_v46  ;;  %v7404_v29 = vmul.f32 0.11778303, %v7263_v34 }
 0xa23   :  { %v7454_v49 = vadd.f32 %v7406_v11, %v7358_v36  ;;  %v7501_v32 = vmax.f32 %v7453_v31, 0.0  ;;  %v13013_v36 = vld [vmem:[#allocation46_spill] sm:$0xff] }
 0xa24   :  { %v7452_v53 = vadd.f32 %v7404_v29, %v7356_v15  ;;  %v7499_v51 = vmax.f32 %v7451_v0, 0.0  ;;  %v7367_v11 = vmul.f32 0.882217, %v13013_v36  ;;  %v13014_v29 = vld [vmem:[#allocation48_spill] sm:$0xff] }
 0xa25   :  { %v7502_v60 = vmax.f32 %v7454_v49, 0.0  ;;  %v7370_v49 = vmul.f32 0.882217, %v13014_v29 }
 0xa26   :  { %v7500_v54 = vmax.f32 %v7452_v53, 0.0 }
 0xa27   :  { %v7532_v16 = vpack.c.bf16 %v7502_v60, %v7501_v32 }
 0xa28   :  { %v7531_v10 = vpack.c.bf16 %v7500_v54, %v7499_v51  ;;  %v13015_v51 = vld [vmem:[#allocation34_spill] sm:$0xff] }
 0xa29   :  { %v7368_v54 = vmul.f32 0.882217, %v13015_v51 }
 0xa2a   :  { %9317 = vmatprep.mubr.bf16.mxu1 %v7531_v10 }
 0xa2b   :  { %9318 = vmatmul.mubr.bf16.gmra.mrb[152].mxu1 %v7532_v16 }
 0xa2e   :  { %v9259_v55 = vpop.f32.mrb[172].mxu0 }
 0xa2f   :  { %v7409_v37 = vmul.f32 0.11778303, %v9259_v55  ;;  %v7276_v41 = vpop.f32.mrb[173].mxu0 }
 0xa30   :  { %v7407_v5 = vmul.f32 0.11778303, %v7276_v41  ;;  %v9260_v30 = vpop.f32.mrb[174].mxu0 }
 0xa31   :  { %v7457_v63 = vadd.f32 %v7409_v37, %v7361_v19  ;;  %v7410_v7 = vmul.f32 0.11778303, %v9260_v30  ;;  %v7279_v45 = vpop.f32.mrb[175].mxu0  ;;  %v12517_v30 = vld [vmem:[%s12717_s6] ss:$0 sm:$0xff] }
 0xa32   :  { %v7455_v47 = vadd.f32 %v7407_v5, %v7359_v28  ;;  %v7408_v22 = vmul.f32 0.11778303, %v7279_v45 }
 0xa33   :  { %v7458_v52 = vadd.f32 %v7410_v7, %v7362_v3  ;;  %v7505_v62 = vmax.f32 %v7457_v63, 0.0 }
 0xa34   :  { %v7456_v4 = vadd.f32 %v7408_v22, %v7360_v48  ;;  %v7503_v23 = vmax.f32 %v7455_v47, 0.0 }
 0xa35   :  { %v7506_v42 = vmax.f32 %v7458_v52, 0.0 }
 0xa36   :  { %v7504_v43 = vmax.f32 %v7456_v4, 0.0 }
 0xa37   :  { %v7534_v12 = vpack.c.bf16 %v7506_v42, %v7505_v62 }
 0xa38   :  { %v7533_v8 = vpack.c.bf16 %v7504_v43, %v7503_v23 }
 0xa3a   :  { %9321 = vmatprep.mubr.bf16.mxu1 %v7533_v8 }
 0xa3b   :  { %9322 = vmatmul.mubr.bf16.gmra.mrb[156].mxu1 %v7534_v12 }
 0xa3e   :  { %v9263_v9 = vpop.f32.mrb[176].mxu0 }
 0xa3f   :  { %v7413_v44 = vmul.f32 0.11778303, %v9263_v9  ;;  %v7292_v50 = vpop.f32.mrb[177].mxu0 }
 0xa40   :  { %v7411_v1 = vmul.f32 0.11778303, %v7292_v50  ;;  %v9264_v58 = vpop.f32.mrb[178].mxu0 }
 0xa41   :  { %v7461_v20 = vadd.f32 %v7413_v44, %v7365_v56  ;;  %v7414_v61 = vmul.f32 0.11778303, %v9264_v58  ;;  %v7295_v57 = vpop.f32.mrb[179].mxu0 }
 0xa42   :  { %v7459_v39 = vadd.f32 %v7411_v1, %v7363_v25  ;;  %v7412_v6 = vmul.f32 0.11778303, %v7295_v57 }
 0xa43   :  { %v7462_v27 = vadd.f32 %v7414_v61, %v7366_v59  ;;  %v7509_v17 = vmax.f32 %v7461_v20, 0.0 }
 0xa44   :  { %v7460_v26 = vadd.f32 %v7412_v6, %v7364_v33  ;;  %v7507_v40 = vmax.f32 %v7459_v39, 0.0 }
 0xa45   :  { %v7510_v2 = vmax.f32 %v7462_v27, 0.0 }
 0xa46   :  { %v7508_v13 = vmax.f32 %v7460_v26, 0.0 }
 0xa47   :  { %v7536_v46 = vpack.c.bf16 %v7510_v2, %v7509_v17 }
 0xa48   :  { %v7535_v35 = vpack.c.bf16 %v7508_v13, %v7507_v40 }
 0xa4a   :  { %9325 = vmatprep.mubr.bf16.mxu1 %v7535_v35 }
 0xa4b   :  { %9326 = vmatmul.mubr.bf16.gmra.mrb[160].mxu1 %v7536_v46 }
 0xa4e   :  { %v9267_v24 = vpop.f32.mrb[180].mxu0 }
 0xa4f   :  { %v7417_v21 = vmul.f32 0.11778303, %v9267_v24  ;;  %v7308_v31 = vpop.f32.mrb[181].mxu0 }
 0xa50   :  { %v7415_v34 = vmul.f32 0.11778303, %v7308_v31  ;;  %v9268_v0 = vpop.f32.mrb[182].mxu0 }
 0xa51   :  { %v7465_v15 = vadd.f32 %v7417_v21, %v7369_v38  ;;  %v7418_v53 = vmul.f32 0.11778303, %v9268_v0  ;;  %v7311_v32 = vpop.f32.mrb[183].mxu0 }
 0xa52   :  { %v7463_v60 = vadd.f32 %v7415_v34, %v7367_v11  ;;  %v7416_v16 = vmul.f32 0.11778303, %v7311_v32 }
 0xa53   :  { %v7466_v10 = vadd.f32 %v7418_v53, %v7370_v49  ;;  %v7513_v19 = vmax.f32 %v7465_v15, 0.0 }
 0xa54   :  { %v7464_v55 = vadd.f32 %v7416_v16, %v7368_v54  ;;  %v7511_v14 = vmax.f32 %v7463_v60, 0.0 }
 0xa55   :  { %v7514_v37 = vmax.f32 %v7466_v10, 0.0 }
 0xa56   :  { %v7512_v41 = vmax.f32 %v7464_v55, 0.0 }
 0xa57   :  { %v7538_v28 = vpack.c.bf16 %v7514_v37, %v7513_v19 }
 0xa58   :  { %v7537_v5 = vpack.c.bf16 %v7512_v41, %v7511_v14 }
 0xa5a   :  { %9329 = vmatprep.mubr.bf16.mxu1 %v7537_v5 }
 0xa5b   :  { %9330 = vmatmul.mubr.bf16.gmra.mrb[164].mxu1 %v7538_v28 }
 0xab9   :  { %v9287_v63 = vpop.f32.mrb[120].mxu1 }
 0xaba   :  { %v7701_v3 = vadd.f32 %v9287_v63, %v12517_v30  ;;  %v7692_v7 = vpop.f32.mrb[121].mxu1 }
 0xabb   :  { %v7693_v45 = vadd.f32 %v12517_v30, %v7692_v7  ;;  %v9288_v47 = vpop.f32.mrb[122].mxu1 }
 0xabc   :  { %7885 = vst [vmem:[%s12718_s7 + $0x10] sm:$0xff] %v7701_v3  ;;  %v7704_v48 = vadd.f32 %v9288_v47, %v12517_v30  ;;  %v7695_v22 = vpop.f32.mrb[123].mxu1 }
 0xabd   :  { %7883 = vst [vmem:[%s12718_s7] sm:$0xff] %v7693_v45  ;;  %v7696_v52 = vadd.f32 %v12517_v30, %v7695_v22 }
 0xabe   :  { %7886 = vst [vmem:[%s12718_s7 + $0x18] sm:$0xff] %v7704_v48 }
 0xabf   :  { %7884 = vst [vmem:[%s12718_s7 + $0x8] sm:$0xff] %v7696_v52 }
 0xac1   :  { %v9291_v4 = vpop.f32.mrb[124].mxu1 }
 0xac2   :  { %v7717_v62 = vadd.f32 %v9291_v4, %v12517_v30  ;;  %v7708_v42 = vpop.f32.mrb[125].mxu1 }
 0xac3   :  { %v7709_v23 = vadd.f32 %v12517_v30, %v7708_v42  ;;  %v9292_v43 = vpop.f32.mrb[126].mxu1 }
 0xac4   :  { %7889 = vst [vmem:[%s12718_s7 + $0x30] sm:$0xff] %v7717_v62  ;;  %v7720_v12 = vadd.f32 %v9292_v43, %v12517_v30  ;;  %v7711_v8 = vpop.f32.mrb[127].mxu1 }
 0xac5   :  { %7887 = vst [vmem:[%s12718_s7 + $0x20] sm:$0xff] %v7709_v23  ;;  %v7712_v9 = vadd.f32 %v12517_v30, %v7711_v8 }
 0xac6   :  { %7890 = vst [vmem:[%s12718_s7 + $0x38] sm:$0xff] %v7720_v12 }
 0xac7   :  { %7888 = vst [vmem:[%s12718_s7 + $0x28] sm:$0xff] %v7712_v9 }
 0xac9   :  { %v9295_v56 = vpop.f32.mrb[128].mxu1 }
 0xaca   :  { %v7733_v44 = vadd.f32 %v9295_v56, %v12517_v30  ;;  %v7724_v50 = vpop.f32.mrb[129].mxu1 }
 0xacb   :  { %v7725_v25 = vadd.f32 %v12517_v30, %v7724_v50  ;;  %v9296_v1 = vpop.f32.mrb[130].mxu1 }
 0xacc   :  { %7893 = vst [vmem:[%s12718_s7 + $0x50] sm:$0xff] %v7733_v44  ;;  %v7736_v58 = vadd.f32 %v9296_v1, %v12517_v30  ;;  %v7727_v20 = vpop.f32.mrb[131].mxu1 }
 0xacd   :  { %7891 = vst [vmem:[%s12718_s7 + $0x40] sm:$0xff] %v7725_v25  ;;  %v7728_v59 = vadd.f32 %v12517_v30, %v7727_v20 }
 0xace   :  { %7894 = vst [vmem:[%s12718_s7 + $0x58] sm:$0xff] %v7736_v58 }
 0xacf   :  { %7892 = vst [vmem:[%s12718_s7 + $0x48] sm:$0xff] %v7728_v59 }
 0xad1   :  { %v9299_v61 = vpop.f32.mrb[132].mxu1 }
 0xad2   :  { %v7749_v57 = vadd.f32 %v9299_v61, %v12517_v30  ;;  %v7740_v39 = vpop.f32.mrb[133].mxu1 }
 0xad3   :  { %v7741_v18 = vadd.f32 %v12517_v30, %v7740_v39  ;;  %v9300_v33 = vpop.f32.mrb[134].mxu1 }
 0xad4   :  { %7897 = vst [vmem:[%s12718_s7 + $0x70] sm:$0xff] %v7749_v57  ;;  %v7752_v6 = vadd.f32 %v9300_v33, %v12517_v30  ;;  %v7743_v27 = vpop.f32.mrb[135].mxu1 }
 0xad5   :  { %7895 = vst [vmem:[%s12718_s7 + $0x60] sm:$0xff] %v7741_v18  ;;  %v7744_v26 = vadd.f32 %v12517_v30, %v7743_v27 }
 0xad6   :  { %7898 = vst [vmem:[%s12718_s7 + $0x78] sm:$0xff] %v7752_v6 }
 0xad7   :  { %7896 = vst [vmem:[%s12718_s7 + $0x68] sm:$0xff] %v7744_v26 }
 0xad9   :  { %v9303_v17 = vpop.f32.mrb[136].mxu1 }
 0xada   :  { %v7765_v2 = vadd.f32 %v9303_v17, %v12517_v30  ;;  %v7756_v40 = vpop.f32.mrb[137].mxu1 }
 0xadb   :  { %v7757_v13 = vadd.f32 %v12517_v30, %v7756_v40  ;;  %v9304_v46 = vpop.f32.mrb[138].mxu1 }
 0xadc   :  { %7901 = vst [vmem:[%s12718_s7 + $0x90] sm:$0xff] %v7765_v2  ;;  %v7768_v35 = vadd.f32 %v9304_v46, %v12517_v30  ;;  %v7759_v24 = vpop.f32.mrb[139].mxu1 }
 0xadd   :  { %7899 = vst [vmem:[%s12718_s7 + $0x80] sm:$0xff] %v7757_v13  ;;  %v7760_v38 = vadd.f32 %v12517_v30, %v7759_v24 }
 0xade   :  { %7902 = vst [vmem:[%s12718_s7 + $0x98] sm:$0xff] %v7768_v35 }
 0xadf   :  { %7900 = vst [vmem:[%s12718_s7 + $0x88] sm:$0xff] %v7760_v38 }
 0xae1   :  { %v9307_v21 = vpop.f32.mrb[140].mxu1 }
 0xae2   :  { %v7781_v31 = vadd.f32 %v9307_v21, %v12517_v30  ;;  %v7772_v36 = vpop.f32.mrb[141].mxu1 }
 0xae3   :  { %v7773_v11 = vadd.f32 %v12517_v30, %v7772_v36  ;;  %v9308_v34 = vpop.f32.mrb[142].mxu1 }
 0xae4   :  { %7905 = vst [vmem:[%s12718_s7 + $0xb0] sm:$0xff] %v7781_v31  ;;  %v7784_v0 = vadd.f32 %v9308_v34, %v12517_v30  ;;  %v7775_v15 = vpop.f32.mrb[143].mxu1 }
 0xae5   :  { %7903 = vst [vmem:[%s12718_s7 + $0xa0] sm:$0xff] %v7773_v11  ;;  %v7776_v29 = vadd.f32 %v12517_v30, %v7775_v15 }
 0xae6   :  { %7906 = vst [vmem:[%s12718_s7 + $0xb8] sm:$0xff] %v7784_v0 }
 0xae7   :  { %7904 = vst [vmem:[%s12718_s7 + $0xa8] sm:$0xff] %v7776_v29 }
 0xae9   :  { %v9311_v49 = vpop.f32.mrb[144].mxu1 }
 0xaea   :  { %v7797_v53 = vadd.f32 %v9311_v49, %v12517_v30  ;;  %v7788_v32 = vpop.f32.mrb[145].mxu1 }
 0xaeb   :  { %v7789_v60 = vadd.f32 %v12517_v30, %v7788_v32  ;;  %v9312_v51 = vpop.f32.mrb[146].mxu1 }
 0xaec   :  { %7909 = vst [vmem:[%s12718_s7 + $0xd0] sm:$0xff] %v7797_v53  ;;  %v7800_v54 = vadd.f32 %v9312_v51, %v12517_v30  ;;  %v7791_v16 = vpop.f32.mrb[147].mxu1 }
 0xaed   :  { %7907 = vst [vmem:[%s12718_s7 + $0xc0] sm:$0xff] %v7789_v60  ;;  %v7792_v10 = vadd.f32 %v12517_v30, %v7791_v16 }
 0xaee   :  { %7910 = vst [vmem:[%s12718_s7 + $0xd8] sm:$0xff] %v7800_v54 }
 0xaef   :  { %7908 = vst [vmem:[%s12718_s7 + $0xc8] sm:$0xff] %v7792_v10 }
 0xaf1   :  { %v9315_v55 = vpop.f32.mrb[148].mxu1 }
 0xaf2   :  { %v7813_v19 = vadd.f32 %v9315_v55, %v12517_v30  ;;  %v7804_v37 = vpop.f32.mrb[149].mxu1 }
 0xaf3   :  { %v7805_v14 = vadd.f32 %v12517_v30, %v7804_v37  ;;  %v9316_v41 = vpop.f32.mrb[150].mxu1 }
 0xaf4   :  { %7913 = vst [vmem:[%s12718_s7 + $0xf0] sm:$0xff] %v7813_v19  ;;  %v7816_v28 = vadd.f32 %v9316_v41, %v12517_v30  ;;  %v7807_v5 = vpop.f32.mrb[151].mxu1 }
 0xaf5   :  { %7911 = vst [vmem:[%s12718_s7 + $0xe0] sm:$0xff] %v7805_v14  ;;  %v7808_v63 = vadd.f32 %v12517_v30, %v7807_v5 }
 0xaf6   :  { %7914 = vst [vmem:[%s12718_s7 + $0xf8] sm:$0xff] %v7816_v28 }
 0xaf7   :  { %7912 = vst [vmem:[%s12718_s7 + $0xe8] sm:$0xff] %v7808_v63 }
 0xafe   :  { %v9319_v3 = vpop.f32.mrb[152].mxu1 }
 0xaff   :  { %v7829_v7 = vadd.f32 %v9319_v3, %v12517_v30  ;;  %v7820_v45 = vpop.f32.mrb[153].mxu1 }
 0xb00   :  { %v7821_v47 = vadd.f32 %v12517_v30, %v7820_v45  ;;  %v9320_v48 = vpop.f32.mrb[154].mxu1 }
 0xb01   :  { %7917 = vst [vmem:[%s12718_s7 + $0x110] sm:$0xff] %v7829_v7  ;;  %v7832_v22 = vadd.f32 %v9320_v48, %v12517_v30  ;;  %v7823_v52 = vpop.f32.mrb[155].mxu1 }
 0xb02   :  { %7915 = vst [vmem:[%s12718_s7 + $0x100] sm:$0xff] %v7821_v47  ;;  %v7824_v4 = vadd.f32 %v12517_v30, %v7823_v52 }
 0xb03   :  { %7918 = vst [vmem:[%s12718_s7 + $0x118] sm:$0xff] %v7832_v22 }
 0xb04   :  { %7916 = vst [vmem:[%s12718_s7 + $0x108] sm:$0xff] %v7824_v4 }
 0xb0e   :  { %v9323_v62 = vpop.f32.mrb[156].mxu1 }
 0xb0f   :  { %v7845_v42 = vadd.f32 %v9323_v62, %v12517_v30  ;;  %v7836_v23 = vpop.f32.mrb[157].mxu1 }
 0xb10   :  { %v7837_v43 = vadd.f32 %v12517_v30, %v7836_v23  ;;  %v9324_v12 = vpop.f32.mrb[158].mxu1 }
 0xb11   :  { %7921 = vst [vmem:[%s12718_s7 + $0x130] sm:$0xff] %v7845_v42  ;;  %v7848_v8 = vadd.f32 %v9324_v12, %v12517_v30  ;;  %v7839_v9 = vpop.f32.mrb[159].mxu1 }
 0xb12   :  { %7919 = vst [vmem:[%s12718_s7 + $0x120] sm:$0xff] %v7837_v43  ;;  %v7840_v56 = vadd.f32 %v12517_v30, %v7839_v9 }
 0xb13   :  { %7922 = vst [vmem:[%s12718_s7 + $0x138] sm:$0xff] %v7848_v8 }
 0xb14   :  { %7920 = vst [vmem:[%s12718_s7 + $0x128] sm:$0xff] %v7840_v56 }
 0xb1e   :  { %v9327_v44 = vpop.f32.mrb[160].mxu1 }
 0xb1f   :  { %v7861_v50 = vadd.f32 %v9327_v44, %v12517_v30  ;;  %v7852_v25 = vpop.f32.mrb[161].mxu1 }
 0xb20   :  { %v7853_v1 = vadd.f32 %v12517_v30, %v7852_v25  ;;  %v9328_v58 = vpop.f32.mrb[162].mxu1 }
 0xb21   :  { %7925 = vst [vmem:[%s12718_s7 + $0x150] sm:$0xff] %v7861_v50  ;;  %v7864_v20 = vadd.f32 %v9328_v58, %v12517_v30  ;;  %v7855_v59 = vpop.f32.mrb[163].mxu1 }
 0xb22   :  { %7923 = vst [vmem:[%s12718_s7 + $0x140] sm:$0xff] %v7853_v1  ;;  %v7856_v61 = vadd.f32 %v12517_v30, %v7855_v59 }
 0xb23   :  { %7926 = vst [vmem:[%s12718_s7 + $0x158] sm:$0xff] %v7864_v20 }
 0xb24   :  { %7924 = vst [vmem:[%s12718_s7 + $0x148] sm:$0xff] %v7856_v61 }
 0xb2e   :  { %v9331_v57 = vpop.f32.mrb[164].mxu1 }
 0xb2f   :  { %v7877_v39 = vadd.f32 %v9331_v57, %v12517_v30  ;;  %v7868_v18 = vpop.f32.mrb[165].mxu1 }
 0xb30   :  { %v7869_v33 = vadd.f32 %v12517_v30, %v7868_v18  ;;  %v9332_v6 = vpop.f32.mrb[166].mxu1 }
 0xb31   :  { %7929 = vst [vmem:[%s12718_s7 + $0x170] sm:$0xff] %v7877_v39  ;;  %v7880_v27 = vadd.f32 %v9332_v6, %v12517_v30  ;;  %v7871_v26 = vpop.f32.mrb[167].mxu1 }
 0xb32   :  { %7927 = vst [vmem:[%s12718_s7 + $0x160] sm:$0xff] %v7869_v33  ;;  %v7872_v17 = vadd.f32 %v12517_v30, %v7871_v26 }
 0xb33   :  { %7930 = vst [vmem:[%s12718_s7 + $0x178] sm:$0xff] %v7880_v27 }
 0xb34   :  { %7928 = vst [vmem:[%s12718_s7 + $0x168] sm:$0xff] %v7872_v17 }

</bundles_post_ra>
